<compile_context>
chip_gen: v6e
topology: v6e:2x2x1
jax: 0.10.0
libtpu: 0.0.40
codegen_flags: <defaults>
</compile_context>

<pallas_src>
import functools

import jax
import jax.numpy as jnp
from jax.experimental import pallas as pl
from jax.experimental.pallas import tpu as pltpu

IN_DIM = 28     # module-fixed feature dim (residual forces out == in == 28)
H = 300         # hidden width (module default)
F_PAD = 128     # feature dim zero-padded to one full lane group inside the kernel
H_PAD = 384     # hidden dim zero-padded to 3*128 -> unmasked MXU / VPU tiles


def _mlp_residual_kernel(x_ref,
                         w1_ref, b1_ref, w2_ref, b2_ref, w3_ref, b3_ref,
                         w4_ref, b4_ref, w5_ref, b5_ref, w6_ref, b6_ref,
                         o_ref, xpad_ref, *, n_chunks, bf16_act):
    tile_m = x_ref.shape[0]
    sub = tile_m // n_chunks
    w_dtype = w1_ref.dtype
    act_dtype = jnp.bfloat16 if bf16_act else jnp.float32

    # Stage x into a lane-aligned (tile_m, 128) VMEM buffer with exact zero
    # padding (padded weight rows are zero), so every matmul runs on aligned
    # (8,128) tiles: K = 128/384, N = 384/128.
    x28 = x_ref[...]                                   # (tile_m, 28) f32
    xpad_ref[...] = jnp.zeros_like(xpad_ref)
    xpad_ref[:, :IN_DIM] = x28.astype(w_dtype)

    def act(pre_f32):
        # tanh on the EUP; bf16 tanh ~doubles EUP throughput on v6e/v7x.
        return jnp.tanh(pre_f32.astype(act_dtype)).astype(w_dtype)

    def layer(hs, w_ref, b_ref, last):
        w = w_ref[...]
        b = b_ref[...].astype(jnp.float32)
        outs = []
        # hs are independent row sub-chunks: the dot of the next chunk can
        # overlap the tanh of the previous one (MXU vs EUP slots).
        for h in hs:
            pre = jnp.dot(h.astype(w_dtype), w,
                          preferred_element_type=jnp.float32) + b
            outs.append(pre if last else act(pre))
        return outs

    hs = [xpad_ref[pl.ds(c * sub, sub), :] for c in range(n_chunks)]
    hs = layer(hs, w1_ref, b1_ref, last=False)         # (sub,128) -> (sub,384)
    hs = layer(hs, w2_ref, b2_ref, last=False)
    hs = layer(hs, w3_ref, b3_ref, last=False)
    hs = layer(hs, w4_ref, b4_ref, last=False)
    hs = layer(hs, w5_ref, b5_ref, last=False)
    ys = layer(hs, w6_ref, b6_ref, last=True)          # (sub,384) -> (sub,128) f32

    # Residual on the 28 real feature lanes, in f32, per sub-chunk.
    for c in range(n_chunks):
        rows = pl.ds(c * sub, sub)
        o_ref[rows, :] = (ys[c][:, :IN_DIM]
                          + x28[c * sub:(c + 1) * sub, :]).astype(o_ref.dtype)


def _pad2(a, rows, cols, dtype):
    r, c = a.shape
    return jnp.pad(a, ((0, rows - r), (0, cols - c))).astype(dtype)


def prepare_params(params, *, param_dtype=jnp.bfloat16):
    """One-time padding + cast of the 6 Linear layers (keep out of the hot path).

    Weights -> (in_pad, out_pad) in `param_dtype` (bf16 = native MXU rate);
    biases  -> (1, out_pad) float32 (added to the f32 accumulator).
    Zero padding is exact: padded rows/cols contribute nothing."""
    (w1, b1, w2, b2, w3, b3, w4, b4, w5, b5, w6, b6) = params
    f32 = jnp.float32
    return (
        _pad2(w1, F_PAD, H_PAD, param_dtype), _pad2(b1, 1, H_PAD, f32),
        _pad2(w2, H_PAD, H_PAD, param_dtype), _pad2(b2, 1, H_PAD, f32),
        _pad2(w3, H_PAD, H_PAD, param_dtype), _pad2(b3, 1, H_PAD, f32),
        _pad2(w4, H_PAD, H_PAD, param_dtype), _pad2(b4, 1, H_PAD, f32),
        _pad2(w5, H_PAD, H_PAD, param_dtype), _pad2(b5, 1, H_PAD, f32),
        _pad2(w6, H_PAD, F_PAD, param_dtype), _pad2(b6, 1, F_PAD, f32),
    )


@functools.partial(
    jax.jit,
    static_argnames=("tile_m", "n_chunks", "bf16_act", "vmem_limit_bytes"))
def another_dn_forward(x, prepared_params, *, tile_m=512, n_chunks=2,
                       bf16_act=True, vmem_limit_bytes=None):
    """Fused forward of another_DN.  x: (N, 28) float32, any N.

    prepared_params must come from prepare_params().  For strict parity with
    the f32 reference use prepare_params(..., param_dtype=jnp.float32) and
    bf16_act=False."""
    n, d = x.shape
    assert d == IN_DIM, f"expected feature dim {IN_DIM}, got {d}"
    assert tile_m % (8 * n_chunks) == 0

    w_dtype = prepared_params[0].dtype
    grid_m = pl.cdiv(n, tile_m)          # ragged last block handled by Pallas

    x_spec = pl.BlockSpec((tile_m, IN_DIM), lambda i: (i, 0))
    # Weights / biases: whole padded arrays VMEM-resident, constant across grid.
    param_specs = [pl.BlockSpec(p.shape, lambda i: (0, 0)) for p in prepared_params]
    out_spec = pl.BlockSpec((tile_m, IN_DIM), lambda i: (i, 0))

    weight_bytes = int(sum(p.size * p.dtype.itemsize for p in prepared_params))
    cost = pl.CostEstimate(
        flops=2 * n * (F_PAD * H_PAD + 4 * H_PAD * H_PAD + H_PAD * F_PAD),
        transcendentals=5 * n * H_PAD,
        bytes_accessed=2 * n * IN_DIM * 4 + weight_bytes,
    )

    return pl.pallas_call(
        functools.partial(_mlp_residual_kernel,
                          n_chunks=n_chunks, bf16_act=bf16_act),
        out_shape=jax.ShapeDtypeStruct((n, IN_DIM), x.dtype),
        grid_spec=pltpu.PrefetchScalarGridSpec(
            num_scalar_prefetch=0,
            grid=(grid_m,),
            in_specs=[x_spec] + param_specs,
            out_specs=out_spec,
            scratch_shapes=[pltpu.VMEM((tile_m, F_PAD), w_dtype)],
        ),
        compiler_params=pltpu.CompilerParams(
            # Batch tiles are independent: "parallel" lets megacore shard them.
            # TODO(synk): on v7x consider pltpu.CORE_PARALLEL / pl.core_map for an
            # explicit 2-TC split; on v5e pass vmem_limit_bytes~48MB if tile_m>512.
            dimension_semantics=("parallel",),
            vmem_limit_bytes=vmem_limit_bytes,
        ),
        cost_estimate=cost,
    )(x, *prepared_params)


def init_params(key, h=H):
    """Deterministic init mimicking PyTorch Linear default (uniform +/- 1/sqrt(fan_in)).
    Weights stored as (in_features, out_features); biases as (1, out_features)."""
    dims = [(IN_DIM, h), (h, h), (h, h), (h, h), (h, h), (h, IN_DIM)]
    params = []
    for fan_in, fan_out in dims:
        key, kw, kb = jax.random.split(key, 3)
        bound = 1.0 / jnp.sqrt(jnp.float32(fan_in))
        w = jax.random.uniform(kw, (fan_in, fan_out), jnp.float32, -bound, bound)
        b = jax.random.uniform(kb, (1, fan_out), jnp.float32, -bound, bound)
        params.extend([w, b])
    return tuple(params)


def reference_forward(x, params):
    (w1, b1, w2, b2, w3, b3, w4, b4, w5, b5, w6, b6) = params
    h = jnp.tanh(x @ w1 + b1)
    h = jnp.tanh(h @ w2 + b2)
    h = jnp.tanh(h @ w3 + b3)
    h = jnp.tanh(h @ w4 + b4)
    h = jnp.tanh(h @ w5 + b5)
    y = h @ w6 + b6
    return y + x


if __name__ == "__main__":
    key = jax.random.PRNGKey(0)
    key, kx = jax.random.split(key)

    # Small batch, deliberately NOT a multiple of tile_m: exercises the ragged
    # last block and a 2-step "parallel" grid.
    N = 200
    x = jax.random.normal(kx, (N, IN_DIM), jnp.float32)
    params = init_params(key, H)
    ref = reference_forward(x, params)

    # 1) f32 parity path: exact module semantics (1e-4 vs reference).
    p_f32 = prepare_params(params, param_dtype=jnp.float32)
    out_f32 = jax.block_until_ready(
        another_dn_forward(x, p_f32, tile_m=128, n_chunks=2, bf16_act=False))
    assert out_f32.shape == (N, IN_DIM)
    assert jnp.allclose(out_f32, ref, atol=1e-4, rtol=1e-4), "f32 parity mismatch"

    # 2) Default fast path: bf16 matmul operands + bf16 tanh, f32 accumulation
    #    and f32 residual.  Looser tolerance (6 chained bf16 layers).
    p_bf16 = prepare_params(params)                       # bf16 weights
    out_fast = jax.block_until_ready(
        another_dn_forward(x, p_bf16, tile_m=128, n_chunks=2))
    max_err = float(jnp.max(jnp.abs(out_fast - ref)))
    assert max_err < 7.5e-2, f"bf16 fast path drifted too far: {max_err}"

    print("KERNEL_OK")
</pallas_src>

<mosaic_0001>
module attributes {stable_mosaic.version = 11 : i64} {
  func.func @_mlp_residual_kernel(%arg0: i32, %arg1: memref<128x28xf32, #tpu.memory_space<vmem>>, %arg2: memref<128x384xf32, #tpu.memory_space<vmem>>, %arg3: memref<1x384xf32, #tpu.memory_space<vmem>>, %arg4: memref<384x384xf32, #tpu.memory_space<vmem>>, %arg5: memref<1x384xf32, #tpu.memory_space<vmem>>, %arg6: memref<384x384xf32, #tpu.memory_space<vmem>>, %arg7: memref<1x384xf32, #tpu.memory_space<vmem>>, %arg8: memref<384x384xf32, #tpu.memory_space<vmem>>, %arg9: memref<1x384xf32, #tpu.memory_space<vmem>>, %arg10: memref<384x384xf32, #tpu.memory_space<vmem>>, %arg11: memref<1x384xf32, #tpu.memory_space<vmem>>, %arg12: memref<384x128xf32, #tpu.memory_space<vmem>>, %arg13: memref<1x128xf32, #tpu.memory_space<vmem>>, %arg14: memref<128x28xf32, #tpu.memory_space<vmem>>, %arg15: memref<128x128xf32, #tpu.memory_space<vmem>>) attributes {dimension_semantics = [#tpu.dimension_semantics<parallel>], iteration_bounds = array<i64: 2>, scalar_prefetch = 0 : i64, scratch_operands = 1 : i64, tpu.core_type = #tpu.core_type<tc>, window_params = [{transform_indices = @transform_0, window_bounds = array<i64: 128, 28>}, {pipeline_mode = #tpu.pipeline_mode<synchronous>, transform_indices = @transform_1, window_bounds = array<i64: 128, 384>}, {pipeline_mode = #tpu.pipeline_mode<synchronous>, transform_indices = @transform_2, window_bounds = array<i64: 1, 384>}, {pipeline_mode = #tpu.pipeline_mode<synchronous>, transform_indices = @transform_3, window_bounds = array<i64: 384, 384>}, {pipeline_mode = #tpu.pipeline_mode<synchronous>, transform_indices = @transform_4, window_bounds = array<i64: 1, 384>}, {pipeline_mode = #tpu.pipeline_mode<synchronous>, transform_indices = @transform_5, window_bounds = array<i64: 384, 384>}, {pipeline_mode = #tpu.pipeline_mode<synchronous>, transform_indices = @transform_6, window_bounds = array<i64: 1, 384>}, {pipeline_mode = #tpu.pipeline_mode<synchronous>, transform_indices = @transform_7, window_bounds = array<i64: 384, 384>}, {pipeline_mode = #tpu.pipeline_mode<synchronous>, transform_indices = @transform_8, window_bounds = array<i64: 1, 384>}, {pipeline_mode = #tpu.pipeline_mode<synchronous>, transform_indices = @transform_9, window_bounds = array<i64: 384, 384>}, {pipeline_mode = #tpu.pipeline_mode<synchronous>, transform_indices = @transform_10, window_bounds = array<i64: 1, 384>}, {pipeline_mode = #tpu.pipeline_mode<synchronous>, transform_indices = @transform_11, window_bounds = array<i64: 384, 128>}, {pipeline_mode = #tpu.pipeline_mode<synchronous>, transform_indices = @transform_12, window_bounds = array<i64: 1, 128>}, {transform_indices = @transform_13, window_bounds = array<i64: 128, 28>}]} {
    %c0 = arith.constant 0 : index
    %c0_0 = arith.constant 0 : index
    %0 = vector.load %arg1[%c0, %c0_0] : memref<128x28xf32, #tpu.memory_space<vmem>>, vector<128x28xf32>
    %cst = arith.constant 0.000000e+00 : f32
    %1 = vector.broadcast %cst : f32 to vector<128x128xf32>
    %c0_1 = arith.constant 0 : index
    %c0_2 = arith.constant 0 : index
    %2 = vector.load %arg15[%c0_1, %c0_2] : memref<128x128xf32, #tpu.memory_space<vmem>>, vector<128x128xf32>
    tpu.vector_store %arg15[%c0_1, %c0_2], %1 {strides = array<i32>} : memref<128x128xf32, #tpu.memory_space<vmem>>, vector<128x128xf32>,
    %c0_3 = arith.constant 0 : index
    %c0_4 = arith.constant 0 : index
    %3 = vector.load %arg15[%c0_3, %c0_4] : memref<128x128xf32, #tpu.memory_space<vmem>>, vector<128x28xf32>
    tpu.vector_store %arg15[%c0_3, %c0_4], %0 {strides = array<i32>} : memref<128x128xf32, #tpu.memory_space<vmem>>, vector<128x28xf32>,
    %c0_5 = arith.constant 0 : index
    %c0_6 = arith.constant 0 : index
    %4 = vector.load %arg15[%c0_5, %c0_6] : memref<128x128xf32, #tpu.memory_space<vmem>>, vector<64x128xf32>
    %c64 = arith.constant 64 : index
    %c0_7 = arith.constant 0 : index
    %5 = vector.load %arg15[%c64, %c0_7] : memref<128x128xf32, #tpu.memory_space<vmem>>, vector<64x128xf32>
    %c0_8 = arith.constant 0 : index
    %c0_9 = arith.constant 0 : index
    %6 = vector.load %arg2[%c0_8, %c0_9] : memref<128x384xf32, #tpu.memory_space<vmem>>, vector<128x384xf32>
    %c0_10 = arith.constant 0 : index
    %c0_11 = arith.constant 0 : index
    %7 = vector.load %arg3[%c0_10, %c0_11] : memref<1x384xf32, #tpu.memory_space<vmem>>, vector<1x384xf32>
    %cst_12 = arith.constant dense<0.000000e+00> : vector<64x384xf32>
    %8 = tpu.matmul %4, %6, %cst_12 {dimension_numbers = #tpu.dot_dimension_numbers<[1], [0], [0], [1], [0, 0, 1, 1], [], []>} : vector<64x128xf32>, vector<128x384xf32>, vector<64x384xf32> -> vector<64x384xf32>
    %9 = vector.broadcast %7 : vector<1x384xf32> to vector<64x384xf32>
    %10 = arith.addf %8, %9 : vector<64x384xf32>
    %11 = math.tanh %10 : vector<64x384xf32>
    %cst_13 = arith.constant dense<0.000000e+00> : vector<64x384xf32>
    %12 = tpu.matmul %5, %6, %cst_13 {dimension_numbers = #tpu.dot_dimension_numbers<[1], [0], [0], [1], [0, 0, 1, 1], [], []>} : vector<64x128xf32>, vector<128x384xf32>, vector<64x384xf32> -> vector<64x384xf32>
    %13 = vector.broadcast %7 : vector<1x384xf32> to vector<64x384xf32>
    %14 = arith.addf %12, %13 : vector<64x384xf32>
    %15 = math.tanh %14 : vector<64x384xf32>
    %c0_14 = arith.constant 0 : index
    %c0_15 = arith.constant 0 : index
    %16 = vector.load %arg4[%c0_14, %c0_15] : memref<384x384xf32, #tpu.memory_space<vmem>>, vector<384x384xf32>
    %c0_16 = arith.constant 0 : index
    %c0_17 = arith.constant 0 : index
    %17 = vector.load %arg5[%c0_16, %c0_17] : memref<1x384xf32, #tpu.memory_space<vmem>>, vector<1x384xf32>
    %cst_18 = arith.constant dense<0.000000e+00> : vector<64x384xf32>
    %18 = tpu.matmul %11, %16, %cst_18 {dimension_numbers = #tpu.dot_dimension_numbers<[1], [0], [0], [1], [0, 0, 1, 1], [], []>} : vector<64x384xf32>, vector<384x384xf32>, vector<64x384xf32> -> vector<64x384xf32>
    %19 = vector.broadcast %17 : vector<1x384xf32> to vector<64x384xf32>
    %20 = arith.addf %18, %19 : vector<64x384xf32>
    %21 = math.tanh %20 : vector<64x384xf32>
    %cst_19 = arith.constant dense<0.000000e+00> : vector<64x384xf32>
    %22 = tpu.matmul %15, %16, %cst_19 {dimension_numbers = #tpu.dot_dimension_numbers<[1], [0], [0], [1], [0, 0, 1, 1], [], []>} : vector<64x384xf32>, vector<384x384xf32>, vector<64x384xf32> -> vector<64x384xf32>
    %23 = vector.broadcast %17 : vector<1x384xf32> to vector<64x384xf32>
    %24 = arith.addf %22, %23 : vector<64x384xf32>
    %25 = math.tanh %24 : vector<64x384xf32>
    %c0_20 = arith.constant 0 : index
    %c0_21 = arith.constant 0 : index
    %26 = vector.load %arg6[%c0_20, %c0_21] : memref<384x384xf32, #tpu.memory_space<vmem>>, vector<384x384xf32>
    %c0_22 = arith.constant 0 : index
    %c0_23 = arith.constant 0 : index
    %27 = vector.load %arg7[%c0_22, %c0_23] : memref<1x384xf32, #tpu.memory_space<vmem>>, vector<1x384xf32>
    %cst_24 = arith.constant dense<0.000000e+00> : vector<64x384xf32>
    %28 = tpu.matmul %21, %26, %cst_24 {dimension_numbers = #tpu.dot_dimension_numbers<[1], [0], [0], [1], [0, 0, 1, 1], [], []>} : vector<64x384xf32>, vector<384x384xf32>, vector<64x384xf32> -> vector<64x384xf32>
    %29 = vector.broadcast %27 : vector<1x384xf32> to vector<64x384xf32>
    %30 = arith.addf %28, %29 : vector<64x384xf32>
    %31 = math.tanh %30 : vector<64x384xf32>
    %cst_25 = arith.constant dense<0.000000e+00> : vector<64x384xf32>
    %32 = tpu.matmul %25, %26, %cst_25 {dimension_numbers = #tpu.dot_dimension_numbers<[1], [0], [0], [1], [0, 0, 1, 1], [], []>} : vector<64x384xf32>, vector<384x384xf32>, vector<64x384xf32> -> vector<64x384xf32>
    %33 = vector.broadcast %27 : vector<1x384xf32> to vector<64x384xf32>
    %34 = arith.addf %32, %33 : vector<64x384xf32>
    %35 = math.tanh %34 : vector<64x384xf32>
    %c0_26 = arith.constant 0 : index
    %c0_27 = arith.constant 0 : index
    %36 = vector.load %arg8[%c0_26, %c0_27] : memref<384x384xf32, #tpu.memory_space<vmem>>, vector<384x384xf32>
    %c0_28 = arith.constant 0 : index
    %c0_29 = arith.constant 0 : index
    %37 = vector.load %arg9[%c0_28, %c0_29] : memref<1x384xf32, #tpu.memory_space<vmem>>, vector<1x384xf32>
    %cst_30 = arith.constant dense<0.000000e+00> : vector<64x384xf32>
    %38 = tpu.matmul %31, %36, %cst_30 {dimension_numbers = #tpu.dot_dimension_numbers<[1], [0], [0], [1], [0, 0, 1, 1], [], []>} : vector<64x384xf32>, vector<384x384xf32>, vector<64x384xf32> -> vector<64x384xf32>
    %39 = vector.broadcast %37 : vector<1x384xf32> to vector<64x384xf32>
    %40 = arith.addf %38, %39 : vector<64x384xf32>
    %41 = math.tanh %40 : vector<64x384xf32>
    %cst_31 = arith.constant dense<0.000000e+00> : vector<64x384xf32>
    %42 = tpu.matmul %35, %36, %cst_31 {dimension_numbers = #tpu.dot_dimension_numbers<[1], [0], [0], [1], [0, 0, 1, 1], [], []>} : vector<64x384xf32>, vector<384x384xf32>, vector<64x384xf32> -> vector<64x384xf32>
    %43 = vector.broadcast %37 : vector<1x384xf32> to vector<64x384xf32>
    %44 = arith.addf %42, %43 : vector<64x384xf32>
    %45 = math.tanh %44 : vector<64x384xf32>
    %c0_32 = arith.constant 0 : index
    %c0_33 = arith.constant 0 : index
    %46 = vector.load %arg10[%c0_32, %c0_33] : memref<384x384xf32, #tpu.memory_space<vmem>>, vector<384x384xf32>
    %c0_34 = arith.constant 0 : index
    %c0_35 = arith.constant 0 : index
    %47 = vector.load %arg11[%c0_34, %c0_35] : memref<1x384xf32, #tpu.memory_space<vmem>>, vector<1x384xf32>
    %cst_36 = arith.constant dense<0.000000e+00> : vector<64x384xf32>
    %48 = tpu.matmul %41, %46, %cst_36 {dimension_numbers = #tpu.dot_dimension_numbers<[1], [0], [0], [1], [0, 0, 1, 1], [], []>} : vector<64x384xf32>, vector<384x384xf32>, vector<64x384xf32> -> vector<64x384xf32>
    %49 = vector.broadcast %47 : vector<1x384xf32> to vector<64x384xf32>
    %50 = arith.addf %48, %49 : vector<64x384xf32>
    %51 = math.tanh %50 : vector<64x384xf32>
    %cst_37 = arith.constant dense<0.000000e+00> : vector<64x384xf32>
    %52 = tpu.matmul %45, %46, %cst_37 {dimension_numbers = #tpu.dot_dimension_numbers<[1], [0], [0], [1], [0, 0, 1, 1], [], []>} : vector<64x384xf32>, vector<384x384xf32>, vector<64x384xf32> -> vector<64x384xf32>
    %53 = vector.broadcast %47 : vector<1x384xf32> to vector<64x384xf32>
    %54 = arith.addf %52, %53 : vector<64x384xf32>
    %55 = math.tanh %54 : vector<64x384xf32>
    %c0_38 = arith.constant 0 : index
    %c0_39 = arith.constant 0 : index
    %56 = vector.load %arg12[%c0_38, %c0_39] : memref<384x128xf32, #tpu.memory_space<vmem>>, vector<384x128xf32>
    %c0_40 = arith.constant 0 : index
    %c0_41 = arith.constant 0 : index
    %57 = vector.load %arg13[%c0_40, %c0_41] : memref<1x128xf32, #tpu.memory_space<vmem>>, vector<1x128xf32>
    %cst_42 = arith.constant dense<0.000000e+00> : vector<64x128xf32>
    %58 = tpu.matmul %51, %56, %cst_42 {dimension_numbers = #tpu.dot_dimension_numbers<[1], [0], [0], [1], [0, 0, 1, 1], [], []>} : vector<64x384xf32>, vector<384x128xf32>, vector<64x128xf32> -> vector<64x128xf32>
    %59 = vector.broadcast %57 : vector<1x128xf32> to vector<64x128xf32>
    %60 = arith.addf %58, %59 : vector<64x128xf32>
    %cst_43 = arith.constant dense<0.000000e+00> : vector<64x128xf32>
    %61 = tpu.matmul %55, %56, %cst_43 {dimension_numbers = #tpu.dot_dimension_numbers<[1], [0], [0], [1], [0, 0, 1, 1], [], []>} : vector<64x384xf32>, vector<384x128xf32>, vector<64x128xf32> -> vector<64x128xf32>
    %62 = vector.broadcast %57 : vector<1x128xf32> to vector<64x128xf32>
    %63 = arith.addf %61, %62 : vector<64x128xf32>
    %64 = vector.extract_strided_slice %60 {offsets = [0, 0], sizes = [64, 28], strides = [1, 1]} : vector<64x128xf32> to vector<64x28xf32>
    %65 = vector.extract_strided_slice %0 {offsets = [0, 0], sizes = [64, 28], strides = [1, 1]} : vector<128x28xf32> to vector<64x28xf32>
    %66 = arith.addf %64, %65 : vector<64x28xf32>
    %c0_44 = arith.constant 0 : index
    %c0_45 = arith.constant 0 : index
    %67 = vector.load %arg14[%c0_44, %c0_45] : memref<128x28xf32, #tpu.memory_space<vmem>>, vector<64x28xf32>
    tpu.vector_store %arg14[%c0_44, %c0_45], %66 {strides = array<i32>} : memref<128x28xf32, #tpu.memory_space<vmem>>, vector<64x28xf32>,
    %68 = vector.extract_strided_slice %63 {offsets = [0, 0], sizes = [64, 28], strides = [1, 1]} : vector<64x128xf32> to vector<64x28xf32>
    %69 = vector.extract_strided_slice %0 {offsets = [64, 0], sizes = [64, 28], strides = [1, 1]} : vector<128x28xf32> to vector<64x28xf32>
    %70 = arith.addf %68, %69 : vector<64x28xf32>
    %c64_46 = arith.constant 64 : index
    %c0_47 = arith.constant 0 : index
    %71 = vector.load %arg14[%c64_46, %c0_47] : memref<128x28xf32, #tpu.memory_space<vmem>>, vector<64x28xf32>
    tpu.vector_store %arg14[%c64_46, %c0_47], %70 {strides = array<i32>} : memref<128x28xf32, #tpu.memory_space<vmem>>, vector<64x28xf32>,
    return
  }
  func.func @transform_0(%arg0: i32) -> (i32, i32) {
    %c0_i32 = arith.constant 0 : i32
    %c0_i32_0 = arith.constant 0 : i32
    return %arg0, %c0_i32 : i32, i32
  }
  func.func @transform_1(%arg0: i32) -> (i32, i32) {
    %c0_i32 = arith.constant 0 : i32
    %c0_i32_0 = arith.constant 0 : i32
    %c0_i32_1 = arith.constant 0 : i32
    return %c0_i32, %c0_i32_0 : i32, i32
  }
  func.func @transform_2(%arg0: i32) -> (i32, i32) {
    %c0_i32 = arith.constant 0 : i32
    %c0_i32_0 = arith.constant 0 : i32
    %c0_i32_1 = arith.constant 0 : i32
    return %c0_i32, %c0_i32_0 : i32, i32
  }
  func.func @transform_3(%arg0: i32) -> (i32, i32) {
    %c0_i32 = arith.constant 0 : i32
    %c0_i32_0 = arith.constant 0 : i32
    %c0_i32_1 = arith.constant 0 : i32
    return %c0_i32, %c0_i32_0 : i32, i32
  }
  func.func @transform_4(%arg0: i32) -> (i32, i32) {
    %c0_i32 = arith.constant 0 : i32
    %c0_i32_0 = arith.constant 0 : i32
    %c0_i32_1 = arith.constant 0 : i32
    return %c0_i32, %c0_i32_0 : i32, i32
  }
  func.func @transform_5(%arg0: i32) -> (i32, i32) {
    %c0_i32 = arith.constant 0 : i32
    %c0_i32_0 = arith.constant 0 : i32
    %c0_i32_1 = arith.constant 0 : i32
    return %c0_i32, %c0_i32_0 : i32, i32
  }
  func.func @transform_6(%arg0: i32) -> (i32, i32) {
    %c0_i32 = arith.constant 0 : i32
    %c0_i32_0 = arith.constant 0 : i32
    %c0_i32_1 = arith.constant 0 : i32
    return %c0_i32, %c0_i32_0 : i32, i32
  }
  func.func @transform_7(%arg0: i32) -> (i32, i32) {
    %c0_i32 = arith.constant 0 : i32
    %c0_i32_0 = arith.constant 0 : i32
    %c0_i32_1 = arith.constant 0 : i32
    return %c0_i32, %c0_i32_0 : i32, i32
  }
  func.func @transform_8(%arg0: i32) -> (i32, i32) {
    %c0_i32 = arith.constant 0 : i32
    %c0_i32_0 = arith.constant 0 : i32
    %c0_i32_1 = arith.constant 0 : i32
    return %c0_i32, %c0_i32_0 : i32, i32
  }
  func.func @transform_9(%arg0: i32) -> (i32, i32) {
    %c0_i32 = arith.constant 0 : i32
    %c0_i32_0 = arith.constant 0 : i32
    %c0_i32_1 = arith.constant 0 : i32
    return %c0_i32, %c0_i32_0 : i32, i32
  }
  func.func @transform_10(%arg0: i32) -> (i32, i32) {
    %c0_i32 = arith.constant 0 : i32
    %c0_i32_0 = arith.constant 0 : i32
    %c0_i32_1 = arith.constant 0 : i32
    return %c0_i32, %c0_i32_0 : i32, i32
  }
  func.func @transform_11(%arg0: i32) -> (i32, i32) {
    %c0_i32 = arith.constant 0 : i32
    %c0_i32_0 = arith.constant 0 : i32
    %c0_i32_1 = arith.constant 0 : i32
    return %c0_i32, %c0_i32_0 : i32, i32
  }
  func.func @transform_12(%arg0: i32) -> (i32, i32) {
    %c0_i32 = arith.constant 0 : i32
    %c0_i32_0 = arith.constant 0 : i32
    %c0_i32_1 = arith.constant 0 : i32
    return %c0_i32, %c0_i32_0 : i32, i32
  }
  func.func @transform_13(%arg0: i32) -> (i32, i32) {
    %c0_i32 = arith.constant 0 : i32
    %c0_i32_0 = arith.constant 0 : i32
    return %arg0, %c0_i32 : i32, i32
  }
}

</mosaic_0001>

<bundles_post_ra>
// kernel: another_dn_forward.1
= control target key start
LH: loop header
LB: loop body
LE: loop exit
PB: predicated region body
PF: predicated region fallthrough
CT: control target
= control target key end

     0   :  { %s13205_s0 = inlined_call_operand.vmem [shape: f32[200,28], index: 0, kind: input, shape index: {}]   ;;  %s13206_s1 = inlined_call_operand.hbm [shape: f32[128,384], index: 1, kind: input, shape index: {}]   ;;  %s13207_s2 = inlined_call_operand.vmem [shape: f32[1,384], index: 2, kind: input, shape index: {}]   ;;  %s13208_s3 = inlined_call_operand.hbm [shape: f32[384,384], index: 3, kind: input, shape index: {}]   ;;  %s13209_s4 = inlined_call_operand.vmem [shape: f32[1,384], index: 4, kind: input, shape index: {}]   ;;  %s13210_s5 = inlined_call_operand.hbm [shape: f32[384,384], index: 5, kind: input, shape index: {}]   ;;  %s13211_s6 = inlined_call_operand.vmem [shape: f32[1,384], index: 6, kind: input, shape index: {}]   ;;  %s13212_s7 = inlined_call_operand.hbm [shape: f32[384,384], index: 7, kind: input, shape index: {}]   ;;  %s13213_s8 = inlined_call_operand.vmem [shape: f32[1,384], index: 8, kind: input, shape index: {}]   ;;  %s13214_s9 = inlined_call_operand.hbm [shape: f32[384,384], index: 9, kind: input, shape index: {}]   ;;  %s13215_s10 = inlined_call_operand.vmem [shape: f32[1,384], index: 10, kind: input, shape index: {}]   ;;  %s13216_s11 = inlined_call_operand.hbm [shape: f32[384,128], index: 11, kind: input, shape index: {}]   ;;  %s13217_s12 = inlined_call_operand.vmem [shape: f32[1,128], index: 12, kind: input, shape index: {}]   ;;  %s13218_s13 = inlined_call_operand.vmem [shape: f32[200,28], index: 13, kind: output, shape index: {}]  }
   0x1   :  { %13662 = sst [smem:[#allocation147_spill]] %s13208_s3 }
   0x2   :  { %18 = vsyncpa [#allocation4], 0 }
   0x3   :  { %19 = vsyncpa [#allocation6], 0 }
   0x4   :  { %20 = vsyncpa [#allocation9], 0 }
   0x5   :  { %21 = vsyncpa [#allocation12], 0  ;;  %s8785_s25 = smov 0   ;;  %s8787_s26 = smov 0  }
   0x6   :  { %s8789_s27 = smov 0  }
   0x7 LB: > { %13663 = sst [smem:[#allocation18_spill]] %s8666_s26  ;;  %s8798_s28 = sadd.s32 4294967295, %s8670_s27   ;;  %s8670_s27 = sphi %s8789_s27, %s14427_s27   ;;  %s8666_s26 = sphi %s8787_s26, %s14426_s26   ;;  %s8662_s25 = sphi %s8785_s25, %s14425_s25  }
   0x8   : > { %s8800_s29 = sadd.s32 1, %s8670_s27   ;;  %s312_s14 = sadd.s32 1, %s8666_s26 }
   0x9   : > { %s309_s30 = ssub.s32 %s8670_s27, %s8800_s29  ;;  %p322_p1 = scmp.ne.s32.totalorder %s8666_s26, %s8662_s25 }
   0xa   : > { %p310_p0 = scmp.eq.s32.totalorder %s309_s30, 0  ;;  %p323_p2 = scmp.eq.s32.totalorder %s8798_s28, 1 }
   0xb   : > { %p6332_p3 = scmp.ge.s32.totalorder %s8670_s27, 1  ;;  %p336_p5 = scmp.lt.s32.totalorder %s8670_s27, 3 }
   0xc   : > { %s8808_s15 = scalar_select %p310_p0, %s8666_s26, %s312_s14  }
   0xd   : > { %p8810_p4 = por %p323_p2, %p322_p1  ;;  %p7790_p6 = scmp.eq.s32.totalorder %s8798_s28, 0 }
   0xe   : > { %13664 = sst [smem:[#allocation19_spill]] %s8808_s15  ;;  %p8815_p7 = pnand %p6332_p3, %p336_p5 }
   0xf   : > { %s8704_s18 = smov [#allocation5]   ;;  %s8705_s21 = smov [#allocation8]  }
  0x10   : > { %p7771_p8 = pneg %p8815_p7  ;;  %s364_s19 = sshll.u32 %s8704_s18, 4  ;;  %s365_s19 = int_to_ptr.vmem [resolvable:$true] %s364_s19 }
  0x11   : > { %s396_s22 = sshll.u32 %s8705_s21, 4  ;;  %s8706_s23 = smov [#allocation3]   ;;  %s397_s22 = int_to_ptr.vmem [resolvable:$true] %s396_s22 }
  0x12   : > { %p8823_p9 = pnand %p7790_p6, %p7771_p8  ;;  %s348_s24 = sshll.u32 %s8706_s23, 4  ;;  %s349_s24 = int_to_ptr.vmem [resolvable:$true] %s348_s24 }
  0x13   : > { %s8455_s30 = scalar_lea.vmem %s365_s19, 18432  ;;  %p8463_p0 = scmp.lt.s32.totalorder %s365_s19, %s365_s19 }
  0x14   : > { %p8829_p10 = pneg %p8823_p9  ;;  %p8456_p11 = scmp.ne.s32.totalorder %s365_s19, %s8455_s30 }
  0x15   : > { %p8464_p1 = scmp.lt.s32.totalorder %s8455_s30, %s8455_s30 }
  0x16   : > { %p8458_p12 = pnand %p8456_p11, %p8829_p10 }
  0x17   : > { %p8465_p2 = por %p8464_p1, %p8463_p0 }
  0x18   : > { %p8459_p13 = pneg %p8458_p12 }
  0x1a   : > { %p8466_p3 = pnand %p8465_p2, %p8459_p13 }
  0x1c   : > { %8469 = shalt.err (!%p8466_p3)
}
  0x1d   : > { %s8707_s14 = smov 384   ;;  %s8708_s18 = smov 24  }
  0x1e   : > { %s13669_s3 = sld [smem:[#allocation147_spill]]  ;;  %s8481_s15 = scalar_lea.vmem %s397_s22, 18432 }
  0x1f   : > { %p8482_p5 = scmp.ne.s32.totalorder %s397_s22, %s8481_s15  ;;  %p8489_p12 = scmp.lt.s32.totalorder %s397_s22, %s397_s22 }
  0x20   : > { %p8490_p13 = scmp.lt.s32.totalorder %s8481_s15, %s8481_s15 }
  0x21   : > { %p8484_p8 = pnand %p8482_p5, %p8829_p10 }
  0x22   : > { %p8491_p0 = por %p8490_p13, %p8489_p12 }
  0x23   : > { %p8485_p11 = pneg %p8484_p8 }
  0x24   : > { %7777 = dma.hbm_to_vmem [thread:$0]  (!%p8823_p9), %s13669_s3, 18432, %s365_s19, [#allocation6], %s8707_s14, %s8707_s14, %s8708_s18  }
  0x25   : > { %p8492_p1 = pnand %p8491_p0, %p8485_p11 }
  0x27   : > { %8495 = shalt.err (!%p8492_p1)
}
  0x28   : > { %7783 = dma.hbm_to_vmem [thread:$0]  (!%p8823_p9), %s13212_s7, 18432, %s397_s22, [#allocation9], %s8707_s14, %s8707_s14, %s8708_s18  }
  0x29   : > { %s8507_s19 = scalar_lea.vmem %s349_s24, 6144  ;;  %p8515_p8 = scmp.lt.s32.totalorder %s349_s24, %s349_s24 }
  0x2a   : > { %p8508_p2 = scmp.ne.s32.totalorder %s349_s24, %s8507_s19  ;;  %p8516_p12 = scmp.lt.s32.totalorder %s8507_s19, %s8507_s19 }
  0x2c   : > { %p8510_p3 = pnand %p8508_p2, %p8829_p10  ;;  %p8517_p11 = por %p8516_p12, %p8515_p8 }
  0x2e   : > { %p8511_p5 = pneg %p8510_p3 }
  0x30   : > { %p8518_p13 = pnand %p8517_p11, %p8511_p5 }
  0x32   : > { %8521 = shalt.err (!%p8518_p13)
}
  0x33   : > { %7774 = dma.hbm_to_vmem [thread:$0]  (!%p8823_p9), %s13206_s1, 6144, %s349_s24, [#allocation4], %s8707_s14, %s8707_s14, %s8708_s18  }
  0x34   : > { %s8709_s22 = smov [#allocation7]   ;;  %s8710_s23 = smov [#allocation10]  }
  0x35   : > { %s380_s21 = sshll.u32 %s8709_s22, 4  ;;  %s412_s30 = sshll.u32 %s8710_s23, 4  ;;  %s381_s21 = int_to_ptr.vmem [resolvable:$true] %s380_s21  ;;  %s413_s30 = int_to_ptr.vmem [resolvable:$true] %s412_s30 }
  0x36   : > { %s8533_s3 = scalar_lea.vmem %s381_s21, 18432  ;;  %p8541_p3 = scmp.lt.s32.totalorder %s381_s21, %s381_s21 }
  0x37   : > { %p8534_p0 = scmp.ne.s32.totalorder %s381_s21, %s8533_s3  ;;  %p8542_p5 = scmp.lt.s32.totalorder %s8533_s3, %s8533_s3 }
  0x39   : > { %p8536_p1 = pnand %p8534_p0, %p8829_p10  ;;  %p8543_p8 = por %p8542_p5, %p8541_p3 }
  0x3b   : > { %p8537_p2 = pneg %p8536_p1 }
  0x3d   : > { %p8544_p12 = pnand %p8543_p8, %p8537_p2 }
  0x3f   : > { %8547 = shalt.err (!%p8544_p12)
}
  0x40   : > { %7780 = dma.hbm_to_vmem [thread:$0]  (!%p8823_p9), %s13210_s5, 18432, %s381_s21, [#allocation6], %s8707_s14, %s8707_s14, %s8708_s18  }
  0x41   : > { %s8559_s15 = scalar_lea.vmem %s413_s30, 18432  ;;  %p8567_p1 = scmp.lt.s32.totalorder %s413_s30, %s413_s30 }
  0x42   : > { %p8560_p11 = scmp.ne.s32.totalorder %s413_s30, %s8559_s15  ;;  %p8568_p3 = scmp.lt.s32.totalorder %s8559_s15, %s8559_s15 }
  0x44   : > { %p8562_p13 = pnand %p8560_p11, %p8829_p10  ;;  %p8569_p2 = por %p8568_p3, %p8567_p1 }
  0x46   : > { %p8563_p0 = pneg %p8562_p13 }
  0x48   : > { %p8570_p5 = pnand %p8569_p2, %p8563_p0 }
  0x4a   : > { %8573 = shalt.err (!%p8570_p5)
}
  0x4b   : > { %7786 = dma.hbm_to_vmem [thread:$0]  (!%p8823_p9), %s13214_s9, 18432, %s413_s30, [#allocation9], %s8707_s14, %s8707_s14, %s8708_s18  }
  0x4c   : > { %s8711_s22 = smov [#allocation11]  }
  0x4d   : > { %s428_s21 = sshll.u32 %s8711_s22, 4  ;;  %s429_s21 = int_to_ptr.vmem [resolvable:$true] %s428_s21 }
  0x4e   : > { %s8585_s23 = scalar_lea.vmem %s429_s21, 6144  ;;  %p8593_p13 = scmp.lt.s32.totalorder %s429_s21, %s429_s21 }
  0x4f   : > { %p8586_p8 = scmp.ne.s32.totalorder %s429_s21, %s8585_s23  ;;  %p8594_p0 = scmp.lt.s32.totalorder %s8585_s23, %s8585_s23 }
  0x51   : > { %p8588_p12 = pnand %p8586_p8, %p8829_p10  ;;  %p8595_p1 = por %p8594_p0, %p8593_p13 }
  0x53   : > { %p8589_p11 = pneg %p8588_p12 }
  0x55   : > { %p8596_p3 = pnand %p8595_p1, %p8589_p11 }
  0x57   : > { %8599 = shalt.err (!%p8596_p3)
}
  0x58   : > { %s8712_s24 = smov 128   ;;  %s8713_s19 = smov 8  }
  0x59   : > { %7789 = dma.hbm_to_vmem [thread:$0]  (!%p8823_p9), %s13216_s11, 6144, %s429_s21, [#allocation12], %s8712_s24, %s8712_s24, %s8713_s19  }
  0x5a   : > { %464 = sbr.rel (%p8815_p7) target bundleno = 1744 (0x6d0), region = 72 }
  0x5f   : > { %8645 = dma.done.wait (%p7790_p6), [#allocation4], 6144  }
  0x60   : > { %8647 = vsyncadd (%p7790_p6), [#allocation4], 4294961152 }
  0x61   : > { %8649 = dma.done.wait (%p7790_p6), [#allocation6], 36864  }
  0x62   : > { %8651 = vsyncadd (%p7790_p6), [#allocation6], 4294930432 }
  0x63   : > { %8653 = dma.done.wait (%p7790_p6), [#allocation9], 36864  }
  0x64   : > { %8655 = vsyncadd (%p7790_p6), [#allocation9], 4294930432 }
  0x65   : > { %8657 = dma.done.wait (%p7790_p6), [#allocation12], 6144  }
  0x66   : > { %8659 = vsyncadd (%p7790_p6), [#allocation12], 4294961152  ;;  %v13220_v0 = vmov 0.0   ;;  %s8926_s17 = sshll.u32 %s8798_s28, 4  ;;  %v8928_v1 = vld [vmem:[#allocation3 + $0x170] sm:$0xff]  ;;  %v8930_v2 = vld [vmem:[#allocation3 + $0x178] sm:$0xff] }
  0x67   : > { %744 = vmatprep.mubr.f32.mxu0 %v13220_v0  ;;  %566 = vst [vmem:[#allocation2] sm:$0xff] %v13220_v0  ;;  %567 = vst [vmem:[#allocation2 + $0x8] sm:$0xff] %v13220_v0  ;;  %v8932_v3 = vld [vmem:[#allocation3 + $0x168] sm:$0xff]  ;;  %680 = vmatprep.subr.mxu0 %v8928_v1  ;;  %v8936_v4 = vld [vmem:[#allocation3 + $0x158] sm:$0xff]  ;;  %p536_p6 = scmp.lt.s32.totalorder %s8926_s17, 24  ;;  %vm582_vm0 = vcmask 228352  }
  0x68   : > { %568 = vst [vmem:[#allocation2 + $0x10] sm:$0xff] %v13220_v0  ;;  %569 = vst [vmem:[#allocation2 + $0x18] sm:$0xff] %v13220_v0  ;;  %7219 = vmatprep.subr.mxu1 %v8930_v2  ;;  %v8938_v5 = vld [vmem:[#allocation3 + $0x160] sm:$0xff]  ;;  %v8940_v6 = vld [vmem:[#allocation3 + $0x150] sm:$0xff]  ;;  %681 = vmatpush1.msra.mxu0 %v8932_v3  ;;  %s528_s14 = sand.u32 1, %s8662_s25   ;;  %s6003_s22 = ssub.s32 (%p8810_p4), 25, %s8926_s17 }
  0x69   : > { %570 = vst [vmem:[#allocation2 + $0x20] sm:$0xff] %v13220_v0  ;;  %571 = vst [vmem:[#allocation2 + $0x28] sm:$0xff] %v13220_v0  ;;  %7220 = vmatpush3.msra.mxu1 %v8930_v2  ;;  %v8944_v7 = vld [vmem:[#allocation3 + $0x140] sm:$0xff]  ;;  %v8946_v8 = vld [vmem:[#allocation3 + $0x148] sm:$0xff]  ;;  %682 = vmatprep.subr.mxu0 %v8936_v4  ;;  %s537_s20 = scalar_select %p536_p6, %s8926_s17, 24 }
  0x6a   : > { %572 = vst [vmem:[#allocation2 + $0x30] sm:$0xff] %v13220_v0  ;;  %573 = vst [vmem:[#allocation2 + $0x38] sm:$0xff] %v13220_v0  ;;  %7221 = vmatprep.subr.mxu1 %v8938_v5  ;;  %v8951_v9 = vld [vmem:[#allocation3 + $0x138] sm:$0xff]  ;;  %683 = vmatpush1.msra.mxu0 %v8940_v6  ;;  %v8955_v10 = vld [vmem:[#allocation3 + $0x128] sm:$0xff]  ;;  %s6347_s26 = sshll.u32 %s528_s14, 7  ;;  %s6368_s21 = sshll.u32 (%p8810_p4), %s8798_s28, 7 }
  0x6b   : > { %574 = vst [vmem:[#allocation2 + $0x40] sm:$0xff] %v13220_v0  ;;  %575 = vst [vmem:[#allocation2 + $0x48] sm:$0xff] %v13220_v0  ;;  %7222 = vmatpush3.msra.mxu1 %v8938_v5  ;;  %v8957_v11 = vld [vmem:[#allocation3 + $0x130] sm:$0xff]  ;;  %684 = vmatprep.subr.mxu0 %v8944_v7  ;;  %v8961_v12 = vld [vmem:[#allocation3 + $0x120] sm:$0xff]  ;;  %s6349_s27 = sshll.u32 %s537_s20, 3  ;;  %s13042_s25 = scalar_lea.vmem [#allocation13], %s6347_s26  }
  0x6c   : > { %576 = vst [vmem:[#allocation2 + $0x50] sm:$0xff] %v13220_v0  ;;  %577 = vst [vmem:[#allocation2 + $0x58] sm:$0xff] %v13220_v0  ;;  %7223 = vmatprep.subr.mxu1 %v8946_v8  ;;  %685 = vmatpush1.msra.mxu0 %v8951_v9  ;;  %v8965_v13 = vld [vmem:[#allocation3 + $0x110] sm:$0xff]  ;;  %v8967_v14 = vld [vmem:[#allocation3 + $0x118] sm:$0xff]  ;;  %s9009_s30 = scalar_lea.vmem %s13205_s0, %s6349_s27  ;;  %p6004_p7 = scmp.lt.s32.totalorder (%p8810_p4), %s6003_s22, 16 }
  0x6d   : > { %578 = vst [vmem:[#allocation2 + $0x60] sm:$0xff] %v13220_v0  ;;  %579 = vst [vmem:[#allocation2 + $0x68] sm:$0xff] %v13220_v0  ;;  %7224 = vmatpush3.msra.mxu1 %v8946_v8  ;;  %686 = vmatprep.subr.mxu0 %v8955_v10  ;;  %v8974_v15 = vld [vmem:[#allocation3 + $0x108] sm:$0xff]  ;;  %v8978_v16 = vld [vmem:[#allocation3 + $0xf8] sm:$0xff]  ;;  %s13112_s19 = scalar_lea.vmem (%p8810_p4), %s13218_s13, %s6368_s21  }
  0x6e   : > { %580 = vst [vmem:[#allocation2 + $0x70] sm:$0xff] %v13220_v0  ;;  %581 = vst [vmem:[#allocation2 + $0x78] sm:$0xff] %v13220_v0  ;;  %7225 = vmatprep.subr.mxu1 %v8957_v11  ;;  %687 = vmatpush1.msra.mxu0 %v8961_v12  ;;  %v8980_v17 = vld [vmem:[#allocation3 + $0x100] sm:$0xff]  ;;  %v8984_v18 = vld [vmem:[#allocation3 + $0xf0] sm:$0xff] }
  0x6f   : > { %7226 = vmatpush3.msra.mxu1 %v8957_v11  ;;  %688 = vmatprep.subr.mxu0 %v8965_v13  ;;  %v8988_v19 = vld [vmem:[#allocation3 + $0xe0] sm:$0xff]  ;;  %v8990_v20 = vld [vmem:[#allocation3 + $0xe8] sm:$0xff]  ;;  %v8994_v21 = vld [vmem:[#allocation3 + $0xd8] sm:$0xff] }
  0x70   : > { %7227 = vmatprep.subr.mxu1 %v8967_v14  ;;  %689 = vmatpush1.msra.mxu0 %v8974_v15  ;;  %v8998_v22 = vld [vmem:[#allocation3 + $0xc8] sm:$0xff]  ;;  %v9000_v23 = vld [vmem:[#allocation3 + $0xd0] sm:$0xff]  ;;  %v9004_v24 = vld [vmem:[#allocation3 + $0xc0] sm:$0xff] }
  0x71   : > { %7228 = vmatpush3.msra.mxu1 %v8967_v14  ;;  %690 = vmatprep.subr.mxu0 %v8978_v16  ;;  %v9013_v25 = vld [vmem:[#allocation3 + $0xb0] sm:$0xff]  ;;  %v9015_v26 = vld [vmem:[#allocation3 + $0xb8] sm:$0xff]  ;;  %v9017_v27 = vld [vmem:[#allocation3 + $0xa8] sm:$0xff] }
  0x72   : > { %7229 = vmatprep.subr.mxu1 %v8980_v17  ;;  %691 = vmatpush1.msra.mxu0 %v8984_v18  ;;  %v9021_v28 = vld [vmem:[#allocation3 + $0x98] sm:$0xff]  ;;  %v9023_v29 = vld [vmem:[#allocation3 + $0xa0] sm:$0xff]  ;;  %v9025_v30 = vld [vmem:[#allocation3 + $0x90] sm:$0xff] }
  0x73   : > { %7230 = vmatpush3.msra.mxu1 %v8980_v17  ;;  %692 = vmatprep.subr.mxu0 %v8988_v19  ;;  %v9029_v31 = vld [vmem:[#allocation3 + $0x80] sm:$0xff]  ;;  %v9031_v32 = vld [vmem:[#allocation3 + $0x88] sm:$0xff]  ;;  %v9040_v35 = vld [vmem:[%s9009_s30 + $0x10] sm:$0xff] }
  0x74   : > { %7231 = vmatprep.subr.mxu1 %v8990_v20  ;;  %693 = vmatpush1.msra.mxu0 %v8994_v21  ;;  %v9034_v33 = vld [vmem:[%s9009_s30] sm:$0xff]  ;;  %v9037_v34 = vld [vmem:[%s9009_s30 + $0x8] sm:$0xff]  ;;  %13672 = vst [vmem:[#allocation22_spill] sm:$0xff] %v9040_v35  ;;  %v9044_v36 = vld [vmem:[#allocation3 + $0x78] sm:$0xff] }
  0x75   : > { %7232 = vmatpush3.msra.mxu1 %v8990_v20  ;;  %694 = vmatprep.subr.mxu0 %v8998_v22  ;;  %13670 = vst [vmem:[#allocation20_spill] sm:$0xff] %v9034_v33  ;;  %13671 = vst [vmem:[#allocation21_spill] sm:$0xff] %v9037_v34  ;;  %v9053_v37 = vld [vmem:[%s9009_s30 + $0x18] sm:$0xff]  ;;  %v9056_v38 = vld [vmem:[%s9009_s30 + $0x20] sm:$0xff] }
  0x76   : > { %7233 = vmatprep.subr.mxu1 %v9000_v23  ;;  %695 = vmatpush1.msra.mxu0 %v9004_v24  ;;  %583 = vst.msk [vmem:[#allocation2] sm:$0xff] %vm582_vm0, %v9034_v33  ;;  %584 = vst.msk [vmem:[#allocation2 + $0x8] sm:$0xff] %vm582_vm0, %v9037_v34  ;;  %v9059_v39 = vld [vmem:[%s9009_s30 + $0x28] sm:$0xff]  ;;  %v9065_v41 = vld [vmem:[#allocation3 + $0x70] sm:$0xff] }
  0x77   : > { %7234 = vmatpush3.msra.mxu1 %v9000_v23  ;;  %696 = vmatprep.subr.mxu0 %v9013_v25  ;;  %585 = vst.msk [vmem:[#allocation2 + $0x10] sm:$0xff] %vm582_vm0, %v9040_v35  ;;  %13673 = vst [vmem:[#allocation23_spill] sm:$0xff] %v9053_v37  ;;  %v9063_v40 = vld [vmem:[#allocation3 + $0x68] sm:$0xff]  ;;  %v9074_v42 = vld [vmem:[%s9009_s30 + $0x30] sm:$0xff] }
  0x78   : > { %7235 = vmatprep.subr.mxu1 %v9015_v26  ;;  %13674 = vst [vmem:[#allocation24_spill] sm:$0xff] %v9056_v38  ;;  %13675 = vst [vmem:[#allocation25_spill] sm:$0xff] %v9059_v39  ;;  %697 = vmatpush1.msra.mxu0 %v9017_v27  ;;  %v9077_v43 = vld [vmem:[%s9009_s30 + $0x38] sm:$0xff]  ;;  %v9080_v44 = vld [vmem:[%s9009_s30 + $0x40] sm:$0xff] }
  0x79   : > { %7236 = vmatpush3.msra.mxu1 %v9015_v26  ;;  %586 = vst.msk [vmem:[#allocation2 + $0x18] sm:$0xff] %vm582_vm0, %v9053_v37  ;;  %587 = vst.msk [vmem:[#allocation2 + $0x20] sm:$0xff] %vm582_vm0, %v9056_v38  ;;  %698 = vmatprep.subr.mxu0 %v9021_v28  ;;  %v9091_v45 = vld [vmem:[%s9009_s30 + $0x48] sm:$0xff]  ;;  %v9094_v46 = vld [vmem:[%s9009_s30 + $0x50] sm:$0xff] }
  0x7a   : > { %588 = vst.msk [vmem:[#allocation2 + $0x28] sm:$0xff] %vm582_vm0, %v9059_v39  ;;  %13676 = vst [vmem:[#allocation26_spill] sm:$0xff] %v9074_v42  ;;  %7237 = vmatprep.subr.mxu1 %v9023_v29  ;;  %v9097_v47 = vld [vmem:[%s9009_s30 + $0x58] sm:$0xff]  ;;  %699 = vmatpush1.msra.mxu0 %v9025_v30  ;;  %v9108_v48 = vld [vmem:[%s9009_s30 + $0x60] sm:$0xff] }
  0x7b   : > { %13677 = vst [vmem:[#allocation27_spill] sm:$0xff] %v9077_v43  ;;  %13678 = vst [vmem:[#allocation28_spill] sm:$0xff] %v9080_v44  ;;  %7238 = vmatpush3.msra.mxu1 %v9023_v29  ;;  %v9111_v49 = vld [vmem:[%s9009_s30 + $0x68] sm:$0xff]  ;;  %v9114_v50 = vld [vmem:[%s9009_s30 + $0x70] sm:$0xff]  ;;  %700 = vmatprep.subr.mxu0 %v9029_v31 }
  0x7c   : > { %589 = vst.msk [vmem:[#allocation2 + $0x30] sm:$0xff] %vm582_vm0, %v9074_v42  ;;  %590 = vst.msk [vmem:[#allocation2 + $0x38] sm:$0xff] %vm582_vm0, %v9077_v43  ;;  %7239 = vmatprep.subr.mxu1 %v9031_v32  ;;  %v9118_v51 = vld [vmem:[#allocation3 + $0x60] sm:$0xff]  ;;  %v9127_v52 = vld [vmem:[%s9009_s30 + $0x78] sm:$0xff]  ;;  %701 = vmatpush1.msra.mxu0 %v9044_v36 }
  0x7d   : > { %591 = vst.msk [vmem:[#allocation2 + $0x40] sm:$0xff] %vm582_vm0, %v9080_v44  ;;  %13679 = vst [vmem:[#allocation29_spill] sm:$0xff] %v9091_v45  ;;  %7240 = vmatpush3.msra.mxu1 %v9031_v32  ;;  %v9131_v53 = vld [vmem:[#allocation3 + $0x50] sm:$0xff]  ;;  %v9133_v54 = vld [vmem:[#allocation3 + $0x58] sm:$0xff]  ;;  %702 = vmatprep.subr.mxu0 %v9063_v40 }
  0x7e   : > { %13680 = vst [vmem:[#allocation30_spill] sm:$0xff] %v9094_v46  ;;  %13681 = vst [vmem:[#allocation31_spill] sm:$0xff] %v9097_v47  ;;  %7241 = vmatprep.subr.mxu1 %v9065_v41  ;;  %v9139_v55 = vld [vmem:[#allocation3 + $0x48] sm:$0xff]  ;;  %703 = vmatpush1.msra.mxu0 %v9118_v51  ;;  %v9143_v56 = vld [vmem:[#allocation3 + $0x38] sm:$0xff] }
  0x7f   : > { %592 = vst.msk [vmem:[#allocation2 + $0x48] sm:$0xff] %vm582_vm0, %v9091_v45  ;;  %593 = vst.msk [vmem:[#allocation2 + $0x50] sm:$0xff] %vm582_vm0, %v9094_v46  ;;  %7242 = vmatpush3.msra.mxu1 %v9065_v41  ;;  %v9145_v57 = vld [vmem:[#allocation3 + $0x40] sm:$0xff]  ;;  %704 = vmatprep.subr.mxu0 %v9131_v53  ;;  %v9149_v58 = vld [vmem:[#allocation3 + $0x30] sm:$0xff] }
  0x80   : > { %594 = vst.msk [vmem:[#allocation2 + $0x58] sm:$0xff] %vm582_vm0, %v9097_v47  ;;  %13682 = vst [vmem:[#allocation32_spill] sm:$0xff] %v9108_v48  ;;  %7243 = vmatprep.subr.mxu1 %v9133_v54  ;;  %705 = vmatpush1.msra.mxu0 %v9139_v55  ;;  %v9153_v59 = vld [vmem:[#allocation3 + $0x20] sm:$0xff]  ;;  %v9155_v60 = vld [vmem:[#allocation3 + $0x28] sm:$0xff] }
  0x81   : > { %13683 = vst [vmem:[#allocation33_spill] sm:$0xff] %v9111_v49  ;;  %13684 = vst [vmem:[#allocation34_spill] sm:$0xff] %v9114_v50  ;;  %7244 = vmatpush3.msra.mxu1 %v9133_v54  ;;  %706 = vmatprep.subr.mxu0 %v9143_v56  ;;  %v9159_v61 = vld [vmem:[#allocation3 + $0x18] sm:$0xff]  ;;  %v9163_v62 = vld [vmem:[#allocation3 + $0x8] sm:$0xff] }
  0x82   : > { %595 = vst.msk [vmem:[#allocation2 + $0x60] sm:$0xff] %vm582_vm0, %v9108_v48  ;;  %596 = vst.msk [vmem:[#allocation2 + $0x68] sm:$0xff] %vm582_vm0, %v9111_v49  ;;  %7245 = vmatprep.subr.mxu1 %v9145_v57  ;;  %707 = vmatpush1.msra.mxu0 %v9149_v58  ;;  %v9165_v63 = vld [vmem:[#allocation3 + $0x10] sm:$0xff]  ;;  %v9169_v0 = vld [vmem:[#allocation3] sm:$0xff]  ;;  %v13686_v49 = vmov 0.0  }
  0x83   : > { %597 = vst.msk [vmem:[#allocation2 + $0x70] sm:$0xff] %vm582_vm0, %v9114_v50  ;;  %13685 = vst [vmem:[#allocation35_spill] sm:$0xff] %v9127_v52  ;;  %7246 = vmatpush3.msra.mxu1 %v9145_v57  ;;  %708 = vmatprep.subr.mxu0 %v9153_v59  ;;  %v599_v50 = vld [vmem:[#allocation2] sm:$0xff]  ;;  %v601_v48 = vld [vmem:[#allocation2 + $0x10] sm:$0xff] }
  0x84   : > { %598 = vst.msk [vmem:[#allocation2 + $0x78] sm:$0xff] %vm582_vm0, %v9127_v52  ;;  %7247 = vmatprep.subr.mxu1 %v9155_v60  ;;  %709 = vmatpush1.msra.mxu0 %v9159_v61  ;;  %v600_v52 = vld [vmem:[#allocation2 + $0x8] sm:$0xff]  ;;  %v602_v46 = vld [vmem:[#allocation2 + $0x18] sm:$0xff]  ;;  %v603_v47 = vld [vmem:[#allocation2 + $0x20] sm:$0xff] }
  0x85   : > { %7248 = vmatpush3.msra.mxu1 %v9155_v60  ;;  %710 = vmatprep.subr.mxu0 %v9163_v62  ;;  %v605_v44 = vld [vmem:[#allocation2 + $0x30] sm:$0xff]  ;;  %v9443_v45 = vld [vmem:[#allocation5] sm:$0xff]  ;;  %v9445_v42 = vld [vmem:[#allocation5 + $0x368] sm:$0xff] }
  0x86   : > { %7249 = vmatprep.subr.mxu1 %v9165_v63  ;;  %711 = vmatpush1.msra.mxu0 %v9169_v0  ;;  %13707 = vst [vmem:[#allocation56_spill] sm:$0xff] %v9443_v45  ;;  %13708 = vst [vmem:[#allocation57_spill] sm:$0xff] %v9445_v42  ;;  %v9448_v43 = vld [vmem:[#allocation5 + $0x2f0] sm:$0xff]  ;;  %v9451_v38 = vld [vmem:[#allocation5 + $0x360] sm:$0xff] }
  0x87   : > { %7250 = vmatpush3.msra.mxu1 %v9165_v63  ;;  %7251 = vmatprep.mubr.f32.mxu1 %v599_v50  ;;  %13709 = vst [vmem:[#allocation58_spill] sm:$0xff] %v9448_v43  ;;  %13710 = vst [vmem:[#allocation59_spill] sm:$0xff] %v9451_v38  ;;  %v9454_v39 = vld [vmem:[#allocation5 + $0x2e8] sm:$0xff]  ;;  %v9460_v35 = vld [vmem:[#allocation5 + $0x2d8] sm:$0xff] }
  0x88   : > { %745 = vmatmul.mubr.f32.vlgmr.msra.gmra.mxu0 %v599_v50  ;;  %7252 = vmatmul.mubr.f32.vlgmr.msra.gmra.mxu1 %v600_v52  ;;  %v604_v50 = vld [vmem:[#allocation2 + $0x28] sm:$0xff]  ;;  %13711 = vst [vmem:[#allocation60_spill] sm:$0xff] %v9454_v39  ;;  %13713 = vst [vmem:[#allocation62_spill] sm:$0xff] %v9460_v35  ;;  %v9466_v33 = vld [vmem:[#allocation5 + $0x2d0] sm:$0xff] }
  0x89   : > { %750 = vmatprep.mubr.f32.mxu0 %v13686_v49  ;;  %7254 = vmatprep.mubr.f32.mxu1 %v601_v48  ;;  %v9463_v37 = vld [vmem:[#allocation5 + $0x348] sm:$0xff]  ;;  %13715 = vst [vmem:[#allocation64_spill] sm:$0xff] %v9466_v33  ;;  %v9469_v34 = vld [vmem:[#allocation5 + $0x338] sm:$0xff] }
  0x8a   : > { %7263 = vmatprep.subr.mxu1 %v8930_v2  ;;  %922 = vmatprep.subr.mxu0 %v8928_v1  ;;  %v606_v1 = vld [vmem:[#allocation2 + $0x38] sm:$0xff]  ;;  %13714 = vst [vmem:[#allocation63_spill] sm:$0xff] %v9463_v37  ;;  %13716 = vst [vmem:[#allocation65_spill] sm:$0xff] %v9469_v34 }
  0x8b   : > { %7264 = vmatpush3.msra.mxu1 %v8930_v2  ;;  %923 = vmatpush1.msra.mxu0 %v8932_v3  ;;  %v9191_v2 = vld [vmem:[#allocation2 + $0x40] sm:$0xff]  ;;  %v9232_v3 = vld [vmem:[#allocation2 + $0x48] sm:$0xff] }
  0x8c   : > { %751 = vmatmul.mubr.f32.gmra.mxu0 %v600_v52  ;;  %7265 = vmatprep.subr.mxu1 %v8938_v5  ;;  %v9374_v52 = vld [vmem:[#allocation5 + $0x98] sm:$0xff] }
  0x8d   : > { %7255 = vmatmul.mubr.f32.gmra.mxu1 %v602_v46  ;;  %756 = vmatprep.mubr.f32.mxu0 %v13686_v49  ;;  %13688 = vst [vmem:[#allocation37_spill] sm:$0xff] %v9374_v52 }
  0x8e   : > { %7257 = vmatprep.mubr.f32.mxu1 %v603_v47  ;;  %7266 = vmatpush3.msra.mxu1 %v8938_v5  ;;  %v9243_v5 = vld [vmem:[#allocation5 + $0x470] sm:$0xff] }
  0x8f   : > { %7267 = vmatprep.subr.mxu1 %v8946_v8  ;;  %924 = vmatprep.subr.mxu0 %v8936_v4  ;;  %v9236_v4 = vld [vmem:[#allocation2 + $0x50] sm:$0xff] }
  0x90   : > { %757 = vmatmul.mubr.f32.gmra.mxu0 %v601_v48  ;;  %7268 = vmatpush3.msra.mxu1 %v8946_v8  ;;  %v9255_v8 = vld [vmem:[#allocation5 + $0x468] sm:$0xff]  ;;  %v9367_v48 = vld [vmem:[#allocation5 + $0xb0] sm:$0xff] }
  0x91   : > { %762 = vmatprep.mubr.f32.mxu0 %v13686_v49  ;;  %7258 = vmatmul.mubr.f32.gmra.mxu1 %v604_v50 }
  0x92   : > { %7260 = vmatprep.mubr.f32.mxu1 %v605_v44  ;;  %7269 = vmatprep.subr.mxu1 %v8957_v11 }
  0x93   : > { %7270 = vmatpush3.msra.mxu1 %v8957_v11  ;;  %925 = vmatpush1.msra.mxu0 %v8940_v6  ;;  %v9246_v6 = vld [vmem:[#allocation2 + $0x58] sm:$0xff]  ;;  %v9266_v11 = vld [vmem:[#allocation2 + $0x70] sm:$0xff] }
  0x94   : > { %763 = vmatmul.mubr.f32.gmra.mxu0 %v602_v46  ;;  %7271 = vmatprep.subr.mxu1 %v8967_v14  ;;  %v9361_v46 = vld [vmem:[#allocation5 + $0xc0] sm:$0xff] }
  0x95   : > { %768 = vmatprep.mubr.f32.mxu0 %v13686_v49  ;;  %7261 = vmatmul.mubr.f32.gmra.mxu1 %v606_v1 }
  0x96   : > { %7272 = vmatpush3.msra.mxu1 %v8967_v14  ;;  %7295 = vmatprep.mubr.f32.mxu1 %v9191_v2  ;;  %v9279_v14 = vld [vmem:[#allocation2 + $0x78] sm:$0xff] }
  0x97   : > { %7273 = vmatprep.subr.mxu1 %v8980_v17  ;;  %926 = vmatprep.subr.mxu0 %v8944_v7  ;;  %v9249_v7 = vld [vmem:[#allocation2 + $0x60] sm:$0xff] }
  0x98   : > { %769 = vmatmul.mubr.f32.gmra.mxu0 %v603_v47  ;;  %7274 = vmatpush3.msra.mxu1 %v8980_v17  ;;  %v9291_v17 = vld [vmem:[#allocation5 + $0x168] sm:$0xff]  ;;  %v9363_v47 = vld [vmem:[#allocation5 + $0x3d8] sm:$0xff] }
  0x99   : > { %774 = vmatprep.mubr.f32.mxu0 %v13686_v49  ;;  %7275 = vmatprep.subr.mxu1 %v8990_v20 }
  0x9a   : > { %7276 = vmatpush3.msra.mxu1 %v8990_v20  ;;  %927 = vmatpush1.msra.mxu0 %v8951_v9  ;;  %v9259_v9 = vld [vmem:[#allocation5 + $0x458] sm:$0xff]  ;;  %v9301_v20 = vld [vmem:[#allocation5 + $0x150] sm:$0xff] }
  0x9b   : > { %7277 = vmatprep.subr.mxu1 %v9000_v23  ;;  %928 = vmatprep.subr.mxu0 %v8955_v10  ;;  %v9262_v10 = vld [vmem:[#allocation2 + $0x68] sm:$0xff] }
  0x9c   : > { %775 = vmatmul.mubr.f32.gmra.mxu0 %v604_v50  ;;  %7278 = vmatpush3.msra.mxu1 %v9000_v23  ;;  %v9314_v23 = vld [vmem:[#allocation5 + $0x128] sm:$0xff]  ;;  %v9414_v50 = vld [vmem:[#allocation5 + $0x38] sm:$0xff] }
  0x9d   : > { %780 = vmatprep.mubr.f32.mxu0 %v13686_v49  ;;  %7279 = vmatprep.subr.mxu1 %v9015_v26  ;;  %13698 = vst [vmem:[#allocation47_spill] sm:$0xff] %v9414_v50 }
  0x9e   : > { %7280 = vmatpush3.msra.mxu1 %v9015_v26  ;;  %929 = vmatpush1.msra.mxu0 %v8961_v12  ;;  %v9271_v12 = vld [vmem:[#allocation5 + $0x450] sm:$0xff]  ;;  %v9323_v26 = vld [vmem:[#allocation5 + $0x408] sm:$0xff] }
  0x9f   : > { %7281 = vmatprep.subr.mxu1 %v9023_v29  ;;  %930 = vmatprep.subr.mxu0 %v8965_v13  ;;  %v9275_v13 = vld [vmem:[#allocation5 + $0x440] sm:$0xff] }
  0xa0   : > { %781 = vmatmul.mubr.f32.gmra.mxu0 %v605_v44  ;;  %7282 = vmatpush3.msra.mxu1 %v9023_v29  ;;  %v9334_v29 = vld [vmem:[#allocation5 + $0xf8] sm:$0xff]  ;;  %v9357_v44 = vld [vmem:[#allocation5 + $0x3e0] sm:$0xff] }
  0xa1   : > { %786 = vmatprep.mubr.f32.mxu0 %v13686_v49  ;;  %7283 = vmatprep.subr.mxu1 %v9031_v32 }
  0xa2   : > { %7284 = vmatpush3.msra.mxu1 %v9031_v32  ;;  %931 = vmatpush1.msra.mxu0 %v8974_v15  ;;  %v9283_v15 = vld [vmem:[#allocation5 + $0x438] sm:$0xff]  ;;  %v9343_v32 = vld [vmem:[#allocation5 + $0x3f0] sm:$0xff] }
  0xa3   : > { %7285 = vmatprep.subr.mxu1 %v9065_v41  ;;  %932 = vmatprep.subr.mxu0 %v8978_v16  ;;  %v9286_v16 = vld [vmem:[#allocation5 + $0x170] sm:$0xff] }
  0xa4   : > { %787 = vmatmul.mubr.f32.gmra.mxu0 %v606_v1  ;;  %7286 = vmatpush3.msra.mxu1 %v9065_v41  ;;  %v9354_v41 = vld [vmem:[#allocation5 + $0xc8] sm:$0xff]  ;;  %v9417_v1 = vld [vmem:[#allocation5 + $0x398] sm:$0xff] }
  0xa5   : > { %7287 = vmatprep.subr.mxu1 %v9133_v54  ;;  %933 = vmatpush1.msra.mxu0 %v8984_v18  ;;  %v9294_v18 = vld [vmem:[#allocation5 + $0x158] sm:$0xff]  ;;  %13699 = vst [vmem:[#allocation48_spill] sm:$0xff] %v9417_v1 }
  0xa6   : > { %7288 = vmatpush3.msra.mxu1 %v9133_v54  ;;  %934 = vmatprep.subr.mxu0 %v8988_v19  ;;  %v9297_v19 = vld [vmem:[#allocation5 + $0x428] sm:$0xff]  ;;  %v9381_v54 = vld [vmem:[#allocation5 + $0x90] sm:$0xff] }
  0xa7   : > { %7289 = vmatprep.subr.mxu1 %v9145_v57  ;;  %935 = vmatpush1.msra.mxu0 %v8994_v21  ;;  %v9303_v21 = vld [vmem:[#allocation5 + $0x420] sm:$0xff]  ;;  %13689 = vst [vmem:[#allocation38_spill] sm:$0xff] %v9381_v54 }
  0xa8   : > { %7290 = vmatpush3.msra.mxu1 %v9145_v57  ;;  %936 = vmatprep.subr.mxu0 %v8998_v22  ;;  %v9307_v22 = vld [vmem:[#allocation5 + $0x140] sm:$0xff]  ;;  %v9390_v57 = vld [vmem:[#allocation5 + $0x78] sm:$0xff] }
  0xa9   : > { %7291 = vmatprep.subr.mxu1 %v9155_v60  ;;  %937 = vmatpush1.msra.mxu0 %v9004_v24  ;;  %v9317_v24 = vld [vmem:[#allocation5 + $0x410] sm:$0xff]  ;;  %13691 = vst [vmem:[#allocation40_spill] sm:$0xff] %v9390_v57 }
  0xaa   : > { %7292 = vmatpush3.msra.mxu1 %v9155_v60  ;;  %938 = vmatprep.subr.mxu0 %v9013_v25  ;;  %v9321_v25 = vld [vmem:[#allocation5 + $0x120] sm:$0xff] }
  0xab   : > { %7293 = vmatprep.subr.mxu1 %v9165_v63  ;;  %939 = vmatpush1.msra.mxu0 %v9017_v27  ;;  %v9327_v27 = vld [vmem:[#allocation5 + $0x110] sm:$0xff]  ;;  %v9401_v60 = vld [vmem:[#allocation5 + $0x60] sm:$0xff] }
  0xac   : > { %7294 = vmatpush3.msra.mxu1 %v9165_v63  ;;  %940 = vmatprep.subr.mxu0 %v9021_v28  ;;  %v9330_v28 = vld [vmem:[#allocation5 + $0x108] sm:$0xff]  ;;  %13694 = vst [vmem:[#allocation43_spill] sm:$0xff] %v9401_v60 }
  0xad   : > { %7296 = vmatmul.mubr.f32.vlgmr.msra.gmra.mxu1 %v9232_v3  ;;  %941 = vmatpush1.msra.mxu0 %v9025_v30  ;;  %v9337_v30 = vld [vmem:[#allocation5 + $0x3f8] sm:$0xff]  ;;  %v9410_v63 = vld [vmem:[#allocation5 + $0x48] sm:$0xff] }
  0xae   : > { %7298 = vmatprep.mubr.f32.mxu1 %v9236_v4  ;;  %942 = vmatprep.subr.mxu0 %v9029_v31  ;;  %v9341_v31 = vld [vmem:[#allocation5 + $0xf0] sm:$0xff]  ;;  %13697 = vst [vmem:[#allocation46_spill] sm:$0xff] %v9410_v63 }
  0xaf   : > { %986 = vmatprep.mubr.f32.mxu0 %v13686_v49  ;;  %943 = vmatpush1.msra.mxu0 %v9044_v36  ;;  %v9347_v36 = vld [vmem:[#allocation5 + $0xe0] sm:$0xff] }
  0xb0   : > { %1438 = vmatprep.subr.mxu1 %v9243_v5  ;;  %944 = vmatprep.subr.mxu0 %v9063_v40  ;;  %v9350_v40 = vld [vmem:[#allocation5 + $0xd8] sm:$0xff] }
  0xb1   : > { %7299 = vmatmul.mubr.f32.gmra.mxu1 %v9246_v6  ;;  %945 = vmatpush1.msra.mxu0 %v9118_v51  ;;  %v9370_v51 = vld [vmem:[#allocation5 + $0xa8] sm:$0xff] }
  0xb2   : > { %7301 = vmatprep.mubr.f32.mxu1 %v9249_v7  ;;  %946 = vmatprep.subr.mxu0 %v9131_v53  ;;  %13687 = vst [vmem:[#allocation36_spill] sm:$0xff] %v9370_v51  ;;  %v9377_v53 = vld [vmem:[#allocation5 + $0x3c8] sm:$0xff] }
  0xb3   : > { %1439 = vmatpush1.msra.mxu1 %v9255_v8  ;;  %947 = vmatpush1.msra.mxu0 %v9139_v55  ;;  %v9383_v55 = vld [vmem:[#allocation5 + $0x3c0] sm:$0xff] }
  0xb4   : > { %1440 = vmatprep.subr.mxu1 %v9259_v9  ;;  %948 = vmatprep.subr.mxu0 %v9143_v56  ;;  %v9387_v56 = vld [vmem:[#allocation5 + $0x80] sm:$0xff] }
  0xb5   : > { %7302 = vmatmul.mubr.f32.gmra.mxu1 %v9262_v10  ;;  %949 = vmatpush1.msra.mxu0 %v9149_v58  ;;  %13690 = vst [vmem:[#allocation39_spill] sm:$0xff] %v9387_v56  ;;  %v9394_v58 = vld [vmem:[#allocation5 + $0x68] sm:$0xff] }
  0xb6   : > { %7304 = vmatprep.mubr.f32.mxu1 %v9266_v11  ;;  %950 = vmatprep.subr.mxu0 %v9153_v59  ;;  %13692 = vst [vmem:[#allocation41_spill] sm:$0xff] %v9394_v58  ;;  %v9397_v59 = vld [vmem:[#allocation5 + $0x3b0] sm:$0xff] }
  0xb7   : > { %1441 = vmatpush1.msra.mxu1 %v9271_v12  ;;  %951 = vmatpush1.msra.mxu0 %v9159_v61  ;;  %13693 = vst [vmem:[#allocation42_spill] sm:$0xff] %v9397_v59  ;;  %v9403_v61 = vld [vmem:[#allocation5 + $0x3a8] sm:$0xff] }
  0xb8   : > { %1442 = vmatprep.subr.mxu1 %v9275_v13  ;;  %952 = vmatprep.subr.mxu0 %v9163_v62  ;;  %13695 = vst [vmem:[#allocation44_spill] sm:$0xff] %v9403_v61  ;;  %v9407_v62 = vld [vmem:[#allocation5 + $0x50] sm:$0xff] }
  0xb9   : > { %7305 = vmatmul.mubr.f32.gmra.mxu1 %v9279_v14  ;;  %953 = vmatpush1.msra.mxu0 %v9169_v0  ;;  %v9310_v0 = vld [vmem:[#allocation5 + $0x138] sm:$0xff]  ;;  %13696 = vst [vmem:[#allocation45_spill] sm:$0xff] %v9407_v62 }
  0xba   : > { %1443 = vmatpush1.msra.mxu1 %v9283_v15  ;;  %987 = vmatmul.mubr.f32.vlgmr.msra.gmra.mxu0 %v9191_v2  ;;  %v9421_v2 = vld [vmem:[#allocation5 + $0x30] sm:$0xff] }
  0xbb   : > { %1325 = vmatprep.subr.mxu0 %v9286_v16  ;;  %992 = vmatprep.mubr.f32.mxu0 %v13686_v49  ;;  %13700 = vst [vmem:[#allocation49_spill] sm:$0xff] %v9421_v2 }
  0xbc   : > { %1326 = vmatpush1.msra.mxu0 %v9291_v17  ;;  %1444 = vmatprep.subr.mxu1 %v9297_v19 }
  0xbd   : > { %1327 = vmatprep.subr.mxu0 %v9294_v18  ;;  %1445 = vmatpush1.msra.mxu1 %v9303_v21 }
  0xbe   : > { %1328 = vmatpush1.msra.mxu0 %v9301_v20  ;;  %1446 = vmatprep.subr.mxu1 %v9317_v24 }
  0xbf   : > { %993 = vmatmul.mubr.f32.gmra.mxu0 %v9232_v3  ;;  %1329 = vmatprep.subr.mxu0 %v9307_v22  ;;  %v9423_v3 = vld [vmem:[#allocation5 + $0x390] sm:$0xff] }
  0xc0   : > { %998 = vmatprep.mubr.f32.mxu0 %v13686_v49  ;;  %1330 = vmatpush1.msra.mxu0 %v9310_v0  ;;  %13701 = vst [vmem:[#allocation50_spill] sm:$0xff] %v9423_v3 }
  0xc1   : > { %1331 = vmatprep.subr.mxu0 %v9314_v23  ;;  %1447 = vmatpush1.msra.mxu1 %v9323_v26 }
  0xc2   : > { %1332 = vmatpush1.msra.mxu0 %v9321_v25  ;;  %1448 = vmatprep.subr.mxu1 %v9337_v30 }
  0xc3   : > { %999 = vmatmul.mubr.f32.gmra.mxu0 %v9236_v4  ;;  %1333 = vmatprep.subr.mxu0 %v9327_v27  ;;  %v9427_v4 = vld [vmem:[#allocation5 + $0x20] sm:$0xff] }
  0xc4   : > { %1004 = vmatprep.mubr.f32.mxu0 %v13686_v49  ;;  %1334 = vmatpush1.msra.mxu0 %v9330_v28  ;;  %13702 = vst [vmem:[#allocation51_spill] sm:$0xff] %v9427_v4 }
  0xc5   : > { %1335 = vmatprep.subr.mxu0 %v9334_v29  ;;  %1449 = vmatpush1.msra.mxu1 %v9343_v32 }
  0xc6   : > { %1336 = vmatpush1.msra.mxu0 %v9341_v31  ;;  %1450 = vmatprep.subr.mxu1 %v9357_v44 }
  0xc7   : > { %1005 = vmatmul.mubr.f32.gmra.mxu0 %v9246_v6  ;;  %1337 = vmatprep.subr.mxu0 %v9347_v36  ;;  %v9430_v6 = vld [vmem:[#allocation5 + $0x18] sm:$0xff] }
  0xc8   : > { %1010 = vmatprep.mubr.f32.mxu0 %v13686_v49  ;;  %1338 = vmatpush1.msra.mxu0 %v9350_v40  ;;  %13703 = vst [vmem:[#allocation52_spill] sm:$0xff] %v9430_v6 }
  0xc9   : > { %1339 = vmatprep.subr.mxu0 %v9354_v41  ;;  %1451 = vmatpush1.msra.mxu1 %v9363_v47 }
  0xca   : > { %1340 = vmatpush1.msra.mxu0 %v9361_v46  ;;  %1452 = vmatprep.subr.mxu1 %v9377_v53 }
  0xcb   : > { %1011 = vmatmul.mubr.f32.gmra.mxu0 %v9249_v7  ;;  %1341 = vmatprep.subr.mxu0 %v9367_v48  ;;  %v9433_v7 = vld [vmem:[#allocation5 + $0x380] sm:$0xff] }
  0xcc   : > { %1016 = vmatprep.mubr.f32.mxu0 %v13686_v49  ;;  %1342 = vmatpush1.msra.mxu0 %v9370_v51  ;;  %13704 = vst [vmem:[#allocation53_spill] sm:$0xff] %v9433_v7 }
  0xcd   : > { %1343 = vmatprep.subr.mxu0 %v9374_v52  ;;  %1453 = vmatpush1.msra.mxu1 %v9383_v55  ;;  %v9713_v52 = vld [vmem:[#allocation5 + $0x3e8] sm:$0xff] }
  0xce   : > { %1344 = vmatpush1.msra.mxu0 %v9381_v54  ;;  %1454 = vmatprep.subr.mxu1 %v9397_v59  ;;  %v9692_v54 = vld [vmem:[#allocation5 + $0x100] sm:$0xff]  ;;  %13775 = vst [vmem:[#allocation124_spill] sm:$0xff] %v9713_v52 }
  0xcf   : > { %1017 = vmatmul.mubr.f32.gmra.mxu0 %v9262_v10  ;;  %1345 = vmatprep.subr.mxu0 %v9387_v56  ;;  %v9436_v10 = vld [vmem:[#allocation5 + $0x8] sm:$0xff]  ;;  %13771 = vst [vmem:[#allocation120_spill] sm:$0xff] %v9692_v54 }
  0xd0   : > { %1022 = vmatprep.mubr.f32.mxu0 %v13686_v49  ;;  %1346 = vmatpush1.msra.mxu0 %v9390_v57  ;;  %13705 = vst [vmem:[#allocation54_spill] sm:$0xff] %v9436_v10 }
  0xd1   : > { %1347 = vmatprep.subr.mxu0 %v9394_v58  ;;  %1455 = vmatpush1.msra.mxu1 %v9403_v61  ;;  %v9616_v58 = vld [vmem:[#allocation5 + $0x178] sm:$0xff] }
  0xd2   : > { %1348 = vmatpush1.msra.mxu0 %v9401_v60  ;;  %1456 = vmatprep.subr.mxu1 %v9417_v1  ;;  %13757 = vst [vmem:[#allocation106_spill] sm:$0xff] %v9616_v58 }
  0xd3   : > { %1023 = vmatmul.mubr.f32.gmra.mxu0 %v9266_v11  ;;  %1349 = vmatprep.subr.mxu0 %v9407_v62  ;;  %v9439_v11 = vld [vmem:[#allocation5 + $0x378] sm:$0xff] }
  0xd4   : > { %1028 = vmatprep.mubr.f32.mxu0 %v13686_v49  ;;  %1350 = vmatpush1.msra.mxu0 %v9410_v63  ;;  %13706 = vst [vmem:[#allocation55_spill] sm:$0xff] %v9439_v11 }
  0xd5   : > { %1351 = vmatprep.subr.mxu0 %v9414_v50  ;;  %1457 = vmatpush1.msra.mxu1 %v9423_v3 }
  0xd6   : > { %1352 = vmatpush1.msra.mxu0 %v9421_v2  ;;  %1458 = vmatprep.subr.mxu1 %v9433_v7  ;;  %v9490_v2 = vld [vmem:[#allocation5 + $0x2a0] sm:$0xff] }
  0xd7   : > { %1029 = vmatmul.mubr.f32.gmra.mxu0 %v9279_v14  ;;  %1353 = vmatprep.subr.mxu0 %v9427_v4  ;;  %v9457_v14 = vld [vmem:[#allocation5 + $0x350] sm:$0xff]  ;;  %v9484_v4 = vld [vmem:[#allocation5 + $0x2a8] sm:$0xff]  ;;  %13723 = vst [vmem:[#allocation72_spill] sm:$0xff] %v9490_v2 }
  0xd8   : > { %1354 = vmatpush1.msra.mxu0 %v9430_v6  ;;  %1459 = vmatpush1.msra.mxu1 %v9439_v11  ;;  %13712 = vst [vmem:[#allocation61_spill] sm:$0xff] %v9457_v14  ;;  %v9478_v6 = vld [vmem:[#allocation5 + $0x2b8] sm:$0xff]  ;;  %13721 = vst [vmem:[#allocation70_spill] sm:$0xff] %v9484_v4 }
  0xd9   : > { %1355 = vmatprep.subr.mxu0 %v9436_v10  ;;  %1460 = vmatprep.subr.mxu1 %v9445_v42  ;;  %v9472_v10 = vld [vmem:[#allocation5 + $0x2c0] sm:$0xff]  ;;  %13719 = vst [vmem:[#allocation68_spill] sm:$0xff] %v9478_v6 }
  0xda   : > { %1356 = vmatpush1.msra.mxu0 %v9443_v45  ;;  %1461 = vmatpush1.msra.mxu1 %v9451_v38  ;;  %13717 = vst [vmem:[#allocation66_spill] sm:$0xff] %v9472_v10  ;;  %v9475_v45 = vld [vmem:[#allocation5 + $0x330] sm:$0xff] }
  0xdb   : > { %1357 = vmatprep.subr.mxu0 %v9448_v43  ;;  %1462 = vmatprep.subr.mxu1 %v9457_v14  ;;  %13718 = vst [vmem:[#allocation67_spill] sm:$0xff] %v9475_v45  ;;  %v9481_v43 = vld [vmem:[#allocation5 + $0x320] sm:$0xff] }
  0xdc   : > { %1358 = vmatpush2.msra.mxu0 %v9454_v39  ;;  %1463 = vmatpush1.msra.mxu1 %v9463_v37  ;;  %13720 = vst [vmem:[#allocation69_spill] sm:$0xff] %v9481_v43  ;;  %v9487_v39 = vld [vmem:[#allocation5 + $0x318] sm:$0xff]  ;;  %v9496_v37 = vld [vmem:[#allocation5 + $0x290] sm:$0xff] }
  0xdd   : > { %1359 = vmatprep.subr.mxu0 %v9460_v35  ;;  %1464 = vmatprep.subr.mxu1 %v9469_v34  ;;  %13722 = vst [vmem:[#allocation71_spill] sm:$0xff] %v9487_v39  ;;  %v9493_v35 = vld [vmem:[#allocation5 + $0x308] sm:$0xff]  ;;  %13725 = vst [vmem:[#allocation74_spill] sm:$0xff] %v9496_v37 }
  0xde   : > { %1360 = vmatpush2.msra.mxu0 %v9466_v33  ;;  %1465 = vmatpush1.msra.mxu1 %v9475_v45  ;;  %13724 = vst [vmem:[#allocation73_spill] sm:$0xff] %v9493_v35  ;;  %v9499_v33 = vld [vmem:[#allocation5 + $0x300] sm:$0xff]  ;;  %v9502_v34 = vld [vmem:[#allocation5 + $0x288] sm:$0xff]  ;;  %v9509_v45 = vld [vmem:[#allocation5 + $0x2f8] sm:$0xff] }
  0xdf   : > { %1361 = vmatprep.subr.mxu0 %v9472_v10  ;;  %1466 = vmatprep.subr.mxu1 %v9481_v43  ;;  %13726 = vst [vmem:[#allocation75_spill] sm:$0xff] %v9499_v33  ;;  %13727 = vst [vmem:[#allocation76_spill] sm:$0xff] %v9502_v34  ;;  %v9506_v10 = vld [vmem:[#allocation5 + $0x278] sm:$0xff] }
  0xe0   : > { %1362 = vmatpush2.msra.mxu0 %v9478_v6  ;;  %1467 = vmatpush1.msra.mxu1 %v9487_v39  ;;  %13728 = vst [vmem:[#allocation77_spill] sm:$0xff] %v9506_v10  ;;  %13729 = vst [vmem:[#allocation78_spill] sm:$0xff] %v9509_v45  ;;  %v9512_v6 = vld [vmem:[#allocation5 + $0x270] sm:$0xff] }
  0xe1   : > { %1363 = vmatprep.subr.mxu0 %v9484_v4  ;;  %1468 = vmatprep.subr.mxu1 %v9493_v35  ;;  %13730 = vst [vmem:[#allocation79_spill] sm:$0xff] %v9512_v6  ;;  %v9516_v4 = vld [vmem:[#allocation5 + $0x260] sm:$0xff]  ;;  %v9524_v35 = vld [vmem:[#allocation5 + $0x248] sm:$0xff] }
  0xe2   : > { %1364 = vmatpush2.msra.mxu0 %v9490_v2  ;;  %1469 = vmatpush1.msra.mxu1 %v9499_v33  ;;  %13731 = vst [vmem:[#allocation80_spill] sm:$0xff] %v9516_v4  ;;  %v9520_v2 = vld [vmem:[#allocation5 + $0x258] sm:$0xff]  ;;  %13733 = vst [vmem:[#allocation82_spill] sm:$0xff] %v9524_v35  ;;  %v9533_v33 = vld [vmem:[#allocation5 + $0x228] sm:$0xff] }
  0xe3   : > { %1365 = vmatprep.subr.mxu0 %v9496_v37  ;;  %1502 = vmatprep.mubr.f32.mxu1 %v13686_v49  ;;  %13732 = vst [vmem:[#allocation81_spill] sm:$0xff] %v9520_v2  ;;  %v9527_v37 = vld [vmem:[#allocation5 + $0x240] sm:$0xff]  ;;  %13736 = vst [vmem:[#allocation85_spill] sm:$0xff] %v9533_v33 }
  0xe4   : > { %1366 = vmatpush2.msra.mxu0 %v9502_v34  ;;  %6419 = vmatprep.subr.mxu1 %v9509_v45  ;;  %13734 = vst [vmem:[#allocation83_spill] sm:$0xff] %v9527_v37  ;;  %v9530_v34 = vld [vmem:[#allocation5 + $0x230] sm:$0xff] }
  0xe5   : > { %1367 = vmatprep.subr.mxu0 %v9506_v10  ;;  %13735 = vst [vmem:[#allocation84_spill] sm:$0xff] %v9530_v34  ;;  %v9536_v10 = vld [vmem:[#allocation5 + $0x218] sm:$0xff] }
  0xe6   : > { %1368 = vmatpush2.msra.mxu0 %v9512_v6  ;;  %13737 = vst [vmem:[#allocation86_spill] sm:$0xff] %v9536_v10  ;;  %v9539_v6 = vld [vmem:[#allocation5 + $0x210] sm:$0xff] }
  0xe7   : > { %1369 = vmatprep.subr.mxu0 %v9516_v4  ;;  %13738 = vst [vmem:[#allocation87_spill] sm:$0xff] %v9539_v6  ;;  %v9542_v4 = vld [vmem:[#allocation5 + $0x200] sm:$0xff] }
  0xe8   : > { %1370 = vmatpush2.msra.mxu0 %v9520_v2  ;;  %13739 = vst [vmem:[#allocation88_spill] sm:$0xff] %v9542_v4  ;;  %v9545_v2 = vld [vmem:[#allocation5 + $0x1f8] sm:$0xff] }
  0xe9   : > { %1371 = vmatprep.subr.mxu0 %v9524_v35  ;;  %13740 = vst [vmem:[#allocation89_spill] sm:$0xff] %v9545_v2  ;;  %v9548_v35 = vld [vmem:[#allocation5 + $0x1e8] sm:$0xff] }
  0xea   : > { %1372 = vmatpush2.msra.mxu0 %v9527_v37  ;;  %13741 = vst [vmem:[#allocation90_spill] sm:$0xff] %v9548_v35  ;;  %v9551_v37 = vld [vmem:[#allocation5 + $0x1e0] sm:$0xff] }
  0xeb   : > { %1373 = vmatprep.subr.mxu0 %v9530_v34  ;;  %13742 = vst [vmem:[#allocation91_spill] sm:$0xff] %v9551_v37  ;;  %v9554_v34 = vld [vmem:[#allocation5 + $0x1d0] sm:$0xff] }
  0xec   : > { %1374 = vmatpush2.msra.mxu0 %v9533_v33  ;;  %13743 = vst [vmem:[#allocation92_spill] sm:$0xff] %v9554_v34  ;;  %v9557_v33 = vld [vmem:[#allocation5 + $0x1c8] sm:$0xff] }
  0xed   : > { %1375 = vmatprep.subr.mxu0 %v9536_v10  ;;  %13744 = vst [vmem:[#allocation93_spill] sm:$0xff] %v9557_v33  ;;  %v9560_v10 = vld [vmem:[#allocation5 + $0x1b8] sm:$0xff] }
  0xee   : > { %1376 = vmatpush2.msra.mxu0 %v9539_v6  ;;  %13745 = vst [vmem:[#allocation94_spill] sm:$0xff] %v9560_v10  ;;  %v9563_v6 = vld [vmem:[#allocation5 + $0x1b0] sm:$0xff] }
  0xef   : > { %1377 = vmatprep.subr.mxu0 %v9542_v4  ;;  %13746 = vst [vmem:[#allocation95_spill] sm:$0xff] %v9563_v6  ;;  %v9566_v4 = vld [vmem:[#allocation5 + $0x1a0] sm:$0xff] }
  0xf0   : > { %1378 = vmatpush2.msra.mxu0 %v9545_v2  ;;  %13747 = vst [vmem:[#allocation96_spill] sm:$0xff] %v9566_v4  ;;  %v9569_v2 = vld [vmem:[#allocation5 + $0x198] sm:$0xff] }
  0xf1   : > { %1379 = vmatprep.subr.mxu0 %v9548_v35  ;;  %13748 = vst [vmem:[#allocation97_spill] sm:$0xff] %v9569_v2  ;;  %v9572_v35 = vld [vmem:[#allocation5 + $0x188] sm:$0xff] }
  0xf2   : > { %1380 = vmatpush2.msra.mxu0 %v9551_v37  ;;  %13749 = vst [vmem:[#allocation98_spill] sm:$0xff] %v9572_v35  ;;  %v9575_v37 = vld [vmem:[#allocation5 + $0x180] sm:$0xff] }
  0xf3   : > { %1381 = vmatprep.subr.mxu0 %v9554_v34  ;;  %13750 = vst [vmem:[#allocation99_spill] sm:$0xff] %v9575_v37  ;;  %v9578_v34 = vld [vmem:[#allocation5 + $0x478] sm:$0xff] }
  0xf4   : > { %1382 = vmatpush2.msra.mxu0 %v9557_v33  ;;  %13751 = vst [vmem:[#allocation100_spill] sm:$0xff] %v9578_v34 }
  0xf5   : > { %1383 = vmatprep.subr.mxu0 %v9560_v10  ;;  %v665_v10 = vlaneseq }
  0xf6   : > { %1384 = vmatpush2.msra.mxu0 %v9563_v6 }
  0xf7   : > { %1385 = vmatprep.subr.mxu0 %v9566_v4  ;;  %v666_v33 = vshrl.u32 %v665_v10, 7  ;;  %v663_v4 = vld [vmem:[%s13207_s2] sm:$0x7] }
  0xf8   : > { %1386 = vmatpush2.msra.mxu0 %v9569_v2 }
  0xf9   : > { %1387 = vmatprep.subr.mxu0 %v9572_v35  ;;  %v9583_v45 = vsub.s32 0, %v666_v33  ;;  %v9585_v6 = vsub.s32 1, %v666_v33  ;;  %v9593_v39 = vsub.s32 2, %v666_v33 }
  0xfa   : > { %1388 = vmatpush2.msra.mxu0 %v9575_v37 }
  0xfb   : > { %7307 = vmatprep.subr.mxu0 %v9578_v34  ;;  %13752 = vst [vmem:[#allocation101_spill] sm:$0xff] %v9583_v45  ;;  %13753 = vst [vmem:[#allocation102_spill] sm:$0xff] %v9585_v6  ;;  %v9591_v2 = vrot.slane %v663_v4, %v9583_v45  ;;  %v9596_v35 = vrot.slane %v663_v4, %v9585_v6  ;;  %v9600_v50 = vrot.slane %v663_v4, %v9593_v39 }
  0xfc   : > { %13755 = vst [vmem:[#allocation104_spill] sm:$0xff] %v9593_v39 }
  0xfd   : > { %13754 = vst [vmem:[#allocation103_spill] sm:$0xff] %v9591_v2  ;;  %13756 = vst [vmem:[#allocation105_spill] sm:$0xff] %v9596_v35 }
 0x148   : > { %v746_v37 = vpop.f32.mrf.mxu0  ;;  %v7253_v10 = vpop.f32.mrf.mxu1 }
 0x149   : > { %v747_v43 = vadd.f32 %v746_v37, %v9591_v2  ;;  %v865_v6 = vadd.f32 %v7253_v10, %v9600_v50 }
 0x14a   : > { %v748_v63 = vpop.f32.mrf.mxu0  ;;  %v859_v38 = vpop.f32.mrf.mxu1 }
 0x14b   : > { %v749_v14 = vadd.f32 %v748_v63, %v9596_v35  ;;  %7901 = vtanh.f32 %v747_v43  ;;  %v860_v45 = vadd.f32 %v859_v38, %v9600_v50 }
 0x14c   : > { %v752_v62 = vpop.f32.mrf.mxu0 }
 0x14d   : > { %7903 = vtanh.f32 %v749_v14  ;;  %v7256_v33 = vpop.f32.mrf.mxu1  ;;  %v753_v37 = vadd.f32 %v752_v62, %v9591_v2 }
 0x14e   : > { %7905 = vtanh.f32 %v860_v45  ;;  %v754_v42 = vpop.f32.mrf.mxu0 }
 0x14f   : > { %v755_v60 = vadd.f32 %v754_v42, %v9596_v35  ;;  %v869_v39 = vpop.f32.mrf.mxu1 }
 0x150   : > { %v758_v4 = vpop.f32.mrf.mxu0  ;;  %v870_v38 = vadd.f32 %v869_v39, %v9600_v50 }
 0x151   : > { %7907 = vtanh.f32 %v755_v60  ;;  %v759_v11 = vadd.f32 %v758_v4, %v9591_v2  ;;  %v7259_v60 = vpop.f32.mrf.mxu1 }
 0x152   : > { %7909 = vtanh.f32 %v865_v6  ;;  %v760_v63 = vpop.f32.mrf.mxu0 }
 0x153   : > { %7911 = vtanh.f32 %v753_v37  ;;  %v761_v43 = vadd.f32 %v760_v63, %v9596_v35  ;;  %v875_v37 = vadd.f32 %v7256_v33, %v9600_v50  ;;  %v879_v33 = vpop.f32.mrf.mxu1 }
 0x154   : > { %v764_v14 = vpop.f32.mrf.mxu0 }
 0x155   : > { %7913 = vtanh.f32 %v761_v43  ;;  %v765_v4 = vadd.f32 %v764_v14, %v9591_v2  ;;  %v9622_v43 = vld [vmem:[#allocation5 + $0x2e0] sm:$0xff]  ;;  %v9632_v14 = vld [vmem:[#allocation5 + $0x2c8] sm:$0xff]  ;;  %v9674_v1 = vpop.f32.mrf.mxu1 }
 0x156   : > { %v766_v10 = vpop.f32.mrf.mxu0  ;;  %7915 = vtanh.f32 %v870_v38  ;;  %13758 = vst [vmem:[#allocation107_spill] sm:$0xff] %v9622_v43  ;;  %v9624_v38 = vld [vmem:[#allocation5 + $0x460] sm:$0xff]  ;;  %13761 = vst [vmem:[#allocation110_spill] sm:$0xff] %v9632_v14 }
 0x157   : > { %7917 = vtanh.f32 %v759_v11  ;;  %v767_v42 = vadd.f32 %v766_v10, %v9596_v35  ;;  %13759 = vst [vmem:[#allocation108_spill] sm:$0xff] %v9624_v38  ;;  %v9628_v10 = vld [vmem:[#allocation5 + $0x160] sm:$0xff] }
 0x158   : > { %v770_v45 = vpop.f32.mrf.mxu0  ;;  %v9610_v62 = vpop.eup %7901  ;;  %13760 = vst [vmem:[#allocation109_spill] sm:$0xff] %v9628_v10 }
 0x159   : > { %7919 = vtanh.f32 %v767_v42 }
 0x15a   : > { %v9613_v6 = vpop.eup %7903  ;;  %v772_v63 = vpop.f32.mrf.mxu0  ;;  %7921 = vtanh.f32 %v875_v37  ;;  %v880_v37 = vadd.f32 %v879_v33, %v9600_v50  ;;  %v9661_v33 = vld [vmem:[#allocation5 + $0x430] sm:$0xff] }
 0x15b   : > { %v9618_v39 = vpop.eup %7905  ;;  %1389 = vmatprep.mubr.f32.mxu0 %v9613_v6  ;;  %7923 = vtanh.f32 %v765_v4  ;;  %v773_v42 = vadd.f32 %v772_v63, %v9596_v35  ;;  %v771_v63 = vadd.f32 %v770_v45, %v9591_v2  ;;  %v9657_v4 = vld [vmem:[#allocation5 + $0x130] sm:$0xff]  ;;  %13766 = vst [vmem:[#allocation115_spill] sm:$0xff] %v9661_v33 }
 0x15c   : > { %1503 = vmatmul.mubr.f32.vlgmr.msra.gmra.mxu1 %v9618_v39  ;;  %v776_v11 = vpop.f32.mrf.mxu0  ;;  %1390 = vmatmul.mubr.f32.vlgmr.msra.gmra.mxu0 %v9610_v62  ;;  %13765 = vst [vmem:[#allocation114_spill] sm:$0xff] %v9657_v4 }
 0x15d   : > { %6420 = vmatpush3.msra.mxu1 %v9616_v58  ;;  %7308 = vmatpush3.msra.mxu0 %v9578_v34  ;;  %v9643_v34 = vld [vmem:[#allocation5 + $0x148] sm:$0xff]  ;;  %7925 = vtanh.f32 %v773_v42  ;;  %v9678_v42 = vld [vmem:[#allocation5 + $0x118] sm:$0xff] }
 0x15e   : > { %v9634_v57 = vpop.eup %7907  ;;  %6421 = vmatprep.subr.mxu1 %v9622_v43  ;;  %7309 = vmatprep.subr.mxu0 %v9624_v38  ;;  %v778_v7 = vpop.f32.mrf.mxu0  ;;  %13762 = vst [vmem:[#allocation111_spill] sm:$0xff] %v9643_v34  ;;  %v9645_v58 = vld [vmem:[#allocation5 + $0x448] sm:$0xff]  ;;  %v9652_v43 = vld [vmem:[#allocation5 + $0x2b0] sm:$0xff]  ;;  %7927 = vtanh.f32 %v880_v37  ;;  %13768 = vst [vmem:[#allocation117_spill] sm:$0xff] %v9678_v42 }
 0x15f   : > { %v9638_v3 = vpop.eup %7909  ;;  %6422 = vmatpush3.msra.mxu1 %v9628_v10  ;;  %1508 = vmatprep.mubr.f32.mxu1 %v13686_v49  ;;  %13763 = vst [vmem:[#allocation112_spill] sm:$0xff] %v9645_v58  ;;  %13764 = vst [vmem:[#allocation113_spill] sm:$0xff] %v9652_v43  ;;  %7929 = vtanh.f32 %v771_v63  ;;  %v777_v63 = vadd.f32 %v776_v11, %v9591_v2 }
 0x160   : > { %v9647_v56 = vpop.eup %7911  ;;  %6423 = vmatprep.subr.mxu1 %v9632_v14  ;;  %7310 = vmatpush3.msra.mxu0 %v9624_v38  ;;  %v782_v10 = vpop.f32.mrf.mxu0  ;;  %v9665_v38 = vld [vmem:[#allocation5 + $0x298] sm:$0xff]  ;;  %v779_v14 = vadd.f32 %v778_v7, %v9596_v35  ;;  %v9687_v7 = vld [vmem:[#allocation5 + $0x280] sm:$0xff] }
 0x161   : > { %1395 = vmatprep.mubr.f32.mxu0 %v9634_v57  ;;  %1509 = vmatmul.mubr.f32.gmra.mxu1 %v9638_v3  ;;  %13767 = vst [vmem:[#allocation116_spill] sm:$0xff] %v9665_v38  ;;  %13770 = vst [vmem:[#allocation119_spill] sm:$0xff] %v9687_v7 }
 0x162   : > { %6424 = vmatpush3.msra.mxu1 %v9643_v34  ;;  %7311 = vmatprep.subr.mxu0 %v9645_v58  ;;  %v9667_v45 = vpop.eup %7913  ;;  %7931 = vtanh.f32 %v779_v14 }
 0x163   : > { %1396 = vmatmul.mubr.f32.gmra.mxu0 %v9647_v56  ;;  %6425 = vmatprep.subr.mxu1 %v9652_v43  ;;  %v9671_v34 = vpop.eup %7915  ;;  %v9680_v43 = vld [vmem:[#allocation5 + $0x418] sm:$0xff] }
 0x164   : > { %7312 = vmatpush3.msra.mxu0 %v9645_v58  ;;  %6426 = vmatpush3.msra.mxu1 %v9657_v4  ;;  %13769 = vst [vmem:[#allocation118_spill] sm:$0xff] %v9680_v43  ;;  %v9682_v37 = vpop.eup %7917  ;;  %v885_v58 = vadd.f32 %v7259_v60, %v9600_v50  ;;  %v784_v4 = vpop.f32.mrf.mxu0  ;;  %v9696_v60 = vld [vmem:[#allocation5 + $0x400] sm:$0xff] }
 0x165   : > { %7313 = vmatprep.subr.mxu0 %v9661_v33  ;;  %1514 = vmatprep.mubr.f32.mxu1 %v13686_v49  ;;  %13772 = vst [vmem:[#allocation121_spill] sm:$0xff] %v9696_v60  ;;  %v785_v14 = vadd.f32 %v784_v4, %v9596_v35  ;;  %v783_v4 = vadd.f32 %v782_v10, %v9591_v2 }
 0x166   : > { %6427 = vmatprep.subr.mxu1 %v9665_v38  ;;  %7314 = vmatpush3.msra.mxu0 %v9661_v33  ;;  %v889_v38 = vpop.f32.mrf.mxu1  ;;  %v9700_v33 = vld [vmem:[#allocation5 + $0x268] sm:$0xff]  ;;  %v9702_v11 = vpop.eup %7919  ;;  %7933 = vtanh.f32 %v885_v58 }
 0x167   : > { %1401 = vmatprep.mubr.f32.mxu0 %v9667_v45  ;;  %1515 = vmatmul.mubr.f32.gmra.mxu1 %v9671_v34  ;;  %13773 = vst [vmem:[#allocation122_spill] sm:$0xff] %v9700_v33  ;;  %v788_v61 = vpop.f32.mrf.mxu0  ;;  %7935 = vtanh.f32 %v777_v63  ;;  %v890_v58 = vadd.f32 %v889_v38, %v9600_v50  ;;  %v9725_v63 = vld [vmem:[#allocation5 + $0xd0] sm:$0xff] }
 0x168   : > { %6428 = vmatpush3.msra.mxu1 %v9678_v42  ;;  %7315 = vmatprep.subr.mxu0 %v9680_v43  ;;  %v9706_v42 = vpop.eup %7921  ;;  %13777 = vst [vmem:[#allocation126_spill] sm:$0xff] %v9725_v63  ;;  %v9729_v38 = vld [vmem:[#allocation5 + $0x3d0] sm:$0xff]  ;;  %7937 = vtanh.f32 %v785_v14  ;;  %v9744_v14 = vld [vmem:[#allocation5 + $0xb8] sm:$0xff] }
 0x169   : > { %1402 = vmatmul.mubr.f32.gmra.mxu0 %v9682_v37  ;;  %6429 = vmatprep.subr.mxu1 %v9687_v7  ;;  %v9711_v7 = vld [vmem:[#allocation5 + $0xe8] sm:$0xff]  ;;  %v9715_v51 = vpop.eup %7923  ;;  %13778 = vst [vmem:[#allocation127_spill] sm:$0xff] %v9729_v38  ;;  %7939 = vtanh.f32 %v890_v58  ;;  %13780 = vst [vmem:[#allocation129_spill] sm:$0xff] %v9744_v14  ;;  %v895_v58 = vadd.f32 %v9674_v1, %v9600_v50 }
 0x16a   : > { %7316 = vmatpush3.msra.mxu0 %v9680_v43  ;;  %6430 = vmatpush3.msra.mxu1 %v9692_v54  ;;  %13774 = vst [vmem:[#allocation123_spill] sm:$0xff] %v9711_v7  ;;  %v9720_v43 = vld [vmem:[#allocation5 + $0x250] sm:$0xff]  ;;  %v790_v54 = vpop.f32.mrf.mxu0  ;;  %v9735_v10 = vpop.eup %7925  ;;  %7941 = vtanh.f32 %v783_v4  ;;  %v9754_v4 = vld [vmem:[#allocation5 + $0x220] sm:$0xff]  ;;  %v9767_v1 = vld [vmem:[#allocation5 + $0x208] sm:$0xff] }
 0x16b   : > { %7317 = vmatprep.subr.mxu0 %v9696_v60  ;;  %1520 = vmatprep.mubr.f32.mxu1 %v13686_v49  ;;  %13776 = vst [vmem:[#allocation125_spill] sm:$0xff] %v9720_v43  ;;  %13782 = vst [vmem:[#allocation131_spill] sm:$0xff] %v9754_v4 }
 0x16c   : > { %6431 = vmatprep.subr.mxu1 %v9700_v33  ;;  %7318 = vmatpush3.msra.mxu0 %v9696_v60  ;;  %v9733_v60 = vld [vmem:[#allocation5 + $0x238] sm:$0xff]  ;;  %v9739_v33 = vpop.eup %7927  ;;  %13785 = vst [vmem:[#allocation134_spill] sm:$0xff] %v9767_v1 }
 0x16d   : > { %1407 = vmatprep.mubr.f32.mxu0 %v9702_v11  ;;  %1521 = vmatmul.mubr.f32.gmra.mxu1 %v9706_v42  ;;  %13779 = vst [vmem:[#allocation128_spill] sm:$0xff] %v9733_v60  ;;  %v9748_v59 = vpop.eup %7929 }
 0x16e   : > { %6432 = vmatpush3.msra.mxu1 %v9711_v7  ;;  %7319 = vmatprep.subr.mxu0 %v9713_v52  ;;  %v791_v7 = vadd.f32 %v790_v54, %v9596_v35  ;;  %v789_v54 = vadd.f32 %v788_v61, %v9591_v2 }
 0x16f   : > { %1408 = vmatmul.mubr.f32.gmra.mxu0 %v9715_v51  ;;  %6433 = vmatprep.subr.mxu1 %v9720_v43  ;;  %v9746_v43 = vld [vmem:[#allocation5 + $0x3b8] sm:$0xff]  ;;  %v9769_v61 = vpop.eup %7931 }
 0x170   : > { %7320 = vmatpush3.msra.mxu0 %v9713_v52  ;;  %6434 = vmatpush3.msra.mxu1 %v9725_v63  ;;  %13781 = vst [vmem:[#allocation130_spill] sm:$0xff] %v9746_v43  ;;  %v9759_v52 = vld [vmem:[#allocation5 + $0xa0] sm:$0xff]  ;;  %7943 = vtanh.f32 %v791_v7  ;;  %v9777_v7 = vld [vmem:[#allocation5 + $0x88] sm:$0xff] }
 0x171   : > { %7321 = vmatprep.subr.mxu0 %v9729_v38  ;;  %1526 = vmatprep.mubr.f32.mxu1 %v13686_v49  ;;  %13783 = vst [vmem:[#allocation132_spill] sm:$0xff] %v9759_v52  ;;  %v9763_v63 = vld [vmem:[#allocation5 + $0x3a0] sm:$0xff]  ;;  %7945 = vtanh.f32 %v895_v58  ;;  %13786 = vst [vmem:[#allocation135_spill] sm:$0xff] %v9777_v7  ;;  %v9785_v58 = vld [vmem:[#allocation5 + $0x1f0] sm:$0xff] }
 0x172   : > { %6435 = vmatprep.subr.mxu1 %v9733_v60  ;;  %7322 = vmatpush3.msra.mxu0 %v9729_v38  ;;  %13784 = vst [vmem:[#allocation133_spill] sm:$0xff] %v9763_v63  ;;  %7947 = vtanh.f32 %v789_v54  ;;  %13788 = vst [vmem:[#allocation137_spill] sm:$0xff] %v9785_v58  ;;  %v9789_v54 = vld [vmem:[#allocation5 + $0x70] sm:$0xff]  ;;  %v9809_v60 = vld [vmem:[#allocation5 + $0x358] sm:$0xff] }
 0x173   : > { %1413 = vmatprep.mubr.f32.mxu0 %v9735_v10  ;;  %1527 = vmatmul.mubr.f32.gmra.mxu1 %v9739_v33  ;;  %v9773_v38 = vpop.eup %7933  ;;  %13789 = vst [vmem:[#allocation138_spill] sm:$0xff] %v9789_v54  ;;  %13794 = vst [vmem:[#allocation143_spill] sm:$0xff] %v9809_v60 }
 0x174   : > { %6436 = vmatpush3.msra.mxu1 %v9744_v14  ;;  %7323 = vmatprep.subr.mxu0 %v9746_v43  ;;  %v9779_v14 = vld [vmem:[#allocation5 + $0x388] sm:$0xff] }
 0x175   : > { %1414 = vmatmul.mubr.f32.gmra.mxu0 %v9748_v59  ;;  %6437 = vmatprep.subr.mxu1 %v9754_v4  ;;  %13787 = vst [vmem:[#allocation136_spill] sm:$0xff] %v9779_v14  ;;  %v9781_v4 = vpop.eup %7935 }
 0x176   : > { %7324 = vmatpush3.msra.mxu0 %v9746_v43  ;;  %6438 = vmatpush3.msra.mxu1 %v9759_v52  ;;  %v9793_v43 = vld [vmem:[#allocation5 + $0x370] sm:$0xff] }
 0x177   : > { %7325 = vmatprep.subr.mxu0 %v9763_v63  ;;  %1532 = vmatprep.mubr.f32.mxu1 %v13686_v49  ;;  %13790 = vst [vmem:[#allocation139_spill] sm:$0xff] %v9793_v43 }
 0x178   : > { %6439 = vmatprep.subr.mxu1 %v9767_v1  ;;  %7326 = vmatpush3.msra.mxu0 %v9763_v63  ;;  %v9797_v1 = vld [vmem:[#allocation5 + $0x1d8] sm:$0xff]  ;;  %v9799_v63 = vpop.eup %7937 }
 0x179   : > { %1419 = vmatprep.mubr.f32.mxu0 %v9769_v61  ;;  %1533 = vmatmul.mubr.f32.gmra.mxu1 %v9773_v38  ;;  %13791 = vst [vmem:[#allocation140_spill] sm:$0xff] %v9797_v1  ;;  %13792 = vst [vmem:[#allocation141_spill] sm:$0xff] %v9799_v63  ;;  %v9803_v52 = vpop.eup %7939 }
 0x17a   : > { %6440 = vmatpush3.msra.mxu1 %v9777_v7  ;;  %7327 = vmatprep.subr.mxu0 %v9779_v14  ;;  %v9807_v7 = vld [vmem:[#allocation5 + $0x58] sm:$0xff]  ;;  %v9811_v2 = vpop.eup %7941 }
 0x17b   : > { %1420 = vmatmul.mubr.f32.gmra.mxu0 %v9781_v4  ;;  %6441 = vmatprep.subr.mxu1 %v9785_v58  ;;  %13793 = vst [vmem:[#allocation142_spill] sm:$0xff] %v9807_v7  ;;  %13795 = vst [vmem:[#allocation144_spill] sm:$0xff] %v9811_v2  ;;  %v9815_v58 = vld [vmem:[#allocation5 + $0x1c0] sm:$0xff] }
 0x17c   : > { %7328 = vmatpush3.msra.mxu0 %v9779_v14  ;;  %6442 = vmatpush3.msra.mxu1 %v9789_v54  ;;  %13796 = vst [vmem:[#allocation145_spill] sm:$0xff] %v9815_v58  ;;  %v9819_v14 = vld [vmem:[#allocation5 + $0x40] sm:$0xff] }
 0x17d   : > { %7329 = vmatprep.subr.mxu0 %v9793_v43  ;;  %1538 = vmatprep.mubr.f32.mxu1 %v13686_v49  ;;  %13797 = vst [vmem:[#allocation146_spill] sm:$0xff] %v9819_v14  ;;  %v9823_v54 = vld [vmem:[#allocation5 + $0x340] sm:$0xff] }
 0x17e   : > { %6443 = vmatprep.subr.mxu1 %v9797_v1  ;;  %7330 = vmatpush3.msra.mxu0 %v9793_v43  ;;  %v9827_v1 = vld [vmem:[#allocation5 + $0x1a8] sm:$0xff]  ;;  %v9829_v43 = vpop.eup %7943 }
 0x17f   : > { %1425 = vmatprep.mubr.f32.mxu0 %v9799_v63  ;;  %1539 = vmatmul.mubr.f32.gmra.mxu1 %v9803_v52  ;;  %v9833_v35 = vpop.eup %7945  ;;  %v9839_v63 = vld [vmem:[#allocation5 + $0x328] sm:$0xff] }
 0x180   : > { %6444 = vmatpush3.msra.mxu1 %v9807_v7  ;;  %7331 = vmatprep.subr.mxu0 %v9809_v60  ;;  %v9837_v7 = vld [vmem:[#allocation5 + $0x28] sm:$0xff] }
 0x181   : > { %1426 = vmatmul.mubr.f32.gmra.mxu0 %v9811_v2  ;;  %6445 = vmatprep.subr.mxu1 %v9815_v58  ;;  %v9841_v2 = vpop.eup %7947  ;;  %v9845_v58 = vld [vmem:[#allocation5 + $0x190] sm:$0xff] }
 0x182   : > { %7332 = vmatpush3.msra.mxu0 %v9809_v60  ;;  %6446 = vmatpush3.msra.mxu1 %v9819_v14  ;;  %v9851_v60 = vld [vmem:[#allocation5 + $0x10] sm:$0xff] }
 0x183   : > { %7333 = vmatprep.subr.mxu0 %v9823_v54  ;;  %1544 = vmatprep.mubr.f32.mxu1 %v13686_v49  ;;  %v9853_v14 = vld [vmem:[#allocation5 + $0x310] sm:$0xff] }
 0x184   : > { %6447 = vmatprep.subr.mxu1 %v9827_v1  ;;  %7334 = vmatpush3.msra.mxu0 %v9823_v54 }
 0x185   : > { %1431 = vmatprep.mubr.f32.mxu0 %v9829_v43  ;;  %1545 = vmatmul.mubr.f32.gmra.mxu1 %v9833_v35 }
 0x186   : > { %6448 = vmatpush3.msra.mxu1 %v9837_v7  ;;  %7335 = vmatprep.subr.mxu0 %v9839_v63 }
 0x187   : > { %1432 = vmatmul.mubr.f32.gmra.mxu0 %v9841_v2  ;;  %6449 = vmatprep.subr.mxu1 %v9845_v58 }
 0x188   : > { %1615 = vmatprep.mubr.f32.mxu1 %v9613_v6  ;;  %7336 = vmatpush3.msra.mxu0 %v9839_v63 }
 0x189   : > { %6450 = vmatpush3.msra.mxu1 %v9851_v60  ;;  %7337 = vmatprep.subr.mxu0 %v9853_v14 }
 0x18a   : > { %7339 = vmatprep.mubr.f32.mxu0 %v9618_v39  ;;  %7338 = vmatpush3.msra.mxu0 %v9853_v14  ;;  %v13827_v39 = vld [vmem:[#allocation54_spill] sm:$0xff] }
 0x18b   : > { %1785 = vmatprep.subr.mxu1 %v9286_v16  ;;  %1616 = vmatmul.mubr.f32.vlgmr.msra.gmra.mxu1 %v9610_v62  ;;  %v13802_v16 = vld [vmem:[#allocation38_spill] sm:$0xff]  ;;  %v13826_v62 = vld [vmem:[#allocation71_spill] sm:$0xff] }
 0x18c   : > { %1786 = vmatpush1.msra.mxu1 %v9291_v17  ;;  %1898 = vmatprep.subr.mxu0 %v9243_v5  ;;  %v13803_v17 = vld [vmem:[#allocation48_spill] sm:$0xff] }
 0x18d   : > { %1620 = vmatprep.mubr.f32.mxu1 %v9634_v57  ;;  %7340 = vmatmul.mubr.f32.vlgmr.msra.gmra.mxu0 %v9638_v3  ;;  %v13825_v3 = vld [vmem:[#allocation52_spill] sm:$0xff] }
 0x18e   : > { %1787 = vmatprep.subr.mxu1 %v9294_v18  ;;  %1899 = vmatpush1.msra.mxu0 %v9255_v8 }
 0x18f   : > { %7342 = vmatprep.mubr.f32.mxu0 %v9671_v34  ;;  %1788 = vmatpush1.msra.mxu1 %v9301_v20  ;;  %v7297_v34 = vpop.f32.mrf.mxu1  ;;  %v13805_v20 = vld [vmem:[#allocation50_spill] sm:$0xff] }
 0x190   : > { %1900 = vmatprep.subr.mxu0 %v9259_v9  ;;  %1789 = vmatprep.subr.mxu1 %v9307_v22  ;;  %v13798_v9 = vld [vmem:[#allocation42_spill] sm:$0xff]  ;;  %v13806_v22 = vld [vmem:[#allocation53_spill] sm:$0xff] }
 0x191   : > { %1901 = vmatpush1.msra.mxu0 %v9271_v12  ;;  %1621 = vmatmul.mubr.f32.gmra.mxu1 %v9647_v56  ;;  %v1101_v5 = vpop.f32.mrf.mxu1  ;;  %v9916_v12 = vpop.f32.mrf.mxu0  ;;  %v13823_v56 = vld [vmem:[#allocation67_spill] sm:$0xff] }
 0x192   : > { %1790 = vmatpush1.msra.mxu1 %v9310_v0  ;;  %1902 = vmatprep.subr.mxu0 %v9275_v13  ;;  %v1102_v8 = vadd.f32 %v1101_v5, %v9600_v50  ;;  %v13800_v13 = vld [vmem:[#allocation37_spill] sm:$0xff]  ;;  %v13835_v5 = vld [vmem:[#allocation106_spill] sm:$0xff] }
 0x193   : > { %1625 = vmatprep.mubr.f32.mxu1 %v9667_v45  ;;  %7343 = vmatmul.mubr.f32.gmra.mxu0 %v9706_v42  ;;  %v7300_v18 = vpop.f32.mrf.mxu1  ;;  %v9927_v0 = vpop.f32.mrf.mxu0  ;;  %v13829_v42 = vld [vmem:[#allocation56_spill] sm:$0xff] }
 0x194   : > { %1791 = vmatprep.subr.mxu1 %v9314_v23  ;;  %1903 = vmatpush1.msra.mxu0 %v9283_v15  ;;  %v13801_v15 = vld [vmem:[#allocation44_spill] sm:$0xff]  ;;  %7949 = vtanh.f32 %v1102_v8  ;;  %v1117_v57 = vadd.f32 %v7300_v18, %v9600_v50 }
 0x195   : > { %7345 = vmatprep.mubr.f32.mxu0 %v9739_v33  ;;  %1792 = vmatpush1.msra.mxu1 %v9321_v25  ;;  %v13807_v23 = vld [vmem:[#allocation40_spill] sm:$0xff]  ;;  %v13809_v25 = vld [vmem:[#allocation41_spill] sm:$0xff] }
 0x196   : > { %1904 = vmatprep.subr.mxu0 %v9297_v19  ;;  %1793 = vmatprep.subr.mxu1 %v9327_v27  ;;  %v13804_v19 = vld [vmem:[#allocation39_spill] sm:$0xff]  ;;  %v1111_v27 = vpop.f32.mrf.mxu1  ;;  %v13836_v8 = vld [vmem:[#allocation64_spill] sm:$0xff] }
 0x197   : > { %1905 = vmatpush1.msra.mxu0 %v9303_v21  ;;  %1626 = vmatmul.mubr.f32.gmra.mxu1 %v9682_v37  ;;  %v1107_v21 = vadd.f32 %v7297_v34, %v9600_v50  ;;  %v13830_v37 = vld [vmem:[#allocation75_spill] sm:$0xff] }
 0x198   : > { %1794 = vmatpush1.msra.mxu1 %v9330_v28  ;;  %1906 = vmatprep.subr.mxu0 %v9317_v24  ;;  %v13808_v24 = vld [vmem:[#allocation141_spill] sm:$0xff]  ;;  %v13811_v28 = vld [vmem:[#allocation43_spill] sm:$0xff] }
 0x199   : > { %1630 = vmatprep.mubr.f32.mxu1 %v9702_v11  ;;  %7346 = vmatmul.mubr.f32.gmra.mxu0 %v9773_v38  ;;  %7951 = vtanh.f32 %v1107_v21  ;;  %v13832_v38 = vld [vmem:[#allocation60_spill] sm:$0xff] }
 0x19a   : > { %1795 = vmatprep.subr.mxu1 %v9334_v29  ;;  %1907 = vmatpush1.msra.mxu0 %v9323_v26  ;;  %v13810_v26 = vld [vmem:[#allocation55_spill] sm:$0xff]  ;;  %v13812_v29 = vld [vmem:[#allocation57_spill] sm:$0xff] }
 0x19b   : > { %7348 = vmatprep.mubr.f32.mxu0 %v9803_v52  ;;  %1796 = vmatpush1.msra.mxu1 %v9341_v31  ;;  %v13814_v31 = vld [vmem:[#allocation59_spill] sm:$0xff]  ;;  %v7303_v52 = vpop.f32.mrf.mxu1 }
 0x19c   : > { %1908 = vmatprep.subr.mxu0 %v9337_v30  ;;  %1797 = vmatprep.subr.mxu1 %v9347_v36  ;;  %v13813_v30 = vld [vmem:[#allocation45_spill] sm:$0xff]  ;;  %v1112_v36 = vadd.f32 %v1111_v27, %v9600_v50  ;;  %v13847_v27 = vld [vmem:[#allocation114_spill] sm:$0xff] }
 0x19d   : > { %1909 = vmatpush1.msra.mxu0 %v9343_v32  ;;  %1631 = vmatmul.mubr.f32.gmra.mxu1 %v9715_v51  ;;  %v9937_v32 = vpop.f32.mrf.mxu0  ;;  %v13821_v51 = vld [vmem:[#allocation65_spill] sm:$0xff]  ;;  %v1121_v33 = vpop.f32.mrf.mxu1 }
 0x19e   : > { %1798 = vmatpush1.msra.mxu1 %v9350_v40  ;;  %1910 = vmatprep.subr.mxu0 %v9357_v44  ;;  %v13815_v40 = vld [vmem:[#allocation144_spill] sm:$0xff]  ;;  %v13817_v44 = vld [vmem:[#allocation46_spill] sm:$0xff]  ;;  %7953 = vtanh.f32 %v1112_v36  ;;  %v1122_v11 = vadd.f32 %v1121_v33, %v9600_v50  ;;  %v13850_v36 = vld [vmem:[#allocation77_spill] sm:$0xff] }
 0x19f   : > { %1635 = vmatprep.mubr.f32.mxu1 %v9735_v10  ;;  %7349 = vmatmul.mubr.f32.gmra.mxu0 %v9833_v35  ;;  %v13799_v35 = vld [vmem:[#allocation36_spill] sm:$0xff]  ;;  %7955 = vtanh.f32 %v1117_v57  ;;  %v13833_v10 = vld [vmem:[#allocation78_spill] sm:$0xff] }
 0x1a0   : > { %1799 = vmatprep.subr.mxu1 %v9354_v41  ;;  %1911 = vmatpush1.msra.mxu0 %v9363_v47  ;;  %v13816_v41 = vld [vmem:[#allocation61_spill] sm:$0xff]  ;;  %v13819_v47 = vld [vmem:[#allocation63_spill] sm:$0xff]  ;;  %7957 = vtanh.f32 %v1122_v11  ;;  %v13858_v57 = vld [vmem:[#allocation82_spill] sm:$0xff] }
 0x1a1   : > { %1800 = vmatpush1.msra.mxu1 %v9361_v46  ;;  %1912 = vmatprep.subr.mxu0 %v9377_v53  ;;  %v13818_v46 = vld [vmem:[#allocation47_spill] sm:$0xff]  ;;  %v9948_v53 = vpop.f32.mrf.mxu0  ;;  %v9957_v6 = vpop.eup %7949 }
 0x1a2   : > { %1801 = vmatprep.subr.mxu1 %v9367_v48  ;;  %1913 = vmatpush1.msra.mxu0 %v9383_v55  ;;  %v13820_v48 = vld [vmem:[#allocation49_spill] sm:$0xff]  ;;  %v13822_v55 = vld [vmem:[#allocation51_spill] sm:$0xff] }
 0x1a3   : > { %1636 = vmatmul.mubr.f32.gmra.mxu1 %v9748_v59  ;;  %1914 = vmatprep.subr.mxu0 %v13798_v9  ;;  %v13824_v59 = vld [vmem:[#allocation69_spill] sm:$0xff]  ;;  %v9961_v45 = vpop.f32.mrf.mxu0  ;;  %v13837_v9 = vld [vmem:[#allocation107_spill] sm:$0xff] }
 0x1a4   : > { %1802 = vmatpush1.msra.mxu1 %v13799_v35  ;;  %1640 = vmatprep.mubr.f32.mxu1 %v9769_v61  ;;  %v13838_v35 = vld [vmem:[#allocation66_spill] sm:$0xff]  ;;  %v13866_v11 = vld [vmem:[#allocation103_spill] sm:$0xff] }
 0x1a5   : > { %1803 = vmatprep.subr.mxu1 %v13800_v13  ;;  %1915 = vmatpush1.msra.mxu0 %v13801_v15  ;;  %v9972_v61 = vpop.f32.mrf.mxu0  ;;  %v7306_v13 = vpop.f32.mrf.mxu1  ;;  %v13839_v15 = vld [vmem:[#allocation109_spill] sm:$0xff] }
 0x1a6   : > { %1804 = vmatpush1.msra.mxu1 %v13802_v16  ;;  %1916 = vmatprep.subr.mxu0 %v13803_v17  ;;  %v9974_v34 = vpop.eup %7951  ;;  %v1127_v16 = vadd.f32 %v7303_v52, %v9600_v50  ;;  %v13840_v17 = vld [vmem:[#allocation68_spill] sm:$0xff]  ;;  %v1137_v52 = vadd.f32 %v7306_v13, %v9600_v50  ;;  %v13871_v13 = vld [vmem:[#allocation131_spill] sm:$0xff] }
 0x1a7   : > { %1805 = vmatprep.subr.mxu1 %v13804_v19  ;;  %1917 = vmatpush1.msra.mxu0 %v13805_v20  ;;  %v9985_v18 = vpop.f32.mrf.mxu0  ;;  %v13841_v19 = vld [vmem:[#allocation110_spill] sm:$0xff] }
 0x1a8   : > { %1641 = vmatmul.mubr.f32.gmra.mxu1 %v9781_v4  ;;  %1918 = vmatprep.subr.mxu0 %v13806_v22  ;;  %v13834_v4 = vld [vmem:[#allocation62_spill] sm:$0xff]  ;;  %v13843_v22 = vld [vmem:[#allocation111_spill] sm:$0xff]  ;;  %7959 = vtanh.f32 %v1127_v16 }
 0x1a9   : > { %1806 = vmatpush1.msra.mxu1 %v13807_v23  ;;  %1645 = vmatprep.mubr.f32.mxu1 %v13808_v24  ;;  %v13842_v20 = vld [vmem:[#allocation70_spill] sm:$0xff]  ;;  %v13844_v23 = vld [vmem:[#allocation72_spill] sm:$0xff]  ;;  %v1131_v24 = vpop.f32.mrf.mxu1 }
 0x1aa   : > { %1807 = vmatprep.subr.mxu1 %v13809_v25  ;;  %1919 = vmatpush1.msra.mxu0 %v13810_v26  ;;  %v13845_v25 = vld [vmem:[#allocation113_spill] sm:$0xff]  ;;  %v13846_v26 = vld [vmem:[#allocation74_spill] sm:$0xff] }
 0x1ab   : > { %1808 = vmatpush1.msra.mxu1 %v13811_v28  ;;  %1920 = vmatprep.subr.mxu0 %v13812_v29  ;;  %v9989_v21 = vpop.eup %7953  ;;  %v1008_v28 = vpop.f32.mrf.mxu0  ;;  %v1132_v29 = vadd.f32 %v1131_v24, %v9600_v50  ;;  %v13863_v50 = vld [vmem:[#allocation84_spill] sm:$0xff]  ;;  %v13877_v24 = vld [vmem:[#allocation135_spill] sm:$0xff] }
 0x1ac   : > { %1809 = vmatprep.subr.mxu1 %v13813_v30  ;;  %1921 = vmatpush1.msra.mxu0 %v13814_v31  ;;  %v13848_v30 = vld [vmem:[#allocation76_spill] sm:$0xff] }
 0x1ad   : > { %1646 = vmatmul.mubr.f32.gmra.mxu1 %v13815_v40  ;;  %1922 = vmatprep.subr.mxu0 %v13816_v41  ;;  %v13849_v31 = vld [vmem:[#allocation116_spill] sm:$0xff]  ;;  %v10002_v40 = vpop.eup %7955  ;;  %v13851_v41 = vld [vmem:[#allocation117_spill] sm:$0xff]  ;;  %7961 = vtanh.f32 %v1132_v29  ;;  %v13881_v29 = vld [vmem:[#allocation138_spill] sm:$0xff] }
 0x1ae   : > { %1810 = vmatpush1.msra.mxu1 %v13817_v44  ;;  %1650 = vmatprep.mubr.f32.mxu1 %v9829_v43  ;;  %v13828_v43 = vld [vmem:[#allocation73_spill] sm:$0xff]  ;;  %v13852_v44 = vld [vmem:[#allocation79_spill] sm:$0xff]  ;;  %7963 = vtanh.f32 %v1137_v52  ;;  %v13888_v52 = vld [vmem:[#allocation96_spill] sm:$0xff] }
 0x1af   : > { %1811 = vmatprep.subr.mxu1 %v13818_v46  ;;  %1923 = vmatpush1.msra.mxu0 %v13819_v47  ;;  %v13853_v46 = vld [vmem:[#allocation119_spill] sm:$0xff]  ;;  %v13854_v47 = vld [vmem:[#allocation80_spill] sm:$0xff] }
 0x1b0   : > { %1812 = vmatpush1.msra.mxu1 %v13820_v48  ;;  %1924 = vmatprep.subr.mxu0 %v13821_v51  ;;  %v10008_v48 = vpop.f32.mrf.mxu0  ;;  %v13855_v51 = vld [vmem:[#allocation120_spill] sm:$0xff] }
 0x1b1   : > { %1813 = vmatprep.subr.mxu1 %v13822_v55  ;;  %1925 = vmatpush1.msra.mxu0 %v13823_v56  ;;  %v13856_v55 = vld [vmem:[#allocation81_spill] sm:$0xff]  ;;  %v13857_v56 = vld [vmem:[#allocation122_spill] sm:$0xff] }
 0x1b2   : > { %1651 = vmatmul.mubr.f32.gmra.mxu1 %v9841_v2  ;;  %1926 = vmatprep.subr.mxu0 %v13824_v59  ;;  %v13831_v2 = vld [vmem:[#allocation58_spill] sm:$0xff]  ;;  %v10017_v59 = vpop.eup %7957  ;;  %v1014_v33 = vpop.f32.mrf.mxu0 }
 0x1b3   : > { %1814 = vmatpush1.msra.mxu1 %v13825_v3  ;;  %1927 = vmatpush1.msra.mxu0 %v13826_v62  ;;  %v13859_v3 = vld [vmem:[#allocation105_spill] sm:$0xff] }
 0x1b4   : > { %1815 = vmatprep.subr.mxu1 %v13827_v39  ;;  %1928 = vmatprep.subr.mxu0 %v13828_v43  ;;  %v991_v62 = vadd.f32 %v9927_v0, %v13859_v3  ;;  %v13860_v39 = vld [vmem:[#allocation123_spill] sm:$0xff]  ;;  %v989_v0 = vadd.f32 %v9916_v12, %v13866_v11  ;;  %v13873_v12 = vld [vmem:[#allocation132_spill] sm:$0xff]  ;;  %v1003_v16 = vadd.f32 %v9972_v61, %v13859_v3  ;;  %v13879_v61 = vld [vmem:[#allocation137_spill] sm:$0xff] }
 0x1b5   : > { %1816 = vmatpush1.msra.mxu1 %v13829_v42  ;;  %1929 = vmatpush1.msra.mxu0 %v13830_v37  ;;  %v13861_v43 = vld [vmem:[#allocation83_spill] sm:$0xff]  ;;  %v13862_v42 = vld [vmem:[#allocation125_spill] sm:$0xff]  ;;  %v13864_v37 = vld [vmem:[#allocation126_spill] sm:$0xff] }
 0x1b6   : > { %1817 = vmatprep.subr.mxu1 %v13831_v2  ;;  %1962 = vmatprep.mubr.f32.mxu0 %v13686_v49  ;;  %v13865_v2 = vld [vmem:[#allocation85_spill] sm:$0xff]  ;;  %7965 = vtanh.f32 %v991_v62 }
 0x1b7   : > { %1818 = vmatpush2.msra.mxu1 %v13832_v38  ;;  %1963 = vmatmul.mubr.f32.vlgmr.msra.gmra.mxu0 %v9957_v6  ;;  %v13867_v38 = vld [vmem:[#allocation128_spill] sm:$0xff]  ;;  %7967 = vtanh.f32 %v989_v0  ;;  %v13890_v62 = vld [vmem:[#allocation97_spill] sm:$0xff] }
 0x1b8   : > { %6499 = vmatprep.subr.mxu0 %v13833_v10  ;;  %1819 = vmatprep.subr.mxu1 %v13834_v4  ;;  %v13868_v10 = vld [vmem:[#allocation86_spill] sm:$0xff]  ;;  %v10033_v4 = vpop.f32.mrf.mxu0 }
 0x1b9   : > { %6500 = vmatpush3.msra.mxu0 %v13835_v5  ;;  %1820 = vmatpush2.msra.mxu1 %v13836_v8  ;;  %v10035_v5 = vpop.eup %7959  ;;  %v997_v8 = vadd.f32 %v9948_v53, %v13859_v3  ;;  %v13874_v53 = vld [vmem:[#allocation89_spill] sm:$0xff] }
 0x1ba   : > { %6501 = vmatprep.subr.mxu0 %v13837_v9  ;;  %1821 = vmatprep.subr.mxu1 %v13838_v35  ;;  %v13869_v9 = vld [vmem:[#allocation129_spill] sm:$0xff]  ;;  %v13870_v35 = vld [vmem:[#allocation87_spill] sm:$0xff] }
 0x1bb   : > { %1968 = vmatprep.mubr.f32.mxu0 %v13686_v49  ;;  %6502 = vmatpush3.msra.mxu0 %v13839_v15  ;;  %v13872_v15 = vld [vmem:[#allocation88_spill] sm:$0xff]  ;;  %7969 = vtanh.f32 %v997_v8 }
 0x1bc   : > { %1822 = vmatpush2.msra.mxu1 %v13840_v17  ;;  %1969 = vmatmul.mubr.f32.gmra.mxu0 %v9974_v34  ;;  %v995_v17 = vadd.f32 %v9937_v32, %v13866_v11  ;;  %7971 = vtanh.f32 %v1003_v16  ;;  %v13880_v32 = vld [vmem:[#allocation92_spill] sm:$0xff]  ;;  %v13898_v16 = vld [vmem:[#allocation121_spill] sm:$0xff] }
 0x1bd   : > { %6503 = vmatprep.subr.mxu0 %v13841_v19  ;;  %1823 = vmatprep.subr.mxu1 %v13842_v20  ;;  %v1020_v19 = vpop.f32.mrf.mxu0  ;;  %v13875_v20 = vld [vmem:[#allocation134_spill] sm:$0xff]  ;;  %v13895_v8 = vld [vmem:[#allocation112_spill] sm:$0xff] }
 0x1be   : > { %6504 = vmatpush3.msra.mxu0 %v13843_v22  ;;  %1824 = vmatpush2.msra.mxu1 %v13844_v23  ;;  %v13876_v22 = vld [vmem:[#allocation90_spill] sm:$0xff]  ;;  %v10053_v23 = vpop.eup %7961  ;;  %7973 = vtanh.f32 %v995_v17 }
 0x1bf   : > { %6505 = vmatprep.subr.mxu0 %v13845_v25  ;;  %1825 = vmatprep.subr.mxu1 %v13846_v26  ;;  %v13878_v25 = vld [vmem:[#allocation91_spill] sm:$0xff]  ;;  %v1009_v26 = vadd.f32 %v1008_v28, %v13859_v3  ;;  %v13885_v28 = vld [vmem:[#allocation142_spill] sm:$0xff] }
 0x1c0   : > { %1974 = vmatprep.mubr.f32.mxu0 %v13686_v49  ;;  %6506 = vmatpush3.msra.mxu0 %v13847_v27  ;;  %v1001_v27 = vadd.f32 %v9961_v45, %v13866_v11  ;;  %v1015_v45 = vadd.f32 %v1014_v33, %v13859_v3 }
 0x1c1   : > { %1826 = vmatpush2.msra.mxu1 %v13848_v30  ;;  %1975 = vmatmul.mubr.f32.gmra.mxu0 %v9989_v21  ;;  %v1024_v30 = vpop.f32.mrf.mxu0  ;;  %7975 = vtanh.f32 %v1009_v26 }
 0x1c2   : > { %6507 = vmatprep.subr.mxu0 %v13849_v31  ;;  %1827 = vmatprep.subr.mxu1 %v13850_v36  ;;  %v13882_v31 = vld [vmem:[#allocation93_spill] sm:$0xff]  ;;  %v13883_v36 = vld [vmem:[#allocation140_spill] sm:$0xff]  ;;  %7977 = vtanh.f32 %v1001_v27  ;;  %v13904_v27 = vld [vmem:[#allocation139_spill] sm:$0xff] }
 0x1c3   : > { %6508 = vmatpush3.msra.mxu0 %v13851_v41  ;;  %1828 = vmatpush2.msra.mxu1 %v13852_v44  ;;  %v13884_v41 = vld [vmem:[#allocation94_spill] sm:$0xff]  ;;  %v10068_v44 = vpop.eup %7963  ;;  %7979 = vtanh.f32 %v1015_v45  ;;  %v2284_v45 = vld [vmem:[#allocation7 + $0x138] sm:$0xff] }
 0x1c4   : > { %6509 = vmatprep.subr.mxu0 %v13853_v46  ;;  %1829 = vmatprep.subr.mxu1 %v13854_v47  ;;  %v13886_v46 = vld [vmem:[#allocation95_spill] sm:$0xff]  ;;  %v1007_v47 = vadd.f32 %v9985_v18, %v13866_v11  ;;  %v1021_v18 = vadd.f32 %v1020_v19, %v13859_v3 }
 0x1c5   : > { %1980 = vmatprep.mubr.f32.mxu0 %v13686_v49  ;;  %6510 = vmatpush3.msra.mxu0 %v13855_v51  ;;  %v13887_v51 = vld [vmem:[#allocation145_spill] sm:$0xff] }
 0x1c6   : > { %1830 = vmatpush2.msra.mxu1 %v13856_v55  ;;  %1981 = vmatmul.mubr.f32.gmra.mxu0 %v10002_v40  ;;  %v1026_v55 = vpop.f32.mrf.mxu0  ;;  %7981 = vtanh.f32 %v1007_v47  ;;  %v10132_v47 = vld [vmem:[#allocation7 + $0x468] sm:$0xff] }
 0x1c7   : > { %6511 = vmatprep.subr.mxu0 %v13857_v56  ;;  %1831 = vmatprep.subr.mxu1 %v13858_v57  ;;  %v7966_v56 = vpop.eup %7965  ;;  %v13889_v57 = vld [vmem:[#allocation146_spill] sm:$0xff]  ;;  %7983 = vtanh.f32 %v1021_v18 }
 0x1c8   : > { %6512 = vmatpush3.msra.mxu0 %v13860_v39  ;;  %1832 = vmatpush2.msra.mxu1 %v13861_v43  ;;  %v13891_v39 = vld [vmem:[#allocation98_spill] sm:$0xff]  ;;  %v1013_v43 = vadd.f32 %v10008_v48, %v13866_v11  ;;  %v1030_v33 = vpop.f32.mrf.mxu0 }
 0x1c9   : > { %6513 = vmatprep.subr.mxu0 %v13862_v42  ;;  %1833 = vmatprep.subr.mxu1 %v13863_v50  ;;  %v7968_v42 = vpop.eup %7967  ;;  %v13892_v50 = vld [vmem:[#allocation99_spill] sm:$0xff]  ;;  %v2267_v18 = vld [vmem:[#allocation7 + $0xb0] sm:$0xff] }
 0x1ca   : > { %1986 = vmatprep.mubr.f32.mxu0 %v13686_v49  ;;  %6514 = vmatpush3.msra.mxu0 %v13864_v37  ;;  %v7970_v37 = vpop.eup %7969  ;;  %7985 = vtanh.f32 %v1013_v43  ;;  %v1032_v0 = vpop.f32.mrf.mxu0  ;;  %v10152_v43 = vld [vmem:[#allocation7 + $0x428] sm:$0xff] }
 0x1cb   : > { %1834 = vmatpush2.msra.mxu1 %v13865_v2  ;;  %1987 = vmatmul.mubr.f32.gmra.mxu0 %v10017_v59  ;;  %v1027_v2 = vadd.f32 %v1026_v55, %v13859_v3  ;;  %v7972_v48 = vpop.eup %7971  ;;  %v10140_v55 = vld [vmem:[#allocation7 + $0x450] sm:$0xff] }
 0x1cc   : > { %6515 = vmatprep.subr.mxu0 %v13867_v38  ;;  %1835 = vmatprep.subr.mxu1 %v13868_v10  ;;  %v7974_v38 = vpop.eup %7973 }
 0x1cd   : > { %6516 = vmatpush3.msra.mxu0 %v13869_v9  ;;  %1836 = vmatpush2.msra.mxu1 %v13870_v35  ;;  %7987 = vtanh.f32 %v1027_v2  ;;  %v13896_v35 = vld [vmem:[#allocation115_spill] sm:$0xff] }
 0x1ce   : > { %6517 = vmatprep.subr.mxu0 %v13871_v13  ;;  %1837 = vmatprep.subr.mxu1 %v13872_v15  ;;  %v7976_v10 = vpop.eup %7975  ;;  %v13897_v15 = vld [vmem:[#allocation118_spill] sm:$0xff]  ;;  %v10164_v2 = vld [vmem:[#allocation7 + $0x3f8] sm:$0xff] }
 0x1cf   : > { %1992 = vmatprep.mubr.f32.mxu0 %v13686_v49  ;;  %6518 = vmatpush3.msra.mxu0 %v13873_v12  ;;  %v7978_v9 = vpop.eup %7977 }
 0x1d0   : > { %1838 = vmatpush2.msra.mxu1 %v13874_v53  ;;  %1993 = vmatmul.mubr.f32.gmra.mxu0 %v10035_v5  ;;  %v7980_v13 = vpop.eup %7979  ;;  %v13899_v53 = vld [vmem:[#allocation124_spill] sm:$0xff] }
 0x1d1   : > { %6519 = vmatprep.subr.mxu0 %v13875_v20  ;;  %1839 = vmatprep.subr.mxu1 %v13876_v22  ;;  %v13901_v22 = vld [vmem:[#allocation130_spill] sm:$0xff] }
 0x1d2   : > { %6520 = vmatpush3.msra.mxu0 %v13877_v24  ;;  %1840 = vmatpush2.msra.mxu1 %v13878_v25  ;;  %v13902_v25 = vld [vmem:[#allocation133_spill] sm:$0xff] }
 0x1d3   : > { %6521 = vmatprep.subr.mxu0 %v13879_v61  ;;  %1841 = vmatprep.subr.mxu1 %v13880_v32  ;;  %v7982_v12 = vpop.eup %7981  ;;  %v13903_v32 = vld [vmem:[#allocation136_spill] sm:$0xff] }
 0x1d4   : > { %1998 = vmatprep.mubr.f32.mxu0 %v13686_v49  ;;  %6522 = vmatpush3.msra.mxu0 %v13881_v29  ;;  %v7984_v17 = vpop.eup %7983  ;;  %v13905_v29 = vld [vmem:[#allocation143_spill] sm:$0xff] }
 0x1d5   : > { %1842 = vmatpush2.msra.mxu1 %v13882_v31  ;;  %1999 = vmatmul.mubr.f32.gmra.mxu0 %v10053_v23  ;;  %v2291_v31 = vld [vmem:[#allocation7 + $0x170] sm:$0xff] }
 0x1d6   : > { %6523 = vmatprep.subr.mxu0 %v13883_v36  ;;  %1843 = vmatprep.subr.mxu1 %v13884_v41  ;;  %v2290_v36 = vld [vmem:[#allocation7 + $0x168] sm:$0xff]  ;;  %v2288_v41 = vld [vmem:[#allocation7 + $0x158] sm:$0xff] }
 0x1d7   : > { %6524 = vmatpush3.msra.mxu0 %v13885_v28  ;;  %1844 = vmatpush2.msra.mxu1 %v13886_v46  ;;  %v7986_v19 = vpop.eup %7985  ;;  %v2287_v28 = vld [vmem:[#allocation7 + $0x150] sm:$0xff]  ;;  %v2285_v46 = vld [vmem:[#allocation7 + $0x140] sm:$0xff] }
 0x1d8   : > { %6525 = vmatprep.subr.mxu0 %v13887_v51  ;;  %1845 = vmatprep.subr.mxu1 %v13888_v52  ;;  %v2279_v51 = vld [vmem:[#allocation7 + $0x110] sm:$0xff]  ;;  %v10137_v52 = vld [vmem:[#allocation7 + $0x458] sm:$0xff] }
 0x1d9   : > { %2004 = vmatprep.mubr.f32.mxu0 %v13686_v49  ;;  %6526 = vmatpush3.msra.mxu0 %v13889_v57  ;;  %v2272_v57 = vld [vmem:[#allocation7 + $0xd8] sm:$0xff] }
 0x1da   : > { %1846 = vmatpush2.msra.mxu1 %v13890_v62  ;;  %2005 = vmatmul.mubr.f32.gmra.mxu0 %v10068_v44  ;;  %v7988_v20 = vpop.eup %7987  ;;  %v10145_v62 = vld [vmem:[#allocation7 + $0x440] sm:$0xff] }
 0x1db   : > { %6527 = vmatprep.subr.mxu0 %v9827_v1  ;;  %1847 = vmatprep.subr.mxu1 %v13891_v39  ;;  %v13893_v1 = vld [vmem:[#allocation100_spill] sm:$0xff]  ;;  %v10148_v39 = vld [vmem:[#allocation7 + $0x438] sm:$0xff] }
 0x1dc   : > { %1849 = vmatprep.mubr.f32.mxu1 %v7966_v56  ;;  %6528 = vmatpush3.msra.mxu0 %v9837_v7  ;;  %v1019_v7 = vadd.f32 %v10033_v4, %v13866_v11  ;;  %v1025_v4 = vadd.f32 %v1024_v30, %v13866_v11 }
 0x1dd   : > { %2075 = vmatprep.mubr.f32.mxu0 %v7966_v56  ;;  %1848 = vmatpush2.msra.mxu1 %v13892_v50  ;;  %v2273_v56 = vld [vmem:[#allocation7 + $0xe0] sm:$0xff]  ;;  %v10158_v50 = vld [vmem:[#allocation7 + $0x410] sm:$0xff] }
 0x1de   : > { %6529 = vmatprep.subr.mxu0 %v9845_v58  ;;  %1850 = vmatmul.mubr.f32.vlgmr.msra.gmra.mxu1 %v7968_v42  ;;  %v13894_v58 = vld [vmem:[#allocation108_spill] sm:$0xff]  ;;  %7989 = vtanh.f32 %v1019_v7  ;;  %v2258_v7 = vld [vmem:[#allocation7 + $0x68] sm:$0xff] }
 0x1df   : > { %6530 = vmatpush3.msra.mxu0 %v9851_v60  ;;  %7351 = vmatprep.subr.mxu1 %v13893_v1  ;;  %v1033_v60 = vadd.f32 %v1032_v0, %v13859_v3  ;;  %v1031_v3 = vadd.f32 %v1030_v33, %v13866_v11  ;;  %v13900_v11 = vld [vmem:[#allocation127_spill] sm:$0xff]  ;;  %v2266_v33 = vld [vmem:[#allocation7 + $0xa8] sm:$0xff]  ;;  %v10170_v0 = vld [vmem:[#allocation7 + $0x3e0] sm:$0xff] }
 0x1e0   : > { %2076 = vmatmul.mubr.f32.vlgmr.msra.gmra.mxu0 %v7968_v42  ;;  %7352 = vmatpush3.msra.mxu1 %v13893_v1  ;;  %v10155_v42 = vld [vmem:[#allocation7 + $0x420] sm:$0xff] }
 0x1e1   : > { %1855 = vmatprep.mubr.f32.mxu1 %v7970_v37  ;;  %2080 = vmatprep.mubr.f32.mxu0 %v7970_v37  ;;  %7991 = vtanh.f32 %v1033_v60  ;;  %v10161_v37 = vld [vmem:[#allocation7 + $0x408] sm:$0xff]  ;;  %v2261_v1 = vld [vmem:[#allocation7 + $0x80] sm:$0xff]  ;;  %v2255_v60 = vld [vmem:[#allocation7 + $0x50] sm:$0xff] }
 0x1e2   : > { %7353 = vmatprep.subr.mxu1 %v13894_v58  ;;  %1856 = vmatmul.mubr.f32.gmra.mxu1 %v7974_v38  ;;  %7993 = vtanh.f32 %v1025_v4  ;;  %v2254_v4 = vld [vmem:[#allocation7 + $0x48] sm:$0xff] }
 0x1e3   : > { %7354 = vmatpush3.msra.mxu1 %v13894_v58  ;;  %1861 = vmatprep.mubr.f32.mxu1 %v7972_v48  ;;  %7995 = vtanh.f32 %v1031_v3  ;;  %v10173_v58 = vld [vmem:[#allocation7 + $0x3d8] sm:$0xff]  ;;  %v10185_v3 = vld [vmem:[#allocation7 + $0x3a8] sm:$0xff] }
 0x1e4   : > { %7355 = vmatprep.subr.mxu1 %v13895_v8  ;;  %2081 = vmatmul.mubr.f32.gmra.mxu0 %v7974_v38  ;;  %v2257_v38 = vld [vmem:[#allocation7 + $0x60] sm:$0xff] }
 0x1e5   : > { %7356 = vmatpush3.msra.mxu1 %v13895_v8  ;;  %2085 = vmatprep.mubr.f32.mxu0 %v7972_v48  ;;  %v2260_v48 = vld [vmem:[#allocation7 + $0x78] sm:$0xff]  ;;  %v10179_v8 = vld [vmem:[#allocation7 + $0x3c0] sm:$0xff] }
 0x1e6   : > { %7357 = vmatprep.subr.mxu1 %v13896_v35  ;;  %1862 = vmatmul.mubr.f32.gmra.mxu1 %v7978_v9 }
 0x1e7   : > { %7358 = vmatpush3.msra.mxu1 %v13896_v35  ;;  %1867 = vmatprep.mubr.f32.mxu1 %v7976_v10  ;;  %v10182_v35 = vld [vmem:[#allocation7 + $0x3b0] sm:$0xff] }
 0x1e8   : > { %7359 = vmatprep.subr.mxu1 %v13897_v15  ;;  %2086 = vmatmul.mubr.f32.gmra.mxu0 %v7978_v9  ;;  %v2252_v9 = vld [vmem:[#allocation7 + $0x38] sm:$0xff] }
 0x1e9   : > { %7360 = vmatpush3.msra.mxu1 %v13897_v15  ;;  %2090 = vmatprep.mubr.f32.mxu0 %v7976_v10  ;;  %v10176_v10 = vld [vmem:[#allocation7 + $0x3c8] sm:$0xff]  ;;  %v2249_v15 = vld [vmem:[#allocation7 + $0x20] sm:$0xff] }
 0x1ea   : > { %7361 = vmatprep.subr.mxu1 %v13898_v16  ;;  %1868 = vmatmul.mubr.f32.gmra.mxu1 %v7982_v12 }
 0x1eb   : > { %7362 = vmatpush3.msra.mxu1 %v13898_v16  ;;  %1873 = vmatprep.mubr.f32.mxu1 %v7980_v13  ;;  %v7990_v24 = vpop.eup %7989  ;;  %v2248_v16 = vld [vmem:[#allocation7 + $0x18] sm:$0xff] }
 0x1ec   : > { %7363 = vmatprep.subr.mxu1 %v13899_v53  ;;  %2091 = vmatmul.mubr.f32.gmra.mxu0 %v7982_v12  ;;  %v10188_v12 = vld [vmem:[#allocation7 + $0x398] sm:$0xff] }
 0x1ed   : > { %7364 = vmatpush3.msra.mxu1 %v13899_v53  ;;  %2095 = vmatprep.mubr.f32.mxu0 %v7980_v13  ;;  %v2251_v13 = vld [vmem:[#allocation7 + $0x30] sm:$0xff]  ;;  %v2246_v53 = vld [vmem:[#allocation7 + $0x8] sm:$0xff] }
 0x1ee   : > { %7365 = vmatprep.subr.mxu1 %v13900_v11  ;;  %1874 = vmatmul.mubr.f32.gmra.mxu1 %v7986_v19  ;;  %v7992_v61 = vpop.eup %7991 }
 0x1ef   : > { %7366 = vmatpush3.msra.mxu1 %v13900_v11  ;;  %1879 = vmatprep.mubr.f32.mxu1 %v7984_v17  ;;  %v7994_v26 = vpop.eup %7993  ;;  %v2245_v11 = vld [vmem:[#allocation7] sm:$0xff] }
 0x1f0   : > { %7367 = vmatprep.subr.mxu1 %v13901_v22  ;;  %2096 = vmatmul.mubr.f32.gmra.mxu0 %v7986_v19  ;;  %v7996_v30 = vpop.eup %7995  ;;  %v10194_v19 = vld [vmem:[#allocation7 + $0x380] sm:$0xff] }
 0x1f1   : > { %7368 = vmatpush3.msra.mxu1 %v13901_v22  ;;  %2100 = vmatprep.mubr.f32.mxu0 %v7984_v17  ;;  %v10191_v17 = vld [vmem:[#allocation7 + $0x390] sm:$0xff] }
 0x1f2   : > { %7369 = vmatprep.subr.mxu1 %v13902_v25  ;;  %1880 = vmatmul.mubr.f32.gmra.mxu1 %v7990_v24  ;;  %v2339_v22 = vld [vmem:[#allocation7 + $0x2f0] sm:$0xff] }
 0x1f3   : > { %7370 = vmatpush3.msra.mxu1 %v13902_v25  ;;  %1885 = vmatprep.mubr.f32.mxu1 %v7988_v20  ;;  %v10205_v25 = vld [vmem:[#allocation7 + $0x368] sm:$0xff] }
 0x1f4   : > { %7371 = vmatprep.subr.mxu1 %v13903_v32  ;;  %2101 = vmatmul.mubr.f32.gmra.mxu0 %v7990_v24  ;;  %v10202_v24 = vld [vmem:[%s13209_s4] sm:$0x7] }
 0x1f5   : > { %7372 = vmatpush3.msra.mxu1 %v13903_v32  ;;  %2105 = vmatprep.mubr.f32.mxu0 %v7988_v20  ;;  %v10197_v20 = vld [vmem:[#allocation7 + $0x378] sm:$0xff]  ;;  %v13906_v32 = vld [vmem:[#allocation102_spill] sm:$0xff] }
 0x1f6   : > { %7373 = vmatprep.subr.mxu1 %v13904_v27  ;;  %1886 = vmatmul.mubr.f32.gmra.mxu1 %v7994_v26 }
 0x1f7   : > { %7374 = vmatpush3.msra.mxu1 %v13904_v27  ;;  %1891 = vmatprep.mubr.f32.mxu1 %v7992_v61  ;;  %v10212_v27 = vld [vmem:[#allocation7 + $0x360] sm:$0xff] }
 0x1f8   : > { %7375 = vmatprep.subr.mxu1 %v13905_v29  ;;  %2106 = vmatmul.mubr.f32.gmra.mxu0 %v7994_v26  ;;  %v10209_v26 = vrot.slane %v10202_v24, %v13906_v32  ;;  %v10296_v32 = vld [vmem:[#allocation7 + $0x228] sm:$0xff] }
 0x1f9   : > { %7376 = vmatpush3.msra.mxu1 %v13905_v29  ;;  %2110 = vmatprep.mubr.f32.mxu0 %v7992_v61  ;;  %v2338_v61 = vld [vmem:[#allocation7 + $0x2e8] sm:$0xff]  ;;  %v2336_v29 = vld [vmem:[#allocation7 + $0x2d8] sm:$0xff]  ;;  %13923 = vst [vmem:[#allocation45_spill] sm:$0xff] %v10296_v32 }
 0x1fa   : > { %7377 = vmatprep.subr.mxu1 %v9823_v54  ;;  %1892 = vmatmul.mubr.f32.gmra.mxu1 %v7996_v30 }
 0x1fb   : > { %7378 = vmatpush3.msra.mxu1 %v9823_v54  ;;  %7383 = vmatprep.mubr.f32.mxu1 %v9957_v6  ;;  %v10129_v54 = vld [vmem:[#allocation7 + $0x470] sm:$0xff]  ;;  %v2282_v6 = vld [vmem:[#allocation7 + $0x128] sm:$0xff] }
 0x1fc   : > { %7379 = vmatprep.subr.mxu1 %v9839_v63  ;;  %2111 = vmatmul.mubr.f32.gmra.mxu0 %v7996_v30 }
 0x1fd   : > { %7380 = vmatpush3.msra.mxu1 %v9839_v63  ;;  %2406 = vmatprep.subr.mxu0 %v2291_v31  ;;  %v2281_v63 = vld [vmem:[#allocation7 + $0x120] sm:$0xff] }
 0x1fe   : > { %7381 = vmatprep.subr.mxu1 %v9853_v14  ;;  %2407 = vmatpush1.msra.mxu0 %v2290_v36  ;;  %v10217_v36 = vld [vmem:[#allocation7 + $0x350] sm:$0xff] }
 0x1ff   : > { %7382 = vmatpush3.msra.mxu1 %v9853_v14  ;;  %2408 = vmatprep.subr.mxu0 %v2288_v41  ;;  %v2278_v14 = vld [vmem:[#allocation7 + $0x108] sm:$0xff]  ;;  %v10219_v41 = vld [vmem:[#allocation7 + $0x2d0] sm:$0xff] }
 0x200   : > { %7384 = vmatmul.mubr.f32.vlgmr.msra.gmra.mxu1 %v9974_v34  ;;  %2409 = vmatpush1.msra.mxu0 %v2287_v28  ;;  %v2276_v34 = vld [vmem:[#allocation7 + $0xf8] sm:$0xff]  ;;  %13907 = vst [vmem:[#allocation42_spill] sm:$0xff] %v10219_v41  ;;  %v10222_v28 = vld [vmem:[#allocation7 + $0x348] sm:$0xff] }
 0x201   : > { %7386 = vmatprep.mubr.f32.mxu1 %v9989_v21  ;;  %2410 = vmatprep.subr.mxu0 %v2285_v46  ;;  %v2275_v21 = vld [vmem:[#allocation7 + $0xf0] sm:$0xff]  ;;  %v10224_v46 = vld [vmem:[#allocation7 + $0x2c0] sm:$0xff] }
 0x202   : > { %2411 = vmatpush1.msra.mxu0 %v2284_v45  ;;  %2519 = vmatprep.subr.mxu1 %v10129_v54  ;;  %13908 = vst [vmem:[#allocation36_spill] sm:$0xff] %v10224_v46 }
 0x203   : > { %2412 = vmatprep.subr.mxu0 %v2282_v6  ;;  %2520 = vmatpush1.msra.mxu1 %v10132_v47 }
 0x204   : > { %7387 = vmatmul.mubr.f32.gmra.mxu1 %v10002_v40  ;;  %2413 = vmatpush1.msra.mxu0 %v2281_v63  ;;  %v2270_v40 = vld [vmem:[#allocation7 + $0xc8] sm:$0xff]  ;;  %v10227_v63 = vld [vmem:[#allocation7 + $0x338] sm:$0xff] }
 0x205   : > { %7389 = vmatprep.mubr.f32.mxu1 %v10017_v59  ;;  %2414 = vmatprep.subr.mxu0 %v2279_v51  ;;  %v2269_v59 = vld [vmem:[#allocation7 + $0xc0] sm:$0xff]  ;;  %v10229_v51 = vld [vmem:[#allocation7 + $0x2b8] sm:$0xff] }
 0x206   : > { %2415 = vmatpush1.msra.mxu0 %v2278_v14  ;;  %2521 = vmatprep.subr.mxu1 %v10137_v52  ;;  %13909 = vst [vmem:[#allocation37_spill] sm:$0xff] %v10229_v51 }
 0x207   : > { %2416 = vmatprep.subr.mxu0 %v2276_v34  ;;  %2522 = vmatpush1.msra.mxu1 %v10140_v55  ;;  %v10233_v34 = vld [vmem:[#allocation7 + $0x330] sm:$0xff] }
 0x208   : > { %7390 = vmatmul.mubr.f32.gmra.mxu1 %v10035_v5  ;;  %2417 = vmatpush1.msra.mxu0 %v2275_v21  ;;  %v2264_v5 = vld [vmem:[#allocation7 + $0x98] sm:$0xff]  ;;  %v10236_v21 = vld [vmem:[#allocation7 + $0x2a8] sm:$0xff] }
 0x209   : > { %7392 = vmatprep.mubr.f32.mxu1 %v10053_v23  ;;  %2418 = vmatprep.subr.mxu0 %v2273_v56  ;;  %v2263_v23 = vld [vmem:[#allocation7 + $0x90] sm:$0xff]  ;;  %13910 = vst [vmem:[#allocation44_spill] sm:$0xff] %v10236_v21  ;;  %v10239_v56 = vld [vmem:[#allocation7 + $0x320] sm:$0xff] }
 0x20a   : > { %2419 = vmatpush1.msra.mxu0 %v2272_v57  ;;  %2523 = vmatprep.subr.mxu1 %v10145_v62  ;;  %v10242_v57 = vld [vmem:[#allocation7 + $0x2a0] sm:$0xff] }
 0x20b   : > { %2420 = vmatprep.subr.mxu0 %v2270_v40  ;;  %2524 = vmatpush1.msra.mxu1 %v10148_v39  ;;  %13911 = vst [vmem:[#allocation38_spill] sm:$0xff] %v10242_v57 }
 0x20c   : > { %7393 = vmatmul.mubr.f32.gmra.mxu1 %v10068_v44  ;;  %2421 = vmatpush1.msra.mxu0 %v2269_v59  ;;  %v10167_v44 = vld [vmem:[#allocation7 + $0x3f0] sm:$0xff] }
 0x20d   : > { %2422 = vmatprep.subr.mxu0 %v2267_v18  ;;  %2525 = vmatprep.subr.mxu1 %v10152_v43  ;;  %v10245_v18 = vld [vmem:[#allocation7 + $0x318] sm:$0xff] }
 0x20e   : > { %2423 = vmatpush1.msra.mxu0 %v2266_v33  ;;  %2526 = vmatpush1.msra.mxu1 %v10155_v42  ;;  %v10248_v33 = vld [vmem:[#allocation7 + $0x290] sm:$0xff] }
 0x20f   : > { %2424 = vmatprep.subr.mxu0 %v2264_v5  ;;  %2527 = vmatprep.subr.mxu1 %v10158_v50  ;;  %13912 = vst [vmem:[#allocation48_spill] sm:$0xff] %v10248_v33  ;;  %v10251_v5 = vld [vmem:[#allocation7 + $0x308] sm:$0xff] }
 0x210   : > { %2425 = vmatpush1.msra.mxu0 %v2263_v23  ;;  %2528 = vmatpush1.msra.mxu1 %v10161_v37  ;;  %v10254_v23 = vld [vmem:[#allocation7 + $0x288] sm:$0xff] }
 0x211   : > { %2426 = vmatprep.subr.mxu0 %v2261_v1  ;;  %2529 = vmatprep.subr.mxu1 %v10164_v2  ;;  %13913 = vst [vmem:[#allocation39_spill] sm:$0xff] %v10254_v23  ;;  %v13914_v1 = vld [vmem:[#allocation101_spill] sm:$0xff] }
 0x212   : > { %2427 = vmatpush1.msra.mxu0 %v2260_v48  ;;  %2530 = vmatpush1.msra.mxu1 %v10167_v44  ;;  %v10258_v48 = vrot.slane %v10202_v24, %v13914_v1 }
 0x213   : > { %2428 = vmatprep.subr.mxu0 %v2258_v7  ;;  %2531 = vmatprep.subr.mxu1 %v10170_v0 }
 0x214   : > { %2429 = vmatpush1.msra.mxu0 %v2257_v38  ;;  %2532 = vmatpush1.msra.mxu1 %v10173_v58  ;;  %13915 = vst [vmem:[#allocation50_spill] sm:$0xff] %v10258_v48 }
 0x215   : > { %2430 = vmatprep.subr.mxu0 %v2255_v60  ;;  %2533 = vmatprep.subr.mxu1 %v10176_v10  ;;  %v10261_v60 = vld [vmem:[#allocation7 + $0x300] sm:$0xff] }
 0x216   : > { %2431 = vmatpush1.msra.mxu0 %v2254_v4  ;;  %2534 = vmatpush1.msra.mxu1 %v10179_v8  ;;  %v10264_v4 = vld [vmem:[#allocation7 + $0x278] sm:$0xff] }
 0x217   : > { %2432 = vmatprep.subr.mxu0 %v2252_v9  ;;  %2535 = vmatprep.subr.mxu1 %v10182_v35  ;;  %13916 = vst [vmem:[#allocation53_spill] sm:$0xff] %v10264_v4  ;;  %v10268_v9 = vld [vmem:[#allocation7 + $0x270] sm:$0xff] }
 0x218   : > { %2433 = vmatpush1.msra.mxu0 %v2251_v13  ;;  %2536 = vmatpush1.msra.mxu1 %v10185_v3  ;;  %13917 = vst [vmem:[#allocation40_spill] sm:$0xff] %v10268_v9 }
 0x219   : > { %2434 = vmatprep.subr.mxu0 %v2249_v15  ;;  %2537 = vmatprep.subr.mxu1 %v10188_v12  ;;  %v10271_v15 = vld [vmem:[#allocation7 + $0x2f8] sm:$0xff] }
 0x21a   : > { %2435 = vmatpush1.msra.mxu0 %v2248_v16  ;;  %2538 = vmatpush1.msra.mxu1 %v10191_v17  ;;  %v10274_v16 = vld [vmem:[#allocation7 + $0x260] sm:$0xff] }
 0x21b   : > { %2436 = vmatprep.subr.mxu0 %v2246_v53  ;;  %2539 = vmatprep.subr.mxu1 %v10194_v19  ;;  %13918 = vst [vmem:[#allocation141_spill] sm:$0xff] %v10274_v16 }
 0x21c   : > { %2437 = vmatpush1.msra.mxu0 %v2245_v11  ;;  %v10214_v30 = vpop.f32.mrf.mxu1  ;;  %v1391_v31 = vpop.f32.mrf.mxu0  ;;  %2540 = vmatpush1.msra.mxu1 %v10197_v20 }
 0x21d   : > { %2438 = vmatprep.subr.mxu0 %v2339_v22  ;;  %2541 = vmatprep.subr.mxu1 %v10205_v25  ;;  %v1392_v11 = vadd.f32 %v1391_v31, %v10258_v48  ;;  %v10280_v22 = vld [vmem:[#allocation7 + $0x258] sm:$0xff] }
 0x21e   : > { %2439 = vmatpush2.msra.mxu0 %v2338_v61  ;;  %v1506_v45 = vpop.f32.mrf.mxu1  ;;  %v1393_v6 = vpop.f32.mrf.mxu0  ;;  %2542 = vmatpush1.msra.mxu1 %v10212_v27  ;;  %13919 = vst [vmem:[#allocation41_spill] sm:$0xff] %v10280_v22 }
 0x21f   : > { %2440 = vmatprep.subr.mxu0 %v2336_v29  ;;  %v1394_v14 = vadd.f32 %v1393_v6, %v10209_v26  ;;  %2543 = vmatprep.subr.mxu1 %v10217_v36  ;;  %v10284_v29 = vld [vmem:[#allocation7 + $0x248] sm:$0xff] }
 0x220   : > { %2441 = vmatpush2.msra.mxu0 %v10219_v41  ;;  %2544 = vmatpush1.msra.mxu1 %v10222_v28  ;;  %13920 = vst [vmem:[#allocation55_spill] sm:$0xff] %v10284_v29 }
 0x221   : > { %2442 = vmatprep.subr.mxu0 %v10224_v46  ;;  %v1507_v40 = vadd.f32 %v1506_v45, %v1394_v14  ;;  %v1510_v59 = vpop.f32.mrf.mxu1  ;;  %2545 = vmatprep.subr.mxu1 %v10227_v63  ;;  %v10288_v45 = vld [vmem:[#allocation7 + $0x240] sm:$0xff]  ;;  %v2346_v46 = vld [vmem:[#allocation7 + $0x328] sm:$0xff] }
 0x222   : > { %2443 = vmatpush2.msra.mxu0 %v10229_v51  ;;  %2546 = vmatpush1.msra.mxu1 %v10233_v34  ;;  %13921 = vst [vmem:[#allocation43_spill] sm:$0xff] %v10288_v45 }
 0x223   : > { %2444 = vmatprep.subr.mxu0 %v10236_v21  ;;  %7997 = vtanh.f32 %v1507_v40  ;;  %v1397_v7 = vpop.f32.mrf.mxu0  ;;  %v1512_v38 = vpop.f32.mrf.mxu1  ;;  %2547 = vmatprep.subr.mxu1 %v10239_v56  ;;  %v10291_v40 = vld [vmem:[#allocation7 + $0x230] sm:$0xff] }
 0x224   : > { %2445 = vmatpush2.msra.mxu0 %v10242_v57  ;;  %2548 = vmatpush1.msra.mxu1 %v10245_v18  ;;  %13922 = vst [vmem:[#allocation57_spill] sm:$0xff] %v10291_v40  ;;  %v1398_v1 = vadd.f32 %v1397_v7, %v10258_v48  ;;  %v10306_v7 = vld [vmem:[#allocation7 + $0x200] sm:$0xff] }
 0x225   : > { %2446 = vmatprep.subr.mxu0 %v10248_v33  ;;  %v1399_v13 = vpop.f32.mrf.mxu0  ;;  %2549 = vmatprep.subr.mxu1 %v10251_v5  ;;  %13926 = vst [vmem:[#allocation61_spill] sm:$0xff] %v10306_v7 }
 0x226   : > { %2447 = vmatpush2.msra.mxu0 %v10254_v23  ;;  %v1400_v53 = vadd.f32 %v1399_v13, %v10209_v26  ;;  %2550 = vmatpush1.msra.mxu1 %v10261_v60  ;;  %v1505_v13 = vadd.f32 %v10214_v30, %v1392_v11  ;;  %v1511_v11 = vadd.f32 %v1510_v59, %v1398_v1  ;;  %v10323_v1 = vld [vmem:[#allocation7 + $0x1d0] sm:$0xff] }
 0x227   : > { %2448 = vmatprep.subr.mxu0 %v10264_v4  ;;  %v1516_v61 = vpop.f32.mrf.mxu1  ;;  %2583 = vmatprep.mubr.f32.mxu1 %v13686_v49  ;;  %13930 = vst [vmem:[#allocation49_spill] sm:$0xff] %v10323_v1 }
 0x228   : > { %2449 = vmatpush2.msra.mxu0 %v10268_v9  ;;  %6579 = vmatprep.subr.mxu1 %v10271_v15  ;;  %v1513_v31 = vadd.f32 %v1512_v38, %v1400_v53  ;;  %v10303_v38 = vld [vmem:[#allocation7 + $0x210] sm:$0xff] }
 0x229   : > { %2450 = vmatprep.subr.mxu0 %v10274_v16  ;;  %v1403_v6 = vpop.f32.mrf.mxu0  ;;  %v1518_v14 = vpop.f32.mrf.mxu1  ;;  %v10299_v16 = vld [vmem:[#allocation7 + $0x218] sm:$0xff]  ;;  %13925 = vst [vmem:[#allocation144_spill] sm:$0xff] %v10303_v38 }
 0x22a   : > { %2451 = vmatpush2.msra.mxu0 %v10280_v22  ;;  %13924 = vst [vmem:[#allocation59_spill] sm:$0xff] %v10299_v16  ;;  %7999 = vtanh.f32 %v1513_v31  ;;  %v10315_v31 = vld [vmem:[#allocation7 + $0x1e8] sm:$0xff] }
 0x22b   : > { %2452 = vmatprep.subr.mxu0 %v10284_v29  ;;  %v1405_v9 = vpop.f32.mrf.mxu0  ;;  %8001 = vtanh.f32 %v1505_v13  ;;  %v1404_v29 = vadd.f32 %v1403_v6, %v10258_v48  ;;  %13928 = vst [vmem:[#allocation47_spill] sm:$0xff] %v10315_v31 }
 0x22c   : > { %2453 = vmatpush2.msra.mxu0 %v10288_v45  ;;  %v1406_v4 = vadd.f32 %v1405_v9, %v10209_v26  ;;  %v10310_v45 = vld [vmem:[#allocation7 + $0x1f8] sm:$0xff] }
 0x22d   : > { %2454 = vmatprep.subr.mxu0 %v10291_v40  ;;  %v1522_v53 = vpop.f32.mrf.mxu1  ;;  %13927 = vst [vmem:[#allocation46_spill] sm:$0xff] %v10310_v45  ;;  %v1517_v6 = vadd.f32 %v1516_v61, %v1404_v29  ;;  %v10336_v61 = vld [vmem:[#allocation7 + $0x1a0] sm:$0xff] }
 0x22e   : > { %2455 = vmatpush2.msra.mxu0 %v10296_v32  ;;  %v1519_v30 = vadd.f32 %v1518_v14, %v1406_v4  ;;  %v10318_v4 = vld [vmem:[#allocation7 + $0x1e0] sm:$0xff]  ;;  %v10330_v32 = vld [vmem:[#allocation7 + $0x1b8] sm:$0xff]  ;;  %13934 = vst [vmem:[#allocation69_spill] sm:$0xff] %v10336_v61 }
 0x22f   : > { %2456 = vmatprep.subr.mxu0 %v10299_v16  ;;  %v1409_v9 = vpop.f32.mrf.mxu0  ;;  %v1524_v22 = vpop.f32.mrf.mxu1  ;;  %13929 = vst [vmem:[#allocation63_spill] sm:$0xff] %v10318_v4  ;;  %13932 = vst [vmem:[#allocation51_spill] sm:$0xff] %v10330_v32 }
 0x230   : > { %v10312_v40 = vpop.eup %7997  ;;  %2457 = vmatpush2.msra.mxu0 %v10303_v38  ;;  %8003 = vtanh.f32 %v1519_v30  ;;  %v1410_v13 = vadd.f32 %v1409_v9, %v10258_v48  ;;  %v10340_v9 = vld [vmem:[#allocation7 + $0x198] sm:$0xff] }
 0x231   : > { %2458 = vmatprep.subr.mxu0 %v10306_v7  ;;  %v1411_v14 = vpop.f32.mrf.mxu0  ;;  %2470 = vmatprep.mubr.f32.mxu0 %v10312_v40  ;;  %8005 = vtanh.f32 %v1511_v11  ;;  %v10327_v7 = vld [vmem:[#allocation7 + $0x1c8] sm:$0xff]  ;;  %13935 = vst [vmem:[#allocation52_spill] sm:$0xff] %v10340_v9 }
 0x232   : > { %2459 = vmatpush2.msra.mxu0 %v10310_v45  ;;  %v1412_v59 = vadd.f32 %v1411_v14, %v10209_v26  ;;  %13931 = vst [vmem:[#allocation65_spill] sm:$0xff] %v10327_v7  ;;  %v10333_v45 = vld [vmem:[#allocation7 + $0x1b0] sm:$0xff]  ;;  %v1523_v29 = vadd.f32 %v1522_v53, %v1410_v13  ;;  %v10350_v53 = vld [vmem:[#allocation7 + $0x478] sm:$0xff] }
 0x233   : > { %2460 = vmatprep.subr.mxu0 %v10315_v31  ;;  %v1528_v38 = vpop.f32.mrf.mxu1  ;;  %13933 = vst [vmem:[#allocation67_spill] sm:$0xff] %v10333_v45  ;;  %13938 = vst [vmem:[#allocation73_spill] sm:$0xff] %v10350_v53 }
 0x234   : > { %2461 = vmatpush2.msra.mxu0 %v10318_v4  ;;  %v1525_v16 = vadd.f32 %v1524_v22, %v1412_v59 }
 0x235   : > { %2462 = vmatprep.subr.mxu0 %v10323_v1  ;;  %v1415_v30 = vpop.f32.mrf.mxu0  ;;  %v1530_v14 = vpop.f32.mrf.mxu1  ;;  %v10344_v1 = vld [vmem:[#allocation7 + $0x188] sm:$0xff] }
 0x236   : > { %8007 = vtanh.f32 %v1525_v16  ;;  %2463 = vmatpush2.msra.mxu0 %v10327_v7  ;;  %v1416_v11 = vadd.f32 %v1415_v30, %v10258_v48  ;;  %13936 = vst [vmem:[#allocation71_spill] sm:$0xff] %v10344_v1  ;;  %v10347_v7 = vld [vmem:[#allocation7 + $0x180] sm:$0xff] }
 0x237   : > { %8009 = vtanh.f32 %v1517_v6  ;;  %2464 = vmatprep.subr.mxu0 %v10330_v32  ;;  %v1417_v22 = vpop.f32.mrf.mxu0  ;;  %13937 = vst [vmem:[#allocation54_spill] sm:$0xff] %v10347_v7  ;;  %v10352_v13 = vpop.eup %7999 }
 0x238   : > { %2465 = vmatpush2.msra.mxu0 %v10333_v45  ;;  %v1418_v59 = vadd.f32 %v1417_v22, %v10209_v26  ;;  %8011 = vtanh.f32 %v1523_v29  ;;  %v1529_v30 = vadd.f32 %v1528_v38, %v1416_v11  ;;  %v10355_v45 = vpop.eup %8001  ;;  %v10366_v29 = vld [vmem:[#allocation7 + $0x448] sm:$0xff] }
 0x239   : > { %2466 = vmatprep.subr.mxu0 %v10336_v61  ;;  %v1534_v16 = vpop.f32.mrf.mxu1  ;;  %13940 = vst [vmem:[#allocation75_spill] sm:$0xff] %v10366_v29 }
 0x23a   : > { %v1531_v6 = vadd.f32 %v1530_v14, %v1418_v59  ;;  %2467 = vmatpush2.msra.mxu0 %v10340_v9  ;;  %v10359_v14 = vld [vmem:[#allocation7 + $0x460] sm:$0xff]  ;;  %v10374_v9 = vld [vmem:[#allocation7 + $0x430] sm:$0xff] }
 0x23b   : > { %v1421_v32 = vpop.f32.mrf.mxu0  ;;  %2468 = vmatprep.subr.mxu0 %v10344_v1  ;;  %v1536_v22 = vpop.f32.mrf.mxu1  ;;  %13939 = vst [vmem:[#allocation56_spill] sm:$0xff] %v10359_v14  ;;  %13941 = vst [vmem:[#allocation58_spill] sm:$0xff] %v10374_v9 }
 0x23c   : > { %8013 = vtanh.f32 %v1531_v6  ;;  %v1422_v61 = vadd.f32 %v1421_v32, %v10258_v48  ;;  %2469 = vmatpush2.msra.mxu0 %v10347_v7 }
 0x23d   : > { %v1423_v59 = vpop.f32.mrf.mxu0  ;;  %2471 = vmatmul.mubr.f32.vlgmr.msra.gmra.mxu0 %v10355_v45  ;;  %7395 = vmatprep.subr.mxu0 %v10350_v53  ;;  %v10368_v11 = vpop.eup %8003  ;;  %8015 = vtanh.f32 %v1529_v30 }
 0x23e   : > { %v1424_v38 = vadd.f32 %v1423_v59, %v10209_v26  ;;  %2476 = vmatprep.mubr.f32.mxu0 %v10352_v13  ;;  %7396 = vmatpush3.msra.mxu0 %v10350_v53  ;;  %v1535_v32 = vadd.f32 %v1534_v16, %v1422_v61  ;;  %v10371_v7 = vpop.eup %8005  ;;  %v10381_v61 = vld [vmem:[#allocation7 + $0x418] sm:$0xff] }
 0x23f   : > { %v1540_v6 = vpop.f32.mrf.mxu1  ;;  %7397 = vmatprep.subr.mxu0 %v10359_v14  ;;  %13942 = vst [vmem:[#allocation60_spill] sm:$0xff] %v10381_v61 }
 0x240   : > { %v1537_v1 = vadd.f32 %v1536_v22, %v1424_v38  ;;  %7398 = vmatpush3.msra.mxu0 %v10359_v14 }
 0x241   : > { %v1427_v59 = vpop.f32.mrf.mxu0  ;;  %v1542_v4 = vpop.f32.mrf.mxu1  ;;  %2477 = vmatmul.mubr.f32.gmra.mxu0 %v10371_v7  ;;  %7399 = vmatprep.subr.mxu0 %v10366_v29 }
 0x242   : > { %8017 = vtanh.f32 %v1537_v1  ;;  %v1428_v30 = vadd.f32 %v1427_v59, %v10258_v48  ;;  %2482 = vmatprep.mubr.f32.mxu0 %v10368_v11  ;;  %7400 = vmatpush3.msra.mxu0 %v10366_v29  ;;  %v10390_v1 = vld [vmem:[#allocation7 + $0x400] sm:$0xff] }
 0x243   : > { %v10383_v16 = vpop.eup %8007  ;;  %8019 = vtanh.f32 %v1535_v32  ;;  %v1429_v22 = vpop.f32.mrf.mxu0  ;;  %7401 = vmatprep.subr.mxu0 %v10374_v9  ;;  %13943 = vst [vmem:[#allocation78_spill] sm:$0xff] %v10390_v1  ;;  %v2370_v32 = vld [vmem:[#allocation7 + $0x3e8] sm:$0xff] }
 0x244   : > { %v10386_v38 = vpop.eup %8009  ;;  %v1430_v14 = vadd.f32 %v1429_v22, %v10209_v26  ;;  %7402 = vmatpush3.msra.mxu0 %v10374_v9  ;;  %v1541_v59 = vadd.f32 %v1540_v6, %v1428_v30  ;;  %v2367_v30 = vld [vmem:[#allocation7 + $0x3d0] sm:$0xff] }
 0x245   : > { %v1546_v53 = vpop.f32.mrf.mxu1  ;;  %2483 = vmatmul.mubr.f32.gmra.mxu0 %v10386_v38  ;;  %7403 = vmatprep.subr.mxu0 %v10381_v61  ;;  %v10397_v22 = vpop.eup %8011 }
 0x246   : > { %v1543_v29 = vadd.f32 %v1542_v4, %v1430_v14  ;;  %2488 = vmatprep.mubr.f32.mxu0 %v10383_v16  ;;  %7404 = vmatpush3.msra.mxu0 %v10381_v61  ;;  %v2364_v61 = vld [vmem:[#allocation7 + $0x3b8] sm:$0xff] }
 0x247   : > { %v1433_v31 = vpop.f32.mrf.mxu0  ;;  %v1548_v23 = vpop.f32.mrf.mxu1  ;;  %7405 = vmatprep.subr.mxu0 %v10390_v1 }
 0x248   : > { %8021 = vtanh.f32 %v1543_v29  ;;  %v1434_v6 = vadd.f32 %v1433_v31, %v10258_v48  ;;  %7406 = vmatpush3.msra.mxu0 %v10390_v1  ;;  %v13944_v48 = vld [vmem:[#allocation104_spill] sm:$0xff] }
 0x249   : > { %v10401_v9 = vpop.eup %8013  ;;  %8023 = vtanh.f32 %v1541_v59  ;;  %v1435_v4 = vpop.f32.mrf.mxu0  ;;  %2489 = vmatmul.mubr.f32.gmra.mxu0 %v10397_v22  ;;  %7407 = vmatprep.subr.mxu0 %v2370_v32  ;;  %v10410_v57 = vrot.slane %v10202_v24, %v13944_v48  ;;  %v2361_v59 = vld [vmem:[#allocation7 + $0x3a0] sm:$0xff] }
 0x24a   : > { %v1436_v14 = vadd.f32 %v1435_v4, %v10209_v26  ;;  %2494 = vmatprep.mubr.f32.mxu0 %v10401_v9  ;;  %7408 = vmatpush3.msra.mxu0 %v2370_v32  ;;  %v1547_v33 = vadd.f32 %v1546_v53, %v1434_v6  ;;  %v10406_v31 = vpop.eup %8015  ;;  %v2358_v53 = vld [vmem:[#allocation7 + $0x388] sm:$0xff] }
 0x24b   : > { %v6451_v29 = vpop.f32.mrf.mxu1  ;;  %7409 = vmatprep.subr.mxu0 %v2367_v30 }
 0x24c   : > { %v1549_v1 = vadd.f32 %v1548_v23, %v1436_v14  ;;  %7410 = vmatpush3.msra.mxu0 %v2367_v30  ;;  %v2355_v30 = vld [vmem:[#allocation7 + $0x370] sm:$0xff] }
 0x24d   : > { %v7341_v21 = vpop.f32.mrf.mxu0  ;;  %v6452_v51 = vpop.f32.mrf.mxu1  ;;  %2495 = vmatmul.mubr.f32.gmra.mxu0 %v10406_v31  ;;  %7411 = vmatprep.subr.mxu0 %v2364_v61 }
 0x24e   : > { %8025 = vtanh.f32 %v1549_v1  ;;  %v6453_v32 = vadd.f32 %v6452_v51, %v6451_v29  ;;  %7412 = vmatpush3.msra.mxu0 %v2364_v61  ;;  %v2352_v61 = vld [vmem:[#allocation7 + $0x358] sm:$0xff]  ;;  %v2349_v29 = vld [vmem:[#allocation7 + $0x340] sm:$0xff] }
 0x24f   : > { %v10413_v6 = vpop.eup %8017  ;;  %8027 = vtanh.f32 %v1547_v33  ;;  %7413 = vmatprep.subr.mxu0 %v2361_v59  ;;  %v1722_v4 = vpop.f32.mrf.mxu0 }
 0x250   : > { %v10415_v23 = vpop.eup %8019  ;;  %v1618_v24 = vadd.f32 %v6453_v32, %v10410_v57  ;;  %2500 = vmatprep.mubr.f32.mxu0 %v10413_v6  ;;  %7414 = vmatpush3.msra.mxu0 %v2361_v59 }
 0x251   : > { %v6454_v14 = vpop.f32.mrf.mxu1  ;;  %2501 = vmatmul.mubr.f32.gmra.mxu0 %v10415_v23  ;;  %7415 = vmatprep.subr.mxu0 %v2358_v53 }
 0x252   : > { %v1723_v51 = vadd.f32 %v1722_v4, %v1618_v24  ;;  %7416 = vmatpush3.msra.mxu0 %v2358_v53  ;;  %v2343_v4 = vld [vmem:[#allocation7 + $0x310] sm:$0xff] }
 0x253   : > { %v6455_v1 = vpop.f32.mrf.mxu1  ;;  %7417 = vmatprep.subr.mxu0 %v2355_v30 }
 0x254   : > { %8029 = vtanh.f32 %v1723_v51  ;;  %v6456_v33 = vadd.f32 %v6455_v1, %v6454_v14  ;;  %7418 = vmatpush3.msra.mxu0 %v2355_v30  ;;  %v7344_v30 = vpop.f32.mrf.mxu0 }
 0x255   : > { %v10420_v48 = vpop.eup %8021  ;;  %7419 = vmatprep.subr.mxu0 %v2352_v61 }
 0x256   : > { %v10422_v32 = vpop.eup %8023  ;;  %v1623_v59 = vadd.f32 %v6456_v33, %v10410_v57  ;;  %2506 = vmatprep.mubr.f32.mxu0 %v10420_v48  ;;  %7420 = vmatpush3.msra.mxu0 %v2352_v61  ;;  %v1732_v41 = vpop.f32.mrf.mxu0 }
 0x257   : > { %v6457_v24 = vpop.f32.mrf.mxu1  ;;  %2507 = vmatmul.mubr.f32.gmra.mxu0 %v10422_v32  ;;  %7421 = vmatprep.subr.mxu0 %v2349_v29 }
 0x258   : > { %v1728_v53 = vadd.f32 %v7341_v21, %v1623_v59  ;;  %7422 = vmatpush3.msra.mxu0 %v2349_v29 }
 0x259   : > { %v6458_v14 = vpop.f32.mrf.mxu1  ;;  %7423 = vmatprep.subr.mxu0 %v2346_v46 }
 0x25a   : > { %8031 = vtanh.f32 %v1728_v53  ;;  %v6459_v51 = vadd.f32 %v6458_v14, %v6457_v24  ;;  %7424 = vmatpush3.msra.mxu0 %v2346_v46  ;;  %v10435_v24 = vld [vmem:[#allocation7 + $0x178] sm:$0xff]  ;;  %v10437_v14 = vld [vmem:[#allocation7 + $0x2e0] sm:$0xff] }
 0x25b   : > { %v10427_v1 = vpop.eup %8025  ;;  %7425 = vmatprep.subr.mxu0 %v2343_v4  ;;  %13947 = vst [vmem:[#allocation64_spill] sm:$0xff] %v10435_v24  ;;  %13948 = vst [vmem:[#allocation107_spill] sm:$0xff] %v10437_v14 }
 0x25c   : > { %13945 = vst [vmem:[#allocation62_spill] sm:$0xff] %v10427_v1  ;;  %v10429_v33 = vpop.eup %8027  ;;  %v1628_v61 = vadd.f32 %v6459_v51, %v10410_v57  ;;  %2512 = vmatprep.mubr.f32.mxu0 %v10427_v1  ;;  %7426 = vmatpush3.msra.mxu0 %v2343_v4  ;;  %v10440_v4 = vld [vmem:[#allocation7 + $0x160] sm:$0xff] }
 0x25d   : > { %13946 = vst [vmem:[#allocation106_spill] sm:$0xff] %v10429_v33  ;;  %v6460_v21 = vpop.f32.mrf.mxu1  ;;  %2513 = vmatmul.mubr.f32.gmra.mxu0 %v10429_v33  ;;  %2979 = vmatprep.subr.mxu0 %v10129_v54  ;;  %v10444_v54 = vld [vmem:[#allocation7 + $0x2c8] sm:$0xff] }
 0x25e   : > { %v1733_v29 = vadd.f32 %v1732_v41, %v1628_v61  ;;  %v10447_v61 = vld [vmem:[#allocation7 + $0x148] sm:$0xff] }
 0x25f   : > { %v6461_v59 = vpop.f32.mrf.mxu1  ;;  %13949 = vst [vmem:[#allocation66_spill] sm:$0xff] %v10447_v61 }
 0x260   : > { %8033 = vtanh.f32 %v1733_v29  ;;  %v6462_v46 = vadd.f32 %v6461_v59, %v6460_v21  ;;  %v7347_v21 = vpop.f32.mrf.mxu0 }
 0x261   : > { %v8030_v53 = vpop.eup %8029 }
 0x262   : > { %v1633_v51 = vadd.f32 %v6462_v46, %v10410_v57  ;;  %2584 = vmatmul.mubr.f32.vlgmr.msra.gmra.mxu1 %v8030_v53  ;;  %7427 = vmatprep.mubr.f32.mxu0 %v8030_v53  ;;  %v10451_v46 = vld [vmem:[#allocation7 + $0x2b0] sm:$0xff]  ;;  %v1742_v33 = vpop.f32.mrf.mxu0 }
 0x263   : > { %v6463_v1 = vpop.f32.mrf.mxu1  ;;  %6580 = vmatpush3.msra.mxu1 %v10435_v24  ;;  %2589 = vmatprep.mubr.f32.mxu1 %v13686_v49  ;;  %13950 = vst [vmem:[#allocation109_spill] sm:$0xff] %v10451_v46  ;;  %v10454_v24 = vld [vmem:[#allocation7 + $0x130] sm:$0xff] }
 0x264   : > { %v1738_v41 = vadd.f32 %v7344_v30, %v1633_v51  ;;  %6581 = vmatprep.subr.mxu1 %v10437_v14  ;;  %13951 = vst [vmem:[#allocation68_spill] sm:$0xff] %v10454_v24  ;;  %v10457_v14 = vld [vmem:[#allocation7 + $0x298] sm:$0xff] }
 0x265   : > { %v6464_v29 = vpop.f32.mrf.mxu1  ;;  %6582 = vmatpush3.msra.mxu1 %v10440_v4 }
 0x266   : > { %8035 = vtanh.f32 %v1738_v41  ;;  %v6465_v59 = vadd.f32 %v6464_v29, %v6463_v1  ;;  %6583 = vmatprep.subr.mxu1 %v10444_v54  ;;  %v10461_v1 = vld [vmem:[#allocation7 + $0x118] sm:$0xff] }
 0x267   : > { %v8032_v53 = vpop.eup %8031  ;;  %6584 = vmatpush3.msra.mxu1 %v10447_v61  ;;  %v10464_v61 = vld [vmem:[#allocation7 + $0x280] sm:$0xff] }
 0x268   : > { %v1638_v30 = vadd.f32 %v6465_v59, %v10410_v57  ;;  %v6466_v51 = vpop.f32.mrf.mxu1  ;;  %2590 = vmatmul.mubr.f32.gmra.mxu1 %v8032_v53  ;;  %7428 = vmatmul.mubr.f32.vlgmr.msra.gmra.mxu0 %v8032_v53  ;;  %v10470_v53 = vld [vmem:[#allocation7 + $0x100] sm:$0xff] }
 0x269   : > { %6585 = vmatprep.subr.mxu1 %v10451_v46  ;;  %2595 = vmatprep.mubr.f32.mxu1 %v13686_v49  ;;  %v10475_v46 = vld [vmem:[#allocation7 + $0x268] sm:$0xff] }
 0x26a   : > { %v1743_v41 = vadd.f32 %v1742_v33, %v1638_v30  ;;  %v6467_v29 = vpop.f32.mrf.mxu1  ;;  %6586 = vmatpush3.msra.mxu1 %v10454_v24  ;;  %2980 = vmatpush1.msra.mxu0 %v10132_v47  ;;  %v10478_v47 = vld [vmem:[#allocation7 + $0xe8] sm:$0xff] }
 0x26b   : > { %v6468_v59 = vadd.f32 %v6467_v29, %v6466_v51  ;;  %6587 = vmatprep.subr.mxu1 %v10457_v14  ;;  %2981 = vmatprep.subr.mxu0 %v10137_v52  ;;  %v7350_v52 = vpop.f32.mrf.mxu0 }
 0x26c   : > { %8037 = vtanh.f32 %v1743_v41  ;;  %6588 = vmatpush3.msra.mxu1 %v10461_v1  ;;  %2982 = vmatpush1.msra.mxu0 %v10140_v55  ;;  %v10482_v55 = vld [vmem:[#allocation7 + $0x250] sm:$0xff] }
 0x26d   : > { %v8034_v33 = vpop.eup %8033  ;;  %v1643_v30 = vadd.f32 %v6468_v59, %v10410_v57  ;;  %v6469_v24 = vpop.f32.mrf.mxu1  ;;  %6589 = vmatprep.subr.mxu1 %v10464_v61  ;;  %2983 = vmatprep.subr.mxu0 %v10145_v62  ;;  %v10485_v59 = vld [vmem:[#allocation7 + $0xd0] sm:$0xff] }
 0x26e   : > { %2596 = vmatmul.mubr.f32.gmra.mxu1 %v8034_v33  ;;  %7430 = vmatprep.mubr.f32.mxu0 %v8034_v33  ;;  %13952 = vst [vmem:[#allocation110_spill] sm:$0xff] %v10485_v59  ;;  %v10492_v33 = vld [vmem:[#allocation7 + $0x238] sm:$0xff] }
 0x26f   : > { %v1748_v51 = vadd.f32 %v7347_v21, %v1643_v30  ;;  %v6470_v41 = vpop.f32.mrf.mxu1  ;;  %6590 = vmatpush3.msra.mxu1 %v10470_v53  ;;  %2601 = vmatprep.mubr.f32.mxu1 %v13686_v49  ;;  %v1752_v30 = vpop.f32.mrf.mxu0 }
 0x270   : > { %v6471_v29 = vadd.f32 %v6470_v41, %v6469_v24  ;;  %6591 = vmatprep.subr.mxu1 %v10475_v46  ;;  %2984 = vmatpush1.msra.mxu0 %v10148_v39  ;;  %v10496_v41 = vld [vmem:[#allocation7 + $0xb8] sm:$0xff] }
 0x271   : > { %8039 = vtanh.f32 %v1748_v51  ;;  %6592 = vmatpush3.msra.mxu1 %v10478_v47  ;;  %2985 = vmatprep.subr.mxu0 %v10152_v43  ;;  %v10499_v43 = vld [vmem:[#allocation7 + $0x220] sm:$0xff] }
 0x272   : > { %v1648_v62 = vadd.f32 %v6471_v29, %v10410_v57  ;;  %v6472_v21 = vpop.f32.mrf.mxu1  ;;  %6593 = vmatprep.subr.mxu1 %v10482_v55  ;;  %2986 = vmatpush1.msra.mxu0 %v10155_v42  ;;  %v10503_v42 = vld [vmem:[#allocation7 + $0xa0] sm:$0xff] }
 0x273   : > { %v8036_v24 = vpop.eup %8035  ;;  %6594 = vmatpush3.msra.mxu1 %v10485_v59  ;;  %2987 = vmatprep.subr.mxu0 %v10158_v50  ;;  %v10506_v59 = vld [vmem:[#allocation7 + $0x208] sm:$0xff] }
 0x274   : > { %v1753_v39 = vadd.f32 %v1752_v30, %v1648_v62  ;;  %v6473_v51 = vpop.f32.mrf.mxu1  ;;  %2602 = vmatmul.mubr.f32.gmra.mxu1 %v8036_v24  ;;  %7431 = vmatmul.mubr.f32.gmra.mxu0 %v8036_v24  ;;  %13953 = vst [vmem:[#allocation70_spill] sm:$0xff] %v10506_v59 }
 0x275   : > { %v6474_v29 = vadd.f32 %v6473_v51, %v6472_v21  ;;  %2607 = vmatprep.mubr.f32.mxu1 %v13686_v49  ;;  %6595 = vmatprep.subr.mxu1 %v10492_v33  ;;  %v10515_v21 = vld [vmem:[#allocation7 + $0x88] sm:$0xff]  ;;  %v10524_v51 = vld [vmem:[#allocation7 + $0x70] sm:$0xff] }
 0x276   : > { %8041 = vtanh.f32 %v1753_v39  ;;  %6596 = vmatpush3.msra.mxu1 %v10496_v41  ;;  %2988 = vmatpush1.msra.mxu0 %v10161_v37  ;;  %13954 = vst [vmem:[#allocation111_spill] sm:$0xff] %v10515_v21  ;;  %v10521_v37 = vld [vmem:[#allocation7 + $0x1f0] sm:$0xff]  ;;  %13956 = vst [vmem:[#allocation113_spill] sm:$0xff] %v10524_v51 }
 0x277   : > { %v1653_v50 = vadd.f32 %v6474_v29, %v10410_v57  ;;  %v10510_v62 = vpop.f32.mrf.mxu0  ;;  %6597 = vmatprep.subr.mxu1 %v10499_v43  ;;  %2989 = vmatprep.subr.mxu0 %v10164_v2  ;;  %13955 = vst [vmem:[#allocation72_spill] sm:$0xff] %v10521_v37  ;;  %v10528_v2 = vld [vmem:[#allocation7 + $0x1d8] sm:$0xff] }
 0x278   : > { %6598 = vmatpush3.msra.mxu1 %v10503_v42  ;;  %2990 = vmatpush1.msra.mxu0 %v10167_v44  ;;  %13957 = vst [vmem:[#allocation74_spill] sm:$0xff] %v10528_v2 }
 0x279   : > { %v8038_v24 = vpop.eup %8037  ;;  %v1758_v30 = vadd.f32 %v7350_v52, %v1653_v50  ;;  %v10518_v39 = vpop.f32.mrf.mxu0  ;;  %6599 = vmatprep.subr.mxu1 %v10506_v59  ;;  %2991 = vmatprep.subr.mxu0 %v10170_v0  ;;  %v10535_v0 = vld [vmem:[#allocation7 + $0x58] sm:$0xff]  ;;  %v10541_v50 = vld [vmem:[#allocation7 + $0x1c0] sm:$0xff] }
 0x27a   : > { %2608 = vmatmul.mubr.f32.gmra.mxu1 %v8038_v24  ;;  %7433 = vmatprep.mubr.f32.mxu0 %v8038_v24  ;;  %13958 = vst [vmem:[#allocation114_spill] sm:$0xff] %v10535_v0  ;;  %13959 = vst [vmem:[#allocation76_spill] sm:$0xff] %v10541_v50  ;;  %v10544_v24 = vld [vmem:[#allocation7 + $0x40] sm:$0xff] }
 0x27b   : > { %8043 = vtanh.f32 %v1758_v30  ;;  %2613 = vmatprep.mubr.f32.mxu1 %v13686_v49  ;;  %6600 = vmatpush3.msra.mxu1 %v10515_v21  ;;  %13960 = vst [vmem:[#allocation116_spill] sm:$0xff] %v10544_v24  ;;  %v10555_v30 = vld [vmem:[#allocation7 + $0x28] sm:$0xff] }
 0x27c   : > { %v10530_v44 = vpop.f32.mrf.mxu0  ;;  %6601 = vmatprep.subr.mxu1 %v10521_v37  ;;  %2992 = vmatpush1.msra.mxu0 %v10173_v58  ;;  %v10548_v58 = vld [vmem:[#allocation7 + $0x1a8] sm:$0xff]  ;;  %13962 = vst [vmem:[#allocation117_spill] sm:$0xff] %v10555_v30  ;;  %v13980_v37 = vld [vmem:[#allocation55_spill] sm:$0xff] }
 0x27d   : > { %6602 = vmatpush3.msra.mxu1 %v10524_v51  ;;  %2993 = vmatprep.subr.mxu0 %v10176_v10  ;;  %13961 = vst [vmem:[#allocation77_spill] sm:$0xff] %v10548_v58 }
 0x27e   : > { %v8040_v52 = vpop.eup %8039  ;;  %v10538_v29 = vpop.f32.mrf.mxu0  ;;  %6603 = vmatprep.subr.mxu1 %v10528_v2  ;;  %2994 = vmatpush1.msra.mxu0 %v10179_v8 }
 0x27f   : > { %2614 = vmatmul.mubr.f32.gmra.mxu1 %v8040_v52  ;;  %7434 = vmatmul.mubr.f32.gmra.mxu0 %v8040_v52 }
 0x280   : > { %2619 = vmatprep.mubr.f32.mxu1 %v13686_v49  ;;  %6604 = vmatpush3.msra.mxu1 %v10535_v0  ;;  %v10561_v0 = vld [vmem:[#allocation7 + $0x190] sm:$0xff] }
 0x281   : > { %v10550_v10 = vpop.f32.mrf.mxu0  ;;  %6605 = vmatprep.subr.mxu1 %v10541_v50  ;;  %2995 = vmatprep.subr.mxu0 %v10182_v35  ;;  %13963 = vst [vmem:[#allocation79_spill] sm:$0xff] %v10561_v0  ;;  %v10564_v50 = vld [vmem:[#allocation7 + $0x10] sm:$0xff] }
 0x282   : > { %6606 = vmatpush3.msra.mxu1 %v10544_v24  ;;  %2996 = vmatpush1.msra.mxu0 %v10185_v3  ;;  %13964 = vst [vmem:[#allocation119_spill] sm:$0xff] %v10564_v50  ;;  %v13976_v24 = vld [vmem:[#allocation53_spill] sm:$0xff] }
 0x283   : > { %v8042_v8 = vpop.eup %8041  ;;  %v10558_v52 = vpop.f32.mrf.mxu0  ;;  %6607 = vmatprep.subr.mxu1 %v10548_v58  ;;  %2997 = vmatprep.subr.mxu0 %v10188_v12 }
 0x284   : > { %2620 = vmatmul.mubr.f32.gmra.mxu1 %v8042_v8  ;;  %7436 = vmatprep.mubr.f32.mxu0 %v8042_v8  ;;  %v8381_v8 = vld [vmem:[#allocation7 + $0x170] sm:$0xff] }
 0x285   : > { %2625 = vmatprep.mubr.f32.mxu1 %v13686_v49  ;;  %6608 = vmatpush3.msra.mxu1 %v10555_v30  ;;  %v13975_v30 = vld [vmem:[#allocation50_spill] sm:$0xff] }
 0x286   : > { %v10568_v35 = vpop.f32.mrf.mxu0  ;;  %6609 = vmatprep.subr.mxu1 %v10561_v0  ;;  %2998 = vmatpush1.msra.mxu0 %v10191_v17 }
 0x287   : > { %6610 = vmatpush3.msra.mxu1 %v10564_v50  ;;  %2999 = vmatprep.subr.mxu0 %v10194_v19  ;;  %v8382_v19 = vld [vmem:[#allocation7 + $0x168] sm:$0xff]  ;;  %v13973_v50 = vld [vmem:[#allocation48_spill] sm:$0xff] }
 0x288   : > { %v8044_v3 = vpop.eup %8043  ;;  %v10574_v12 = vpop.f32.mrf.mxu0  ;;  %2866 = vmatprep.subr.mxu1 %v8381_v8  ;;  %3000 = vmatpush1.msra.mxu0 %v10197_v20  ;;  %v8383_v20 = vld [vmem:[#allocation7 + $0x158] sm:$0xff] }
 0x289   : > { %2626 = vmatmul.mubr.f32.gmra.mxu1 %v8044_v3  ;;  %7437 = vmatmul.mubr.f32.gmra.mxu0 %v8044_v3 }
 0x28a   : > { %2696 = vmatprep.mubr.f32.mxu1 %v10312_v40  ;;  %3001 = vmatprep.subr.mxu0 %v10205_v25  ;;  %v8387_v40 = vld [vmem:[#allocation7 + $0x128] sm:$0xff] }
 0x28b   : > { %v10579_v0 = vpop.f32.mrf.mxu0  ;;  %3002 = vmatpush1.msra.mxu0 %v10212_v27  ;;  %3043 = vmatprep.mubr.f32.mxu0 %v13686_v49  ;;  %v8384_v27 = vld [vmem:[#allocation7 + $0x150] sm:$0xff] }
 0x28c   : > { %3003 = vmatprep.subr.mxu0 %v10217_v36  ;;  %v8385_v36 = vld [vmem:[#allocation7 + $0x140] sm:$0xff] }
 0x28d   : > { %v10584_v17 = vpop.f32.mrf.mxu0  ;;  %2697 = vmatmul.mubr.f32.vlgmr.msra.gmra.mxu1 %v10355_v45  ;;  %3004 = vmatpush1.msra.mxu0 %v10222_v28  ;;  %v8386_v28 = vld [vmem:[#allocation7 + $0x138] sm:$0xff] }
 0x28e   : > { %2867 = vmatpush1.msra.mxu1 %v8382_v19  ;;  %2701 = vmatprep.mubr.f32.mxu1 %v10352_v13 }
 0x28f   : > { %2868 = vmatprep.subr.mxu1 %v8383_v20  ;;  %3005 = vmatprep.subr.mxu0 %v10227_v63  ;;  %v8388_v63 = vld [vmem:[#allocation7 + $0x120] sm:$0xff]  ;;  %v8397_v20 = vld [vmem:[#allocation7 + $0xb0] sm:$0xff] }
 0x290   : > { %v10590_v25 = vpop.f32.mrf.mxu0  ;;  %2869 = vmatpush1.msra.mxu1 %v8384_v27  ;;  %3006 = vmatpush1.msra.mxu0 %v10233_v34  ;;  %v8389_v34 = vld [vmem:[#allocation7 + $0x110] sm:$0xff]  ;;  %v8399_v27 = vld [vmem:[#allocation7 + $0x98] sm:$0xff] }
 0x291   : > { %2870 = vmatprep.subr.mxu1 %v8385_v36  ;;  %2702 = vmatmul.mubr.f32.gmra.mxu1 %v10371_v7  ;;  %v8390_v7 = vld [vmem:[#allocation7 + $0x108] sm:$0xff] }
 0x292   : > { %v10594_v45 = vpop.f32.mrf.mxu0  ;;  %2871 = vmatpush1.msra.mxu1 %v8386_v28  ;;  %2706 = vmatprep.mubr.f32.mxu1 %v10368_v11  ;;  %v8391_v11 = vld [vmem:[#allocation7 + $0xf8] sm:$0xff] }
 0x293   : > { %2872 = vmatprep.subr.mxu1 %v8387_v40  ;;  %3007 = vmatprep.subr.mxu0 %v10239_v56  ;;  %v8392_v56 = vld [vmem:[#allocation7 + $0xf0] sm:$0xff]  ;;  %v8401_v40 = vld [vmem:[#allocation7 + $0x80] sm:$0xff] }
 0x294   : > { %2873 = vmatpush1.msra.mxu1 %v8388_v63  ;;  %3008 = vmatpush1.msra.mxu0 %v10245_v18  ;;  %v8393_v18 = vld [vmem:[#allocation7 + $0xe0] sm:$0xff] }
 0x295   : > { %v10599_v13 = vpop.f32.mrf.mxu0  ;;  %2874 = vmatprep.subr.mxu1 %v8389_v34  ;;  %2707 = vmatmul.mubr.f32.gmra.mxu1 %v10386_v38  ;;  %v8394_v38 = vld [vmem:[#allocation7 + $0xd8] sm:$0xff] }
 0x296   : > { %2875 = vmatpush1.msra.mxu1 %v8390_v7  ;;  %2711 = vmatprep.mubr.f32.mxu1 %v10383_v16  ;;  %v8395_v16 = vld [vmem:[#allocation7 + $0xc8] sm:$0xff]  ;;  %v8402_v34 = vld [vmem:[#allocation7 + $0x78] sm:$0xff] }
 0x297   : > { %v10603_v3 = vpop.f32.mrf.mxu0  ;;  %2876 = vmatprep.subr.mxu1 %v8391_v11  ;;  %3009 = vmatprep.subr.mxu0 %v10251_v5  ;;  %v8396_v5 = vld [vmem:[#allocation7 + $0xc0] sm:$0xff]  ;;  %v8403_v7 = vld [vmem:[#allocation7 + $0x68] sm:$0xff] }
 0x298   : > { %2877 = vmatpush1.msra.mxu1 %v8392_v56  ;;  %3010 = vmatpush1.msra.mxu0 %v10261_v60  ;;  %v8404_v56 = vld [vmem:[#allocation7 + $0x60] sm:$0xff] }
 0x299   : > { %2878 = vmatprep.subr.mxu1 %v8393_v18  ;;  %2712 = vmatmul.mubr.f32.gmra.mxu1 %v10397_v22  ;;  %v8398_v22 = vld [vmem:[#allocation7 + $0xa8] sm:$0xff] }
 0x29a   : > { %v10608_v8 = vpop.f32.mrf.mxu0  ;;  %2879 = vmatpush1.msra.mxu1 %v8394_v38  ;;  %2716 = vmatprep.mubr.f32.mxu1 %v10401_v9  ;;  %v8405_v38 = vld [vmem:[#allocation7 + $0x50] sm:$0xff] }
 0x29b   : > { %2880 = vmatprep.subr.mxu1 %v8395_v16  ;;  %6659 = vmatprep.subr.mxu0 %v10271_v15  ;;  %v8400_v15 = vld [vmem:[#allocation7 + $0x90] sm:$0xff]  ;;  %v8406_v16 = vld [vmem:[#allocation7 + $0x48] sm:$0xff] }
 0x29c   : > { %v10612_v19 = vpop.f32.mrf.mxu0  ;;  %2881 = vmatpush1.msra.mxu1 %v8396_v5  ;;  %v13965_v5 = vld [vmem:[#allocation62_spill] sm:$0xff] }
 0x29d   : > { %2882 = vmatprep.subr.mxu1 %v8397_v20  ;;  %2717 = vmatmul.mubr.f32.gmra.mxu1 %v10406_v31  ;;  %v8408_v20 = vld [vmem:[#allocation7 + $0x30] sm:$0xff] }
 0x29e   : > { %v10615_v60 = vpop.f32.mrf.mxu1  ;;  %2883 = vmatpush1.msra.mxu1 %v8398_v22  ;;  %2721 = vmatprep.mubr.f32.mxu1 %v10413_v6 }
 0x29f   : > { %2884 = vmatprep.subr.mxu1 %v8399_v27  ;;  %v8409_v27 = vld [vmem:[#allocation7 + $0x20] sm:$0xff]  ;;  %v1852_v58 = vadd.f32 %v10615_v60, %v13975_v30 }
 0x2a0   : > { %v10618_v9 = vpop.f32.mrf.mxu0  ;;  %v1853_v36 = vpop.f32.mrf.mxu1  ;;  %2885 = vmatpush1.msra.mxu1 %v8400_v15 }
 0x2a1   : > { %v1854_v28 = vadd.f32 %v1853_v36, %v10209_v26  ;;  %2886 = vmatprep.subr.mxu1 %v8401_v40  ;;  %2722 = vmatmul.mubr.f32.gmra.mxu1 %v10415_v23  ;;  %v13966_v36 = vld [vmem:[#allocation106_spill] sm:$0xff] }
 0x2a2   : > { %v10622_v31 = vpop.f32.mrf.mxu0  ;;  %v10624_v63 = vpop.f32.mrf.mxu1  ;;  %2887 = vmatpush1.msra.mxu1 %v8402_v34  ;;  %2726 = vmatprep.mubr.f32.mxu1 %v10420_v48  ;;  %v8407_v48 = vld [vmem:[#allocation7 + $0x38] sm:$0xff]  ;;  %v8412_v34 = vld [vmem:[#allocation7] sm:$0xff] }
 0x2a3   : > { %v1967_v6 = vadd.f32 %v10518_v39, %v1854_v28  ;;  %2888 = vmatprep.subr.mxu1 %v8403_v7  ;;  %v8410_v28 = vld [vmem:[#allocation7 + $0x18] sm:$0xff]  ;;  %v8413_v7 = vld [vmem:[#allocation7 + $0x2f0] sm:$0xff]  ;;  %v1858_v60 = vadd.f32 %v10624_v63, %v13975_v30 }
 0x2a4   : > { %v1859_v11 = vpop.f32.mrf.mxu1  ;;  %2889 = vmatpush1.msra.mxu1 %v8404_v56  ;;  %v10628_v18 = vpop.f32.mrf.mxu0 }
 0x2a5   : > { %8045 = vtanh.f32 %v1967_v6  ;;  %2890 = vmatprep.subr.mxu1 %v8405_v38  ;;  %2727 = vmatmul.mubr.f32.gmra.mxu1 %v10422_v32  ;;  %v8411_v32 = vld [vmem:[#allocation7 + $0x8] sm:$0xff] }
 0x2a6   : > { %v10631_v23 = vpop.f32.mrf.mxu1  ;;  %2891 = vmatpush1.msra.mxu1 %v8406_v16  ;;  %2731 = vmatprep.mubr.f32.mxu1 %v13965_v5  ;;  %v6535_v22 = vpop.f32.mrf.mxu0  ;;  %v8414_v38 = vld [vmem:[#allocation7 + $0x2e8] sm:$0xff]  ;;  %v8415_v16 = vld [vmem:[#allocation7 + $0x2d8] sm:$0xff] }
 0x2a7   : > { %2892 = vmatprep.subr.mxu1 %v8407_v48  ;;  %v13967_v48 = vld [vmem:[#allocation42_spill] sm:$0xff]  ;;  %v1864_v63 = vadd.f32 %v10631_v23, %v13975_v30 }
 0x2a8   : > { %v1865_v39 = vpop.f32.mrf.mxu1  ;;  %2893 = vmatpush1.msra.mxu1 %v8408_v20  ;;  %v6537_v6 = vpop.f32.mrf.mxu0 }
 0x2a9   : > { %2894 = vmatprep.subr.mxu1 %v8409_v27  ;;  %2732 = vmatmul.mubr.f32.gmra.mxu1 %v13966_v36  ;;  %v13968_v27 = vld [vmem:[#allocation36_spill] sm:$0xff] }
 0x2aa   : > { %v10635_v15 = vpop.f32.mrf.mxu1  ;;  %2895 = vmatpush1.msra.mxu1 %v8410_v28  ;;  %v6538_v20 = vpop.f32.mrf.mxu0 }
 0x2ab   : > { %2896 = vmatprep.subr.mxu1 %v8411_v32  ;;  %v13970_v32 = vld [vmem:[#allocation37_spill] sm:$0xff] }
 0x2ac   : > { %v10637_v40 = vpop.f32.mrf.mxu1  ;;  %2897 = vmatpush1.msra.mxu1 %v8412_v34  ;;  %v13971_v34 = vld [vmem:[#allocation44_spill] sm:$0xff] }
 0x2ad   : > { %2898 = vmatprep.subr.mxu1 %v8413_v7  ;;  %v1872_v23 = vadd.f32 %v10637_v40, %v10209_v26  ;;  %v13993_v40 = vld [vmem:[#allocation67_spill] sm:$0xff] }
 0x2ae   : > { %v10639_v56 = vpop.f32.mrf.mxu1  ;;  %2899 = vmatpush2.msra.mxu1 %v8414_v38  ;;  %v13972_v38 = vld [vmem:[#allocation38_spill] sm:$0xff] }
 0x2af   : > { %2900 = vmatprep.subr.mxu1 %v8415_v16  ;;  %v6540_v16 = vpop.f32.mrf.mxu0 }
 0x2b0   : > { %v10641_v5 = vpop.f32.mrf.mxu1  ;;  %2901 = vmatpush2.msra.mxu1 %v13967_v48 }
 0x2b1   : > { %2902 = vmatprep.subr.mxu1 %v13968_v27  ;;  %v13974_v27 = vld [vmem:[#allocation39_spill] sm:$0xff]  ;;  %v6541_v2 = vpop.f32.mrf.mxu0 }
 0x2b2   : > { %v10645_v36 = vpop.eup %8045  ;;  %v10647_v28 = vpop.f32.mrf.mxu1  ;;  %2903 = vmatpush2.msra.mxu1 %v13970_v32  ;;  %v1860_v32 = vadd.f32 %v1859_v11, %v10209_v26  ;;  %v1866_v11 = vadd.f32 %v1865_v39, %v10209_v26 }
 0x2b3   : > { %13969 = vst [vmem:[#allocation80_spill] sm:$0xff] %v10645_v36  ;;  %2930 = vmatprep.mubr.f32.mxu1 %v10645_v36  ;;  %2904 = vmatprep.subr.mxu1 %v13971_v34  ;;  %v13977_v34 = vld [vmem:[#allocation40_spill] sm:$0xff]  ;;  %v6543_v59 = vpop.f32.mrf.mxu0 }
 0x2b4   : > { %v10652_v7 = vpop.f32.mrf.mxu1  ;;  %2905 = vmatpush2.msra.mxu1 %v13972_v38  ;;  %v13978_v38 = vld [vmem:[#allocation141_spill] sm:$0xff]  ;;  %v1979_v39 = vadd.f32 %v10558_v52, %v1866_v11  ;;  %v1977_v52 = vadd.f32 %v10550_v10, %v1864_v63  ;;  %v1985_v10 = vadd.f32 %v10574_v12, %v1872_v23  ;;  %v1870_v12 = vadd.f32 %v10635_v15, %v13975_v30 }
 0x2b5   : > { %2906 = vmatprep.subr.mxu1 %v13973_v50  ;;  %v13979_v50 = vld [vmem:[#allocation41_spill] sm:$0xff] }
 0x2b6   : > { %v10656_v48 = vpop.f32.mrf.mxu1  ;;  %2907 = vmatpush2.msra.mxu1 %v13974_v27  ;;  %v1965_v27 = vadd.f32 %v10510_v62, %v1852_v58  ;;  %v13983_v62 = vld [vmem:[#allocation45_spill] sm:$0xff]  ;;  %v1971_v58 = vadd.f32 %v10530_v44, %v1858_v60  ;;  %v13987_v44 = vld [vmem:[#allocation46_spill] sm:$0xff] }
 0x2b7   : > { %2908 = vmatprep.subr.mxu1 %v13976_v24  ;;  %v1973_v24 = vadd.f32 %v10538_v29, %v1860_v32  ;;  %v13984_v29 = vld [vmem:[#allocation59_spill] sm:$0xff] }
 0x2b8   : > { %v10663_v36 = vpop.f32.mrf.mxu1  ;;  %2909 = vmatpush2.msra.mxu1 %v13977_v34  ;;  %v13981_v34 = vld [vmem:[#allocation43_spill] sm:$0xff]  ;;  %8047 = vtanh.f32 %v1965_v27 }
 0x2b9   : > { %2910 = vmatprep.subr.mxu1 %v13978_v38  ;;  %v6533_v38 = vadd.f32 %v10622_v31, %v10618_v9  ;;  %8049 = vtanh.f32 %v1973_v24  ;;  %v13985_v9 = vld [vmem:[#allocation144_spill] sm:$0xff]  ;;  %v6544_v31 = vpop.f32.mrf.mxu0  ;;  %v13988_v24 = vld [vmem:[#allocation47_spill] sm:$0xff] }
 0x2ba   : > { %v10667_v51 = vpop.f32.mrf.mxu1  ;;  %2911 = vmatpush2.msra.mxu1 %v13979_v50  ;;  %v13982_v50 = vld [vmem:[#allocation57_spill] sm:$0xff]  ;;  %8051 = vtanh.f32 %v1971_v58  ;;  %v6542_v58 = vadd.f32 %v6541_v2, %v6540_v16  ;;  %v13996_v16 = vld [vmem:[#allocation71_spill] sm:$0xff] }
 0x2bb   : > { %2912 = vmatprep.subr.mxu1 %v13980_v37  ;;  %v6536_v37 = vadd.f32 %v6535_v22, %v10628_v18  ;;  %v6539_v18 = vadd.f32 %v6538_v20, %v6537_v6  ;;  %8053 = vtanh.f32 %v1979_v39  ;;  %v13991_v20 = vld [vmem:[#allocation65_spill] sm:$0xff] }
 0x2bc   : > { %v10676_v21 = vpop.f32.mrf.mxu1  ;;  %2913 = vmatpush2.msra.mxu1 %v13981_v34  ;;  %v2078_v34 = vadd.f32 %v6533_v38, %v10410_v57  ;;  %v13989_v38 = vld [vmem:[#allocation63_spill] sm:$0xff]  ;;  %v2093_v2 = vadd.f32 %v6542_v58, %v10410_v57 }
 0x2bd   : > { %2914 = vmatprep.subr.mxu1 %v13982_v50  ;;  %v13986_v50 = vld [vmem:[#allocation61_spill] sm:$0xff]  ;;  %v2083_v22 = vadd.f32 %v6536_v37, %v10410_v57  ;;  %v2088_v37 = vadd.f32 %v6539_v18, %v10410_v57  ;;  %v14000_v58 = vld [vmem:[#allocation75_spill] sm:$0xff] }
 0x2be   : > { %2915 = vmatpush2.msra.mxu1 %v13983_v62  ;;  %v6546_v62 = vpop.f32.mrf.mxu0 }
 0x2bf   : > { %2916 = vmatprep.subr.mxu1 %v13984_v29 }
 0x2c0   : > { %v7385_v32 = vpop.f32.mrf.mxu1  ;;  %2917 = vmatpush2.msra.mxu1 %v13985_v9  ;;  %v13990_v9 = vld [vmem:[#allocation49_spill] sm:$0xff]  ;;  %v6547_v63 = vpop.f32.mrf.mxu0 }
 0x2c1   : > { %2918 = vmatprep.subr.mxu1 %v13986_v50  ;;  %v2188_v29 = vadd.f32 %v7385_v32, %v2083_v22  ;;  %v13994_v32 = vld [vmem:[#allocation69_spill] sm:$0xff]  ;;  %v13997_v22 = vld [vmem:[#allocation54_spill] sm:$0xff] }
 0x2c2   : > { %v2182_v27 = vpop.f32.mrf.mxu1  ;;  %2919 = vmatpush2.msra.mxu1 %v13987_v44  ;;  %v6545_v44 = vadd.f32 %v6544_v31, %v6543_v59  ;;  %v13998_v59 = vld [vmem:[#allocation73_spill] sm:$0xff]  ;;  %v1878_v31 = vadd.f32 %v10641_v5, %v10209_v26 }
 0x2c3   : > { %v2183_v60 = vadd.f32 %v2182_v27, %v2078_v34  ;;  %2920 = vmatprep.subr.mxu1 %v13988_v24  ;;  %v13992_v34 = vld [vmem:[#allocation51_spill] sm:$0xff]  ;;  %v13995_v27 = vld [vmem:[#allocation52_spill] sm:$0xff]  ;;  %v6549_v24 = vpop.f32.mrf.mxu0 }
 0x2c4   : > { %v7388_v11 = vpop.f32.mrf.mxu1  ;;  %2921 = vmatpush2.msra.mxu1 %v13989_v38  ;;  %v2098_v15 = vadd.f32 %v6545_v44, %v10410_v57  ;;  %v13999_v38 = vld [vmem:[#allocation56_spill] sm:$0xff] }
 0x2c5   : > { %8055 = vtanh.f32 %v2183_v60  ;;  %2922 = vmatprep.subr.mxu1 %v13990_v9  ;;  %v10709_v18 = vpop.eup %8047  ;;  %v6548_v9 = vadd.f32 %v6547_v63, %v6546_v62  ;;  %v14001_v62 = vld [vmem:[#allocation58_spill] sm:$0xff]  ;;  %v14002_v63 = vld [vmem:[#allocation64_spill] sm:$0xff] }
 0x2c6   : > { %v2192_v6 = vpop.f32.mrf.mxu1  ;;  %2923 = vmatpush2.msra.mxu1 %v13991_v20  ;;  %8057 = vtanh.f32 %v1977_v52  ;;  %v10714_v60 = vpop.eup %8049  ;;  %v2198_v52 = vadd.f32 %v7388_v11, %v2093_v2  ;;  %v1983_v11 = vadd.f32 %v10568_v35, %v1870_v12  ;;  %v1876_v35 = vadd.f32 %v10639_v56, %v13975_v30  ;;  %v14003_v56 = vld [vmem:[#allocation107_spill] sm:$0xff]  ;;  %v14004_v12 = vld [vmem:[#allocation66_spill] sm:$0xff] }
 0x2c7   : > { %2924 = vmatprep.subr.mxu1 %v13992_v34  ;;  %8059 = vtanh.f32 %v2188_v29  ;;  %v2193_v39 = vadd.f32 %v2192_v6, %v2088_v37  ;;  %v10724_v29 = vpop.eup %8051  ;;  %v6550_v20 = vpop.f32.mrf.mxu0  ;;  %v1991_v34 = vadd.f32 %v10584_v17, %v1878_v31  ;;  %v14007_v31 = vld [vmem:[#allocation68_spill] sm:$0xff] }
 0x2c8   : > { %2925 = vmatpush2.msra.mxu1 %v13993_v40  ;;  %v7391_v50 = vpop.f32.mrf.mxu1  ;;  %8061 = vtanh.f32 %v1985_v10  ;;  %v10728_v6 = vpop.eup %8053  ;;  %v1884_v10 = vadd.f32 %v10652_v7, %v10209_v26  ;;  %v2103_v40 = vadd.f32 %v6548_v9, %v10410_v57  ;;  %v6551_v44 = vadd.f32 %v6550_v20, %v6549_v24  ;;  %v8419_v9 = vld [vmem:[#allocation7 + $0x3a0] sm:$0xff] }
 0x2c9   : > { %2926 = vmatprep.subr.mxu1 %v13994_v32  ;;  %8063 = vtanh.f32 %v2193_v39  ;;  %v6552_v39 = vpop.f32.mrf.mxu0  ;;  %v1989_v2 = vadd.f32 %v10579_v0, %v1876_v35  ;;  %v14006_v0 = vld [vmem:[#allocation60_spill] sm:$0xff]  ;;  %v8420_v35 = vld [vmem:[#allocation7 + $0x388] sm:$0xff] }
 0x2ca   : > { %2927 = vmatpush2.msra.mxu1 %v13995_v27  ;;  %v2202_v23 = vpop.f32.mrf.mxu1  ;;  %8065 = vtanh.f32 %v2198_v52  ;;  %v2208_v7 = vadd.f32 %v7391_v50, %v2103_v40  ;;  %v1882_v50 = vadd.f32 %v10647_v28, %v13975_v30  ;;  %v14005_v52 = vld [vmem:[#allocation109_spill] sm:$0xff]  ;;  %v8421_v40 = vld [vmem:[#allocation7 + $0x370] sm:$0xff] }
 0x2cb   : > { %2928 = vmatprep.subr.mxu1 %v13996_v16  ;;  %v2203_v5 = vadd.f32 %v2202_v23, %v2098_v15  ;;  %8067 = vtanh.f32 %v1983_v11  ;;  %v1997_v16 = vadd.f32 %v10594_v45, %v1884_v10  ;;  %v2108_v45 = vadd.f32 %v6551_v44, %v10410_v57  ;;  %v14016_v10 = vld [vmem:[#allocation76_spill] sm:$0xff]  ;;  %v14018_v44 = vld [vmem:[#allocation77_spill] sm:$0xff] }
 0x2cc   : > { %2929 = vmatpush2.msra.mxu1 %v13997_v22  ;;  %v7394_v32 = vpop.f32.mrf.mxu1  ;;  %v1888_v11 = vadd.f32 %v10656_v48, %v13975_v30 }
 0x2cd   : > { %2931 = vmatmul.mubr.f32.vlgmr.msra.gmra.mxu1 %v10709_v18  ;;  %7439 = vmatprep.subr.mxu1 %v13998_v59  ;;  %8069 = vtanh.f32 %v2203_v5 }
 0x2ce   : > { %2936 = vmatprep.mubr.f32.mxu1 %v10714_v60  ;;  %7440 = vmatpush3.msra.mxu1 %v13998_v59  ;;  %8071 = vtanh.f32 %v1991_v34  ;;  %v2212_v24 = vpop.f32.mrf.mxu1  ;;  %v14014_v34 = vld [vmem:[#allocation74_spill] sm:$0xff] }
 0x2cf   : > { %7441 = vmatprep.subr.mxu1 %v13999_v38  ;;  %8073 = vtanh.f32 %v2208_v7  ;;  %v2213_v23 = vadd.f32 %v2212_v24, %v2108_v45  ;;  %v8422_v7 = vld [vmem:[#allocation7 + $0x358] sm:$0xff]  ;;  %v3371_v45 = vld [vmem:[#allocation8 + $0x168] sm:$0xff] }
 0x2d0   : > { %7442 = vmatpush3.msra.mxu1 %v13999_v38  ;;  %8075 = vtanh.f32 %v1989_v2  ;;  %v14019_v2 = vld [vmem:[#allocation117_spill] sm:$0xff] }
 0x2d1   : > { %2937 = vmatmul.mubr.f32.gmra.mxu1 %v10724_v29  ;;  %7443 = vmatprep.subr.mxu1 %v14000_v58  ;;  %8077 = vtanh.f32 %v1997_v16  ;;  %v14020_v16 = vld [vmem:[#allocation80_spill] sm:$0xff] }
 0x2d2   : > { %v10732_v37 = vpop.eup %8055  ;;  %2942 = vmatprep.mubr.f32.mxu1 %v10728_v6  ;;  %7444 = vmatpush3.msra.mxu1 %v14000_v58  ;;  %8079 = vtanh.f32 %v2213_v23  ;;  %v10890_v23 = vld [vmem:[#allocation8 + $0x438] sm:$0xff] }
 0x2d3   : > { %3044 = vmatmul.mubr.f32.vlgmr.msra.gmra.mxu0 %v10732_v37  ;;  %7445 = vmatprep.subr.mxu1 %v14001_v62  ;;  %v10746_v17 = vpop.eup %8057 }
 0x2d4   : > { %6660 = vmatpush3.msra.mxu0 %v14002_v63  ;;  %3049 = vmatprep.mubr.f32.mxu0 %v13686_v49  ;;  %v10750_v27 = vpop.eup %8059 }
 0x2d5   : > { %6661 = vmatprep.subr.mxu0 %v14003_v56  ;;  %7446 = vmatpush3.msra.mxu1 %v14001_v62  ;;  %v10760_v22 = vpop.eup %8061  ;;  %v14015_v62 = vld [vmem:[#allocation114_spill] sm:$0xff] }
 0x2d6   : > { %6662 = vmatpush3.msra.mxu0 %v10440_v4  ;;  %2943 = vmatmul.mubr.f32.gmra.mxu1 %v10746_v17  ;;  %v6553_v4 = vpop.f32.mrf.mxu0  ;;  %v10766_v59 = vpop.eup %8063 }
 0x2d7   : > { %3050 = vmatmul.mubr.f32.gmra.mxu0 %v10750_v27  ;;  %6663 = vmatprep.subr.mxu0 %v10444_v54  ;;  %v1890_v54 = vadd.f32 %v10663_v36, %v10209_v26  ;;  %v6554_v28 = vadd.f32 %v6553_v4, %v6552_v39  ;;  %v1995_v36 = vadd.f32 %v10590_v25, %v1882_v50  ;;  %v10780_v15 = vpop.eup %8065  ;;  %v14017_v39 = vld [vmem:[#allocation116_spill] sm:$0xff]  ;;  %v14022_v4 = vld [vmem:[#allocation119_spill] sm:$0xff] }
 0x2d8   : > { %6664 = vmatpush3.msra.mxu0 %v14004_v12  ;;  %3055 = vmatprep.mubr.f32.mxu0 %v13686_v49  ;;  %v14021_v12 = vld [vmem:[#allocation79_spill] sm:$0xff]  ;;  %v8423_v50 = vld [vmem:[#allocation7 + $0x340] sm:$0xff] }
 0x2d9   : > { %6665 = vmatprep.subr.mxu0 %v14005_v52  ;;  %7447 = vmatprep.subr.mxu1 %v14006_v0  ;;  %v2003_v38 = vadd.f32 %v10603_v3, %v1890_v54  ;;  %8081 = vtanh.f32 %v1995_v36  ;;  %v14009_v3 = vld [vmem:[#allocation110_spill] sm:$0xff]  ;;  %v8424_v52 = vld [vmem:[#allocation7 + $0x328] sm:$0xff] }
 0x2da   : > { %6666 = vmatpush3.msra.mxu0 %v14007_v31  ;;  %2948 = vmatprep.mubr.f32.mxu1 %v10760_v22  ;;  %v3372_v54 = vld [vmem:[#allocation8 + $0x170] sm:$0xff] }
 0x2db   : > { %3056 = vmatmul.mubr.f32.gmra.mxu0 %v10766_v59  ;;  %6667 = vmatprep.subr.mxu0 %v10457_v14  ;;  %v14008_v14 = vld [vmem:[#allocation78_spill] sm:$0xff]  ;;  %8083 = vtanh.f32 %v2003_v38 }
 0x2dc   : > { %6668 = vmatpush3.msra.mxu0 %v10461_v1  ;;  %3061 = vmatprep.mubr.f32.mxu0 %v13686_v49  ;;  %v2113_v1 = vadd.f32 %v6554_v28, %v10410_v57  ;;  %v2001_v57 = vadd.f32 %v10599_v13, %v1888_v11  ;;  %v8417_v13 = vld [vmem:[#allocation7 + $0x3d0] sm:$0xff]  ;;  %v3362_v28 = vld [vmem:[#allocation8 + $0x120] sm:$0xff]  ;;  %v10902_v11 = vld [vmem:[#allocation8 + $0x108] sm:$0xff] }
 0x2dd   : > { %6669 = vmatprep.subr.mxu0 %v10464_v61  ;;  %7448 = vmatpush3.msra.mxu1 %v14006_v0  ;;  %v1896_v61 = vadd.f32 %v10676_v21, %v10209_v26  ;;  %v1894_v21 = vadd.f32 %v10667_v51, %v13975_v30  ;;  %v8418_v30 = vld [vmem:[#allocation7 + $0x3b8] sm:$0xff]  ;;  %v8425_v0 = vld [vmem:[#allocation7 + $0x310] sm:$0xff] }
 0x2de   : > { %6670 = vmatpush3.msra.mxu0 %v10470_v53  ;;  %7449 = vmatprep.subr.mxu1 %v14008_v14  ;;  %v10794_v53 = vpop.eup %8067  ;;  %v10865_v31 = vld [vmem:[#allocation8 + $0x470] sm:$0xff] }
 0x2df   : > { %3062 = vmatmul.mubr.f32.gmra.mxu0 %v10780_v15  ;;  %6671 = vmatprep.subr.mxu0 %v10475_v46  ;;  %v10798_v25 = vpop.eup %8069  ;;  %v2218_v46 = vadd.f32 %v7394_v32, %v2113_v1  ;;  %v2007_v51 = vadd.f32 %v10608_v8, %v1894_v21  ;;  %v14013_v8 = vld [vmem:[#allocation113_spill] sm:$0xff]  ;;  %v3360_v36 = vld [vmem:[#allocation8 + $0x110] sm:$0xff] }
 0x2e0   : > { %6672 = vmatpush3.msra.mxu0 %v10478_v47  ;;  %3067 = vmatprep.mubr.f32.mxu0 %v13686_v49  ;;  %v10802_v26 = vpop.eup %8071  ;;  %v2009_v47 = vadd.f32 %v10612_v19, %v1896_v61  ;;  %v14011_v19 = vld [vmem:[#allocation111_spill] sm:$0xff]  ;;  %v10908_v1 = vld [vmem:[#allocation8 + $0x410] sm:$0xff] }
 0x2e1   : > { %6673 = vmatprep.subr.mxu0 %v10482_v55  ;;  %7450 = vmatpush3.msra.mxu1 %v14008_v14  ;;  %v8416_v55 = vld [vmem:[#allocation7 + $0x3e8] sm:$0xff]  ;;  %8085 = vtanh.f32 %v2218_v46  ;;  %v10813_v48 = vpop.eup %8073  ;;  %v10900_v14 = vld [vmem:[#allocation8 + $0x420] sm:$0xff]  ;;  %v10905_v61 = vld [vmem:[#allocation8 + $0xf8] sm:$0xff] }
 0x2e2   : > { %6674 = vmatpush3.msra.mxu0 %v14009_v3  ;;  %2949 = vmatmul.mubr.f32.gmra.mxu1 %v10794_v53  ;;  %8087 = vtanh.f32 %v2001_v57  ;;  %v10918_v46 = vld [vmem:[#allocation8 + $0xe0] sm:$0xff]  ;;  %v10927_v57 = vld [vmem:[#allocation8 + $0xc8] sm:$0xff]  ;;  %v10936_v21 = vld [vmem:[#allocation8 + $0x3f0] sm:$0xff] }
 0x2e3   : > { %3068 = vmatmul.mubr.f32.gmra.mxu0 %v10798_v25  ;;  %6675 = vmatprep.subr.mxu0 %v10492_v33  ;;  %v10817_v33 = vpop.eup %8075  ;;  %8089 = vtanh.f32 %v2009_v47  ;;  %v10930_v47 = vld [vmem:[#allocation8 + $0x3f8] sm:$0xff] }
 0x2e4   : > { %7451 = vmatprep.subr.mxu1 %v8416_v55  ;;  %2954 = vmatprep.mubr.f32.mxu1 %v10802_v26  ;;  %8091 = vtanh.f32 %v2007_v51  ;;  %v10951_v51 = vld [vmem:[#allocation8 + $0x98] sm:$0xff] }
 0x2e5   : > { %6676 = vmatpush3.msra.mxu0 %v10496_v41  ;;  %7452 = vmatpush3.msra.mxu1 %v8416_v55  ;;  %v10820_v41 = vpop.eup %8077  ;;  %v10934_v55 = vld [vmem:[#allocation8 + $0xc0] sm:$0xff] }
 0x2e6   : > { %6677 = vmatprep.subr.mxu0 %v10499_v43  ;;  %7453 = vmatprep.subr.mxu1 %v8417_v13  ;;  %v14010_v43 = vld [vmem:[#allocation70_spill] sm:$0xff]  ;;  %v10828_v20 = vpop.eup %8079 }
 0x2e7   : > { %3073 = vmatprep.mubr.f32.mxu0 %v13686_v49  ;;  %6678 = vmatpush3.msra.mxu0 %v10503_v42  ;;  %v14012_v42 = vld [vmem:[#allocation72_spill] sm:$0xff]  ;;  %v10832_v5 = vpop.eup %8081 }
 0x2e8   : > { %7454 = vmatpush3.msra.mxu1 %v8417_v13  ;;  %3074 = vmatmul.mubr.f32.gmra.mxu0 %v10813_v48  ;;  %v10835_v58 = vpop.eup %8083 }
 0x2e9   : > { %2955 = vmatmul.mubr.f32.gmra.mxu1 %v10817_v33  ;;  %6679 = vmatprep.subr.mxu0 %v14010_v43  ;;  %v10954_v43 = vld [vmem:[#allocation8 + $0x3d8] sm:$0xff] }
 0x2ea   : > { %7455 = vmatprep.subr.mxu1 %v8418_v30  ;;  %2960 = vmatprep.mubr.f32.mxu1 %v10820_v41 }
 0x2eb   : > { %6680 = vmatpush3.msra.mxu0 %v14011_v19  ;;  %7456 = vmatpush3.msra.mxu1 %v8418_v30  ;;  %v10958_v30 = vld [vmem:[#allocation8 + $0x90] sm:$0xff]  ;;  %v10960_v19 = vld [vmem:[#allocation8 + $0x3c8] sm:$0xff] }
 0x2ec   : > { %6681 = vmatprep.subr.mxu0 %v14012_v42  ;;  %7457 = vmatprep.subr.mxu1 %v8419_v9 }
 0x2ed   : > { %3079 = vmatprep.mubr.f32.mxu0 %v13686_v49  ;;  %6682 = vmatpush3.msra.mxu0 %v14013_v8  ;;  %v10971_v8 = vld [vmem:[#allocation8 + $0x78] sm:$0xff] }
 0x2ee   : > { %7458 = vmatpush3.msra.mxu1 %v8419_v9  ;;  %3080 = vmatmul.mubr.f32.gmra.mxu0 %v10828_v20  ;;  %v10842_v63 = vpop.eup %8085  ;;  %v10965_v9 = vld [vmem:[#allocation8 + $0x80] sm:$0xff] }
 0x2ef   : > { %2961 = vmatmul.mubr.f32.gmra.mxu1 %v10832_v5  ;;  %6683 = vmatprep.subr.mxu0 %v14014_v34  ;;  %v10846_v32 = vpop.eup %8087  ;;  %v10980_v34 = vld [vmem:[#allocation8 + $0x3a8] sm:$0xff] }
 0x2f0   : > { %7459 = vmatprep.subr.mxu1 %v8420_v35  ;;  %2966 = vmatprep.mubr.f32.mxu1 %v10835_v58  ;;  %v10849_v56 = vpop.eup %8089 }
 0x2f1   : > { %6684 = vmatpush3.msra.mxu0 %v14015_v62  ;;  %7460 = vmatpush3.msra.mxu1 %v8420_v35  ;;  %v10858_v24 = vpop.eup %8091  ;;  %v10983_v35 = vld [vmem:[#allocation8 + $0x60] sm:$0xff]  ;;  %v10986_v62 = vld [vmem:[#allocation8 + $0x398] sm:$0xff] }
 0x2f2   : > { %6685 = vmatprep.subr.mxu0 %v14016_v10  ;;  %7461 = vmatprep.subr.mxu1 %v8421_v40  ;;  %14023 = vst [vmem:[#allocation120_spill] sm:$0xff] %v10983_v35  ;;  %14024 = vst [vmem:[#allocation81_spill] sm:$0xff] %v10986_v62 }
 0x2f3   : > { %3085 = vmatprep.mubr.f32.mxu0 %v13686_v49  ;;  %6686 = vmatpush3.msra.mxu0 %v14017_v39  ;;  %v10997_v39 = vld [vmem:[#allocation8 + $0x48] sm:$0xff] }
 0x2f4   : > { %7462 = vmatpush3.msra.mxu1 %v8421_v40  ;;  %3086 = vmatmul.mubr.f32.gmra.mxu0 %v10842_v63  ;;  %v10991_v40 = vld [vmem:[#allocation8 + $0x50] sm:$0xff]  ;;  %14027 = vst [vmem:[#allocation105_spill] sm:$0xff] %v10997_v39 }
 0x2f5   : > { %2967 = vmatmul.mubr.f32.gmra.mxu1 %v10846_v32  ;;  %6687 = vmatprep.subr.mxu0 %v14018_v44  ;;  %14025 = vst [vmem:[#allocation122_spill] sm:$0xff] %v10991_v40  ;;  %v11006_v44 = vld [vmem:[#allocation8 + $0x378] sm:$0xff] }
 0x2f6   : > { %7463 = vmatprep.subr.mxu1 %v8422_v7  ;;  %2972 = vmatprep.mubr.f32.mxu1 %v10849_v56  ;;  %14030 = vst [vmem:[#allocation125_spill] sm:$0xff] %v11006_v44 }
 0x2f7   : > { %6688 = vmatpush3.msra.mxu0 %v14019_v2  ;;  %3156 = vmatprep.mubr.f32.mxu0 %v14020_v16  ;;  %v11014_v2 = vld [vmem:[#allocation8 + $0x30] sm:$0xff]  ;;  %v11017_v16 = vld [vmem:[#allocation8 + $0x368] sm:$0xff] }
 0x2f8   : > { %7464 = vmatpush3.msra.mxu1 %v8422_v7  ;;  %6689 = vmatprep.subr.mxu0 %v14021_v12  ;;  %v11011_v7 = vld [vmem:[%s13211_s6] sm:$0x7]  ;;  %14031 = vst [vmem:[#allocation84_spill] sm:$0xff] %v11014_v2  ;;  %14032 = vst [vmem:[#allocation126_spill] sm:$0xff] %v11017_v16  ;;  %v14033_v12 = vld [vmem:[#allocation102_spill] sm:$0xff] }
 0x2f9   : > { %7465 = vmatprep.subr.mxu1 %v8423_v50  ;;  %6690 = vmatpush3.msra.mxu0 %v14022_v4 }
 0x2fa   : > { %7466 = vmatpush3.msra.mxu1 %v8423_v50  ;;  %3157 = vmatmul.mubr.f32.vlgmr.msra.gmra.mxu0 %v10709_v18  ;;  %v3369_v18 = vld [vmem:[#allocation8 + $0x158] sm:$0xff]  ;;  %v11021_v50 = vrot.slane %v11011_v7, %v14033_v12  ;;  %v11059_v12 = vld [vmem:[#allocation8 + $0x330] sm:$0xff] }
 0x2fb   : > { %2973 = vmatmul.mubr.f32.gmra.mxu1 %v10858_v24  ;;  %7467 = vmatprep.subr.mxu1 %v8424_v52  ;;  %14043 = vst [vmem:[#allocation89_spill] sm:$0xff] %v11059_v12 }
 0x2fc   : > { %3161 = vmatprep.mubr.f32.mxu0 %v10714_v60  ;;  %7468 = vmatpush3.msra.mxu1 %v8424_v52  ;;  %v3368_v60 = vld [vmem:[#allocation8 + $0x150] sm:$0xff]  ;;  %v11029_v52 = vld [vmem:[#allocation8 + $0x360] sm:$0xff] }
 0x2fd   : > { %7471 = vmatprep.mubr.f32.mxu1 %v10732_v37  ;;  %7469 = vmatprep.subr.mxu1 %v8425_v0  ;;  %v3366_v37 = vld [vmem:[#allocation8 + $0x140] sm:$0xff]  ;;  %v10898_v38 = vpop.f32.mrf.mxu0  ;;  %14035 = vst [vmem:[#allocation103_spill] sm:$0xff] %v11029_v52 }
 0x2fe   : > { %7470 = vmatpush3.msra.mxu1 %v8425_v0  ;;  %3162 = vmatmul.mubr.f32.gmra.mxu0 %v10724_v29  ;;  %v10872_v29 = vld [vmem:[#allocation8 + $0x468] sm:$0xff]  ;;  %v11032_v0 = vld [vmem:[#allocation8 + $0x18] sm:$0xff] }
 0x2ff   : > { %7472 = vmatmul.mubr.f32.vlgmr.msra.gmra.mxu1 %v10750_v27  ;;  %3166 = vmatprep.mubr.f32.mxu0 %v10728_v6  ;;  %v10876_v27 = vld [vmem:[#allocation8 + $0x458] sm:$0xff]  ;;  %v10920_v3 = vpop.f32.mrf.mxu0  ;;  %14036 = vst [vmem:[#allocation128_spill] sm:$0xff] %v11032_v0 }
 0x300   : > { %7474 = vmatprep.mubr.f32.mxu1 %v10766_v59  ;;  %3487 = vmatprep.subr.mxu0 %v3372_v54  ;;  %v3365_v6 = vld [vmem:[#allocation8 + $0x138] sm:$0xff]  ;;  %v10882_v59 = vld [vmem:[#allocation8 + $0x450] sm:$0xff] }
 0x301   : > { %3488 = vmatpush1.msra.mxu0 %v3371_v45  ;;  %3600 = vmatprep.subr.mxu1 %v10865_v31  ;;  %v10940_v13 = vpop.f32.mrf.mxu0  ;;  %v11035_v54 = vld [vmem:[#allocation8 + $0x350] sm:$0xff]  ;;  %v11038_v45 = vld [vmem:[#allocation8 + $0x8] sm:$0xff] }
 0x302   : > { %3167 = vmatmul.mubr.f32.gmra.mxu0 %v10746_v17  ;;  %3489 = vmatprep.subr.mxu0 %v3369_v18  ;;  %v3363_v17 = vld [vmem:[#allocation8 + $0x128] sm:$0xff]  ;;  %14037 = vst [vmem:[#allocation86_spill] sm:$0xff] %v11035_v54  ;;  %14038 = vst [vmem:[#allocation129_spill] sm:$0xff] %v11038_v45 }
 0x303   : > { %7475 = vmatmul.mubr.f32.gmra.mxu1 %v10780_v15  ;;  %3171 = vmatprep.mubr.f32.mxu0 %v10760_v22  ;;  %v10886_v22 = vld [vmem:[#allocation8 + $0x440] sm:$0xff]  ;;  %v10894_v15 = vld [vmem:[#allocation8 + $0x428] sm:$0xff]  ;;  %v10963_v42 = vpop.f32.mrf.mxu0 }
 0x304   : > { %7477 = vmatprep.mubr.f32.mxu1 %v10798_v25  ;;  %3490 = vmatpush1.msra.mxu0 %v3368_v60  ;;  %v10914_v25 = vld [vmem:[#allocation8 + $0x408] sm:$0xff]  ;;  %v11044_v60 = vld [vmem:[#allocation8] sm:$0xff] }
 0x305   : > { %3491 = vmatprep.subr.mxu0 %v3366_v37  ;;  %3601 = vmatpush1.msra.mxu1 %v10872_v29  ;;  %v10988_v10 = vpop.f32.mrf.mxu0  ;;  %v11041_v18 = vld [vmem:[#allocation8 + $0x348] sm:$0xff]  ;;  %14040 = vst [vmem:[#allocation131_spill] sm:$0xff] %v11044_v60 }
 0x306   : > { %3172 = vmatmul.mubr.f32.gmra.mxu0 %v10794_v53  ;;  %3602 = vmatprep.subr.mxu1 %v10876_v27  ;;  %v10911_v53 = vld [vmem:[#allocation8 + $0xf0] sm:$0xff]  ;;  %14039 = vst [vmem:[#allocation87_spill] sm:$0xff] %v11041_v18 }
 0x307   : > { %7478 = vmatmul.mubr.f32.gmra.mxu1 %v10813_v48  ;;  %3176 = vmatprep.mubr.f32.mxu0 %v10802_v26  ;;  %v10923_v26 = vld [vmem:[#allocation8 + $0xd8] sm:$0xff]  ;;  %v10942_v48 = vld [vmem:[#allocation8 + $0xb0] sm:$0xff]  ;;  %v11023_v4 = vpop.f32.mrf.mxu0 }
 0x308   : > { %7480 = vmatprep.mubr.f32.mxu1 %v10828_v20  ;;  %3492 = vmatpush1.msra.mxu0 %v3365_v6  ;;  %v10968_v20 = vld [vmem:[#allocation8 + $0x3c0] sm:$0xff]  ;;  %v11049_v6 = vld [vmem:[#allocation8 + $0x338] sm:$0xff] }
 0x309   : > { %3493 = vmatprep.subr.mxu0 %v3363_v17  ;;  %3603 = vmatpush1.msra.mxu1 %v10882_v59  ;;  %14041 = vst [vmem:[#allocation88_spill] sm:$0xff] %v11049_v6  ;;  %v2475_v17 = vadd.f32 %v10920_v3, %v11021_v50  ;;  %v11068_v3 = vld [vmem:[#allocation8 + $0x2d8] sm:$0xff] }
 0x30a   : > { %3177 = vmatmul.mubr.f32.gmra.mxu0 %v10817_v33  ;;  %3604 = vmatprep.subr.mxu1 %v10886_v22  ;;  %v10945_v33 = vld [vmem:[#allocation8 + $0xa8] sm:$0xff]  ;;  %14046 = vst [vmem:[#allocation135_spill] sm:$0xff] %v11068_v3 }
 0x30b   : > { %7481 = vmatmul.mubr.f32.gmra.mxu1 %v10842_v63  ;;  %3181 = vmatprep.mubr.f32.mxu0 %v10820_v41  ;;  %v10948_v41 = vld [vmem:[#allocation8 + $0x3e0] sm:$0xff]  ;;  %v10994_v63 = vld [vmem:[#allocation8 + $0x390] sm:$0xff] }
 0x30c   : > { %3494 = vmatpush1.msra.mxu0 %v3362_v28  ;;  %3605 = vmatpush1.msra.mxu1 %v10890_v23  ;;  %14026 = vst [vmem:[#allocation82_spill] sm:$0xff] %v10994_v63  ;;  %v11053_v28 = vpop.f32.mrf.mxu0 }
 0x30d   : > { %3495 = vmatprep.subr.mxu0 %v3360_v36  ;;  %3606 = vmatprep.subr.mxu1 %v10894_v15  ;;  %v11056_v36 = vld [vmem:[#allocation8 + $0x2f0] sm:$0xff] }
 0x30e   : > { %3182 = vmatmul.mubr.f32.gmra.mxu0 %v10832_v5  ;;  %3607 = vmatpush1.msra.mxu1 %v10900_v14  ;;  %v10974_v5 = vld [vmem:[#allocation8 + $0x3b0] sm:$0xff]  ;;  %14042 = vst [vmem:[#allocation132_spill] sm:$0xff] %v11056_v36 }
 0x30f   : > { %3186 = vmatprep.mubr.f32.mxu0 %v10835_v58  ;;  %3496 = vmatpush1.msra.mxu0 %v10902_v11  ;;  %v10977_v58 = vld [vmem:[#allocation8 + $0x68] sm:$0xff] }
 0x310   : > { %3497 = vmatprep.subr.mxu0 %v10905_v61  ;;  %3608 = vmatprep.subr.mxu1 %v10908_v1 }
 0x311   : > { %3498 = vmatpush1.msra.mxu0 %v10911_v53  ;;  %3609 = vmatpush1.msra.mxu1 %v10914_v25 }
 0x312   : > { %3187 = vmatmul.mubr.f32.gmra.mxu0 %v10846_v32  ;;  %3499 = vmatprep.subr.mxu0 %v10918_v46  ;;  %v11000_v32 = vld [vmem:[#allocation8 + $0x380] sm:$0xff] }
 0x313   : > { %3191 = vmatprep.mubr.f32.mxu0 %v10849_v56  ;;  %3500 = vmatpush1.msra.mxu0 %v10923_v26  ;;  %14028 = vst [vmem:[#allocation123_spill] sm:$0xff] %v11000_v32  ;;  %v11003_v56 = vld [vmem:[#allocation8 + $0x38] sm:$0xff] }
 0x314   : > { %3501 = vmatprep.subr.mxu0 %v10927_v57  ;;  %3610 = vmatprep.subr.mxu1 %v10930_v47  ;;  %14029 = vst [vmem:[#allocation83_spill] sm:$0xff] %v11003_v56 }
 0x315   : > { %3502 = vmatpush1.msra.mxu0 %v10934_v55  ;;  %3611 = vmatpush1.msra.mxu1 %v10936_v21 }
 0x316   : > { %3192 = vmatmul.mubr.f32.gmra.mxu0 %v10858_v24  ;;  %3503 = vmatprep.subr.mxu0 %v10942_v48  ;;  %v11026_v24 = vld [vmem:[#allocation8 + $0x20] sm:$0xff] }
 0x317   : > { %3504 = vmatpush1.msra.mxu0 %v10945_v33  ;;  %3612 = vmatprep.subr.mxu1 %v10948_v41  ;;  %14034 = vst [vmem:[#allocation85_spill] sm:$0xff] %v11026_v24 }
 0x318   : > { %3505 = vmatprep.subr.mxu0 %v10951_v51  ;;  %3613 = vmatpush1.msra.mxu1 %v10954_v43 }
 0x319   : > { %3506 = vmatpush1.msra.mxu0 %v10958_v30  ;;  %3614 = vmatprep.subr.mxu1 %v10960_v19 }
 0x31a   : > { %3507 = vmatprep.subr.mxu0 %v10965_v9  ;;  %3615 = vmatpush1.msra.mxu1 %v10968_v20 }
 0x31b   : > { %3508 = vmatpush1.msra.mxu0 %v10971_v8  ;;  %3616 = vmatprep.subr.mxu1 %v10974_v5 }
 0x31c   : > { %3509 = vmatprep.subr.mxu0 %v10977_v58  ;;  %3617 = vmatpush1.msra.mxu1 %v10980_v34 }
 0x31d   : > { %3510 = vmatpush1.msra.mxu0 %v10983_v35  ;;  %3618 = vmatprep.subr.mxu1 %v10986_v62 }
 0x31e   : > { %3511 = vmatprep.subr.mxu0 %v10991_v40  ;;  %3619 = vmatpush1.msra.mxu1 %v10994_v63  ;;  %v11151_v40 = vld [vmem:[#allocation8 + $0x218] sm:$0xff] }
 0x31f   : > { %3512 = vmatpush1.msra.mxu0 %v10997_v39  ;;  %3620 = vmatprep.subr.mxu1 %v11000_v32  ;;  %14068 = vst [vmem:[#allocation121_spill] sm:$0xff] %v11151_v40 }
 0x320   : > { %3513 = vmatprep.subr.mxu0 %v11003_v56  ;;  %3621 = vmatpush1.msra.mxu1 %v11006_v44  ;;  %v11065_v44 = vld [vmem:[#allocation8 + $0x320] sm:$0xff] }
 0x321   : > { %3514 = vmatpush1.msra.mxu0 %v11014_v2  ;;  %3622 = vmatprep.subr.mxu1 %v11017_v16  ;;  %v11062_v16 = vld [vmem:[#allocation8 + $0x2e8] sm:$0xff]  ;;  %14045 = vst [vmem:[#allocation90_spill] sm:$0xff] %v11065_v44  ;;  %v2481_v2 = vadd.f32 %v10963_v42, %v11021_v50 }
 0x322   : > { %3515 = vmatprep.subr.mxu0 %v11026_v24  ;;  %v11046_v37 = vpop.f32.mrf.mxu1  ;;  %3623 = vmatpush1.msra.mxu1 %v11029_v52  ;;  %14044 = vst [vmem:[#allocation134_spill] sm:$0xff] %v11062_v16  ;;  %v11071_v24 = vld [vmem:[#allocation8 + $0x318] sm:$0xff] }
 0x323   : > { %3516 = vmatpush1.msra.mxu0 %v11032_v0  ;;  %3624 = vmatprep.subr.mxu1 %v11035_v54  ;;  %14047 = vst [vmem:[#allocation91_spill] sm:$0xff] %v11071_v24  ;;  %v11074_v54 = vld [vmem:[#allocation8 + $0x2d0] sm:$0xff] }
 0x324   : > { %3517 = vmatprep.subr.mxu0 %v11038_v45  ;;  %v2587_v52 = vpop.f32.mrf.mxu1  ;;  %3625 = vmatpush1.msra.mxu1 %v11041_v18  ;;  %14048 = vst [vmem:[#allocation137_spill] sm:$0xff] %v11074_v54  ;;  %v11077_v45 = vld [vmem:[#allocation8 + $0x308] sm:$0xff]  ;;  %v11079_v18 = vpop.f32.mrf.mxu0 }
 0x325   : > { %3518 = vmatpush1.msra.mxu0 %v11044_v60  ;;  %v2588_v0 = vadd.f32 %v2587_v52, %v2475_v17  ;;  %3626 = vmatprep.subr.mxu1 %v11049_v6  ;;  %14049 = vst [vmem:[#allocation92_spill] sm:$0xff] %v11077_v45  ;;  %v11082_v60 = vld [vmem:[#allocation8 + $0x2c0] sm:$0xff]  ;;  %v11088_v17 = vld [vmem:[#allocation8 + $0x2b8] sm:$0xff] }
 0x326   : > { %3519 = vmatprep.subr.mxu0 %v11056_v36  ;;  %3627 = vmatpush1.msra.mxu1 %v11059_v12  ;;  %14050 = vst [vmem:[#allocation138_spill] sm:$0xff] %v11082_v60  ;;  %v11085_v52 = vld [vmem:[#allocation8 + $0x300] sm:$0xff]  ;;  %14052 = vst [vmem:[#allocation140_spill] sm:$0xff] %v11088_v17  ;;  %v11092_v12 = vld [vmem:[#allocation8 + $0x2a8] sm:$0xff] }
 0x327   : > { %3520 = vmatpush2.msra.mxu0 %v11062_v16  ;;  %8093 = vtanh.f32 %v2588_v0  ;;  %3628 = vmatprep.subr.mxu1 %v11065_v44  ;;  %14051 = vst [vmem:[#allocation93_spill] sm:$0xff] %v11085_v52  ;;  %14053 = vst [vmem:[#allocation94_spill] sm:$0xff] %v11092_v12  ;;  %v11095_v16 = vld [vmem:[#allocation8 + $0x2f8] sm:$0xff]  ;;  %v11098_v0 = vld [vmem:[#allocation8 + $0x2a0] sm:$0xff] }
 0x328   : > { %3521 = vmatprep.subr.mxu0 %v11068_v3  ;;  %v2591_v6 = vpop.f32.mrf.mxu1  ;;  %3629 = vmatpush1.msra.mxu1 %v11071_v24  ;;  %14054 = vst [vmem:[#allocation142_spill] sm:$0xff] %v11095_v16  ;;  %14055 = vst [vmem:[#allocation95_spill] sm:$0xff] %v11098_v0  ;;  %v11101_v3 = vpop.f32.mrf.mxu0  ;;  %v11104_v24 = vld [vmem:[#allocation8 + $0x290] sm:$0xff] }
 0x329   : > { %3522 = vmatpush2.msra.mxu0 %v11074_v54  ;;  %3630 = vmatprep.subr.mxu1 %v11077_v45  ;;  %14056 = vst [vmem:[#allocation145_spill] sm:$0xff] %v11104_v24  ;;  %v11108_v45 = vld [vmem:[#allocation8 + $0x288] sm:$0xff] }
 0x32a   : > { %3523 = vmatprep.subr.mxu0 %v11082_v60  ;;  %v2593_v44 = vpop.f32.mrf.mxu1  ;;  %3631 = vmatpush1.msra.mxu1 %v11085_v52  ;;  %14057 = vst [vmem:[#allocation96_spill] sm:$0xff] %v11108_v45  ;;  %v11112_v60 = vld [vmem:[#allocation8 + $0x278] sm:$0xff]  ;;  %v14059_v54 = vld [vmem:[#allocation101_spill] sm:$0xff]  ;;  %v2498_v32 = vpop.f32.mrf.mxu0 }
 0x32b   : > { %3524 = vmatpush2.msra.mxu0 %v11088_v17  ;;  %3664 = vmatprep.mubr.f32.mxu1 %v13686_v49  ;;  %14058 = vst [vmem:[#allocation146_spill] sm:$0xff] %v11112_v60  ;;  %v11116_v52 = vrot.slane %v11011_v7, %v14059_v54  ;;  %v11119_v17 = vld [vmem:[#allocation8 + $0x270] sm:$0xff]  ;;  %v11130_v54 = vld [vmem:[#allocation8 + $0x248] sm:$0xff]  ;;  %v2594_v56 = vadd.f32 %v2593_v44, %v2481_v2 }
 0x32c   : > { %3525 = vmatprep.subr.mxu0 %v11092_v12  ;;  %6739 = vmatprep.subr.mxu1 %v11095_v16  ;;  %14061 = vst [vmem:[#allocation98_spill] sm:$0xff] %v11119_v17  ;;  %v11122_v12 = vld [vmem:[#allocation8 + $0x260] sm:$0xff]  ;;  %v11125_v16 = vld [vmem:[#allocation8 + $0x258] sm:$0xff]  ;;  %14064 = vst [vmem:[#allocation108_spill] sm:$0xff] %v11130_v54  ;;  %v11137_v63 = vpop.f32.mrf.mxu0 }
 0x32d   : > { %3526 = vmatpush2.msra.mxu0 %v11098_v0  ;;  %14060 = vst [vmem:[#allocation97_spill] sm:$0xff] %v11116_v52  ;;  %14062 = vst [vmem:[#allocation99_spill] sm:$0xff] %v11122_v12  ;;  %v2479_v44 = vadd.f32 %v10940_v13, %v11116_v52  ;;  %v11157_v2 = vld [vmem:[#allocation8 + $0x210] sm:$0xff]  ;;  %8095 = vtanh.f32 %v2594_v56  ;;  %v2493_v13 = vadd.f32 %v11079_v18, %v11021_v50  ;;  %v11173_v56 = vld [vmem:[#allocation8 + $0x1e0] sm:$0xff] }
 0x32e   : > { %3527 = vmatprep.subr.mxu0 %v11104_v24  ;;  %v2597_v36 = vpop.f32.mrf.mxu1  ;;  %14063 = vst [vmem:[#allocation100_spill] sm:$0xff] %v11125_v16  ;;  %v2473_v24 = vadd.f32 %v10898_v38, %v11116_v52  ;;  %14069 = vst [vmem:[#allocation124_spill] sm:$0xff] %v11157_v2 }
 0x32f   : > { %3528 = vmatpush2.msra.mxu0 %v11108_v45  ;;  %v11135_v45 = vld [vmem:[#allocation8 + $0x240] sm:$0xff]  ;;  %14073 = vst [vmem:[#allocation136_spill] sm:$0xff] %v11173_v56 }
 0x330   : > { %3529 = vmatprep.subr.mxu0 %v11112_v60  ;;  %v2599_v0 = vpop.f32.mrf.mxu1  ;;  %14065 = vst [vmem:[#allocation112_spill] sm:$0xff] %v11135_v45  ;;  %v11140_v60 = vld [vmem:[#allocation8 + $0x230] sm:$0xff]  ;;  %v2586_v42 = vadd.f32 %v11046_v37, %v2473_v24  ;;  %v2504_v37 = vpop.f32.mrf.mxu0 }
 0x331   : > { %3530 = vmatpush2.msra.mxu0 %v11119_v17  ;;  %14066 = vst [vmem:[#allocation115_spill] sm:$0xff] %v11140_v60  ;;  %v11146_v17 = vld [vmem:[#allocation8 + $0x228] sm:$0xff] }
 0x332   : > { %3531 = vmatprep.subr.mxu0 %v11122_v12  ;;  %14067 = vst [vmem:[#allocation118_spill] sm:$0xff] %v11146_v17  ;;  %v2487_v12 = vadd.f32 %v11023_v4, %v11021_v50  ;;  %8097 = vtanh.f32 %v2586_v42 }
 0x333   : > { %3532 = vmatpush2.msra.mxu0 %v11125_v16  ;;  %v11163_v16 = vld [vmem:[#allocation8 + $0x1f8] sm:$0xff] }
 0x334   : > { %v11142_v39 = vpop.eup %8093  ;;  %3533 = vmatprep.subr.mxu0 %v11130_v54  ;;  %v2603_v38 = vpop.f32.mrf.mxu1  ;;  %v11160_v54 = vld [vmem:[#allocation8 + $0x200] sm:$0xff]  ;;  %v2600_v4 = vadd.f32 %v2599_v0, %v2487_v12  ;;  %14071 = vst [vmem:[#allocation130_spill] sm:$0xff] %v11163_v16  ;;  %v11178_v0 = vld [vmem:[#allocation8 + $0x1d0] sm:$0xff] }
 0x335   : > { %3534 = vmatpush2.msra.mxu0 %v11135_v45  ;;  %3551 = vmatprep.mubr.f32.mxu0 %v11142_v39  ;;  %14070 = vst [vmem:[#allocation127_spill] sm:$0xff] %v11160_v54  ;;  %v2592_v45 = vadd.f32 %v2591_v6, %v2479_v44  ;;  %v11175_v6 = vpop.f32.mrf.mxu0  ;;  %14074 = vst [vmem:[#allocation139_spill] sm:$0xff] %v11178_v0  ;;  %v11181_v44 = vld [vmem:[#allocation8 + $0x1c8] sm:$0xff] }
 0x336   : > { %3535 = vmatprep.subr.mxu0 %v11140_v60  ;;  %v2605_v24 = vpop.f32.mrf.mxu1  ;;  %v11168_v60 = vld [vmem:[#allocation8 + $0x1e8] sm:$0xff]  ;;  %8099 = vtanh.f32 %v2600_v4  ;;  %14075 = vst [vmem:[#allocation143_spill] sm:$0xff] %v11181_v44  ;;  %v11190_v4 = vld [vmem:[#allocation8 + $0x1b0] sm:$0xff] }
 0x337   : > { %3536 = vmatpush2.msra.mxu0 %v11146_v17  ;;  %14072 = vst [vmem:[#allocation133_spill] sm:$0xff] %v11168_v60  ;;  %v2485_v17 = vadd.f32 %v10988_v10, %v11116_v52  ;;  %v2606_v18 = vadd.f32 %v2605_v24, %v2493_v13  ;;  %8101 = vtanh.f32 %v2592_v45  ;;  %14077 = vst [vmem:[#allocation106_spill] sm:$0xff] %v11190_v4  ;;  %v2510_v45 = vpop.f32.mrf.mxu0  ;;  %v11196_v13 = vld [vmem:[#allocation8 + $0x198] sm:$0xff] }
 0x338   : > { %3537 = vmatprep.subr.mxu0 %v11151_v40  ;;  %14079 = vst [vmem:[#allocation36_spill] sm:$0xff] %v11196_v13 }
 0x339   : > { %3538 = vmatpush2.msra.mxu0 %v11157_v2  ;;  %v2598_v42 = vadd.f32 %v2597_v36, %v2485_v17  ;;  %v11185_v2 = vld [vmem:[#allocation8 + $0x1b8] sm:$0xff]  ;;  %8103 = vtanh.f32 %v2606_v18  ;;  %v11193_v36 = vld [vmem:[#allocation8 + $0x1a0] sm:$0xff]  ;;  %v2497_v18 = vadd.f32 %v11101_v3, %v11116_v52  ;;  %v2511_v3 = vadd.f32 %v2510_v45, %v11021_v50  ;;  %v11225_v45 = vld [vmem:[#allocation8 + $0x448] sm:$0xff] }
 0x33a   : > { %3539 = vmatprep.subr.mxu0 %v11160_v54  ;;  %v2609_v12 = vpop.f32.mrf.mxu1  ;;  %v2499_v54 = vadd.f32 %v2498_v32, %v11021_v50  ;;  %14076 = vst [vmem:[#allocation62_spill] sm:$0xff] %v11185_v2  ;;  %14078 = vst [vmem:[#allocation42_spill] sm:$0xff] %v11193_v36 }
 0x33b   : > { %3540 = vmatpush2.msra.mxu0 %v11163_v16  ;;  %v2491_v16 = vadd.f32 %v11053_v28, %v11116_v52  ;;  %8105 = vtanh.f32 %v2598_v42  ;;  %v2505_v28 = vadd.f32 %v2504_v37, %v11021_v50  ;;  %v2514_v42 = vpop.f32.mrf.mxu0  ;;  %v11210_v37 = vpop.eup %8095  ;;  %14084 = vst [vmem:[#allocation39_spill] sm:$0xff] %v11225_v45 }
 0x33c   : > { %3541 = vmatprep.subr.mxu0 %v11168_v60  ;;  %v2611_v10 = vpop.f32.mrf.mxu1 }
 0x33d   : > { %3542 = vmatpush2.msra.mxu0 %v11173_v56  ;;  %v2612_v17 = vadd.f32 %v2611_v10, %v2499_v54  ;;  %v2604_v32 = vadd.f32 %v2603_v38, %v2491_v16  ;;  %v11205_v54 = vld [vmem:[#allocation8 + $0x180] sm:$0xff]  ;;  %v11208_v38 = vld [vmem:[#allocation8 + $0x478] sm:$0xff]  ;;  %v2610_v10 = vadd.f32 %v2609_v12, %v2497_v18  ;;  %v2516_v12 = vpop.f32.mrf.mxu0 }
 0x33e   : > { %3543 = vmatprep.subr.mxu0 %v11178_v0  ;;  %v11200_v0 = vld [vmem:[#allocation8 + $0x188] sm:$0xff]  ;;  %14081 = vst [vmem:[#allocation44_spill] sm:$0xff] %v11205_v54  ;;  %14082 = vst [vmem:[#allocation38_spill] sm:$0xff] %v11208_v38 }
 0x33f   : > { %3544 = vmatpush2.msra.mxu0 %v11181_v44  ;;  %v2615_v24 = vpop.f32.mrf.mxu1  ;;  %14080 = vst [vmem:[#allocation37_spill] sm:$0xff] %v11200_v0  ;;  %8107 = vtanh.f32 %v2612_v17  ;;  %v11284_v44 = vld [vmem:[#allocation8 + $0x3a0] sm:$0xff] }
 0x340   : > { %3545 = vmatprep.subr.mxu0 %v11185_v2  ;;  %8109 = vtanh.f32 %v2604_v32  ;;  %v11213_v2 = vpop.eup %8097  ;;  %14092 = vst [vmem:[#allocation43_spill] sm:$0xff] %v11284_v44 }
 0x341   : > { %3546 = vmatpush2.msra.mxu0 %v11190_v4  ;;  %v2617_v56 = vpop.f32.mrf.mxu1 }
 0x342   : > { %3547 = vmatprep.subr.mxu0 %v11193_v36  ;;  %v2618_v16 = vadd.f32 %v2617_v56, %v2505_v28  ;;  %v11217_v36 = vld [vmem:[#allocation8 + $0x460] sm:$0xff]  ;;  %v2503_v56 = vadd.f32 %v11137_v63, %v11116_v52 }
 0x343   : > { %3548 = vmatpush2.msra.mxu0 %v11196_v13  ;;  %14083 = vst [vmem:[#allocation48_spill] sm:$0xff] %v11217_v36  ;;  %v11227_v28 = vpop.eup %8099 }
 0x344   : > { %3549 = vmatprep.subr.mxu0 %v11200_v0  ;;  %v2621_v4 = vpop.f32.mrf.mxu1  ;;  %8111 = vtanh.f32 %v2618_v16  ;;  %v2616_v18 = vadd.f32 %v2615_v24, %v2503_v56  ;;  %v11230_v63 = vpop.eup %8101  ;;  %v11233_v0 = vld [vmem:[#allocation8 + $0x430] sm:$0xff]  ;;  %v2509_v16 = vadd.f32 %v11175_v6, %v11116_v52 }
 0x345   : > { %3550 = vmatpush2.msra.mxu0 %v11205_v54  ;;  %8113 = vtanh.f32 %v2610_v10  ;;  %14085 = vst [vmem:[#allocation50_spill] sm:$0xff] %v11233_v0  ;;  %v11242_v10 = vld [vmem:[#allocation8 + $0x418] sm:$0xff] }
 0x346   : > { %3552 = vmatmul.mubr.f32.vlgmr.msra.gmra.mxu0 %v11213_v2  ;;  %v2623_v17 = vpop.f32.mrf.mxu1  ;;  %7483 = vmatprep.subr.mxu0 %v11208_v38  ;;  %14086 = vst [vmem:[#allocation53_spill] sm:$0xff] %v11242_v10  ;;  %v11244_v56 = vpop.eup %8103 }
 0x347   : > { %3557 = vmatprep.mubr.f32.mxu0 %v11210_v37  ;;  %v2624_v32 = vadd.f32 %v2623_v17, %v2511_v3  ;;  %7484 = vmatpush3.msra.mxu0 %v11208_v38  ;;  %v2517_v3 = vadd.f32 %v2516_v12, %v11021_v50  ;;  %v2622_v17 = vadd.f32 %v2621_v4, %v2509_v16  ;;  %v7429_v4 = vpop.f32.mrf.mxu0  ;;  %v11261_v16 = vld [vmem:[#allocation8 + $0x3e8] sm:$0xff] }
 0x348   : > { %7485 = vmatprep.subr.mxu0 %v11217_v36  ;;  %v11247_v6 = vpop.eup %8105  ;;  %v2515_v38 = vadd.f32 %v2514_v42, %v11116_v52  ;;  %14089 = vst [vmem:[#allocation141_spill] sm:$0xff] %v11261_v16 }
 0x349   : > { %v2627_v54 = vpop.f32.mrf.mxu1  ;;  %7486 = vmatpush3.msra.mxu0 %v11217_v36  ;;  %8115 = vtanh.f32 %v2624_v32  ;;  %v11250_v32 = vld [vmem:[#allocation8 + $0x400] sm:$0xff] }
 0x34a   : > { %3558 = vmatmul.mubr.f32.gmra.mxu0 %v11230_v63  ;;  %7487 = vmatprep.subr.mxu0 %v11225_v45  ;;  %8117 = vtanh.f32 %v2616_v18  ;;  %14087 = vst [vmem:[#allocation40_spill] sm:$0xff] %v11250_v32  ;;  %v2628_v42 = vadd.f32 %v2627_v54, %v2515_v38  ;;  %v11276_v38 = vld [vmem:[#allocation8 + $0x3b8] sm:$0xff] }
 0x34b   : > { %3563 = vmatprep.mubr.f32.mxu0 %v11227_v28  ;;  %v2629_v24 = vpop.f32.mrf.mxu1  ;;  %7488 = vmatpush3.msra.mxu0 %v11225_v45  ;;  %v14088_v45 = vld [vmem:[#allocation104_spill] sm:$0xff]  ;;  %14091 = vst [vmem:[#allocation55_spill] sm:$0xff] %v11276_v38 }
 0x34c   : > { %v2630_v36 = vadd.f32 %v2629_v24, %v2517_v3  ;;  %7489 = vmatprep.subr.mxu0 %v11233_v0  ;;  %v11256_v13 = vrot.slane %v11011_v7, %v14088_v45  ;;  %v11263_v3 = vpop.eup %8107 }
 0x34d   : > { %v6611_v12 = vpop.f32.mrf.mxu1  ;;  %7490 = vmatpush3.msra.mxu0 %v11233_v0  ;;  %v11266_v7 = vpop.eup %8109 }
 0x34e   : > { %3564 = vmatmul.mubr.f32.gmra.mxu0 %v11247_v6  ;;  %7491 = vmatprep.subr.mxu0 %v11242_v10  ;;  %8119 = vtanh.f32 %v2630_v36  ;;  %v11269_v36 = vld [vmem:[#allocation8 + $0x3d0] sm:$0xff]  ;;  %v2803_v0 = vpop.f32.mrf.mxu0 }
 0x34f   : > { %3569 = vmatprep.mubr.f32.mxu0 %v11244_v56  ;;  %v6612_v18 = vpop.f32.mrf.mxu1  ;;  %7492 = vmatpush3.msra.mxu0 %v11242_v10  ;;  %8121 = vtanh.f32 %v2622_v17  ;;  %14090 = vst [vmem:[#allocation41_spill] sm:$0xff] %v11269_v36 }
 0x350   : > { %v6613_v24 = vadd.f32 %v6612_v18, %v6611_v12  ;;  %7493 = vmatprep.subr.mxu0 %v11250_v32  ;;  %8123 = vtanh.f32 %v2628_v42  ;;  %v7432_v60 = vpop.f32.mrf.mxu0 }
 0x351   : > { %v6614_v45 = vpop.f32.mrf.mxu1  ;;  %7494 = vmatpush3.msra.mxu0 %v11250_v32  ;;  %v11278_v17 = vpop.eup %8111 }
 0x352   : > { %3570 = vmatmul.mubr.f32.gmra.mxu0 %v11266_v7  ;;  %v2699_v10 = vadd.f32 %v6613_v24, %v11256_v13  ;;  %7495 = vmatprep.subr.mxu0 %v11261_v16  ;;  %v11281_v32 = vpop.eup %8113  ;;  %v2813_v40 = vpop.f32.mrf.mxu0 }
 0x353   : > { %3575 = vmatprep.mubr.f32.mxu0 %v11263_v3  ;;  %v6615_v54 = vpop.f32.mrf.mxu1  ;;  %7496 = vmatpush3.msra.mxu0 %v11261_v16 }
 0x354   : > { %v2804_v12 = vadd.f32 %v2803_v0, %v2699_v10  ;;  %v6616_v18 = vadd.f32 %v6615_v54, %v6614_v45  ;;  %7497 = vmatprep.subr.mxu0 %v11269_v36  ;;  %v11291_v45 = vld [vmem:[#allocation8 + $0x388] sm:$0xff]  ;;  %v7435_v62 = vpop.f32.mrf.mxu0 }
 0x355   : > { %v6617_v24 = vpop.f32.mrf.mxu1  ;;  %7498 = vmatpush3.msra.mxu0 %v11269_v36  ;;  %14093 = vst [vmem:[#allocation57_spill] sm:$0xff] %v11291_v45 }
 0x356   : > { %8125 = vtanh.f32 %v2804_v12  ;;  %3576 = vmatmul.mubr.f32.gmra.mxu0 %v11281_v32  ;;  %v2704_v16 = vadd.f32 %v6616_v18, %v11256_v13  ;;  %7499 = vmatprep.subr.mxu0 %v11276_v38  ;;  %v11293_v10 = vpop.eup %8115  ;;  %v11299_v18 = vld [vmem:[#allocation8 + $0x370] sm:$0xff] }
 0x357   : > { %3581 = vmatprep.mubr.f32.mxu0 %v11278_v17  ;;  %v6618_v0 = vpop.f32.mrf.mxu1  ;;  %7500 = vmatpush3.msra.mxu0 %v11276_v38  ;;  %v11296_v12 = vpop.eup %8117  ;;  %14094 = vst [vmem:[#allocation45_spill] sm:$0xff] %v11299_v18 }
 0x358   : > { %v2809_v42 = vadd.f32 %v7429_v4, %v2704_v16  ;;  %v6619_v54 = vadd.f32 %v6618_v0, %v6617_v24  ;;  %7501 = vmatprep.subr.mxu0 %v11284_v44  ;;  %v11306_v16 = vld [vmem:[#allocation8 + $0x358] sm:$0xff] }
 0x359   : > { %v6620_v36 = vpop.f32.mrf.mxu1  ;;  %7502 = vmatpush3.msra.mxu0 %v11284_v44  ;;  %14095 = vst [vmem:[#allocation59_spill] sm:$0xff] %v11306_v16 }
 0x35a   : > { %8127 = vtanh.f32 %v2809_v42  ;;  %3582 = vmatmul.mubr.f32.gmra.mxu0 %v11296_v12  ;;  %v2709_v38 = vadd.f32 %v6619_v54, %v11256_v13  ;;  %7503 = vmatprep.subr.mxu0 %v11291_v45  ;;  %v11314_v54 = vld [vmem:[#allocation8 + $0x340] sm:$0xff] }
 0x35b   : > { %3587 = vmatprep.mubr.f32.mxu0 %v11293_v10  ;;  %v6621_v4 = vpop.f32.mrf.mxu1  ;;  %7504 = vmatpush3.msra.mxu0 %v11291_v45  ;;  %v11308_v24 = vpop.eup %8119  ;;  %14098 = vst [vmem:[#allocation46_spill] sm:$0xff] %v11314_v54 }
 0x35c   : > { %14096 = vst [vmem:[#allocation144_spill] sm:$0xff] %v11308_v24  ;;  %v2814_v0 = vadd.f32 %v2813_v40, %v2709_v38  ;;  %v6622_v44 = vadd.f32 %v6621_v4, %v6620_v36  ;;  %7505 = vmatprep.subr.mxu0 %v11299_v18  ;;  %v11311_v42 = vpop.eup %8121  ;;  %v11321_v36 = vld [vmem:[#allocation8 + $0x328] sm:$0xff] }
 0x35d   : > { %14097 = vst [vmem:[#allocation61_spill] sm:$0xff] %v11311_v42  ;;  %v6623_v52 = vpop.f32.mrf.mxu1  ;;  %7506 = vmatpush3.msra.mxu0 %v11299_v18  ;;  %14099 = vst [vmem:[#allocation47_spill] sm:$0xff] %v11321_v36  ;;  %v11324_v18 = vpop.eup %8123 }
 0x35e   : > { %8129 = vtanh.f32 %v2814_v0  ;;  %3588 = vmatmul.mubr.f32.gmra.mxu0 %v11311_v42  ;;  %v2714_v45 = vadd.f32 %v6622_v44, %v11256_v13  ;;  %7507 = vmatprep.subr.mxu0 %v11306_v16  ;;  %14100 = vst [vmem:[#allocation63_spill] sm:$0xff] %v11324_v18 }
 0x35f   : > { %3593 = vmatprep.mubr.f32.mxu0 %v11308_v24  ;;  %v6624_v40 = vpop.f32.mrf.mxu1  ;;  %7508 = vmatpush3.msra.mxu0 %v11306_v16  ;;  %v11329_v24 = vld [vmem:[#allocation8 + $0x178] sm:$0xff]  ;;  %v11332_v16 = vld [vmem:[#allocation8 + $0x310] sm:$0xff] }
 0x360   : > { %v2819_v38 = vadd.f32 %v7432_v60, %v2714_v45  ;;  %v6625_v4 = vadd.f32 %v6624_v40, %v6623_v52  ;;  %7509 = vmatprep.subr.mxu0 %v11314_v54  ;;  %14101 = vst [vmem:[#allocation49_spill] sm:$0xff] %v11329_v24  ;;  %14102 = vst [vmem:[#allocation65_spill] sm:$0xff] %v11332_v16  ;;  %v2823_v52 = vpop.f32.mrf.mxu0  ;;  %v11334_v40 = vld [vmem:[#allocation8 + $0x2e0] sm:$0xff] }
 0x361   : > { %v6626_v0 = vpop.f32.mrf.mxu1  ;;  %7510 = vmatpush3.msra.mxu0 %v11314_v54  ;;  %14103 = vst [vmem:[#allocation51_spill] sm:$0xff] %v11334_v40 }
 0x362   : > { %8131 = vtanh.f32 %v2819_v38  ;;  %3594 = vmatmul.mubr.f32.gmra.mxu0 %v11324_v18  ;;  %v2719_v44 = vadd.f32 %v6625_v4, %v11256_v13  ;;  %7511 = vmatprep.subr.mxu0 %v11321_v36  ;;  %v11337_v38 = vld [vmem:[#allocation8 + $0x160] sm:$0xff]  ;;  %v11341_v18 = vld [vmem:[#allocation8 + $0x2c8] sm:$0xff] }
 0x363   : > { %v8126_v60 = vpop.eup %8125  ;;  %v6627_v45 = vpop.f32.mrf.mxu1  ;;  %7512 = vmatpush3.msra.mxu0 %v11321_v36  ;;  %14104 = vst [vmem:[#allocation67_spill] sm:$0xff] %v11337_v38 }
 0x364   : > { %v2824_v42 = vadd.f32 %v2823_v52, %v2719_v44  ;;  %v6628_v54 = vadd.f32 %v6627_v45, %v6626_v0  ;;  %3665 = vmatmul.mubr.f32.vlgmr.msra.gmra.mxu1 %v8126_v60  ;;  %7515 = vmatprep.mubr.f32.mxu0 %v8126_v60  ;;  %v11346_v44 = vld [vmem:[#allocation8 + $0x148] sm:$0xff]  ;;  %v7438_v60 = vpop.f32.mrf.mxu0  ;;  %v11350_v45 = vld [vmem:[#allocation8 + $0x2b0] sm:$0xff] }
 0x365   : > { %6740 = vmatpush3.msra.mxu1 %v11329_v24  ;;  %v6629_v4 = vpop.f32.mrf.mxu1  ;;  %7513 = vmatprep.subr.mxu0 %v11332_v16  ;;  %14105 = vst [vmem:[#allocation69_spill] sm:$0xff] %v11346_v44 }
 0x366   : > { %8133 = vtanh.f32 %v2824_v42  ;;  %v2724_v35 = vadd.f32 %v6628_v54, %v11256_v13  ;;  %6741 = vmatprep.subr.mxu1 %v11334_v40  ;;  %3670 = vmatprep.mubr.f32.mxu1 %v13686_v49  ;;  %v11353_v42 = vld [vmem:[#allocation8 + $0x130] sm:$0xff]  ;;  %v11356_v40 = vld [vmem:[#allocation8 + $0x298] sm:$0xff] }
 0x367   : > { %v8128_v0 = vpop.eup %8127  ;;  %6742 = vmatpush3.msra.mxu1 %v11337_v38  ;;  %v6630_v52 = vpop.f32.mrf.mxu1  ;;  %7514 = vmatpush3.msra.mxu0 %v11332_v16  ;;  %14106 = vst [vmem:[#allocation52_spill] sm:$0xff] %v11353_v42  ;;  %v11364_v16 = vld [vmem:[#allocation8 + $0x280] sm:$0xff] }
 0x368   : > { %v2829_v36 = vadd.f32 %v7435_v62, %v2724_v35  ;;  %v6631_v24 = vadd.f32 %v6630_v52, %v6629_v4  ;;  %6743 = vmatprep.subr.mxu1 %v11341_v18  ;;  %3671 = vmatmul.mubr.f32.gmra.mxu1 %v8128_v0  ;;  %v11361_v35 = vld [vmem:[#allocation8 + $0x118] sm:$0xff]  ;;  %v2833_v4 = vpop.f32.mrf.mxu0 }
 0x369   : > { %6744 = vmatpush3.msra.mxu1 %v11346_v44  ;;  %7516 = vmatmul.mubr.f32.vlgmr.msra.gmra.mxu0 %v8128_v0  ;;  %v6632_v54 = vpop.f32.mrf.mxu1 }
 0x36a   : > { %8135 = vtanh.f32 %v2829_v36  ;;  %v2729_v38 = vadd.f32 %v6631_v24, %v11256_v13  ;;  %6745 = vmatprep.subr.mxu1 %v11350_v45  ;;  %3676 = vmatprep.mubr.f32.mxu1 %v13686_v49  ;;  %v11368_v24 = vld [vmem:[#allocation8 + $0x100] sm:$0xff]  ;;  %v11371_v36 = vld [vmem:[#allocation8 + $0x268] sm:$0xff] }
 0x36b   : > { %v8130_v62 = vpop.eup %8129  ;;  %6746 = vmatpush3.msra.mxu1 %v11353_v42  ;;  %v6633_v52 = vpop.f32.mrf.mxu1  ;;  %4060 = vmatprep.subr.mxu0 %v10865_v31  ;;  %v11376_v31 = vld [vmem:[#allocation8 + $0xe8] sm:$0xff] }
 0x36c   : > { %v2834_v0 = vadd.f32 %v2833_v4, %v2729_v38  ;;  %v6634_v44 = vadd.f32 %v6633_v52, %v6632_v54  ;;  %6747 = vmatprep.subr.mxu1 %v11356_v40  ;;  %3677 = vmatmul.mubr.f32.gmra.mxu1 %v8130_v62  ;;  %v11379_v54 = vld [vmem:[#allocation8 + $0x250] sm:$0xff]  ;;  %v11390_v52 = vld [vmem:[#allocation8 + $0xb8] sm:$0xff] }
 0x36d   : > { %6748 = vmatpush3.msra.mxu1 %v11361_v35  ;;  %7518 = vmatprep.mubr.f32.mxu0 %v8130_v62  ;;  %v11383_v62 = vld [vmem:[#allocation8 + $0xd0] sm:$0xff]  ;;  %14107 = vst [vmem:[#allocation71_spill] sm:$0xff] %v11390_v52 }
 0x36e   : > { %8137 = vtanh.f32 %v2834_v0  ;;  %v2734_v42 = vadd.f32 %v6634_v44, %v11256_v13  ;;  %6749 = vmatprep.subr.mxu1 %v11364_v16  ;;  %3682 = vmatprep.mubr.f32.mxu1 %v13686_v49  ;;  %v11386_v44 = vld [vmem:[#allocation8 + $0x238] sm:$0xff] }
 0x36f   : > { %v8132_v38 = vpop.eup %8131  ;;  %6750 = vmatpush3.msra.mxu1 %v11368_v24  ;;  %4061 = vmatpush1.msra.mxu0 %v10872_v29  ;;  %v11393_v29 = vld [vmem:[#allocation8 + $0x220] sm:$0xff] }
 0x370   : > { %v2839_v4 = vadd.f32 %v7438_v60, %v2734_v42  ;;  %6751 = vmatprep.subr.mxu1 %v11371_v36  ;;  %3683 = vmatmul.mubr.f32.gmra.mxu1 %v8132_v38  ;;  %14108 = vst [vmem:[#allocation54_spill] sm:$0xff] %v11393_v29  ;;  %v11397_v60 = vld [vmem:[#allocation8 + $0xa0] sm:$0xff]  ;;  %v11400_v42 = vld [vmem:[#allocation8 + $0x208] sm:$0xff] }
 0x371   : > { %6752 = vmatpush3.msra.mxu1 %v11376_v31  ;;  %7519 = vmatmul.mubr.f32.gmra.mxu0 %v8132_v38  ;;  %14109 = vst [vmem:[#allocation73_spill] sm:$0xff] %v11397_v60  ;;  %v11404_v38 = vld [vmem:[#allocation8 + $0x88] sm:$0xff] }
 0x372   : > { %8139 = vtanh.f32 %v2839_v4  ;;  %6753 = vmatprep.subr.mxu1 %v11379_v54  ;;  %3688 = vmatprep.mubr.f32.mxu1 %v13686_v49  ;;  %14110 = vst [vmem:[#allocation56_spill] sm:$0xff] %v11404_v38 }
 0x373   : > { %v8134_v0 = vpop.eup %8133  ;;  %6754 = vmatpush3.msra.mxu1 %v11383_v62  ;;  %4062 = vmatprep.subr.mxu0 %v10876_v27  ;;  %v11407_v27 = vld [vmem:[#allocation8 + $0x1f0] sm:$0xff] }
 0x374   : > { %6755 = vmatprep.subr.mxu1 %v11386_v44  ;;  %3689 = vmatmul.mubr.f32.gmra.mxu1 %v8134_v0  ;;  %14111 = vst [vmem:[#allocation75_spill] sm:$0xff] %v11407_v27 }
 0x375   : > { %6756 = vmatpush3.msra.mxu1 %v11390_v52  ;;  %7521 = vmatprep.mubr.f32.mxu0 %v8134_v0  ;;  %v11411_v52 = vld [vmem:[#allocation8 + $0x70] sm:$0xff]  ;;  %v11414_v0 = vld [vmem:[#allocation8 + $0x1d8] sm:$0xff] }
 0x376   : > { %6757 = vmatprep.subr.mxu1 %v11393_v29  ;;  %3694 = vmatprep.mubr.f32.mxu1 %v13686_v49  ;;  %14112 = vst [vmem:[#allocation58_spill] sm:$0xff] %v11411_v52  ;;  %v11418_v29 = vld [vmem:[#allocation8 + $0x58] sm:$0xff] }
 0x377   : > { %v8136_v4 = vpop.eup %8135  ;;  %6758 = vmatpush3.msra.mxu1 %v11397_v60  ;;  %4063 = vmatpush1.msra.mxu0 %v10882_v59  ;;  %14113 = vst [vmem:[#allocation64_spill] sm:$0xff] %v11418_v29  ;;  %v11421_v59 = vld [vmem:[#allocation8 + $0x1c0] sm:$0xff] }
 0x378   : > { %6759 = vmatprep.subr.mxu1 %v11400_v42  ;;  %3695 = vmatmul.mubr.f32.gmra.mxu1 %v8136_v4 }
 0x379   : > { %6760 = vmatpush3.msra.mxu1 %v11404_v38  ;;  %7522 = vmatmul.mubr.f32.gmra.mxu0 %v8136_v4  ;;  %v11425_v38 = vld [vmem:[#allocation8 + $0x40] sm:$0xff]  ;;  %v11428_v4 = vld [vmem:[#allocation8 + $0x1a8] sm:$0xff] }
 0x37a   : > { %6761 = vmatprep.subr.mxu1 %v11407_v27  ;;  %3700 = vmatprep.mubr.f32.mxu1 %v13686_v49  ;;  %14114 = vst [vmem:[#allocation107_spill] sm:$0xff] %v11428_v4  ;;  %v11432_v27 = vld [vmem:[#allocation8 + $0x28] sm:$0xff] }
 0x37b   : > { %v8138_v60 = vpop.eup %8137  ;;  %6762 = vmatpush3.msra.mxu1 %v11411_v52  ;;  %4064 = vmatprep.subr.mxu0 %v10886_v22  ;;  %v11435_v22 = vld [vmem:[#allocation8 + $0x190] sm:$0xff] }
 0x37c   : > { %6763 = vmatprep.subr.mxu1 %v11414_v0  ;;  %3701 = vmatmul.mubr.f32.gmra.mxu1 %v8138_v60 }
 0x37d   : > { %6764 = vmatpush3.msra.mxu1 %v11418_v29  ;;  %7524 = vmatprep.mubr.f32.mxu0 %v8138_v60  ;;  %v11439_v29 = vld [vmem:[#allocation8 + $0x10] sm:$0xff] }
 0x37e   : > { %6765 = vmatprep.subr.mxu1 %v11421_v59  ;;  %3706 = vmatprep.mubr.f32.mxu1 %v13686_v49  ;;  %v8426_v60 = vld [vmem:[#allocation8 + $0x170] sm:$0xff] }
 0x37f   : > { %v8140_v52 = vpop.eup %8139  ;;  %6766 = vmatpush3.msra.mxu1 %v11425_v38  ;;  %4065 = vmatpush1.msra.mxu0 %v10890_v23  ;;  %v8427_v23 = vld [vmem:[#allocation8 + $0x168] sm:$0xff] }
 0x380   : > { %6767 = vmatprep.subr.mxu1 %v11428_v4  ;;  %3707 = vmatmul.mubr.f32.gmra.mxu1 %v8140_v52  ;;  %v8428_v4 = vld [vmem:[#allocation8 + $0x158] sm:$0xff] }
 0x381   : > { %6768 = vmatpush3.msra.mxu1 %v11432_v27  ;;  %7525 = vmatmul.mubr.f32.gmra.mxu0 %v8140_v52  ;;  %v8429_v52 = vld [vmem:[#allocation8 + $0x150] sm:$0xff] }
 0x382   : > { %6769 = vmatprep.subr.mxu1 %v11435_v22  ;;  %3777 = vmatprep.mubr.f32.mxu1 %v11142_v39  ;;  %v8430_v39 = vld [vmem:[#allocation8 + $0x140] sm:$0xff] }
 0x383   : > { %6770 = vmatpush3.msra.mxu1 %v11439_v29  ;;  %4066 = vmatprep.subr.mxu0 %v10894_v15  ;;  %v8431_v15 = vld [vmem:[#allocation8 + $0x138] sm:$0xff] }
 0x384   : > { %3947 = vmatprep.subr.mxu1 %v8426_v60  ;;  %3778 = vmatmul.mubr.f32.vlgmr.msra.gmra.mxu1 %v11213_v2  ;;  %v8432_v2 = vld [vmem:[#allocation8 + $0x128] sm:$0xff]  ;;  %v14132_v60 = vld [vmem:[#allocation103_spill] sm:$0xff] }
 0x385   : > { %3948 = vmatpush1.msra.mxu1 %v8427_v23  ;;  %3782 = vmatprep.mubr.f32.mxu1 %v11210_v37  ;;  %v8433_v37 = vld [vmem:[#allocation8 + $0x120] sm:$0xff] }
 0x386   : > { %3949 = vmatprep.subr.mxu1 %v8428_v4  ;;  %4067 = vmatpush1.msra.mxu0 %v10900_v14  ;;  %v8434_v14 = vld [vmem:[#allocation8 + $0x110] sm:$0xff]  ;;  %v14131_v4 = vld [vmem:[#allocation131_spill] sm:$0xff]  ;;  %v14133_v23 = vld [vmem:[#allocation132_spill] sm:$0xff] }
 0x387   : > { %3950 = vmatpush1.msra.mxu1 %v8429_v52  ;;  %4068 = vmatprep.subr.mxu0 %v10908_v1  ;;  %v14134_v52 = vld [vmem:[#allocation86_spill] sm:$0xff] }
 0x388   : > { %3951 = vmatprep.subr.mxu1 %v8430_v39  ;;  %3783 = vmatmul.mubr.f32.gmra.mxu1 %v11230_v63  ;;  %v14125_v63 = vld [vmem:[#allocation85_spill] sm:$0xff] }
 0x389   : > { %3952 = vmatpush1.msra.mxu1 %v8431_v15  ;;  %3787 = vmatprep.mubr.f32.mxu1 %v11227_v28 }
 0x38a   : > { %3953 = vmatprep.subr.mxu1 %v8432_v2  ;;  %4069 = vmatpush1.msra.mxu0 %v10914_v25 }
 0x38b   : > { %3954 = vmatpush1.msra.mxu1 %v8433_v37  ;;  %4070 = vmatprep.subr.mxu0 %v10930_v47  ;;  %v14135_v37 = vld [vmem:[#allocation134_spill] sm:$0xff] }
 0x38c   : > { %3955 = vmatprep.subr.mxu1 %v8434_v14  ;;  %3788 = vmatmul.mubr.f32.gmra.mxu1 %v11247_v6  ;;  %v14136_v14 = vld [vmem:[#allocation87_spill] sm:$0xff] }
 0x38d   : > { %v11455_v1 = vpop.f32.mrf.mxu1  ;;  %3956 = vmatpush1.msra.mxu1 %v10902_v11  ;;  %3792 = vmatprep.mubr.f32.mxu1 %v11244_v56  ;;  %v14126_v56 = vld [vmem:[#allocation63_spill] sm:$0xff] }
 0x38e   : > { %3957 = vmatprep.subr.mxu1 %v10905_v61  ;;  %4071 = vmatpush1.msra.mxu0 %v10936_v21 }
 0x38f   : > { %v2934_v28 = vpop.f32.mrf.mxu1  ;;  %3958 = vmatpush1.msra.mxu1 %v10911_v53  ;;  %4072 = vmatprep.subr.mxu0 %v10948_v41  ;;  %v14117_v41 = vld [vmem:[#allocation122_spill] sm:$0xff] }
 0x390   : > { %3959 = vmatprep.subr.mxu1 %v10918_v46  ;;  %3793 = vmatmul.mubr.f32.gmra.mxu1 %v11266_v7  ;;  %v2935_v11 = vadd.f32 %v2934_v28, %v11021_v50  ;;  %v14137_v28 = vld [vmem:[#allocation135_spill] sm:$0xff] }
 0x391   : > { %3960 = vmatpush1.msra.mxu1 %v10923_v26  ;;  %3797 = vmatprep.mubr.f32.mxu1 %v11263_v3  ;;  %v11468_v25 = vpop.f32.mrf.mxu1  ;;  %v14128_v3 = vld [vmem:[#allocation125_spill] sm:$0xff] }
 0x392   : > { %3961 = vmatprep.subr.mxu1 %v10927_v57  ;;  %4073 = vmatpush1.msra.mxu0 %v10954_v43 }
 0x393   : > { %v11472_v61 = vpop.f32.mrf.mxu0  ;;  %3962 = vmatpush1.msra.mxu1 %v10934_v55  ;;  %4074 = vmatprep.subr.mxu0 %v10960_v19  ;;  %v11480_v26 = vpop.f32.mrf.mxu1  ;;  %v14120_v19 = vld [vmem:[#allocation144_spill] sm:$0xff] }
 0x394   : > { %3963 = vmatprep.subr.mxu1 %v10942_v48  ;;  %3798 = vmatmul.mubr.f32.gmra.mxu1 %v11281_v32  ;;  %v14115_v48 = vld [vmem:[#allocation120_spill] sm:$0xff] }
 0x395   : > { %v3047_v53 = vpop.f32.mrf.mxu0  ;;  %3964 = vmatpush1.msra.mxu1 %v10945_v33  ;;  %3802 = vmatprep.mubr.f32.mxu1 %v11278_v17  ;;  %v14116_v33 = vld [vmem:[#allocation81_spill] sm:$0xff]  ;;  %v14127_v32 = vld [vmem:[#allocation128_spill] sm:$0xff] }
 0x396   : > { %v3048_v46 = vadd.f32 %v3047_v53, %v2935_v11  ;;  %3965 = vmatprep.subr.mxu1 %v10951_v51  ;;  %4075 = vmatpush1.msra.mxu0 %v10968_v20  ;;  %v11494_v55 = vpop.f32.mrf.mxu1  ;;  %v14118_v51 = vld [vmem:[#allocation61_spill] sm:$0xff]  ;;  %v14121_v20 = vld [vmem:[#allocation83_spill] sm:$0xff]  ;;  %v14139_v53 = vld [vmem:[#allocation88_spill] sm:$0xff] }
 0x397   : > { %v11484_v57 = vpop.f32.mrf.mxu0  ;;  %3966 = vmatpush1.msra.mxu1 %v10958_v30  ;;  %4076 = vmatprep.subr.mxu0 %v10974_v5  ;;  %v14119_v30 = vld [vmem:[#allocation105_spill] sm:$0xff] }
 0x398   : > { %8141 = vtanh.f32 %v3048_v46  ;;  %3967 = vmatprep.subr.mxu1 %v10965_v9  ;;  %3803 = vmatmul.mubr.f32.gmra.mxu1 %v11296_v12  ;;  %v2946_v9 = vpop.f32.mrf.mxu1  ;;  %v14129_v17 = vld [vmem:[#allocation129_spill] sm:$0xff] }
 0x399   : > { %v11490_v47 = vpop.f32.mrf.mxu0  ;;  %3968 = vmatpush1.msra.mxu1 %v10971_v8  ;;  %3807 = vmatprep.mubr.f32.mxu1 %v11293_v10  ;;  %v14122_v8 = vld [vmem:[#allocation82_spill] sm:$0xff]  ;;  %v14138_v11 = vld [vmem:[#allocation137_spill] sm:$0xff] }
 0x39a   : > { %3969 = vmatprep.subr.mxu1 %v10977_v58  ;;  %4077 = vmatpush1.msra.mxu0 %v10980_v34  ;;  %v14123_v58 = vld [vmem:[#allocation84_spill] sm:$0xff]  ;;  %v14124_v34 = vld [vmem:[#allocation123_spill] sm:$0xff]  ;;  %v14130_v10 = vld [vmem:[#allocation126_spill] sm:$0xff] }
 0x39b   : > { %v11498_v21 = vpop.f32.mrf.mxu0  ;;  %3970 = vmatpush1.msra.mxu1 %v14115_v48  ;;  %4078 = vmatprep.subr.mxu0 %v14116_v33  ;;  %v14140_v48 = vld [vmem:[#allocation138_spill] sm:$0xff]  ;;  %v14141_v33 = vld [vmem:[#allocation89_spill] sm:$0xff] }
 0x39c   : > { %3971 = vmatprep.subr.mxu1 %v14117_v41  ;;  %3808 = vmatmul.mubr.f32.gmra.mxu1 %v14118_v51  ;;  %v14142_v51 = vld [vmem:[#allocation140_spill] sm:$0xff] }
 0x39d   : > { %v11504_v43 = vpop.f32.mrf.mxu0  ;;  %3972 = vmatpush1.msra.mxu1 %v14119_v30  ;;  %3812 = vmatprep.mubr.f32.mxu1 %v14120_v19  ;;  %v14143_v30 = vld [vmem:[#allocation90_spill] sm:$0xff] }
 0x39e   : > { %3973 = vmatprep.subr.mxu1 %v14121_v20  ;;  %4079 = vmatpush1.msra.mxu0 %v14122_v8  ;;  %v14144_v20 = vld [vmem:[#allocation94_spill] sm:$0xff]  ;;  %v14145_v8 = vld [vmem:[#allocation91_spill] sm:$0xff] }
 0x39f   : > { %v11510_v5 = vpop.f32.mrf.mxu0  ;;  %3974 = vmatpush1.msra.mxu1 %v14123_v58  ;;  %4080 = vmatprep.subr.mxu0 %v14124_v34  ;;  %v14146_v34 = vld [vmem:[#allocation95_spill] sm:$0xff] }
 0x3a0   : > { %3975 = vmatprep.subr.mxu1 %v14125_v63  ;;  %3813 = vmatmul.mubr.f32.gmra.mxu1 %v14126_v56  ;;  %v14147_v63 = vld [vmem:[#allocation92_spill] sm:$0xff]  ;;  %v14148_v56 = vld [vmem:[#allocation145_spill] sm:$0xff] }
 0x3a1   : > { %v11516_v6 = vpop.f32.mrf.mxu0  ;;  %3976 = vmatpush1.msra.mxu1 %v14127_v32  ;;  %4081 = vmatpush1.msra.mxu0 %v14128_v3  ;;  %v14149_v32 = vld [vmem:[#allocation93_spill] sm:$0xff]  ;;  %v14150_v3 = vld [vmem:[#allocation96_spill] sm:$0xff] }
 0x3a2   : > { %v11520_v7 = vpop.f32.mrf.mxu1  ;;  %3977 = vmatprep.subr.mxu1 %v14129_v17  ;;  %4082 = vmatprep.subr.mxu0 %v14130_v10  ;;  %v14151_v17 = vld [vmem:[#allocation97_spill] sm:$0xff] }
 0x3a3   : > { %v11524_v12 = vpop.f32.mrf.mxu0  ;;  %3978 = vmatpush1.msra.mxu1 %v14131_v4  ;;  %4083 = vmatpush1.msra.mxu0 %v14132_v60  ;;  %v2933_v10 = vadd.f32 %v11455_v1, %v14151_v17  ;;  %v14152_v60 = vld [vmem:[#allocation146_spill] sm:$0xff] }
 0x3a4   : > { %3979 = vmatprep.subr.mxu1 %v14133_v23  ;;  %4084 = vmatprep.subr.mxu0 %v14134_v52  ;;  %v2952_v15 = vpop.f32.mrf.mxu1  ;;  %v14153_v23 = vld [vmem:[#allocation142_spill] sm:$0xff]  ;;  %v2941_v52 = vadd.f32 %v11480_v26, %v11021_v50 }
 0x3a5   : > { %v11530_v39 = vpop.eup %8141  ;;  %v11532_v2 = vpop.f32.mrf.mxu0  ;;  %3980 = vmatpush2.msra.mxu1 %v14135_v37  ;;  %4085 = vmatpush1.msra.mxu0 %v14136_v14  ;;  %v14154_v14 = vld [vmem:[#allocation98_spill] sm:$0xff]  ;;  %v3046_v1 = vadd.f32 %v11472_v61, %v2933_v10 }
 0x3a6   : > { %4011 = vmatprep.mubr.f32.mxu1 %v11530_v39  ;;  %3981 = vmatprep.subr.mxu1 %v14137_v28  ;;  %v3054_v26 = vadd.f32 %v11490_v47, %v2941_v52  ;;  %v14161_v47 = vld [vmem:[#allocation121_spill] sm:$0xff]  ;;  %v14164_v52 = vld [vmem:[#allocation130_spill] sm:$0xff] }
 0x3a7   : > { %3982 = vmatpush2.msra.mxu1 %v14138_v11  ;;  %4086 = vmatprep.subr.mxu0 %v14139_v53  ;;  %v14155_v11 = vld [vmem:[#allocation99_spill] sm:$0xff]  ;;  %8143 = vtanh.f32 %v3046_v1  ;;  %v14166_v1 = vld [vmem:[#allocation136_spill] sm:$0xff] }
 0x3a8   : > { %v11540_v46 = vpop.f32.mrf.mxu0  ;;  %3983 = vmatprep.subr.mxu1 %v14140_v48  ;;  %4087 = vmatpush1.msra.mxu0 %v14141_v33  ;;  %v14156_v48 = vld [vmem:[#allocation100_spill] sm:$0xff]  ;;  %v2939_v33 = vadd.f32 %v11468_v25, %v14151_v17  ;;  %v2945_v25 = vadd.f32 %v11494_v55, %v14151_v17  ;;  %8145 = vtanh.f32 %v3054_v26  ;;  %v2951_v55 = vadd.f32 %v11520_v7, %v14151_v17 }
 0x3a9   : > { %v11544_v41 = vpop.f32.mrf.mxu1  ;;  %3984 = vmatpush2.msra.mxu1 %v14142_v51  ;;  %4088 = vmatprep.subr.mxu0 %v14143_v30  ;;  %v14157_v51 = vld [vmem:[#allocation108_spill] sm:$0xff]  ;;  %v2947_v30 = vadd.f32 %v2946_v9, %v11021_v50 }
 0x3aa   : > { %v11548_v19 = vpop.f32.mrf.mxu0  ;;  %3985 = vmatprep.subr.mxu1 %v14144_v20  ;;  %4089 = vmatpush1.msra.mxu0 %v14145_v8  ;;  %v14158_v20 = vld [vmem:[#allocation112_spill] sm:$0xff]  ;;  %v3052_v61 = vadd.f32 %v11484_v57, %v2939_v33  ;;  %v3058_v57 = vadd.f32 %v11498_v21, %v2945_v25  ;;  %v3064_v7 = vadd.f32 %v11510_v5, %v2951_v55  ;;  %v14170_v25 = vld [vmem:[#allocation106_spill] sm:$0xff] }
 0x3ab   : > { %v2958_v58 = vpop.f32.mrf.mxu1  ;;  %3986 = vmatpush2.msra.mxu1 %v14146_v34  ;;  %4090 = vmatprep.subr.mxu0 %v14147_v63  ;;  %v14159_v34 = vld [vmem:[#allocation115_spill] sm:$0xff]  ;;  %v3060_v9 = vadd.f32 %v11504_v43, %v2947_v30  ;;  %v14172_v5 = vld [vmem:[#allocation36_spill] sm:$0xff] }
 0x3ac   : > { %3987 = vmatprep.subr.mxu1 %v14148_v56  ;;  %4091 = vmatpush1.msra.mxu0 %v14149_v32  ;;  %v14160_v56 = vld [vmem:[#allocation118_spill] sm:$0xff]  ;;  %8147 = vtanh.f32 %v3052_v61  ;;  %v14168_v30 = vld [vmem:[#allocation143_spill] sm:$0xff] }
 0x3ad   : > { %3988 = vmatpush2.msra.mxu1 %v14150_v3  ;;  %4124 = vmatprep.mubr.f32.mxu0 %v13686_v49  ;;  %v2953_v3 = vadd.f32 %v2952_v15, %v11021_v50  ;;  %8149 = vtanh.f32 %v3060_v9  ;;  %v2959_v15 = vadd.f32 %v2958_v58, %v11021_v50  ;;  %v14169_v58 = vld [vmem:[#allocation62_spill] sm:$0xff] }
 0x3ae   : > { %v11560_v4 = vpop.f32.mrf.mxu0  ;;  %3989 = vmatprep.subr.mxu1 %v14152_v60  ;;  %6819 = vmatprep.subr.mxu0 %v14153_v23  ;;  %v14162_v60 = vld [vmem:[#allocation124_spill] sm:$0xff]  ;;  %v14163_v23 = vld [vmem:[#allocation127_spill] sm:$0xff]  ;;  %8151 = vtanh.f32 %v3058_v57  ;;  %v14171_v9 = vld [vmem:[#allocation42_spill] sm:$0xff] }
 0x3af   : > { %v11566_v37 = vpop.f32.mrf.mxu1  ;;  %3990 = vmatpush2.msra.mxu1 %v14154_v14  ;;  %v3066_v43 = vadd.f32 %v11516_v6, %v2953_v3  ;;  %v2957_v6 = vadd.f32 %v11544_v41, %v14151_v17 }
 0x3b0   : > { %v11569_v28 = vpop.f32.mrf.mxu0  ;;  %3991 = vmatprep.subr.mxu1 %v14155_v11  ;;  %v14165_v11 = vld [vmem:[#allocation133_spill] sm:$0xff] }
 0x3b1   : > { %v2964_v53 = vpop.f32.mrf.mxu1  ;;  %3992 = vmatpush2.msra.mxu1 %v14156_v48  ;;  %8153 = vtanh.f32 %v3066_v43  ;;  %v3070_v41 = vadd.f32 %v11524_v12, %v2957_v6  ;;  %v14175_v12 = vld [vmem:[#allocation38_spill] sm:$0xff] }
 0x3b2   : > { %3993 = vmatprep.subr.mxu1 %v14157_v51  ;;  %v14167_v51 = vld [vmem:[#allocation139_spill] sm:$0xff]  ;;  %8155 = vtanh.f32 %v3064_v7 }
 0x3b3   : > { %3994 = vmatpush2.msra.mxu1 %v14158_v20 }
 0x3b4   : > { %v11580_v8 = vpop.f32.mrf.mxu0  ;;  %3995 = vmatprep.subr.mxu1 %v14159_v34  ;;  %v3072_v34 = vadd.f32 %v11532_v2, %v2959_v15  ;;  %v14173_v2 = vld [vmem:[#allocation37_spill] sm:$0xff]  ;;  %v11624_v55 = vpop.eup %8143 }
 0x3b5   : > { %v11583_v63 = vpop.f32.mrf.mxu1  ;;  %3996 = vmatpush2.msra.mxu1 %v14160_v56  ;;  %v11628_v43 = vpop.eup %8145 }
 0x3b6   : > { %v11589_v32 = vpop.f32.mrf.mxu0  ;;  %3997 = vmatprep.subr.mxu1 %v14161_v47  ;;  %8157 = vtanh.f32 %v3072_v34 }
 0x3b7   : > { %v11594_v10 = vpop.f32.mrf.mxu1  ;;  %3998 = vmatpush2.msra.mxu1 %v14162_v60 }
 0x3b8   : > { %3999 = vmatprep.subr.mxu1 %v14163_v23  ;;  %v2965_v23 = vadd.f32 %v2964_v53, %v11021_v50 }
 0x3b9   : > { %4000 = vmatpush2.msra.mxu1 %v14164_v52  ;;  %v11636_v7 = vpop.eup %8147 }
 0x3ba   : > { %v6691_v14 = vpop.f32.mrf.mxu0  ;;  %4001 = vmatprep.subr.mxu1 %v14165_v11  ;;  %v14174_v11 = vld [vmem:[#allocation44_spill] sm:$0xff] }
 0x3bb   : > { %v11605_v48 = vpop.f32.mrf.mxu1  ;;  %4002 = vmatpush2.msra.mxu1 %v14166_v1 }
 0x3bc   : > { %v6692_v33 = vpop.f32.mrf.mxu0  ;;  %4003 = vmatprep.subr.mxu1 %v14167_v51  ;;  %v3078_v51 = vadd.f32 %v11548_v19, %v2965_v23 }
 0x3bd   : > { %v11609_v26 = vpop.f32.mrf.mxu1  ;;  %v6693_v21 = vadd.f32 %v6692_v33, %v6691_v14  ;;  %4004 = vmatpush2.msra.mxu1 %v14168_v30  ;;  %v14176_v30 = vld [vmem:[#allocation48_spill] sm:$0xff] }
 0x3be   : > { %v6694_v20 = vpop.f32.mrf.mxu0  ;;  %4005 = vmatprep.subr.mxu1 %v14169_v58 }
 0x3bf   : > { %v7473_v56 = vpop.f32.mrf.mxu1  ;;  %v3159_v61 = vadd.f32 %v6693_v21, %v11256_v13  ;;  %4006 = vmatpush2.msra.mxu1 %v14170_v25  ;;  %v2963_v25 = vadd.f32 %v11566_v37, %v14151_v17 }
 0x3c0   : > { %v6695_v47 = vpop.f32.mrf.mxu0  ;;  %4007 = vmatprep.subr.mxu1 %v14171_v9  ;;  %v14178_v9 = vld [vmem:[#allocation50_spill] sm:$0xff] }
 0x3c1   : > { %v6696_v3 = vadd.f32 %v6695_v47, %v6694_v20  ;;  %v3263_v60 = vpop.f32.mrf.mxu1  ;;  %4008 = vmatpush2.msra.mxu1 %v14172_v5  ;;  %v11640_v20 = vpop.eup %8149 }
 0x3c2   : > { %v3264_v52 = vadd.f32 %v3263_v60, %v3159_v61  ;;  %v6697_v57 = vpop.f32.mrf.mxu0  ;;  %4009 = vmatprep.subr.mxu1 %v14173_v2  ;;  %v3076_v2 = vadd.f32 %v11540_v46, %v2963_v25  ;;  %v14181_v46 = vld [vmem:[#allocation141_spill] sm:$0xff] }
 0x3c3   : > { %v3164_v14 = vadd.f32 %v6696_v3, %v11256_v13  ;;  %4010 = vmatpush2.msra.mxu1 %v14174_v11  ;;  %v7476_v15 = vpop.f32.mrf.mxu1  ;;  %v11649_v3 = vpop.eup %8151 }
 0x3c4   : > { %8159 = vtanh.f32 %v3264_v52  ;;  %v6698_v1 = vpop.f32.mrf.mxu0  ;;  %4012 = vmatmul.mubr.f32.vlgmr.msra.gmra.mxu1 %v11624_v55  ;;  %7527 = vmatprep.subr.mxu1 %v14175_v12  ;;  %v11653_v5 = vpop.eup %8153  ;;  %v14179_v52 = vld [vmem:[#allocation53_spill] sm:$0xff] }
 0x3c5   : > { %v3269_v53 = vadd.f32 %v7473_v56, %v3164_v14  ;;  %v6699_v33 = vadd.f32 %v6698_v1, %v6697_v57  ;;  %4017 = vmatprep.mubr.f32.mxu1 %v11628_v43  ;;  %7528 = vmatpush3.msra.mxu1 %v14175_v12  ;;  %8161 = vtanh.f32 %v3070_v41  ;;  %v3273_v58 = vpop.f32.mrf.mxu1  ;;  %v14177_v56 = vld [vmem:[#allocation39_spill] sm:$0xff]  ;;  %v2971_v14 = vadd.f32 %v11594_v10, %v11021_v50  ;;  %v14180_v1 = vld [vmem:[#allocation40_spill] sm:$0xff]  ;;  %v11663_v12 = vpop.eup %8155 }
 0x3c6   : > { %v6700_v21 = vpop.f32.mrf.mxu0  ;;  %7529 = vmatprep.subr.mxu1 %v14176_v30 }
 0x3c7   : > { %8163 = vtanh.f32 %v3269_v53  ;;  %v3169_v6 = vadd.f32 %v6699_v33, %v11256_v13  ;;  %7530 = vmatpush3.msra.mxu1 %v14176_v30  ;;  %v7479_v41 = vpop.f32.mrf.mxu1 }
 0x3c8   : > { %v6701_v34 = vpop.f32.mrf.mxu0  ;;  %4018 = vmatmul.mubr.f32.gmra.mxu1 %v11636_v7  ;;  %7531 = vmatprep.subr.mxu1 %v14177_v56  ;;  %8165 = vtanh.f32 %v3078_v51 }
 0x3c9   : > { %v3274_v61 = vadd.f32 %v3273_v58, %v3169_v6  ;;  %v6702_v19 = vadd.f32 %v6701_v34, %v6700_v21  ;;  %4023 = vmatprep.mubr.f32.mxu1 %v11640_v20  ;;  %7532 = vmatpush3.msra.mxu1 %v14177_v56  ;;  %v3283_v33 = vpop.f32.mrf.mxu1  ;;  %v3084_v6 = vadd.f32 %v11569_v28, %v2971_v14  ;;  %v14182_v34 = vld [vmem:[#allocation41_spill] sm:$0xff] }
 0x3ca   : > { %v6703_v47 = vpop.f32.mrf.mxu0  ;;  %7533 = vmatprep.subr.mxu1 %v14178_v9 }
 0x3cb   : > { %8167 = vtanh.f32 %v3274_v61  ;;  %v3174_v60 = vadd.f32 %v6702_v19, %v11256_v13  ;;  %7534 = vmatpush3.msra.mxu1 %v14178_v9  ;;  %v14183_v19 = vld [vmem:[#allocation49_spill] sm:$0xff]  ;;  %v14184_v9 = vld [vmem:[#allocation51_spill] sm:$0xff] }
 0x3cc   : > { %v6704_v23 = vpop.f32.mrf.mxu0  ;;  %4024 = vmatmul.mubr.f32.gmra.mxu1 %v11649_v3  ;;  %7535 = vmatprep.subr.mxu1 %v14179_v52 }
 0x3cd   : > { %v3279_v37 = vadd.f32 %v7476_v15, %v3174_v60  ;;  %v6705_v57 = vadd.f32 %v6704_v23, %v6703_v47  ;;  %4029 = vmatprep.mubr.f32.mxu1 %v11653_v5  ;;  %7536 = vmatpush3.msra.mxu1 %v14179_v52  ;;  %v11667_v15 = vpop.eup %8157  ;;  %v7482_v47 = vpop.f32.mrf.mxu1  ;;  %v14185_v52 = vld [vmem:[#allocation67_spill] sm:$0xff] }
 0x3ce   : > { %v6706_v11 = vpop.f32.mrf.mxu0  ;;  %7537 = vmatprep.subr.mxu1 %v14180_v1 }
 0x3cf   : > { %8169 = vtanh.f32 %v3279_v37  ;;  %v3179_v53 = vadd.f32 %v6705_v57, %v11256_v13  ;;  %7538 = vmatpush3.msra.mxu1 %v14180_v1  ;;  %v2969_v37 = vadd.f32 %v11583_v63, %v14151_v17  ;;  %v3293_v1 = vpop.f32.mrf.mxu1 }
 0x3d0   : > { %v6707_v51 = vpop.f32.mrf.mxu0  ;;  %4030 = vmatmul.mubr.f32.gmra.mxu1 %v11663_v12  ;;  %7539 = vmatprep.subr.mxu1 %v14181_v46  ;;  %8171 = vtanh.f32 %v3076_v2 }
 0x3d1   : > { %v11671_v21 = vpop.eup %8159  ;;  %v3284_v10 = vadd.f32 %v3283_v33, %v3179_v53  ;;  %v6708_v30 = vadd.f32 %v6707_v51, %v6706_v11  ;;  %4035 = vmatprep.mubr.f32.mxu1 %v11667_v15  ;;  %7540 = vmatpush3.msra.mxu1 %v14181_v46  ;;  %v14187_v53 = vld [vmem:[#allocation55_spill] sm:$0xff]  ;;  %v14188_v46 = vld [vmem:[#allocation52_spill] sm:$0xff] }
 0x3d2   : > { %4125 = vmatmul.mubr.f32.vlgmr.msra.gmra.mxu0 %v11671_v21  ;;  %v6709_v58 = vpop.f32.mrf.mxu0  ;;  %7541 = vmatprep.subr.mxu1 %v14182_v34  ;;  %v11678_v56 = vpop.eup %8161 }
 0x3d3   : > { %8173 = vtanh.f32 %v3284_v10  ;;  %v3184_v61 = vadd.f32 %v6708_v30, %v11256_v13  ;;  %6820 = vmatpush3.msra.mxu0 %v14183_v19  ;;  %4130 = vmatprep.mubr.f32.mxu0 %v13686_v49  ;;  %v3082_v10 = vadd.f32 %v11560_v4, %v2969_v37  ;;  %v14189_v30 = vld [vmem:[#allocation43_spill] sm:$0xff] }
 0x3d4   : > { %v11683_v25 = vpop.eup %8163  ;;  %6821 = vmatprep.subr.mxu0 %v14184_v9  ;;  %v6710_v28 = vpop.f32.mrf.mxu0  ;;  %7542 = vmatpush3.msra.mxu1 %v14182_v34  ;;  %8175 = vtanh.f32 %v3084_v6  ;;  %v14197_v6 = vld [vmem:[#allocation45_spill] sm:$0xff]  ;;  %v14200_v19 = vld [vmem:[#allocation59_spill] sm:$0xff]  ;;  %v11809_v9 = vld [vmem:[#allocation10 + $0x450] sm:$0xff] }
 0x3d5   : > { %v3289_v60 = vadd.f32 %v7479_v41, %v3184_v61  ;;  %v6711_v23 = vadd.f32 %v6710_v28, %v6709_v58  ;;  %6822 = vmatpush3.msra.mxu0 %v14185_v52  ;;  %4036 = vmatmul.mubr.f32.gmra.mxu1 %v11678_v56  ;;  %v11693_v2 = vpop.eup %8165  ;;  %v14186_v41 = vld [vmem:[#allocation69_spill] sm:$0xff]  ;;  %v4443_v28 = vld [vmem:[#allocation10 + $0x120] sm:$0xff] }
 0x3d6   : > { %4131 = vmatmul.mubr.f32.gmra.mxu0 %v11683_v25  ;;  %6823 = vmatprep.subr.mxu0 %v11341_v18  ;;  %v6712_v57 = vpop.f32.mrf.mxu0  ;;  %v2977_v18 = vadd.f32 %v11609_v26, %v11021_v50  ;;  %v11827_v52 = vld [vmem:[#allocation10 + $0x108] sm:$0xff] }
 0x3d7   : > { %8177 = vtanh.f32 %v3289_v60  ;;  %v3189_v14 = vadd.f32 %v6711_v23, %v11256_v13  ;;  %6824 = vmatpush3.msra.mxu0 %v14186_v41  ;;  %4136 = vmatprep.mubr.f32.mxu0 %v13686_v49  ;;  %v11817_v60 = vld [vmem:[#allocation10 + $0x438] sm:$0xff]  ;;  %v11821_v23 = vld [vmem:[#allocation10 + $0x428] sm:$0xff] }
 0x3d8   : > { %v11698_v11 = vpop.eup %8167  ;;  %6825 = vmatprep.subr.mxu0 %v11350_v45  ;;  %v6713_v63 = vpop.f32.mrf.mxu0  ;;  %7543 = vmatprep.subr.mxu1 %v14187_v53  ;;  %v3090_v26 = vadd.f32 %v11589_v32, %v2977_v18  ;;  %v14195_v32 = vld [vmem:[#allocation75_spill] sm:$0xff] }
 0x3d9   : > { %v3294_v33 = vadd.f32 %v3293_v1, %v3189_v14  ;;  %v6714_v51 = vadd.f32 %v6713_v63, %v6712_v57  ;;  %6826 = vmatpush3.msra.mxu0 %v14188_v46  ;;  %4041 = vmatprep.mubr.f32.mxu1 %v11693_v2  ;;  %v11835_v57 = vld [vmem:[#allocation10 + $0x410] sm:$0xff]  ;;  %v11850_v1 = vld [vmem:[#allocation10 + $0xd8] sm:$0xff]  ;;  %v11854_v63 = vld [vmem:[#allocation10 + $0xc8] sm:$0xff] }
 0x3da   : > { %4137 = vmatmul.mubr.f32.gmra.mxu0 %v11698_v11  ;;  %6827 = vmatprep.subr.mxu0 %v11356_v40  ;;  %v11838_v14 = vld [vmem:[#allocation10 + $0xf0] sm:$0xff] }
 0x3db   : > { %8179 = vtanh.f32 %v3294_v33  ;;  %v3194_v45 = vadd.f32 %v6714_v51, %v11256_v13  ;;  %6828 = vmatpush3.msra.mxu0 %v11361_v35  ;;  %4142 = vmatprep.mubr.f32.mxu0 %v13686_v49  ;;  %v2975_v13 = vadd.f32 %v11605_v48, %v14151_v17  ;;  %v14192_v17 = vld [vmem:[#allocation57_spill] sm:$0xff]  ;;  %v14196_v48 = vld [vmem:[#allocation58_spill] sm:$0xff]  ;;  %v11863_v33 = vld [vmem:[#allocation10 + $0xc0] sm:$0xff] }
 0x3dc   : > { %v11712_v50 = vpop.eup %8169  ;;  %6829 = vmatprep.subr.mxu0 %v11364_v16  ;;  %7544 = vmatpush3.msra.mxu1 %v14187_v53  ;;  %8181 = vtanh.f32 %v3082_v10  ;;  %v11857_v53 = vld [vmem:[#allocation10 + $0x3f8] sm:$0xff]  ;;  %v11865_v51 = vld [vmem:[#allocation10 + $0x3f0] sm:$0xff]  ;;  %v11872_v10 = vld [vmem:[#allocation10 + $0xa8] sm:$0xff] }
 0x3dd   : > { %v3299_v4 = vadd.f32 %v7482_v47, %v3194_v45  ;;  %6830 = vmatpush3.msra.mxu0 %v11368_v24  ;;  %7545 = vmatprep.subr.mxu1 %v14189_v30  ;;  %v11723_v40 = vpop.eup %8171  ;;  %v3088_v35 = vadd.f32 %v11580_v8, %v2975_v13  ;;  %v14202_v47 = vld [vmem:[#allocation47_spill] sm:$0xff]  ;;  %v11869_v46 = vld [vmem:[#allocation10 + $0xb0] sm:$0xff]  ;;  %v11875_v45 = vld [vmem:[#allocation10 + $0x3e0] sm:$0xff] }
 0x3de   : > { %4143 = vmatmul.mubr.f32.gmra.mxu0 %v11712_v50  ;;  %6831 = vmatprep.subr.mxu0 %v11371_v36  ;;  %v14190_v36 = vld [vmem:[#allocation71_spill] sm:$0xff]  ;;  %v11889_v13 = vld [vmem:[#allocation10 + $0x3c8] sm:$0xff] }
 0x3df   : > { %8183 = vtanh.f32 %v3299_v4  ;;  %6832 = vmatpush3.msra.mxu0 %v11376_v31  ;;  %4148 = vmatprep.mubr.f32.mxu0 %v13686_v49 }
 0x3e0   : > { %v11727_v16 = vpop.eup %8173  ;;  %6833 = vmatprep.subr.mxu0 %v11379_v54  ;;  %7546 = vmatpush3.msra.mxu1 %v14189_v30  ;;  %8185 = vtanh.f32 %v3090_v26  ;;  %v14191_v54 = vld [vmem:[#allocation54_spill] sm:$0xff]  ;;  %v11881_v26 = vld [vmem:[#allocation10 + $0x3d8] sm:$0xff] }
 0x3e1   : > { %6834 = vmatpush3.msra.mxu0 %v11383_v62  ;;  %4042 = vmatmul.mubr.f32.gmra.mxu1 %v11723_v40  ;;  %v11736_v24 = vpop.eup %8175  ;;  %v14193_v62 = vld [vmem:[#allocation73_spill] sm:$0xff]  ;;  %8187 = vtanh.f32 %v3088_v35  ;;  %v11887_v30 = vld [vmem:[#allocation10 + $0x90] sm:$0xff]  ;;  %v11898_v35 = vld [vmem:[#allocation10 + $0x78] sm:$0xff] }
 0x3e2   : > { %4149 = vmatmul.mubr.f32.gmra.mxu0 %v11727_v16  ;;  %6835 = vmatprep.subr.mxu0 %v11386_v44  ;;  %v14194_v44 = vld [vmem:[#allocation56_spill] sm:$0xff] }
 0x3e3   : > { %6836 = vmatpush3.msra.mxu0 %v14190_v36  ;;  %4154 = vmatprep.mubr.f32.mxu0 %v13686_v49  ;;  %v11904_v36 = vld [vmem:[#allocation10 + $0x68] sm:$0xff] }
 0x3e4   : > { %v11740_v31 = vpop.eup %8177  ;;  %6837 = vmatprep.subr.mxu0 %v14191_v54  ;;  %7547 = vmatprep.subr.mxu1 %v14192_v17  ;;  %14204 = vst [vmem:[#allocation66_spill] sm:$0xff] %v11904_v36 }
 0x3e5   : > { %6838 = vmatpush3.msra.mxu0 %v14193_v62  ;;  %4047 = vmatprep.mubr.f32.mxu1 %v11736_v24  ;;  %v11915_v62 = vld [vmem:[#allocation10 + $0x398] sm:$0xff] }
 0x3e6   : > { %4155 = vmatmul.mubr.f32.gmra.mxu0 %v11740_v31  ;;  %6839 = vmatprep.subr.mxu0 %v11400_v42  ;;  %v14198_v42 = vld [vmem:[#allocation64_spill] sm:$0xff]  ;;  %14206 = vst [vmem:[#allocation60_spill] sm:$0xff] %v11915_v62 }
 0x3e7   : > { %6840 = vmatpush3.msra.mxu0 %v14194_v44  ;;  %4160 = vmatprep.mubr.f32.mxu0 %v13686_v49  ;;  %v11918_v44 = vld [vmem:[#allocation10 + $0x50] sm:$0xff] }
 0x3e8   : > { %v11750_v8 = vpop.eup %8179  ;;  %6841 = vmatprep.subr.mxu0 %v14195_v32  ;;  %7548 = vmatpush3.msra.mxu1 %v14192_v17  ;;  %v11912_v17 = vld [vmem:[#allocation10 + $0x60] sm:$0xff]  ;;  %14207 = vst [vmem:[#allocation68_spill] sm:$0xff] %v11918_v44  ;;  %v11924_v32 = vld [vmem:[#allocation10 + $0x48] sm:$0xff] }
 0x3e9   : > { %6842 = vmatpush3.msra.mxu0 %v14196_v48  ;;  %7549 = vmatprep.subr.mxu1 %v14197_v6  ;;  %v11758_v58 = vpop.eup %8181  ;;  %14205 = vst [vmem:[#allocation109_spill] sm:$0xff] %v11912_v17  ;;  %14209 = vst [vmem:[#allocation110_spill] sm:$0xff] %v11924_v32  ;;  %v11927_v48 = vld [vmem:[#allocation10 + $0x380] sm:$0xff] }
 0x3ea   : > { %4161 = vmatmul.mubr.f32.gmra.mxu0 %v11750_v8  ;;  %6843 = vmatprep.subr.mxu0 %v11414_v0  ;;  %v14199_v0 = vld [vmem:[#allocation107_spill] sm:$0xff]  ;;  %14210 = vst [vmem:[#allocation70_spill] sm:$0xff] %v11927_v48 }
 0x3eb   : > { %6844 = vmatpush3.msra.mxu0 %v14198_v42  ;;  %4166 = vmatprep.mubr.f32.mxu0 %v13686_v49 }
 0x3ec   : > { %v11762_v34 = vpop.eup %8183  ;;  %6845 = vmatprep.subr.mxu0 %v11421_v59  ;;  %7550 = vmatpush3.msra.mxu1 %v14197_v6  ;;  %v11930_v6 = vld [vmem:[#allocation10 + $0x38] sm:$0xff] }
 0x3ed   : > { %6846 = vmatpush3.msra.mxu0 %v11425_v38  ;;  %4048 = vmatmul.mubr.f32.gmra.mxu1 %v11758_v58  ;;  %v11768_v61 = vpop.eup %8185  ;;  %v14201_v38 = vld [vmem:[#allocation46_spill] sm:$0xff]  ;;  %14211 = vst [vmem:[#allocation111_spill] sm:$0xff] %v11930_v6 }
 0x3ee   : > { %4167 = vmatmul.mubr.f32.gmra.mxu0 %v11762_v34  ;;  %6847 = vmatprep.subr.mxu0 %v14199_v0  ;;  %v11780_v59 = vpop.eup %8187  ;;  %v11944_v0 = vld [vmem:[#allocation10 + $0x20] sm:$0xff] }
 0x3ef   : > { %7551 = vmatprep.subr.mxu1 %v14200_v19  ;;  %4053 = vmatprep.mubr.f32.mxu1 %v11768_v61  ;;  %14215 = vst [vmem:[#allocation114_spill] sm:$0xff] %v11944_v0 }
 0x3f0   : > { %6848 = vmatpush3.msra.mxu0 %v11432_v27  ;;  %4237 = vmatprep.mubr.f32.mxu0 %v11530_v39  ;;  %v14203_v27 = vld [vmem:[#allocation65_spill] sm:$0xff]  ;;  %v11792_v39 = vld [vmem:[#allocation10 + $0x470] sm:$0xff] }
 0x3f1   : > { %7552 = vmatpush3.msra.mxu1 %v14200_v19  ;;  %6849 = vmatprep.subr.mxu0 %v11435_v22  ;;  %v4453_v22 = vld [vmem:[#allocation10 + $0x170] sm:$0xff]  ;;  %v11947_v19 = vld [vmem:[#allocation10 + $0x360] sm:$0xff] }
 0x3f2   : > { %7553 = vmatprep.subr.mxu1 %v14201_v38  ;;  %6850 = vmatpush3.msra.mxu0 %v11439_v29  ;;  %v4452_v29 = vld [vmem:[#allocation10 + $0x168] sm:$0xff]  ;;  %14216 = vst [vmem:[#allocation76_spill] sm:$0xff] %v11947_v19 }
 0x3f3   : > { %7554 = vmatpush3.msra.mxu1 %v14201_v38  ;;  %4238 = vmatmul.mubr.f32.vlgmr.msra.gmra.mxu0 %v11624_v55  ;;  %v4450_v55 = vld [vmem:[#allocation10 + $0x158] sm:$0xff] }
 0x3f4   : > { %4054 = vmatmul.mubr.f32.gmra.mxu1 %v11780_v59  ;;  %7555 = vmatprep.subr.mxu1 %v14202_v47  ;;  %v11950_v38 = vld [vmem:[#allocation10 + $0x18] sm:$0xff] }
 0x3f5   : > { %4242 = vmatprep.mubr.f32.mxu0 %v11628_v43  ;;  %7556 = vmatpush3.msra.mxu1 %v14202_v47  ;;  %v4449_v43 = vld [vmem:[#allocation10 + $0x150] sm:$0xff]  ;;  %14217 = vst [vmem:[#allocation116_spill] sm:$0xff] %v11950_v38  ;;  %v11956_v47 = vld [vmem:[#allocation10 + $0x8] sm:$0xff] }
 0x3f6   : > { %7559 = vmatprep.mubr.f32.mxu1 %v11671_v21  ;;  %7557 = vmatprep.subr.mxu1 %v14203_v27  ;;  %v4447_v21 = vld [vmem:[#allocation10 + $0x140] sm:$0xff]  ;;  %14219 = vst [vmem:[#allocation117_spill] sm:$0xff] %v11956_v47 }
 0x3f7   : > { %7558 = vmatpush3.msra.mxu1 %v14203_v27  ;;  %4243 = vmatmul.mubr.f32.gmra.mxu0 %v11636_v7  ;;  %v11799_v7 = vld [vmem:[#allocation10 + $0x468] sm:$0xff] }
 0x3f8   : > { %7560 = vmatmul.mubr.f32.vlgmr.msra.gmra.mxu1 %v11683_v25  ;;  %4247 = vmatprep.mubr.f32.mxu0 %v11640_v20  ;;  %v11803_v25 = vld [vmem:[#allocation10 + $0x458] sm:$0xff]  ;;  %v11959_v27 = vld [vmem:[#allocation10 + $0x348] sm:$0xff] }
 0x3f9   : > { %7562 = vmatprep.mubr.f32.mxu1 %v11698_v11  ;;  %4568 = vmatprep.subr.mxu0 %v4453_v22  ;;  %v4446_v20 = vld [vmem:[#allocation10 + $0x138] sm:$0xff]  ;;  %v11847_v11 = vld [vmem:[#allocation10 + $0xe0] sm:$0xff]  ;;  %14220 = vst [vmem:[#allocation80_spill] sm:$0xff] %v11959_v27 }
 0x3fa   : > { %4569 = vmatpush1.msra.mxu0 %v4452_v29  ;;  %4681 = vmatprep.subr.mxu1 %v11792_v39  ;;  %v11964_v29 = vld [vmem:[#allocation10] sm:$0xff] }
 0x3fb   : > { %4248 = vmatmul.mubr.f32.gmra.mxu0 %v11649_v3  ;;  %4570 = vmatprep.subr.mxu0 %v4450_v55  ;;  %v4444_v3 = vld [vmem:[#allocation10 + $0x128] sm:$0xff]  ;;  %14221 = vst [vmem:[#allocation79_spill] sm:$0xff] %v11964_v29  ;;  %v11967_v55 = vld [vmem:[#allocation10 + $0x338] sm:$0xff] }
 0x3fc   : > { %7563 = vmatmul.mubr.f32.gmra.mxu1 %v11712_v50  ;;  %4252 = vmatprep.mubr.f32.mxu0 %v11653_v5  ;;  %v11813_v5 = vld [vmem:[#allocation10 + $0x440] sm:$0xff]  ;;  %v11878_v50 = vld [vmem:[#allocation10 + $0x98] sm:$0xff]  ;;  %14222 = vst [vmem:[#allocation119_spill] sm:$0xff] %v11967_v55 }
 0x3fd   : > { %7565 = vmatprep.mubr.f32.mxu1 %v11727_v16  ;;  %4571 = vmatpush1.msra.mxu0 %v4449_v43  ;;  %v11895_v16 = vld [vmem:[#allocation10 + $0x3c0] sm:$0xff]  ;;  %v11970_v43 = vld [vmem:[#allocation10 + $0x2f0] sm:$0xff] }
 0x3fe   : > { %4572 = vmatprep.subr.mxu0 %v4447_v21  ;;  %4682 = vmatpush1.msra.mxu1 %v11799_v7  ;;  %14223 = vst [vmem:[#allocation120_spill] sm:$0xff] %v11970_v43  ;;  %v11973_v21 = vld [vmem:[#allocation10 + $0x330] sm:$0xff] }
 0x3ff   : > { %4253 = vmatmul.mubr.f32.gmra.mxu0 %v11663_v12  ;;  %4683 = vmatprep.subr.mxu1 %v11803_v25  ;;  %v4441_v12 = vld [vmem:[#allocation10 + $0x110] sm:$0xff]  ;;  %14224 = vst [vmem:[#allocation81_spill] sm:$0xff] %v11973_v21 }
 0x400   : > { %7566 = vmatmul.mubr.f32.gmra.mxu1 %v11740_v31  ;;  %4257 = vmatprep.mubr.f32.mxu0 %v11667_v15  ;;  %v11825_v15 = vld [vmem:[#allocation10 + $0x420] sm:$0xff]  ;;  %v11907_v31 = vld [vmem:[#allocation10 + $0x3a8] sm:$0xff] }
 0x401   : > { %7568 = vmatprep.mubr.f32.mxu1 %v11750_v8  ;;  %4573 = vmatpush1.msra.mxu0 %v4446_v20  ;;  %v11921_v8 = vld [vmem:[#allocation10 + $0x390] sm:$0xff]  ;;  %v11976_v20 = vld [vmem:[#allocation10 + $0x2e8] sm:$0xff] }
 0x402   : > { %4574 = vmatprep.subr.mxu0 %v4444_v3  ;;  %4684 = vmatpush1.msra.mxu1 %v11809_v9  ;;  %14208 = vst [vmem:[#allocation78_spill] sm:$0xff] %v11921_v8  ;;  %14225 = vst [vmem:[#allocation122_spill] sm:$0xff] %v11976_v20  ;;  %v11979_v3 = vld [vmem:[#allocation10 + $0x320] sm:$0xff] }
 0x403   : > { %4258 = vmatmul.mubr.f32.gmra.mxu0 %v11678_v56  ;;  %4685 = vmatprep.subr.mxu1 %v11813_v5  ;;  %v11832_v56 = vld [vmem:[#allocation10 + $0xf8] sm:$0xff]  ;;  %14226 = vst [vmem:[#allocation61_spill] sm:$0xff] %v11979_v3 }
 0x404   : > { %7569 = vmatmul.mubr.f32.gmra.mxu1 %v11762_v34  ;;  %4262 = vmatprep.mubr.f32.mxu0 %v11693_v2  ;;  %v11841_v2 = vld [vmem:[#allocation10 + $0x408] sm:$0xff]  ;;  %v11938_v34 = vld [vmem:[#allocation10 + $0x30] sm:$0xff] }
 0x405   : > { %4575 = vmatpush1.msra.mxu0 %v4443_v28  ;;  %4686 = vmatpush1.msra.mxu1 %v11817_v60  ;;  %14213 = vst [vmem:[#allocation113_spill] sm:$0xff] %v11938_v34  ;;  %v11982_v28 = vld [vmem:[#allocation10 + $0x2d8] sm:$0xff] }
 0x406   : > { %4576 = vmatprep.subr.mxu0 %v4441_v12  ;;  %v11830_v37 = vpop.f32.mrf.mxu0  ;;  %4687 = vmatprep.subr.mxu1 %v11821_v23  ;;  %14227 = vst [vmem:[#allocation105_spill] sm:$0xff] %v11982_v28  ;;  %v11985_v12 = vld [vmem:[#allocation10 + $0x318] sm:$0xff] }
 0x407   : > { %4263 = vmatmul.mubr.f32.gmra.mxu0 %v11723_v40  ;;  %4688 = vmatpush1.msra.mxu1 %v11825_v15  ;;  %v11892_v40 = vld [vmem:[#allocation10 + $0x80] sm:$0xff]  ;;  %14228 = vst [vmem:[#allocation144_spill] sm:$0xff] %v11985_v12 }
 0x408   : > { %4267 = vmatprep.mubr.f32.mxu0 %v11736_v24  ;;  %4577 = vmatpush1.msra.mxu0 %v11827_v52  ;;  %v11845_v41 = vpop.f32.mrf.mxu0  ;;  %v11901_v24 = vld [vmem:[#allocation10 + $0x3b0] sm:$0xff] }
 0x409   : > { %4578 = vmatprep.subr.mxu0 %v11832_v56  ;;  %4689 = vmatprep.subr.mxu1 %v11835_v57 }
 0x40a   : > { %4579 = vmatpush1.msra.mxu0 %v11838_v14  ;;  %4690 = vmatpush1.msra.mxu1 %v11841_v2  ;;  %v11861_v18 = vpop.f32.mrf.mxu0 }
 0x40b   : > { %4268 = vmatmul.mubr.f32.gmra.mxu0 %v11758_v58  ;;  %4580 = vmatprep.subr.mxu0 %v11847_v11  ;;  %v11933_v58 = vld [vmem:[#allocation10 + $0x378] sm:$0xff] }
 0x40c   : > { %4272 = vmatprep.mubr.f32.mxu0 %v11768_v61  ;;  %4581 = vmatpush1.msra.mxu0 %v11850_v1  ;;  %v11884_v4 = vpop.f32.mrf.mxu0  ;;  %14212 = vst [vmem:[#allocation72_spill] sm:$0xff] %v11933_v58  ;;  %v11941_v61 = vld [vmem:[#allocation10 + $0x368] sm:$0xff] }
 0x40d   : > { %4582 = vmatprep.subr.mxu0 %v11854_v63  ;;  %4691 = vmatprep.subr.mxu1 %v11857_v53  ;;  %14214 = vst [vmem:[#allocation74_spill] sm:$0xff] %v11941_v61 }
 0x40e   : > { %4583 = vmatpush1.msra.mxu0 %v11863_v33  ;;  %4692 = vmatpush1.msra.mxu1 %v11865_v51  ;;  %v11909_v54 = vpop.f32.mrf.mxu0 }
 0x40f   : > { %4273 = vmatmul.mubr.f32.gmra.mxu0 %v11780_v59  ;;  %4584 = vmatprep.subr.mxu0 %v11869_v46  ;;  %v11953_v59 = vld [vmem:[#allocation10 + $0x350] sm:$0xff] }
 0x410   : > { %4585 = vmatpush1.msra.mxu0 %v11872_v10  ;;  %4693 = vmatprep.subr.mxu1 %v11875_v45  ;;  %v11935_v42 = vpop.f32.mrf.mxu0  ;;  %14218 = vst [vmem:[#allocation77_spill] sm:$0xff] %v11953_v59 }
 0x411   : > { %4586 = vmatprep.subr.mxu0 %v11878_v50  ;;  %4694 = vmatpush1.msra.mxu1 %v11881_v26 }
 0x412   : > { %4587 = vmatpush1.msra.mxu0 %v11887_v30  ;;  %4695 = vmatprep.subr.mxu1 %v11889_v13  ;;  %v11961_v22 = vpop.f32.mrf.mxu0 }
 0x413   : > { %4588 = vmatprep.subr.mxu0 %v11892_v40  ;;  %4696 = vmatpush1.msra.mxu1 %v11895_v16 }
 0x414   : > { %4589 = vmatpush1.msra.mxu0 %v11898_v35  ;;  %4697 = vmatprep.subr.mxu1 %v11901_v24 }
 0x415   : > { %4590 = vmatprep.subr.mxu0 %v11904_v36  ;;  %4698 = vmatpush1.msra.mxu1 %v11907_v31 }
 0x416   : > { %4591 = vmatpush1.msra.mxu0 %v11912_v17  ;;  %4699 = vmatprep.subr.mxu1 %v11915_v62  ;;  %v12251_v62 = vld [vmem:[#allocation10 + $0x328] sm:$0xff] }
 0x417   : > { %4592 = vmatprep.subr.mxu0 %v11918_v44  ;;  %4700 = vmatpush1.msra.mxu1 %v11921_v8  ;;  %14282 = vst [vmem:[#allocation42_spill] sm:$0xff] %v12251_v62 }
 0x418   : > { %4593 = vmatpush1.msra.mxu0 %v11924_v32  ;;  %4701 = vmatprep.subr.mxu1 %v11927_v48  ;;  %v12055_v48 = vld [vmem:[#allocation10 + $0x248] sm:$0xff]  ;;  %v12073_v32 = vld [vmem:[#allocation10 + $0x218] sm:$0xff] }
 0x419   : > { %4594 = vmatprep.subr.mxu0 %v11930_v6  ;;  %4702 = vmatpush1.msra.mxu1 %v11933_v58  ;;  %14246 = vst [vmem:[#allocation87_spill] sm:$0xff] %v12055_v48  ;;  %14250 = vst [vmem:[#allocation138_spill] sm:$0xff] %v12073_v32 }
 0x41a   : > { %4595 = vmatpush1.msra.mxu0 %v11938_v34  ;;  %4703 = vmatprep.subr.mxu1 %v11941_v61  ;;  %v12044_v34 = vld [vmem:[#allocation10 + $0x270] sm:$0xff] }
 0x41b   : > { %4596 = vmatprep.subr.mxu0 %v11944_v0  ;;  %4704 = vmatpush1.msra.mxu1 %v11947_v19  ;;  %v11987_v19 = vpop.f32.mrf.mxu0  ;;  %14243 = vst [vmem:[#allocation132_spill] sm:$0xff] %v12044_v34 }
 0x41c   : > { %4597 = vmatpush1.msra.mxu0 %v11950_v38  ;;  %4705 = vmatprep.subr.mxu1 %v11953_v59  ;;  %v11990_v59 = vld [vmem:[#allocation10 + $0x2d0] sm:$0xff]  ;;  %v12015_v38 = vld [vmem:[#allocation10 + $0x2a8] sm:$0xff] }
 0x41d   : > { %4598 = vmatprep.subr.mxu0 %v11956_v47  ;;  %4706 = vmatpush1.msra.mxu1 %v11959_v27  ;;  %14229 = vst [vmem:[#allocation83_spill] sm:$0xff] %v11990_v59  ;;  %v11993_v47 = vld [vmem:[#allocation10 + $0x308] sm:$0xff]  ;;  %v11998_v27 = vld [vmem:[%s13213_s8] sm:$0x7]  ;;  %14235 = vst [vmem:[#allocation63_spill] sm:$0xff] %v12015_v38 }
 0x41e   : > { %4599 = vmatpush1.msra.mxu0 %v11964_v29  ;;  %4707 = vmatprep.subr.mxu1 %v11967_v55  ;;  %14230 = vst [vmem:[#allocation82_spill] sm:$0xff] %v11993_v47  ;;  %v12001_v55 = vld [vmem:[#allocation10 + $0x2c0] sm:$0xff] }
 0x41f   : > { %4600 = vmatprep.subr.mxu0 %v11970_v43  ;;  %4708 = vmatpush1.msra.mxu1 %v11973_v21  ;;  %14231 = vst [vmem:[#allocation84_spill] sm:$0xff] %v12001_v55  ;;  %v12004_v29 = vld [vmem:[#allocation10 + $0x300] sm:$0xff]  ;;  %v14233_v43 = vld [vmem:[#allocation102_spill] sm:$0xff]  ;;  %v12011_v21 = vld [vmem:[#allocation10 + $0x2b8] sm:$0xff] }
 0x420   : > { %4601 = vmatpush2.msra.mxu0 %v11976_v20  ;;  %4709 = vmatprep.subr.mxu1 %v11979_v3  ;;  %14232 = vst [vmem:[#allocation123_spill] sm:$0xff] %v12004_v29  ;;  %v12008_v61 = vrot.slane %v11998_v27, %v14233_v43  ;;  %14234 = vst [vmem:[#allocation85_spill] sm:$0xff] %v12011_v21  ;;  %v12018_v20 = vld [vmem:[#allocation10 + $0x2f8] sm:$0xff]  ;;  %v12020_v3 = vpop.f32.mrf.mxu0  ;;  %v12023_v43 = vld [vmem:[#allocation10 + $0x2a0] sm:$0xff] }
 0x421   : > { %4602 = vmatprep.subr.mxu0 %v11982_v28  ;;  %4710 = vmatpush1.msra.mxu1 %v11985_v12  ;;  %14236 = vst [vmem:[#allocation128_spill] sm:$0xff] %v12018_v20  ;;  %14237 = vst [vmem:[#allocation125_spill] sm:$0xff] %v12023_v43  ;;  %v12027_v28 = vld [vmem:[#allocation10 + $0x290] sm:$0xff] }
 0x422   : > { %4603 = vmatpush2.msra.mxu0 %v11990_v59  ;;  %4711 = vmatprep.subr.mxu1 %v11993_v47  ;;  %14238 = vst [vmem:[#allocation129_spill] sm:$0xff] %v12027_v28  ;;  %v3556_v47 = vadd.f32 %v11845_v41, %v12008_v61  ;;  %v12033_v59 = vld [vmem:[#allocation10 + $0x288] sm:$0xff]  ;;  %v3579_v58 = vpop.f32.mrf.mxu0 }
 0x423   : > { %4604 = vmatprep.subr.mxu0 %v12001_v55  ;;  %4712 = vmatpush1.msra.mxu1 %v12004_v29  ;;  %14239 = vst [vmem:[#allocation126_spill] sm:$0xff] %v12033_v59  ;;  %v12037_v55 = vld [vmem:[#allocation10 + $0x278] sm:$0xff] }
 0x424   : > { %4605 = vmatpush2.msra.mxu0 %v12011_v21  ;;  %v3666_v12 = vpop.f32.mrf.mxu1  ;;  %4745 = vmatprep.mubr.f32.mxu1 %v13686_v49  ;;  %14240 = vst [vmem:[#allocation131_spill] sm:$0xff] %v12037_v55  ;;  %v14241_v21 = vld [vmem:[#allocation101_spill] sm:$0xff] }
 0x425   : > { %4606 = vmatprep.subr.mxu0 %v12015_v38  ;;  %6899 = vmatprep.subr.mxu1 %v12018_v20  ;;  %v12041_v0 = vrot.slane %v11998_v27, %v14241_v21  ;;  %v12047_v38 = vld [vmem:[#allocation10 + $0x260] sm:$0xff]  ;;  %v3562_v21 = vadd.f32 %v11884_v4, %v12008_v61 }
 0x426   : > { %4607 = vmatpush2.msra.mxu0 %v12023_v43  ;;  %v3668_v29 = vpop.f32.mrf.mxu1  ;;  %14244 = vst [vmem:[#allocation86_spill] sm:$0xff] %v12047_v38  ;;  %v12050_v43 = vld [vmem:[#allocation10 + $0x258] sm:$0xff] }
 0x427   : > { %14242 = vst [vmem:[#allocation103_spill] sm:$0xff] %v12041_v0  ;;  %4608 = vmatprep.subr.mxu0 %v12027_v28  ;;  %v3669_v41 = vadd.f32 %v3668_v29, %v3556_v47  ;;  %14245 = vst [vmem:[#allocation134_spill] sm:$0xff] %v12050_v43  ;;  %v3554_v47 = vadd.f32 %v11830_v37, %v12041_v0  ;;  %v12059_v29 = vpop.f32.mrf.mxu0  ;;  %v3568_v37 = vadd.f32 %v11935_v42, %v12008_v61 }
 0x428   : > { %4609 = vmatpush2.msra.mxu0 %v12033_v59  ;;  %v3672_v20 = vpop.f32.mrf.mxu1  ;;  %v12062_v59 = vld [vmem:[#allocation10 + $0x240] sm:$0xff] }
 0x429   : > { %4610 = vmatprep.subr.mxu0 %v12037_v55  ;;  %8189 = vtanh.f32 %v3669_v41  ;;  %14247 = vst [vmem:[#allocation135_spill] sm:$0xff] %v12062_v59  ;;  %v12065_v41 = vld [vmem:[#allocation10 + $0x230] sm:$0xff]  ;;  %v3667_v6 = vadd.f32 %v3666_v12, %v3554_v47  ;;  %v3585_v44 = vpop.f32.mrf.mxu0 }
 0x42a   : > { %4611 = vmatpush2.msra.mxu0 %v12044_v34  ;;  %v3674_v28 = vpop.f32.mrf.mxu1  ;;  %14248 = vst [vmem:[#allocation137_spill] sm:$0xff] %v12065_v41  ;;  %v12068_v34 = vld [vmem:[#allocation10 + $0x228] sm:$0xff] }
 0x42b   : > { %4612 = vmatprep.subr.mxu0 %v12047_v38  ;;  %v3675_v55 = vadd.f32 %v3674_v28, %v3562_v21  ;;  %14249 = vst [vmem:[#allocation88_spill] sm:$0xff] %v12068_v34  ;;  %v12078_v21 = vld [vmem:[#allocation10 + $0x210] sm:$0xff]  ;;  %v12081_v28 = vld [vmem:[#allocation10 + $0x200] sm:$0xff] }
 0x42c   : > { %4613 = vmatpush2.msra.mxu0 %v12050_v43  ;;  %v3678_v4 = vpop.f32.mrf.mxu1  ;;  %v3560_v43 = vadd.f32 %v11861_v18, %v12041_v0  ;;  %14251 = vst [vmem:[#allocation89_spill] sm:$0xff] %v12078_v21  ;;  %14252 = vst [vmem:[#allocation140_spill] sm:$0xff] %v12081_v28  ;;  %v3574_v18 = vadd.f32 %v11987_v19, %v12008_v61 }
 0x42d   : > { %4614 = vmatprep.subr.mxu0 %v12055_v48  ;;  %8191 = vtanh.f32 %v3675_v55  ;;  %v3566_v55 = vadd.f32 %v11909_v54, %v12041_v0 }
 0x42e   : > { %4615 = vmatpush2.msra.mxu0 %v12062_v59  ;;  %v3680_v38 = vpop.f32.mrf.mxu1  ;;  %8193 = vtanh.f32 %v3667_v6  ;;  %v3673_v47 = vadd.f32 %v3672_v20, %v3560_v43  ;;  %v12084_v59 = vld [vmem:[#allocation10 + $0x1f8] sm:$0xff]  ;;  %v12096_v6 = vld [vmem:[#allocation10 + $0x1e0] sm:$0xff] }
 0x42f   : > { %4616 = vmatprep.subr.mxu0 %v12065_v41  ;;  %v3681_v12 = vadd.f32 %v3680_v38, %v3568_v37  ;;  %14253 = vst [vmem:[#allocation90_spill] sm:$0xff] %v12084_v59  ;;  %v12089_v41 = vld [vmem:[#allocation10 + $0x1e8] sm:$0xff]  ;;  %14255 = vst [vmem:[#allocation91_spill] sm:$0xff] %v12096_v6  ;;  %v12099_v38 = vld [vmem:[#allocation10 + $0x1d0] sm:$0xff]  ;;  %v3679_v20 = vadd.f32 %v3678_v4, %v3566_v55 }
 0x430   : > { %4617 = vmatpush2.msra.mxu0 %v12068_v34  ;;  %v3684_v42 = vpop.f32.mrf.mxu1  ;;  %14254 = vst [vmem:[#allocation94_spill] sm:$0xff] %v12089_v41  ;;  %v12093_v34 = vpop.f32.mrf.mxu0  ;;  %14256 = vst [vmem:[#allocation95_spill] sm:$0xff] %v12099_v38  ;;  %v12102_v37 = vld [vmem:[#allocation10 + $0x1c8] sm:$0xff]  ;;  %v12113_v4 = vld [vmem:[#allocation10 + $0x1b0] sm:$0xff] }
 0x431   : > { %4618 = vmatprep.subr.mxu0 %v12073_v32  ;;  %8195 = vtanh.f32 %v3681_v12  ;;  %14257 = vst [vmem:[#allocation92_spill] sm:$0xff] %v12102_v37  ;;  %v3572_v12 = vadd.f32 %v11961_v22, %v12041_v0  ;;  %14259 = vst [vmem:[#allocation93_spill] sm:$0xff] %v12113_v4  ;;  %v3586_v22 = vadd.f32 %v3585_v44, %v12008_v61 }
 0x432   : > { %4619 = vmatpush2.msra.mxu0 %v12078_v21  ;;  %v3686_v48 = vpop.f32.mrf.mxu1  ;;  %8197 = vtanh.f32 %v3673_v47  ;;  %v3580_v21 = vadd.f32 %v3579_v58, %v12008_v61  ;;  %v12117_v47 = vld [vmem:[#allocation10 + $0x1a0] sm:$0xff] }
 0x433   : > { %4620 = vmatprep.subr.mxu0 %v12081_v28  ;;  %v3687_v19 = vadd.f32 %v3686_v48, %v3574_v18  ;;  %v12108_v28 = vld [vmem:[#allocation10 + $0x1b8] sm:$0xff]  ;;  %v3591_v48 = vpop.f32.mrf.mxu0  ;;  %14260 = vst [vmem:[#allocation96_spill] sm:$0xff] %v12117_v47  ;;  %v3685_v55 = vadd.f32 %v3684_v42, %v3572_v12 }
 0x434   : > { %4621 = vmatpush2.msra.mxu0 %v12084_v59  ;;  %v3690_v43 = vpop.f32.mrf.mxu1  ;;  %14258 = vst [vmem:[#allocation145_spill] sm:$0xff] %v12108_v28 }
 0x435   : > { %4622 = vmatprep.subr.mxu0 %v12089_v41  ;;  %8199 = vtanh.f32 %v3687_v19  ;;  %v3578_v19 = vadd.f32 %v12020_v3, %v12041_v0  ;;  %v3592_v3 = vadd.f32 %v3591_v48, %v12008_v61  ;;  %v12149_v48 = vld [vmem:[#allocation10 + $0x448] sm:$0xff] }
 0x436   : > { %v12104_v54 = vpop.eup %8189  ;;  %4623 = vmatpush2.msra.mxu0 %v12096_v6  ;;  %v3692_v59 = vpop.f32.mrf.mxu1  ;;  %8201 = vtanh.f32 %v3679_v20  ;;  %v12120_v6 = vld [vmem:[#allocation10 + $0x198] sm:$0xff]  ;;  %14266 = vst [vmem:[#allocation100_spill] sm:$0xff] %v12149_v48 }
 0x437   : > { %4624 = vmatprep.subr.mxu0 %v12099_v38  ;;  %4632 = vmatprep.mubr.f32.mxu0 %v12104_v54  ;;  %v3693_v58 = vadd.f32 %v3692_v59, %v3580_v21  ;;  %14261 = vst [vmem:[#allocation97_spill] sm:$0xff] %v12120_v6  ;;  %v12124_v38 = vld [vmem:[#allocation10 + $0x188] sm:$0xff]  ;;  %v12129_v59 = vld [vmem:[#allocation10 + $0x180] sm:$0xff]  ;;  %v12132_v20 = vld [vmem:[#allocation10 + $0x478] sm:$0xff]  ;;  %v3691_v12 = vadd.f32 %v3690_v43, %v3578_v19 }
 0x438   : > { %4625 = vmatpush2.msra.mxu0 %v12102_v37  ;;  %v3696_v18 = vpop.f32.mrf.mxu1  ;;  %14262 = vst [vmem:[#allocation146_spill] sm:$0xff] %v12124_v38  ;;  %v3595_v37 = vpop.f32.mrf.mxu0  ;;  %14263 = vst [vmem:[#allocation142_spill] sm:$0xff] %v12129_v59 }
 0x439   : > { %4626 = vmatprep.subr.mxu0 %v12108_v28  ;;  %8203 = vtanh.f32 %v3693_v58  ;;  %14264 = vst [vmem:[#allocation98_spill] sm:$0xff] %v12132_v20  ;;  %v12141_v28 = vld [vmem:[#allocation10 + $0x460] sm:$0xff] }
 0x43a   : > { %4627 = vmatpush2.msra.mxu0 %v12113_v4  ;;  %v3698_v41 = vpop.f32.mrf.mxu1  ;;  %v12134_v44 = vpop.eup %8191  ;;  %8205 = vtanh.f32 %v3685_v55  ;;  %14265 = vst [vmem:[#allocation99_spill] sm:$0xff] %v12141_v28 }
 0x43b   : > { %4628 = vmatprep.subr.mxu0 %v12117_v47  ;;  %v3699_v21 = vadd.f32 %v3698_v41, %v3586_v22  ;;  %v12137_v4 = vpop.eup %8193  ;;  %v3584_v41 = vadd.f32 %v12059_v29, %v12041_v0  ;;  %v3597_v58 = vpop.f32.mrf.mxu0 }
 0x43c   : > { %4629 = vmatpush2.msra.mxu0 %v12120_v6  ;;  %v3702_v42 = vpop.f32.mrf.mxu1 }
 0x43d   : > { %4630 = vmatprep.subr.mxu0 %v12124_v38  ;;  %8207 = vtanh.f32 %v3699_v21  ;;  %v3697_v19 = vadd.f32 %v3696_v18, %v3584_v41  ;;  %v12158_v21 = vld [vmem:[#allocation10 + $0x430] sm:$0xff] }
 0x43e   : > { %4631 = vmatpush2.msra.mxu0 %v12129_v59  ;;  %v3704_v47 = vpop.f32.mrf.mxu1  ;;  %v12151_v22 = vpop.eup %8195  ;;  %8209 = vtanh.f32 %v3691_v12  ;;  %v3598_v59 = vadd.f32 %v3597_v58, %v12008_v61  ;;  %14267 = vst [vmem:[#allocation108_spill] sm:$0xff] %v12158_v21 }
 0x43f   : > { %4633 = vmatmul.mubr.f32.vlgmr.msra.gmra.mxu0 %v12137_v4  ;;  %7571 = vmatprep.subr.mxu0 %v12132_v20  ;;  %v3705_v43 = vadd.f32 %v3704_v47, %v3592_v3  ;;  %v12154_v29 = vpop.eup %8197  ;;  %v3590_v47 = vadd.f32 %v12093_v34, %v12041_v0  ;;  %v12166_v3 = vld [vmem:[#allocation10 + $0x418] sm:$0xff]  ;;  %v14269_v34 = vld [vmem:[#allocation104_spill] sm:$0xff] }
 0x440   : > { %4638 = vmatprep.mubr.f32.mxu0 %v12134_v44  ;;  %v3708_v55 = vpop.f32.mrf.mxu1  ;;  %7572 = vmatpush3.msra.mxu0 %v12132_v20  ;;  %14268 = vst [vmem:[#allocation112_spill] sm:$0xff] %v12166_v3 }
 0x441   : > { %7573 = vmatprep.subr.mxu0 %v12141_v28  ;;  %8211 = vtanh.f32 %v3705_v43  ;;  %v3703_v58 = vadd.f32 %v3702_v42, %v3590_v47  ;;  %v3596_v43 = vadd.f32 %v3595_v37, %v12041_v0  ;;  %v12185_v47 = vld [vmem:[#allocation10 + $0x3e8] sm:$0xff] }
 0x442   : > { %v3710_v38 = vpop.f32.mrf.mxu1  ;;  %7574 = vmatpush3.msra.mxu0 %v12141_v28  ;;  %v12168_v41 = vpop.eup %8199  ;;  %8213 = vtanh.f32 %v3697_v19  ;;  %v12173_v28 = vrot.slane %v11998_v27, %v14269_v34  ;;  %14271 = vst [vmem:[#allocation118_spill] sm:$0xff] %v12185_v47 }
 0x443   : > { %4639 = vmatmul.mubr.f32.gmra.mxu0 %v12154_v29  ;;  %7575 = vmatprep.subr.mxu0 %v12149_v48  ;;  %v3711_v18 = vadd.f32 %v3710_v38, %v3598_v59  ;;  %v12175_v20 = vpop.eup %8201  ;;  %v7517_v38 = vpop.f32.mrf.mxu0  ;;  %v3709_v42 = vadd.f32 %v3708_v55, %v3596_v43  ;;  %v12194_v55 = vld [vmem:[#allocation10 + $0x3d0] sm:$0xff] }
 0x444   : > { %4644 = vmatprep.mubr.f32.mxu0 %v12151_v22  ;;  %v6771_v12 = vpop.f32.mrf.mxu1  ;;  %7576 = vmatpush3.msra.mxu0 %v12149_v48  ;;  %v12179_v48 = vld [vmem:[#allocation10 + $0x400] sm:$0xff]  ;;  %14272 = vst [vmem:[#allocation121_spill] sm:$0xff] %v12194_v55 }
 0x445   : > { %7577 = vmatprep.subr.mxu0 %v12158_v21  ;;  %14270 = vst [vmem:[#allocation115_spill] sm:$0xff] %v12179_v48  ;;  %8215 = vtanh.f32 %v3711_v18 }
 0x446   : > { %v6772_v59 = vpop.f32.mrf.mxu1  ;;  %7578 = vmatpush3.msra.mxu0 %v12158_v21  ;;  %v12187_v37 = vpop.eup %8203  ;;  %8217 = vtanh.f32 %v3703_v58 }
 0x447   : > { %4645 = vmatmul.mubr.f32.gmra.mxu0 %v12175_v20  ;;  %v6773_v19 = vadd.f32 %v6772_v59, %v6771_v12  ;;  %7579 = vmatprep.subr.mxu0 %v12166_v3  ;;  %v12191_v21 = vpop.eup %8205  ;;  %v3884_v12 = vpop.f32.mrf.mxu0  ;;  %8219 = vtanh.f32 %v3709_v42  ;;  %v12209_v42 = vld [vmem:[#allocation10 + $0x3a0] sm:$0xff] }
 0x448   : > { %4650 = vmatprep.mubr.f32.mxu0 %v12168_v41  ;;  %v6774_v27 = vpop.f32.mrf.mxu1  ;;  %7580 = vmatpush3.msra.mxu0 %v12166_v3  ;;  %14274 = vst [vmem:[#allocation127_spill] sm:$0xff] %v12209_v42 }
 0x449   : > { %v3780_v34 = vadd.f32 %v6773_v19, %v12173_v28  ;;  %7581 = vmatprep.subr.mxu0 %v12179_v48  ;;  %v12200_v19 = vld [vmem:[#allocation10 + $0x3b8] sm:$0xff] }
 0x44a   : > { %v6775_v59 = vpop.f32.mrf.mxu1  ;;  %7582 = vmatpush3.msra.mxu0 %v12179_v48  ;;  %14273 = vst [vmem:[#allocation124_spill] sm:$0xff] %v12200_v19  ;;  %v12202_v3 = vpop.eup %8207 }
 0x44b   : > { %4651 = vmatmul.mubr.f32.gmra.mxu0 %v12191_v21  ;;  %v3885_v18 = vadd.f32 %v3884_v12, %v3780_v34  ;;  %v6776_v43 = vadd.f32 %v6775_v59, %v6774_v27  ;;  %7583 = vmatprep.subr.mxu0 %v12185_v47  ;;  %v12206_v6 = vpop.eup %8209  ;;  %v7520_v34 = vpop.f32.mrf.mxu0 }
 0x44c   : > { %4656 = vmatprep.mubr.f32.mxu0 %v12187_v37  ;;  %v6777_v58 = vpop.f32.mrf.mxu1  ;;  %7584 = vmatpush3.msra.mxu0 %v12185_v47 }
 0x44d   : > { %8221 = vtanh.f32 %v3885_v18  ;;  %v3785_v48 = vadd.f32 %v6776_v43, %v12173_v28  ;;  %7585 = vmatprep.subr.mxu0 %v12194_v55  ;;  %v12215_v43 = vld [vmem:[#allocation10 + $0x388] sm:$0xff] }
 0x44e   : > { %v6778_v27 = vpop.f32.mrf.mxu1  ;;  %7586 = vmatpush3.msra.mxu0 %v12194_v55  ;;  %14275 = vst [vmem:[#allocation130_spill] sm:$0xff] %v12215_v43  ;;  %v12217_v47 = vpop.eup %8211 }
 0x44f   : > { %4657 = vmatmul.mubr.f32.gmra.mxu0 %v12206_v6  ;;  %v3890_v12 = vadd.f32 %v7517_v38, %v3785_v48  ;;  %v6779_v59 = vadd.f32 %v6778_v27, %v6777_v58  ;;  %7587 = vmatprep.subr.mxu0 %v12200_v19  ;;  %v12221_v32 = vpop.eup %8213  ;;  %v3894_v48 = vpop.f32.mrf.mxu0  ;;  %v12224_v58 = vld [vmem:[#allocation10 + $0x370] sm:$0xff] }
 0x450   : > { %4662 = vmatprep.mubr.f32.mxu0 %v12202_v3  ;;  %v6780_v18 = vpop.f32.mrf.mxu1  ;;  %7588 = vmatpush3.msra.mxu0 %v12200_v19  ;;  %14276 = vst [vmem:[#allocation133_spill] sm:$0xff] %v12224_v58 }
 0x451   : > { %8223 = vtanh.f32 %v3890_v12  ;;  %v3790_v55 = vadd.f32 %v6779_v59, %v12173_v28  ;;  %7589 = vmatprep.subr.mxu0 %v12209_v42  ;;  %v12230_v59 = vld [vmem:[#allocation10 + $0x358] sm:$0xff] }
 0x452   : > { %v6781_v38 = vpop.f32.mrf.mxu1  ;;  %7590 = vmatpush3.msra.mxu0 %v12209_v42  ;;  %14277 = vst [vmem:[#allocation136_spill] sm:$0xff] %v12230_v59  ;;  %v12232_v0 = vpop.eup %8215 }
 0x453   : > { %4663 = vmatmul.mubr.f32.gmra.mxu0 %v12221_v32  ;;  %v3895_v27 = vadd.f32 %v3894_v48, %v3790_v55  ;;  %v6782_v19 = vadd.f32 %v6781_v38, %v6780_v18  ;;  %7591 = vmatprep.subr.mxu0 %v12215_v43  ;;  %14278 = vst [vmem:[#allocation139_spill] sm:$0xff] %v12232_v0  ;;  %v12236_v8 = vpop.eup %8217  ;;  %v7523_v55 = vpop.f32.mrf.mxu0  ;;  %v12239_v48 = vld [vmem:[#allocation10 + $0x340] sm:$0xff] }
 0x454   : > { %4668 = vmatprep.mubr.f32.mxu0 %v12217_v47  ;;  %v6783_v12 = vpop.f32.mrf.mxu1  ;;  %7592 = vmatpush3.msra.mxu0 %v12215_v43  ;;  %14279 = vst [vmem:[#allocation143_spill] sm:$0xff] %v12236_v8  ;;  %14280 = vst [vmem:[#allocation62_spill] sm:$0xff] %v12239_v48 }
 0x455   : > { %8225 = vtanh.f32 %v3895_v27  ;;  %v3795_v42 = vadd.f32 %v6782_v19, %v12173_v28  ;;  %7593 = vmatprep.subr.mxu0 %v12224_v58  ;;  %v12245_v19 = vpop.eup %8219 }
 0x456   : > { %v6784_v18 = vpop.f32.mrf.mxu1  ;;  %7594 = vmatpush3.msra.mxu0 %v12224_v58  ;;  %v12249_v58 = vld [vmem:[#allocation10 + $0x178] sm:$0xff] }
 0x457   : > { %4669 = vmatmul.mubr.f32.gmra.mxu0 %v12236_v8  ;;  %v3900_v38 = vadd.f32 %v7520_v34, %v3795_v42  ;;  %v6785_v43 = vadd.f32 %v6784_v18, %v6783_v12  ;;  %7595 = vmatprep.subr.mxu0 %v12230_v59  ;;  %14281 = vst [vmem:[#allocation106_spill] sm:$0xff] %v12249_v58  ;;  %v3904_v42 = vpop.f32.mrf.mxu0  ;;  %v12254_v18 = vld [vmem:[#allocation10 + $0x2e0] sm:$0xff]  ;;  %v12261_v8 = vld [vmem:[#allocation10 + $0x310] sm:$0xff] }
 0x458   : > { %4674 = vmatprep.mubr.f32.mxu0 %v12232_v0  ;;  %v6786_v27 = vpop.f32.mrf.mxu1  ;;  %7596 = vmatpush3.msra.mxu0 %v12230_v59  ;;  %14284 = vst [vmem:[#allocation37_spill] sm:$0xff] %v12261_v8 }
 0x459   : > { %8227 = vtanh.f32 %v3900_v38  ;;  %v3800_v17 = vadd.f32 %v6785_v43, %v12173_v28  ;;  %7597 = vmatprep.subr.mxu0 %v12239_v48  ;;  %v12257_v38 = vld [vmem:[#allocation10 + $0x160] sm:$0xff] }
 0x45a   : > { %v8222_v34 = vpop.eup %8221  ;;  %v6787_v12 = vpop.f32.mrf.mxu1  ;;  %7598 = vmatpush3.msra.mxu0 %v12239_v48  ;;  %14283 = vst [vmem:[#allocation36_spill] sm:$0xff] %v12257_v38  ;;  %v12265_v48 = vld [vmem:[#allocation10 + $0x2c8] sm:$0xff] }
 0x45b   : > { %4675 = vmatmul.mubr.f32.gmra.mxu0 %v12245_v19  ;;  %v3905_v59 = vadd.f32 %v3904_v42, %v3800_v17  ;;  %v6788_v0 = vadd.f32 %v6787_v12, %v6786_v27  ;;  %4746 = vmatmul.mubr.f32.vlgmr.msra.gmra.mxu1 %v8222_v34  ;;  %14285 = vst [vmem:[#allocation44_spill] sm:$0xff] %v12265_v48  ;;  %v7526_v27 = vpop.f32.mrf.mxu0 }
 0x45c   : > { %6900 = vmatpush3.msra.mxu1 %v12249_v58  ;;  %7599 = vmatprep.subr.mxu0 %v12251_v62  ;;  %v6789_v43 = vpop.f32.mrf.mxu1 }
 0x45d   : > { %8229 = vtanh.f32 %v3905_v59  ;;  %v3805_v36 = vadd.f32 %v6788_v0, %v12173_v28  ;;  %7603 = vmatprep.mubr.f32.mxu0 %v8222_v34  ;;  %6901 = vmatprep.subr.mxu1 %v12254_v18  ;;  %v12271_v59 = vld [vmem:[#allocation10 + $0x148] sm:$0xff]  ;;  %v12275_v34 = vld [vmem:[#allocation10 + $0x2b0] sm:$0xff] }
 0x45e   : > { %v8224_v17 = vpop.eup %8223  ;;  %7600 = vmatpush3.msra.mxu0 %v12251_v62  ;;  %6902 = vmatpush3.msra.mxu1 %v12257_v38  ;;  %v6790_v42 = vpop.f32.mrf.mxu1  ;;  %14286 = vst [vmem:[#allocation38_spill] sm:$0xff] %v12271_v59 }
 0x45f   : > { %v3910_v12 = vadd.f32 %v7523_v55, %v3805_v36  ;;  %7601 = vmatprep.subr.mxu0 %v12261_v8  ;;  %v6791_v58 = vadd.f32 %v6790_v42, %v6789_v43  ;;  %4751 = vmatprep.mubr.f32.mxu1 %v13686_v49  ;;  %v12278_v36 = vld [vmem:[#allocation10 + $0x130] sm:$0xff]  ;;  %v3914_v43 = vpop.f32.mrf.mxu0 }
 0x460   : > { %6903 = vmatprep.subr.mxu1 %v12265_v48  ;;  %7602 = vmatpush3.msra.mxu0 %v12261_v8  ;;  %v6792_v0 = vpop.f32.mrf.mxu1  ;;  %v12282_v48 = vld [vmem:[#allocation10 + $0x298] sm:$0xff] }
 0x461   : > { %8231 = vtanh.f32 %v3910_v12  ;;  %v3810_v62 = vadd.f32 %v6791_v58, %v12173_v28  ;;  %4752 = vmatmul.mubr.f32.gmra.mxu1 %v8224_v17  ;;  %7604 = vmatmul.mubr.f32.vlgmr.msra.gmra.mxu0 %v8224_v17  ;;  %v12285_v12 = vld [vmem:[#allocation10 + $0x118] sm:$0xff]  ;;  %v12288_v58 = vld [vmem:[#allocation10 + $0x280] sm:$0xff] }
 0x462   : > { %v8226_v55 = vpop.eup %8225  ;;  %6904 = vmatpush3.msra.mxu1 %v12271_v59  ;;  %v6793_v42 = vpop.f32.mrf.mxu1  ;;  %4757 = vmatprep.mubr.f32.mxu1 %v13686_v49  ;;  %v12293_v59 = vld [vmem:[#allocation10 + $0x100] sm:$0xff] }
 0x463   : > { %v3915_v8 = vadd.f32 %v3914_v43, %v3810_v62  ;;  %6905 = vmatprep.subr.mxu1 %v12275_v34  ;;  %v6794_v38 = vadd.f32 %v6793_v42, %v6792_v0  ;;  %7606 = vmatprep.mubr.f32.mxu0 %v8226_v55  ;;  %v12297_v0 = vld [vmem:[#allocation10 + $0x268] sm:$0xff] }
 0x464   : > { %6906 = vmatpush3.msra.mxu1 %v12278_v36  ;;  %5141 = vmatprep.subr.mxu0 %v11792_v39  ;;  %v12300_v42 = vld [vmem:[#allocation10 + $0xe8] sm:$0xff]  ;;  %v12303_v39 = vld [vmem:[#allocation10 + $0x250] sm:$0xff] }
 0x465   : > { %8233 = vtanh.f32 %v3915_v8  ;;  %v3815_v17 = vadd.f32 %v6794_v38, %v12173_v28  ;;  %6907 = vmatprep.subr.mxu1 %v12282_v48  ;;  %4758 = vmatmul.mubr.f32.gmra.mxu1 %v8226_v55  ;;  %14287 = vst [vmem:[#allocation48_spill] sm:$0xff] %v12303_v39  ;;  %v12307_v8 = vld [vmem:[#allocation10 + $0xd0] sm:$0xff]  ;;  %v12314_v55 = vld [vmem:[#allocation10 + $0xb8] sm:$0xff] }
 0x466   : > { %v8228_v62 = vpop.eup %8227  ;;  %6908 = vmatpush3.msra.mxu1 %v12285_v12  ;;  %4763 = vmatprep.mubr.f32.mxu1 %v13686_v49  ;;  %14289 = vst [vmem:[#allocation50_spill] sm:$0xff] %v12314_v55 }
 0x467   : > { %v3920_v43 = vadd.f32 %v7526_v27, %v3815_v17  ;;  %6909 = vmatprep.subr.mxu1 %v12288_v58  ;;  %7607 = vmatmul.mubr.f32.gmra.mxu0 %v8228_v62  ;;  %v12311_v27 = vld [vmem:[#allocation10 + $0x238] sm:$0xff]  ;;  %v12321_v17 = vld [vmem:[#allocation10 + $0xa0] sm:$0xff] }
 0x468   : > { %6910 = vmatpush3.msra.mxu1 %v12293_v59  ;;  %5142 = vmatpush1.msra.mxu0 %v11799_v7  ;;  %14288 = vst [vmem:[#allocation39_spill] sm:$0xff] %v12311_v27  ;;  %v12317_v7 = vld [vmem:[#allocation10 + $0x220] sm:$0xff] }
 0x469   : > { %8235 = vtanh.f32 %v3920_v43  ;;  %6911 = vmatprep.subr.mxu1 %v12297_v0  ;;  %4764 = vmatmul.mubr.f32.gmra.mxu1 %v8228_v62  ;;  %14290 = vst [vmem:[#allocation53_spill] sm:$0xff] %v12317_v7  ;;  %v12325_v43 = vld [vmem:[#allocation10 + $0x208] sm:$0xff] }
 0x46a   : > { %v8230_v38 = vpop.eup %8229  ;;  %6912 = vmatpush3.msra.mxu1 %v12300_v42  ;;  %4769 = vmatprep.mubr.f32.mxu1 %v13686_v49  ;;  %14291 = vst [vmem:[#allocation40_spill] sm:$0xff] %v12325_v43 }
 0x46b   : > { %6913 = vmatprep.subr.mxu1 %v12303_v39  ;;  %7609 = vmatprep.mubr.f32.mxu0 %v8230_v38  ;;  %v12328_v39 = vld [vmem:[#allocation10 + $0x88] sm:$0xff] }
 0x46c   : > { %6914 = vmatpush3.msra.mxu1 %v12307_v8  ;;  %5143 = vmatprep.subr.mxu0 %v11803_v25  ;;  %14292 = vst [vmem:[#allocation141_spill] sm:$0xff] %v12328_v39  ;;  %v12331_v25 = vld [vmem:[#allocation10 + $0x1f0] sm:$0xff] }
 0x46d   : > { %6915 = vmatprep.subr.mxu1 %v12311_v27  ;;  %4770 = vmatmul.mubr.f32.gmra.mxu1 %v8230_v38  ;;  %14293 = vst [vmem:[#allocation41_spill] sm:$0xff] %v12331_v25  ;;  %v12335_v38 = vld [vmem:[#allocation10 + $0x70] sm:$0xff]  ;;  %v12342_v27 = vld [vmem:[#allocation10 + $0x58] sm:$0xff] }
 0x46e   : > { %v8232_v62 = vpop.eup %8231  ;;  %6916 = vmatpush3.msra.mxu1 %v12314_v55  ;;  %4775 = vmatprep.mubr.f32.mxu1 %v13686_v49 }
 0x46f   : > { %6917 = vmatprep.subr.mxu1 %v12317_v7  ;;  %7610 = vmatmul.mubr.f32.gmra.mxu0 %v8232_v62  ;;  %v12339_v7 = vld [vmem:[#allocation10 + $0x1d8] sm:$0xff] }
 0x470   : > { %6918 = vmatpush3.msra.mxu1 %v12321_v17  ;;  %5144 = vmatpush1.msra.mxu0 %v11809_v9  ;;  %v12345_v9 = vld [vmem:[#allocation10 + $0x1c0] sm:$0xff] }
 0x471   : > { %6919 = vmatprep.subr.mxu1 %v12325_v43  ;;  %4776 = vmatmul.mubr.f32.gmra.mxu1 %v8232_v62  ;;  %v12349_v62 = vld [vmem:[#allocation10 + $0x40] sm:$0xff]  ;;  %v12356_v43 = vld [vmem:[#allocation10 + $0x28] sm:$0xff] }
 0x472   : > { %v8234_v55 = vpop.eup %8233  ;;  %6920 = vmatpush3.msra.mxu1 %v12328_v39  ;;  %4781 = vmatprep.mubr.f32.mxu1 %v13686_v49  ;;  %14294 = vst [vmem:[#allocation49_spill] sm:$0xff] %v12349_v62 }
 0x473   : > { %6921 = vmatprep.subr.mxu1 %v12331_v25  ;;  %7612 = vmatprep.mubr.f32.mxu0 %v8234_v55  ;;  %v12353_v25 = vld [vmem:[#allocation10 + $0x1a8] sm:$0xff] }
 0x474   : > { %6922 = vmatpush3.msra.mxu1 %v12335_v38  ;;  %5145 = vmatprep.subr.mxu0 %v11813_v5  ;;  %v12359_v5 = vld [vmem:[#allocation10 + $0x190] sm:$0xff] }
 0x475   : > { %6923 = vmatprep.subr.mxu1 %v12339_v7  ;;  %4782 = vmatmul.mubr.f32.gmra.mxu1 %v8234_v55  ;;  %v12363_v55 = vld [vmem:[#allocation10 + $0x10] sm:$0xff] }
 0x476   : > { %v8236_v39 = vpop.eup %8235  ;;  %6924 = vmatpush3.msra.mxu1 %v12342_v27  ;;  %4787 = vmatprep.mubr.f32.mxu1 %v13686_v49 }
 0x477   : > { %6925 = vmatprep.subr.mxu1 %v12345_v9  ;;  %7613 = vmatmul.mubr.f32.gmra.mxu0 %v8236_v39 }
 0x478   : > { %6926 = vmatpush3.msra.mxu1 %v12349_v62  ;;  %5146 = vmatpush1.msra.mxu0 %v11817_v60  ;;  %v8435_v62 = vld [vmem:[#allocation10 + $0x170] sm:$0xff]  ;;  %v8436_v60 = vld [vmem:[#allocation10 + $0x168] sm:$0xff] }
 0x479   : > { %6927 = vmatprep.subr.mxu1 %v12353_v25  ;;  %4788 = vmatmul.mubr.f32.gmra.mxu1 %v8236_v39  ;;  %v8437_v39 = vld [vmem:[#allocation10 + $0x158] sm:$0xff] }
 0x47a   : > { %6928 = vmatpush3.msra.mxu1 %v12356_v43  ;;  %4858 = vmatprep.mubr.f32.mxu1 %v12104_v54  ;;  %v8438_v54 = vld [vmem:[#allocation10 + $0x150] sm:$0xff] }
 0x47b   : > { %6929 = vmatprep.subr.mxu1 %v12359_v5  ;;  %5147 = vmatprep.subr.mxu0 %v11821_v23  ;;  %v8439_v23 = vld [vmem:[#allocation10 + $0x140] sm:$0xff] }
 0x47c   : > { %6930 = vmatpush3.msra.mxu1 %v12363_v55  ;;  %5148 = vmatpush1.msra.mxu0 %v11825_v15  ;;  %v8440_v15 = vld [vmem:[#allocation10 + $0x138] sm:$0xff] }
 0x47d   : > { %5028 = vmatprep.subr.mxu1 %v8435_v62  ;;  %4859 = vmatmul.mubr.f32.vlgmr.msra.gmra.mxu1 %v12137_v4  ;;  %v8441_v4 = vld [vmem:[#allocation10 + $0x128] sm:$0xff] }
 0x47e   : > { %5029 = vmatpush1.msra.mxu1 %v8436_v60  ;;  %4863 = vmatprep.mubr.f32.mxu1 %v12134_v44  ;;  %v8442_v44 = vld [vmem:[#allocation10 + $0x120] sm:$0xff]  ;;  %v14312_v60 = vld [vmem:[#allocation79_spill] sm:$0xff] }
 0x47f   : > { %5030 = vmatprep.subr.mxu1 %v8437_v39  ;;  %5149 = vmatprep.subr.mxu0 %v11835_v57  ;;  %v8443_v57 = vld [vmem:[#allocation10 + $0x110] sm:$0xff]  ;;  %v14313_v39 = vld [vmem:[#allocation77_spill] sm:$0xff] }
 0x480   : > { %5031 = vmatpush1.msra.mxu1 %v8438_v54  ;;  %5150 = vmatpush1.msra.mxu0 %v11841_v2 }
 0x481   : > { %5032 = vmatprep.subr.mxu1 %v8439_v23  ;;  %4864 = vmatmul.mubr.f32.gmra.mxu1 %v12154_v29  ;;  %v14314_v23 = vld [vmem:[#allocation120_spill] sm:$0xff] }
 0x482   : > { %5033 = vmatpush1.msra.mxu1 %v8440_v15  ;;  %4868 = vmatprep.mubr.f32.mxu1 %v12151_v22  ;;  %v14307_v22 = vld [vmem:[#allocation114_spill] sm:$0xff] }
 0x483   : > { %5034 = vmatprep.subr.mxu1 %v8441_v4  ;;  %5151 = vmatprep.subr.mxu0 %v11857_v53  ;;  %v14316_v4 = vld [vmem:[#allocation122_spill] sm:$0xff] }
 0x484   : > { %5035 = vmatpush1.msra.mxu1 %v8442_v44  ;;  %v12378_v62 = vpop.f32.mrf.mxu1  ;;  %5152 = vmatpush1.msra.mxu0 %v11865_v51  ;;  %v14317_v44 = vld [vmem:[#allocation119_spill] sm:$0xff] }
 0x485   : > { %5036 = vmatprep.subr.mxu1 %v8443_v57  ;;  %4869 = vmatmul.mubr.f32.gmra.mxu1 %v12175_v20  ;;  %v14318_v57 = vld [vmem:[#allocation105_spill] sm:$0xff] }
 0x486   : > { %5037 = vmatpush1.msra.mxu1 %v11827_v52  ;;  %4873 = vmatprep.mubr.f32.mxu1 %v12168_v41  ;;  %v4015_v2 = vpop.f32.mrf.mxu1  ;;  %v14310_v41 = vld [vmem:[#allocation117_spill] sm:$0xff] }
 0x487   : > { %5038 = vmatprep.subr.mxu1 %v11832_v56  ;;  %5153 = vmatprep.subr.mxu0 %v11875_v45 }
 0x488   : > { %5039 = vmatpush1.msra.mxu1 %v11838_v14  ;;  %v12387_v53 = vpop.f32.mrf.mxu1  ;;  %5154 = vmatpush1.msra.mxu0 %v11881_v26  ;;  %v4016_v14 = vadd.f32 %v4015_v2, %v12008_v61  ;;  %v14299_v26 = vld [vmem:[#allocation68_spill] sm:$0xff]  ;;  %v14319_v2 = vld [vmem:[#allocation81_spill] sm:$0xff] }
 0x489   : > { %5040 = vmatprep.subr.mxu1 %v11847_v11  ;;  %4874 = vmatmul.mubr.f32.gmra.mxu1 %v12191_v21  ;;  %v14308_v21 = vld [vmem:[#allocation116_spill] sm:$0xff] }
 0x48a   : > { %5041 = vmatpush1.msra.mxu1 %v11850_v1  ;;  %4878 = vmatprep.mubr.f32.mxu1 %v12187_v37  ;;  %v12394_v52 = vpop.f32.mrf.mxu1 }
 0x48b   : > { %5042 = vmatprep.subr.mxu1 %v11854_v63  ;;  %5155 = vmatprep.subr.mxu0 %v11889_v13  ;;  %v14295_v63 = vld [vmem:[#allocation66_spill] sm:$0xff] }
 0x48c   : > { %5043 = vmatpush1.msra.mxu1 %v11863_v33  ;;  %5156 = vmatpush1.msra.mxu0 %v11895_v16  ;;  %v12401_v56 = vpop.f32.mrf.mxu1  ;;  %v14296_v33 = vld [vmem:[#allocation60_spill] sm:$0xff]  ;;  %v14302_v16 = vld [vmem:[#allocation139_spill] sm:$0xff] }
 0x48d   : > { %5044 = vmatprep.subr.mxu1 %v11869_v46  ;;  %4879 = vmatmul.mubr.f32.gmra.mxu1 %v12206_v6  ;;  %v14297_v46 = vld [vmem:[#allocation109_spill] sm:$0xff]  ;;  %v14306_v6 = vld [vmem:[#allocation72_spill] sm:$0xff] }
 0x48e   : > { %5045 = vmatpush1.msra.mxu1 %v11872_v10  ;;  %4883 = vmatprep.mubr.f32.mxu1 %v12202_v3  ;;  %v12411_v11 = vpop.f32.mrf.mxu1  ;;  %v14298_v10 = vld [vmem:[#allocation78_spill] sm:$0xff] }
 0x48f   : > { %5046 = vmatprep.subr.mxu1 %v11878_v50  ;;  %5157 = vmatprep.subr.mxu0 %v11901_v24  ;;  %v14304_v24 = vld [vmem:[#allocation70_spill] sm:$0xff] }
 0x490   : > { %5047 = vmatpush1.msra.mxu1 %v11887_v30  ;;  %5158 = vmatpush1.msra.mxu0 %v11907_v31  ;;  %v12423_v50 = vpop.f32.mrf.mxu1  ;;  %v14300_v30 = vld [vmem:[#allocation143_spill] sm:$0xff]  ;;  %v14309_v3 = vld [vmem:[#allocation74_spill] sm:$0xff] }
 0x491   : > { %5048 = vmatprep.subr.mxu1 %v11892_v40  ;;  %4884 = vmatmul.mubr.f32.gmra.mxu1 %v12221_v32  ;;  %v14301_v40 = vld [vmem:[#allocation110_spill] sm:$0xff]  ;;  %v14305_v32 = vld [vmem:[#allocation113_spill] sm:$0xff] }
 0x492   : > { %v12415_v1 = vpop.f32.mrf.mxu0  ;;  %5049 = vmatpush1.msra.mxu1 %v11898_v35  ;;  %4888 = vmatprep.mubr.f32.mxu1 %v12217_v47  ;;  %v14303_v35 = vld [vmem:[#allocation111_spill] sm:$0xff]  ;;  %v12435_v20 = vpop.f32.mrf.mxu1  ;;  %v14311_v47 = vld [vmem:[#allocation76_spill] sm:$0xff] }
 0x493   : > { %5050 = vmatprep.subr.mxu1 %v14295_v63  ;;  %5159 = vmatprep.subr.mxu0 %v14296_v33  ;;  %v14320_v63 = vld [vmem:[#allocation83_spill] sm:$0xff]  ;;  %v14321_v33 = vld [vmem:[#allocation61_spill] sm:$0xff] }
 0x494   : > { %v4128_v51 = vpop.f32.mrf.mxu0  ;;  %5051 = vmatpush1.msra.mxu1 %v14297_v46  ;;  %5160 = vmatpush1.msra.mxu0 %v14298_v10  ;;  %v14322_v46 = vld [vmem:[#allocation84_spill] sm:$0xff] }
 0x495   : > { %v4129_v45 = vadd.f32 %v4128_v51, %v4016_v14  ;;  %5052 = vmatprep.subr.mxu1 %v14299_v26  ;;  %4889 = vmatmul.mubr.f32.gmra.mxu1 %v14300_v30  ;;  %v12447_v54 = vpop.f32.mrf.mxu1  ;;  %v14323_v10 = vld [vmem:[#allocation144_spill] sm:$0xff]  ;;  %v14324_v26 = vld [vmem:[#allocation85_spill] sm:$0xff]  ;;  %v14325_v30 = vld [vmem:[#allocation82_spill] sm:$0xff] }
 0x496   : > { %v12427_v13 = vpop.f32.mrf.mxu0  ;;  %5053 = vmatpush1.msra.mxu1 %v14301_v40  ;;  %4893 = vmatprep.mubr.f32.mxu1 %v14302_v16  ;;  %v14326_v40 = vld [vmem:[#allocation63_spill] sm:$0xff] }
 0x497   : > { %8237 = vtanh.f32 %v4129_v45  ;;  %5054 = vmatprep.subr.mxu1 %v14303_v35  ;;  %5161 = vmatprep.subr.mxu0 %v14304_v24  ;;  %v4039_v51 = vpop.f32.mrf.mxu1  ;;  %v14327_v16 = vld [vmem:[#allocation123_spill] sm:$0xff] }
 0x498   : > { %v4134_v31 = vpop.f32.mrf.mxu0  ;;  %5055 = vmatpush1.msra.mxu1 %v14305_v32  ;;  %5162 = vmatpush1.msra.mxu0 %v14306_v6  ;;  %v14328_v32 = vld [vmem:[#allocation125_spill] sm:$0xff] }
 0x499   : > { %5056 = vmatprep.subr.mxu1 %v14307_v22  ;;  %4894 = vmatmul.mubr.f32.gmra.mxu1 %v12245_v19  ;;  %v14315_v19 = vld [vmem:[#allocation80_spill] sm:$0xff]  ;;  %v14329_v22 = vld [vmem:[#allocation129_spill] sm:$0xff] }
 0x49a   : > { %v12439_v29 = vpop.f32.mrf.mxu0  ;;  %5057 = vmatpush1.msra.mxu1 %v14308_v21  ;;  %5163 = vmatprep.subr.mxu0 %v14309_v3  ;;  %v14330_v3 = vld [vmem:[#allocation126_spill] sm:$0xff] }
 0x49b   : > { %5058 = vmatprep.subr.mxu1 %v14310_v41  ;;  %5164 = vmatpush1.msra.mxu0 %v14311_v47  ;;  %v14331_v41 = vld [vmem:[#allocation128_spill] sm:$0xff]  ;;  %v14332_v47 = vld [vmem:[#allocation103_spill] sm:$0xff] }
 0x49c   : > { %v4140_v37 = vpop.f32.mrf.mxu0  ;;  %5059 = vmatpush1.msra.mxu1 %v14312_v60  ;;  %5165 = vmatprep.subr.mxu0 %v14313_v39  ;;  %v4014_v60 = vadd.f32 %v12378_v62, %v14332_v47  ;;  %v14333_v39 = vld [vmem:[#allocation131_spill] sm:$0xff]  ;;  %v4020_v62 = vadd.f32 %v12387_v53, %v14332_v47 }
 0x49d   : > { %5060 = vmatprep.subr.mxu1 %v14314_v23  ;;  %5166 = vmatpush1.msra.mxu0 %v14315_v19  ;;  %v4022_v23 = vadd.f32 %v12394_v52, %v12008_v61  ;;  %v4028_v52 = vadd.f32 %v12411_v11, %v12008_v61 }
 0x49e   : > { %v12451_v15 = vpop.f32.mrf.mxu0  ;;  %5061 = vmatpush2.msra.mxu1 %v14316_v4  ;;  %5167 = vmatprep.subr.mxu0 %v14317_v44  ;;  %v14334_v4 = vld [vmem:[#allocation132_spill] sm:$0xff]  ;;  %v4133_v53 = vadd.f32 %v12427_v13, %v4020_v62  ;;  %v4032_v13 = vadd.f32 %v12423_v50, %v14332_v47  ;;  %v14346_v62 = vld [vmem:[#allocation91_spill] sm:$0xff] }
 0x49f   : > { %5062 = vmatprep.subr.mxu1 %v14318_v57  ;;  %5168 = vmatpush1.msra.mxu0 %v14319_v2  ;;  %v14335_v57 = vld [vmem:[#allocation86_spill] sm:$0xff]  ;;  %v4141_v11 = vadd.f32 %v4140_v37, %v4028_v52 }
 0x4a0   : > { %v4146_v14 = vpop.f32.mrf.mxu0  ;;  %5063 = vmatpush2.msra.mxu1 %v14320_v63  ;;  %5169 = vmatprep.subr.mxu0 %v14321_v33  ;;  %v14336_v63 = vld [vmem:[#allocation134_spill] sm:$0xff]  ;;  %v4127_v33 = vadd.f32 %v12415_v1, %v4014_v60  ;;  %v14340_v1 = vld [vmem:[#allocation88_spill] sm:$0xff]  ;;  %v4145_v50 = vadd.f32 %v12451_v15, %v4032_v13 }
 0x4a1   : > { %5064 = vmatprep.subr.mxu1 %v14322_v46  ;;  %5170 = vmatpush1.msra.mxu0 %v14323_v10  ;;  %v12471_v6 = vpop.f32.mrf.mxu1  ;;  %v14337_v46 = vld [vmem:[#allocation87_spill] sm:$0xff]  ;;  %v4135_v10 = vadd.f32 %v4134_v31, %v4022_v23  ;;  %v4026_v31 = vadd.f32 %v12401_v56, %v14332_v47  ;;  %v14343_v23 = vld [vmem:[#allocation140_spill] sm:$0xff] }
 0x4a2   : > { %v12461_v45 = vpop.f32.mrf.mxu0  ;;  %5065 = vmatpush2.msra.mxu1 %v14324_v26  ;;  %5171 = vmatprep.subr.mxu0 %v14325_v30  ;;  %v14338_v30 = vld [vmem:[#allocation135_spill] sm:$0xff]  ;;  %8239 = vtanh.f32 %v4127_v33 }
 0x4a3   : > { %5066 = vmatprep.subr.mxu1 %v14326_v40  ;;  %5172 = vmatpush1.msra.mxu0 %v14327_v16  ;;  %v4045_v44 = vpop.f32.mrf.mxu1  ;;  %v14339_v16 = vld [vmem:[#allocation137_spill] sm:$0xff]  ;;  %8241 = vtanh.f32 %v4135_v10  ;;  %v4139_v56 = vadd.f32 %v12439_v29, %v4026_v31  ;;  %v14347_v10 = vld [vmem:[#allocation95_spill] sm:$0xff] }
 0x4a4   : > { %v12467_v35 = vpop.eup %8237  ;;  %v4152_v24 = vpop.f32.mrf.mxu0  ;;  %5067 = vmatpush2.msra.mxu1 %v14328_v32  ;;  %5205 = vmatprep.mubr.f32.mxu0 %v13686_v49  ;;  %8243 = vtanh.f32 %v4133_v53  ;;  %v4046_v15 = vadd.f32 %v4045_v44, %v12008_v61 }
 0x4a5   : > { %5092 = vmatprep.mubr.f32.mxu1 %v12467_v35  ;;  %5068 = vmatprep.subr.mxu1 %v14329_v22  ;;  %v14341_v22 = vld [vmem:[#allocation138_spill] sm:$0xff]  ;;  %8245 = vtanh.f32 %v4141_v11 }
 0x4a6   : > { %v12475_v21 = vpop.f32.mrf.mxu0  ;;  %5069 = vmatpush2.msra.mxu1 %v14330_v3  ;;  %6979 = vmatprep.subr.mxu0 %v14331_v41  ;;  %v4034_v3 = vadd.f32 %v12435_v20, %v12008_v61  ;;  %8247 = vtanh.f32 %v4139_v56 }
 0x4a7   : > { %5070 = vmatprep.subr.mxu1 %v14333_v39  ;;  %v14342_v39 = vld [vmem:[#allocation89_spill] sm:$0xff] }
 0x4a8   : > { %v12484_v19 = vpop.f32.mrf.mxu0  ;;  %5071 = vmatpush2.msra.mxu1 %v14334_v4  ;;  %v14344_v4 = vld [vmem:[#allocation90_spill] sm:$0xff]  ;;  %v4147_v20 = vadd.f32 %v4146_v14, %v4034_v3  ;;  %v4038_v14 = vadd.f32 %v12447_v54, %v14332_v47  ;;  %v14351_v3 = vld [vmem:[#allocation96_spill] sm:$0xff] }
 0x4a9   : > { %5072 = vmatprep.subr.mxu1 %v14335_v57  ;;  %v14345_v57 = vld [vmem:[#allocation94_spill] sm:$0xff] }
 0x4aa   : > { %v12488_v2 = vpop.f32.mrf.mxu0  ;;  %5073 = vmatpush2.msra.mxu1 %v14336_v63  ;;  %v4040_v63 = vadd.f32 %v4039_v51, %v12008_v61  ;;  %v14349_v51 = vld [vmem:[#allocation145_spill] sm:$0xff]  ;;  %8249 = vtanh.f32 %v4147_v20  ;;  %v4151_v54 = vadd.f32 %v12461_v45, %v4038_v14  ;;  %v14354_v20 = vld [vmem:[#allocation142_spill] sm:$0xff] }
 0x4ab   : > { %5074 = vmatprep.subr.mxu1 %v14337_v46  ;;  %8251 = vtanh.f32 %v4145_v50  ;;  %v14355_v45 = vld [vmem:[#allocation98_spill] sm:$0xff]  ;;  %v14356_v50 = vld [vmem:[#allocation99_spill] sm:$0xff] }
 0x4ac   : > { %v12497_v26 = vpop.f32.mrf.mxu0  ;;  %5075 = vmatpush2.msra.mxu1 %v14338_v30  ;;  %v14348_v30 = vld [vmem:[#allocation92_spill] sm:$0xff] }
 0x4ad   : > { %v12500_v40 = vpop.f32.mrf.mxu1  ;;  %5076 = vmatprep.subr.mxu1 %v14339_v16 }
 0x4ae   : > { %v12503_v32 = vpop.f32.mrf.mxu0  ;;  %5077 = vmatpush2.msra.mxu1 %v14340_v1  ;;  %v4153_v1 = vadd.f32 %v4152_v24, %v4040_v63  ;;  %v14353_v24 = vld [vmem:[#allocation146_spill] sm:$0xff] }
 0x4af   : > { %5078 = vmatprep.subr.mxu1 %v14341_v22  ;;  %v12512_v41 = vpop.f32.mrf.mxu1  ;;  %v14350_v22 = vld [vmem:[#allocation93_spill] sm:$0xff] }
 0x4b0   : > { %v12514_v60 = vpop.f32.mrf.mxu0  ;;  %5079 = vmatpush2.msra.mxu1 %v14342_v39  ;;  %8253 = vtanh.f32 %v4153_v1 }
 0x4b1   : > { %5080 = vmatprep.subr.mxu1 %v14343_v23 }
 0x4b2   : > { %5081 = vmatpush2.msra.mxu1 %v14344_v4  ;;  %v14352_v4 = vld [vmem:[#allocation97_spill] sm:$0xff] }
 0x4b3   : > { %v6851_v37 = vpop.f32.mrf.mxu0  ;;  %5082 = vmatprep.subr.mxu1 %v14345_v57 }
 0x4b4   : > { %v12524_v33 = vpop.f32.mrf.mxu1  ;;  %5083 = vmatpush2.msra.mxu1 %v14346_v62 }
 0x4b5   : > { %v6852_v46 = vpop.f32.mrf.mxu0  ;;  %5084 = vmatprep.subr.mxu1 %v14347_v10 }
 0x4b6   : > { %v12528_v52 = vpop.f32.mrf.mxu1  ;;  %v6853_v29 = vadd.f32 %v6852_v46, %v6851_v37  ;;  %5085 = vmatpush2.msra.mxu1 %v14348_v30  ;;  %v12542_v37 = vpop.eup %8239 }
 0x4b7   : > { %v6854_v16 = vpop.f32.mrf.mxu0  ;;  %5086 = vmatprep.subr.mxu1 %v14349_v51  ;;  %v12546_v63 = vpop.eup %8241 }
 0x4b8   : > { %v7561_v53 = vpop.f32.mrf.mxu1  ;;  %v4240_v31 = vadd.f32 %v6853_v29, %v12173_v28  ;;  %5087 = vmatpush2.msra.mxu1 %v14350_v22  ;;  %v4159_v29 = vadd.f32 %v12484_v19, %v4046_v15  ;;  %v12554_v14 = vpop.eup %8243 }
 0x4b9   : > { %v6855_v11 = vpop.f32.mrf.mxu0  ;;  %5088 = vmatprep.subr.mxu1 %v14351_v3  ;;  %v12558_v51 = vpop.eup %8245 }
 0x4ba   : > { %v6856_v39 = vadd.f32 %v6855_v11, %v6854_v16  ;;  %v4344_v23 = vpop.f32.mrf.mxu1  ;;  %5089 = vmatpush2.msra.mxu1 %v14352_v4  ;;  %v4044_v11 = vadd.f32 %v12471_v6, %v14332_v47 }
 0x4bb   : > { %v4345_v56 = vadd.f32 %v4344_v23, %v4240_v31  ;;  %v6857_v13 = vpop.f32.mrf.mxu0  ;;  %5090 = vmatprep.subr.mxu1 %v14353_v24  ;;  %v14357_v31 = vld [vmem:[#allocation100_spill] sm:$0xff]  ;;  %v12567_v23 = vpop.eup %8247 }
 0x4bc   : > { %v4245_v57 = vadd.f32 %v6856_v39, %v12173_v28  ;;  %5091 = vmatpush2.msra.mxu1 %v14354_v20  ;;  %v7564_v62 = vpop.f32.mrf.mxu1  ;;  %v14358_v39 = vld [vmem:[#allocation108_spill] sm:$0xff]  ;;  %v4052_v20 = vadd.f32 %v12512_v41, %v12008_v61 }
 0x4bd   : > { %8255 = vtanh.f32 %v4345_v56  ;;  %v6858_v46 = vpop.f32.mrf.mxu0  ;;  %5093 = vmatmul.mubr.f32.vlgmr.msra.gmra.mxu1 %v12542_v37  ;;  %7615 = vmatprep.subr.mxu1 %v14355_v45 }
 0x4be   : > { %v4350_v44 = vadd.f32 %v7561_v53, %v4245_v57  ;;  %v6859_v10 = vadd.f32 %v6858_v46, %v6857_v13  ;;  %5098 = vmatprep.mubr.f32.mxu1 %v12546_v63  ;;  %7616 = vmatpush3.msra.mxu1 %v14355_v45  ;;  %8257 = vtanh.f32 %v4151_v54  ;;  %v4354_v1 = vpop.f32.mrf.mxu1  ;;  %v12571_v54 = vpop.eup %8249  ;;  %v14359_v13 = vld [vmem:[#allocation112_spill] sm:$0xff]  ;;  %v4157_v57 = vadd.f32 %v12475_v21, %v4044_v11  ;;  %v14360_v45 = vld [vmem:[#allocation115_spill] sm:$0xff]  ;;  %v14361_v21 = vld [vmem:[#allocation118_spill] sm:$0xff] }
 0x4bf   : > { %v6860_v30 = vpop.f32.mrf.mxu0  ;;  %7617 = vmatprep.subr.mxu1 %v14356_v50  ;;  %v14363_v11 = vld [vmem:[#allocation106_spill] sm:$0xff] }
 0x4c0   : > { %8259 = vtanh.f32 %v4350_v44  ;;  %v4250_v16 = vadd.f32 %v6859_v10, %v12173_v28  ;;  %7618 = vmatpush3.msra.mxu1 %v14356_v50  ;;  %v7567_v15 = vpop.f32.mrf.mxu1  ;;  %v12581_v44 = vpop.eup %8251 }
 0x4c1   : > { %v6861_v53 = vpop.f32.mrf.mxu0  ;;  %5099 = vmatmul.mubr.f32.gmra.mxu1 %v12554_v14  ;;  %7619 = vmatprep.subr.mxu1 %v14357_v31  ;;  %8261 = vtanh.f32 %v4159_v29 }
 0x4c2   : > { %v4355_v22 = vadd.f32 %v4354_v1, %v4250_v16  ;;  %v6862_v19 = vadd.f32 %v6861_v53, %v6860_v30  ;;  %5104 = vmatprep.mubr.f32.mxu1 %v12558_v51  ;;  %7620 = vmatpush3.msra.mxu1 %v14357_v31  ;;  %v4364_v29 = vpop.f32.mrf.mxu1  ;;  %v4165_v1 = vadd.f32 %v12497_v26, %v4052_v20  ;;  %v14362_v31 = vld [vmem:[#allocation121_spill] sm:$0xff] }
 0x4c3   : > { %v6863_v3 = vpop.f32.mrf.mxu0  ;;  %7621 = vmatprep.subr.mxu1 %v14358_v39 }
 0x4c4   : > { %8263 = vtanh.f32 %v4355_v22  ;;  %v4255_v4 = vadd.f32 %v6862_v19, %v12173_v28  ;;  %7622 = vmatpush3.msra.mxu1 %v14358_v39  ;;  %v7570_v39 = vpop.f32.mrf.mxu1 }
 0x4c5   : > { %v6864_v56 = vpop.f32.mrf.mxu0  ;;  %5105 = vmatmul.mubr.f32.gmra.mxu1 %v12567_v23  ;;  %7623 = vmatprep.subr.mxu1 %v14359_v13 }
 0x4c6   : > { %v4360_v6 = vadd.f32 %v7564_v62, %v4255_v4  ;;  %v6865_v24 = vadd.f32 %v6864_v56, %v6863_v3  ;;  %5110 = vmatprep.mubr.f32.mxu1 %v12571_v54  ;;  %7624 = vmatpush3.msra.mxu1 %v14359_v13  ;;  %v12585_v62 = vpop.eup %8253  ;;  %v14364_v13 = vld [vmem:[#allocation36_spill] sm:$0xff] }
 0x4c7   : > { %v6866_v46 = vpop.f32.mrf.mxu0  ;;  %7625 = vmatprep.subr.mxu1 %v14360_v45 }
 0x4c8   : > { %8265 = vtanh.f32 %v4360_v6  ;;  %v4260_v10 = vadd.f32 %v6865_v24, %v12173_v28  ;;  %7626 = vmatpush3.msra.mxu1 %v14360_v45  ;;  %v4050_v6 = vadd.f32 %v12500_v40, %v14332_v47  ;;  %v14365_v24 = vld [vmem:[#allocation44_spill] sm:$0xff]  ;;  %v4374_v45 = vpop.f32.mrf.mxu1 }
 0x4c9   : > { %v6867_v30 = vpop.f32.mrf.mxu0  ;;  %5111 = vmatmul.mubr.f32.gmra.mxu1 %v12581_v44  ;;  %7627 = vmatprep.subr.mxu1 %v14361_v21  ;;  %8267 = vtanh.f32 %v4157_v57 }
 0x4ca   : > { %v12589_v50 = vpop.eup %8255  ;;  %v4365_v41 = vadd.f32 %v4364_v29, %v4260_v10  ;;  %v6868_v16 = vadd.f32 %v6867_v30, %v6866_v46  ;;  %5116 = vmatprep.mubr.f32.mxu1 %v12585_v62  ;;  %7628 = vmatpush3.msra.mxu1 %v14361_v21  ;;  %v14367_v10 = vld [vmem:[#allocation124_spill] sm:$0xff]  ;;  %v4058_v29 = vadd.f32 %v12528_v52, %v12008_v61  ;;  %v14368_v52 = vld [vmem:[#allocation127_spill] sm:$0xff] }
 0x4cb   : > { %5206 = vmatmul.mubr.f32.vlgmr.msra.gmra.mxu0 %v12589_v50  ;;  %v6869_v53 = vpop.f32.mrf.mxu0  ;;  %7629 = vmatprep.subr.mxu1 %v14362_v31  ;;  %v12596_v22 = vpop.eup %8257 }
 0x4cc   : > { %8269 = vtanh.f32 %v4365_v41  ;;  %v4265_v19 = vadd.f32 %v6868_v16, %v12173_v28  ;;  %6980 = vmatpush3.msra.mxu0 %v14363_v11  ;;  %5211 = vmatprep.mubr.f32.mxu0 %v13686_v49  ;;  %v4163_v41 = vadd.f32 %v12488_v2, %v4050_v6  ;;  %v14373_v16 = vld [vmem:[#allocation130_spill] sm:$0xff]  ;;  %v14378_v11 = vld [vmem:[#allocation49_spill] sm:$0xff] }
 0x4cd   : > { %v12601_v3 = vpop.eup %8259  ;;  %6981 = vmatprep.subr.mxu0 %v12254_v18  ;;  %v6870_v26 = vpop.f32.mrf.mxu0  ;;  %7630 = vmatpush3.msra.mxu1 %v14362_v31  ;;  %8271 = vtanh.f32 %v4165_v1  ;;  %v12785_v6 = vld [vmem:[#allocation11 + $0x48] sm:$0xff] }
 0x4ce   : > { %v4370_v4 = vadd.f32 %v7567_v15, %v4265_v19  ;;  %v6871_v56 = vadd.f32 %v6870_v26, %v6869_v53  ;;  %6982 = vmatpush3.msra.mxu0 %v14364_v13  ;;  %5117 = vmatmul.mubr.f32.gmra.mxu1 %v12596_v22  ;;  %v12611_v20 = vpop.eup %8261  ;;  %v14366_v15 = vld [vmem:[#allocation38_spill] sm:$0xff]  ;;  %v14376_v53 = vld [vmem:[#allocation41_spill] sm:$0xff]  ;;  %v12772_v26 = vld [vmem:[#allocation11 + $0x158] sm:$0xff] }
 0x4cf   : > { %5212 = vmatmul.mubr.f32.gmra.mxu0 %v12601_v3  ;;  %6983 = vmatprep.subr.mxu0 %v14365_v24  ;;  %v6872_v57 = vpop.f32.mrf.mxu0  ;;  %v12782_v13 = vld [vmem:[#allocation11 + $0xc8] sm:$0xff] }
 0x4d0   : > { %8273 = vtanh.f32 %v4370_v4  ;;  %v4270_v18 = vadd.f32 %v6871_v56, %v12173_v28  ;;  %6984 = vmatpush3.msra.mxu0 %v14366_v15  ;;  %5217 = vmatprep.mubr.f32.mxu0 %v13686_v49  ;;  %v12775_v4 = vld [vmem:[#allocation11 + $0x50] sm:$0xff]  ;;  %v12802_v15 = vld [vmem:[#allocation11 + $0xb8] sm:$0xff] }
 0x4d1   : > { %v12616_v46 = vpop.eup %8263  ;;  %6985 = vmatprep.subr.mxu0 %v12275_v34  ;;  %v6873_v40 = vpop.f32.mrf.mxu0  ;;  %7631 = vmatprep.subr.mxu1 %v14367_v10 }
 0x4d2   : > { %v4375_v30 = vadd.f32 %v4374_v45, %v4270_v18  ;;  %v6874_v21 = vadd.f32 %v6873_v40, %v6872_v57  ;;  %6986 = vmatpush3.msra.mxu0 %v12278_v36  ;;  %5122 = vmatprep.mubr.f32.mxu1 %v12611_v20  ;;  %v4171_v36 = vadd.f32 %v12514_v60, %v4058_v29  ;;  %v12791_v57 = vld [vmem:[#allocation11 + $0xc0] sm:$0xff]  ;;  %v12808_v45 = vld [vmem:[#allocation11 + $0x148] sm:$0xff]  ;;  %v12818_v29 = vld [vmem:[#allocation11 + $0x30] sm:$0xff] }
 0x4d3   : > { %5218 = vmatmul.mubr.f32.gmra.mxu0 %v12616_v46  ;;  %6987 = vmatprep.subr.mxu0 %v12282_v48  ;;  %v12798_v18 = vld [vmem:[#allocation11 + $0x40] sm:$0xff]  ;;  %14383 = vst [vmem:[#allocation51_spill] sm:$0xff] %v12808_v45 }
 0x4d4   : > { %8275 = vtanh.f32 %v4375_v30  ;;  %v4275_v34 = vadd.f32 %v6874_v21, %v12173_v28  ;;  %6988 = vmatpush3.msra.mxu0 %v12285_v12  ;;  %5223 = vmatprep.mubr.f32.mxu0 %v13686_v49  ;;  %v4056_v28 = vadd.f32 %v12524_v33, %v14332_v47  ;;  %v14371_v47 = vld [vmem:[#allocation50_spill] sm:$0xff]  ;;  %v14372_v33 = vld [vmem:[#allocation53_spill] sm:$0xff]  ;;  %v12820_v30 = vld [vmem:[#allocation11 + $0x140] sm:$0xff] }
 0x4d5   : > { %v12630_v61 = vpop.eup %8265  ;;  %6989 = vmatprep.subr.mxu0 %v12288_v58  ;;  %7632 = vmatpush3.msra.mxu1 %v14367_v10  ;;  %8277 = vtanh.f32 %v4163_v41  ;;  %v12813_v10 = vld [vmem:[#allocation11 + $0xb0] sm:$0xff]  ;;  %14384 = vst [vmem:[#allocation67_spill] sm:$0xff] %v12820_v30  ;;  %v12823_v21 = vld [vmem:[#allocation11 + $0xa8] sm:$0xff] }
 0x4d6   : > { %v4380_v2 = vadd.f32 %v7570_v39, %v4275_v34  ;;  %6990 = vmatpush3.msra.mxu0 %v12293_v59  ;;  %7633 = vmatprep.subr.mxu1 %v14368_v52  ;;  %v12641_v48 = vpop.eup %8267  ;;  %v14369_v59 = vld [vmem:[#allocation48_spill] sm:$0xff]  ;;  %v4169_v58 = vadd.f32 %v12503_v32, %v4056_v28  ;;  %v14375_v32 = vld [vmem:[#allocation141_spill] sm:$0xff]  ;;  %v12830_v34 = vld [vmem:[#allocation11 + $0x138] sm:$0xff] }
 0x4d7   : > { %5224 = vmatmul.mubr.f32.gmra.mxu0 %v12630_v61  ;;  %6991 = vmatprep.subr.mxu0 %v12297_v0  ;;  %v14370_v0 = vld [vmem:[#allocation39_spill] sm:$0xff]  ;;  %v12827_v41 = vld [vmem:[#allocation11 + $0x28] sm:$0xff]  ;;  %14385 = vst [vmem:[#allocation69_spill] sm:$0xff] %v12830_v34 }
 0x4d8   : > { %8279 = vtanh.f32 %v4380_v2  ;;  %6992 = vmatpush3.msra.mxu0 %v12300_v42  ;;  %5229 = vmatprep.mubr.f32.mxu0 %v13686_v49  ;;  %v12839_v2 = vld [vmem:[#allocation11 + $0x20] sm:$0xff]  ;;  %v12845_v28 = vld [vmem:[#allocation11 + $0x98] sm:$0xff] }
 0x4d9   : > { %v12645_v12 = vpop.eup %8269  ;;  %6993 = vmatprep.subr.mxu0 %v14369_v59  ;;  %7634 = vmatpush3.msra.mxu1 %v14368_v52  ;;  %8281 = vtanh.f32 %v4171_v36  ;;  %v12835_v36 = vld [vmem:[#allocation11 + $0xa0] sm:$0xff]  ;;  %v12842_v52 = vld [vmem:[#allocation11 + $0x130] sm:$0xff] }
 0x4da   : > { %6994 = vmatpush3.msra.mxu0 %v12307_v8  ;;  %5123 = vmatmul.mubr.f32.gmra.mxu1 %v12641_v48  ;;  %v12654_v42 = vpop.eup %8271  ;;  %8283 = vtanh.f32 %v4169_v58  ;;  %v14374_v8 = vld [vmem:[#allocation40_spill] sm:$0xff]  ;;  %14386 = vst [vmem:[#allocation55_spill] sm:$0xff] %v12842_v52  ;;  %v12855_v58 = vld [vmem:[#allocation11 + $0x90] sm:$0xff] }
 0x4db   : > { %5230 = vmatmul.mubr.f32.gmra.mxu0 %v12645_v12  ;;  %6995 = vmatprep.subr.mxu0 %v14370_v0  ;;  %v12859_v0 = vld [vmem:[#allocation11 + $0x10] sm:$0xff] }
 0x4dc   : > { %6996 = vmatpush3.msra.mxu0 %v14371_v47  ;;  %5235 = vmatprep.mubr.f32.mxu0 %v13686_v49  ;;  %v12865_v47 = vld [vmem:[#allocation11 + $0x88] sm:$0xff] }
 0x4dd   : > { %v12658_v60 = vpop.eup %8273  ;;  %6997 = vmatprep.subr.mxu0 %v14372_v33  ;;  %7635 = vmatprep.subr.mxu1 %v14373_v16  ;;  %v12872_v33 = vld [vmem:[#allocation11 + $0x118] sm:$0xff] }
 0x4de   : > { %6998 = vmatpush3.msra.mxu0 %v12321_v17  ;;  %5128 = vmatprep.mubr.f32.mxu1 %v12654_v42  ;;  %v14377_v17 = vld [vmem:[#allocation133_spill] sm:$0xff]  ;;  %14389 = vst [vmem:[#allocation71_spill] sm:$0xff] %v12872_v33 }
 0x4df   : > { %5236 = vmatmul.mubr.f32.gmra.mxu0 %v12658_v60  ;;  %6999 = vmatprep.subr.mxu0 %v14374_v8  ;;  %v12875_v8 = vld [vmem:[#allocation11 + $0x80] sm:$0xff] }
 0x4e0   : > { %7000 = vmatpush3.msra.mxu0 %v14375_v32  ;;  %5241 = vmatprep.mubr.f32.mxu0 %v13686_v49  ;;  %v12881_v32 = vld [vmem:[%s13215_s10] sm:$0x7] }
 0x4e1   : > { %v12668_v1 = vpop.eup %8275  ;;  %7001 = vmatprep.subr.mxu0 %v14376_v53  ;;  %7636 = vmatpush3.msra.mxu1 %v14373_v16  ;;  %v12887_v53 = vld [vmem:[#allocation11 + $0x110] sm:$0xff] }
 0x4e2   : > { %7002 = vmatpush3.msra.mxu0 %v12335_v38  ;;  %7637 = vmatprep.subr.mxu1 %v14377_v17  ;;  %v12676_v31 = vpop.eup %8277  ;;  %14390 = vst [vmem:[#allocation54_spill] sm:$0xff] %v12887_v53 }
 0x4e3   : > { %5242 = vmatmul.mubr.f32.gmra.mxu0 %v12668_v1  ;;  %7003 = vmatprep.subr.mxu0 %v12339_v7  ;;  %v14379_v7 = vld [vmem:[#allocation136_spill] sm:$0xff] }
 0x4e4   : > { %7004 = vmatpush3.msra.mxu0 %v12342_v27  ;;  %5247 = vmatprep.mubr.f32.mxu0 %v13686_v49  ;;  %v14380_v49 = vld [vmem:[#allocation62_spill] sm:$0xff] }
 0x4e5   : > { %v12680_v19 = vpop.eup %8279  ;;  %7005 = vmatprep.subr.mxu0 %v12345_v9  ;;  %7638 = vmatpush3.msra.mxu1 %v14377_v17  ;;  %v12708_v9 = vld [vmem:[#allocation11 + $0xf8] sm:$0xff]  ;;  %v12893_v17 = vld [vmem:[#allocation11 + $0x108] sm:$0xff] }
 0x4e6   : > { %7006 = vmatpush3.msra.mxu0 %v14378_v11  ;;  %5129 = vmatmul.mubr.f32.gmra.mxu1 %v12676_v31  ;;  %v12686_v38 = vpop.eup %8281  ;;  %14391 = vst [vmem:[#allocation57_spill] sm:$0xff] %v12893_v17 }
 0x4e7   : > { %5248 = vmatmul.mubr.f32.gmra.mxu0 %v12680_v19  ;;  %7007 = vmatprep.subr.mxu0 %v12353_v25  ;;  %v12698_v27 = vpop.eup %8283  ;;  %v14381_v25 = vld [vmem:[#allocation42_spill] sm:$0xff] }
 0x4e8   : > { %7639 = vmatprep.subr.mxu1 %v14379_v7  ;;  %5134 = vmatprep.mubr.f32.mxu1 %v12686_v38 }
 0x4e9   : > { %7008 = vmatpush3.msra.mxu0 %v12356_v43  ;;  %5318 = vmatprep.mubr.f32.mxu0 %v12467_v35  ;;  %v14382_v43 = vld [vmem:[#allocation37_spill] sm:$0xff]  ;;  %v12718_v35 = vld [vmem:[#allocation11 + $0xf0] sm:$0xff] }
 0x4ea   : > { %7640 = vmatpush3.msra.mxu1 %v14379_v7  ;;  %7009 = vmatprep.subr.mxu0 %v12359_v5  ;;  %v12712_v5 = vld [vmem:[#allocation11 + $0x78] sm:$0xff] }
 0x4eb   : > { %7641 = vmatprep.subr.mxu1 %v14380_v49  ;;  %7010 = vmatpush3.msra.mxu0 %v12363_v55  ;;  %v12714_v55 = vld [vmem:[#allocation11 + $0x178] sm:$0xff] }
 0x4ec   : > { %7642 = vmatpush3.msra.mxu1 %v14380_v49  ;;  %5319 = vmatmul.mubr.f32.vlgmr.msra.gmra.mxu0 %v12542_v37  ;;  %v12723_v37 = vld [vmem:[#allocation11 + $0x70] sm:$0xff]  ;;  %v12906_v49 = vld [vmem:[#allocation11 + $0x100] sm:$0xff] }
 0x4ed   : > { %5135 = vmatmul.mubr.f32.gmra.mxu1 %v12698_v27  ;;  %7643 = vmatprep.subr.mxu1 %v14381_v25  ;;  %14394 = vst [vmem:[#allocation73_spill] sm:$0xff] %v12906_v49 }
 0x4ee   : > { %5323 = vmatprep.mubr.f32.mxu0 %v12546_v63  ;;  %7644 = vmatpush3.msra.mxu1 %v14381_v25  ;;  %v12728_v63 = vld [vmem:[#allocation11 + $0xe8] sm:$0xff] }
 0x4ef   : > { %7647 = vmatprep.mubr.f32.mxu1 %v12589_v50  ;;  %7645 = vmatprep.subr.mxu1 %v14382_v43  ;;  %v12751_v50 = vld [vmem:[#allocation11 + $0x60] sm:$0xff] }
 0x4f0   : > { %7646 = vmatpush3.msra.mxu1 %v14382_v43  ;;  %5324 = vmatmul.mubr.f32.gmra.mxu0 %v12554_v14  ;;  %v12732_v14 = vld [vmem:[#allocation11 + $0x170] sm:$0xff] }
 0x4f1   : > { %7648 = vmatmul.mubr.f32.vlgmr.msra.gmra.mxu1 %v12601_v3  ;;  %5328 = vmatprep.mubr.f32.mxu0 %v12558_v51  ;;  %v12737_v51 = vld [vmem:[#allocation11 + $0x68] sm:$0xff]  ;;  %v12758_v3 = vld [vmem:[#allocation11 + $0x160] sm:$0xff] }
 0x4f2   : > { %7650 = vmatprep.mubr.f32.mxu1 %v12616_v46  ;;  %7059 = vmatprep.subr.mxu0 %v12708_v9  ;;  %v12805_v46 = vld [vmem:[#allocation11 + $0x38] sm:$0xff] }
 0x4f3   : > { %7060 = vmatpush3.msra.mxu0 %v12712_v5  ;;  %7659 = vmatprep.subr.mxu1 %v12714_v55 }
 0x4f4   : > { %5329 = vmatmul.mubr.f32.gmra.mxu0 %v12567_v23  ;;  %7061 = vmatprep.subr.mxu0 %v12718_v35  ;;  %v12741_v23 = vld [vmem:[#allocation11 + $0xe0] sm:$0xff] }
 0x4f5   : > { %7651 = vmatmul.mubr.f32.gmra.mxu1 %v12630_v61  ;;  %5333 = vmatprep.mubr.f32.mxu0 %v12571_v54  ;;  %v12746_v54 = vld [vmem:[#allocation11 + $0x168] sm:$0xff] }
 0x4f6   : > { %7653 = vmatprep.mubr.f32.mxu1 %v12645_v12  ;;  %7062 = vmatpush3.msra.mxu0 %v12723_v37  ;;  %v12852_v12 = vld [vmem:[#allocation11 + $0x128] sm:$0xff] }
 0x4f7   : > { %7063 = vmatprep.subr.mxu0 %v12728_v63  ;;  %7660 = vmatpush3.msra.mxu1 %v12714_v55  ;;  %14387 = vst [vmem:[#allocation52_spill] sm:$0xff] %v12852_v12 }
 0x4f8   : > { %5334 = vmatmul.mubr.f32.gmra.mxu0 %v12581_v44  ;;  %7661 = vmatprep.subr.mxu1 %v12732_v14  ;;  %v12755_v44 = vld [vmem:[#allocation11 + $0xd8] sm:$0xff] }
 0x4f9   : > { %7654 = vmatmul.mubr.f32.gmra.mxu1 %v12658_v60  ;;  %5338 = vmatprep.mubr.f32.mxu0 %v12585_v62  ;;  %v12763_v62 = vld [vmem:[#allocation11 + $0x58] sm:$0xff]  ;;  %v12869_v60 = vld [vmem:[#allocation11 + $0x8] sm:$0xff] }
 0x4fa   : > { %7656 = vmatprep.mubr.f32.mxu1 %v12668_v1  ;;  %7064 = vmatpush3.msra.mxu0 %v12737_v51  ;;  %v12884_v1 = vld [vmem:[#allocation11] sm:$0xff] }
 0x4fb   : > { %7065 = vmatprep.subr.mxu0 %v12741_v23  ;;  %7662 = vmatpush3.msra.mxu1 %v12732_v14 }
 0x4fc   : > { %5339 = vmatmul.mubr.f32.gmra.mxu0 %v12596_v22  ;;  %7663 = vmatprep.subr.mxu1 %v12746_v54  ;;  %v12769_v22 = vld [vmem:[#allocation11 + $0xd0] sm:$0xff] }
 0x4fd   : > { %7657 = vmatmul.mubr.f32.gmra.mxu1 %v12680_v19  ;;  %5343 = vmatprep.mubr.f32.mxu0 %v12611_v20  ;;  %v12794_v20 = vld [vmem:[#allocation11 + $0x150] sm:$0xff] }
 0x4fe   : > { %7066 = vmatpush3.msra.mxu0 %v12751_v50  ;;  %7664 = vmatpush3.msra.mxu1 %v12746_v54 }
 0x4ff   : > { %v12766_v39 = vpop.f32.mrf.mxu0  ;;  %7067 = vmatprep.subr.mxu0 %v12755_v44  ;;  %7665 = vmatprep.subr.mxu1 %v12758_v3 }
 0x500   : > { %5344 = vmatmul.mubr.f32.gmra.mxu0 %v12641_v48  ;;  %7666 = vmatpush3.msra.mxu1 %v12758_v3  ;;  %v12849_v48 = vld [vmem:[#allocation11 + $0x18] sm:$0xff] }
 0x501   : > { %5348 = vmatprep.mubr.f32.mxu0 %v12654_v42  ;;  %v12779_v56 = vpop.f32.mrf.mxu0  ;;  %7068 = vmatpush3.msra.mxu0 %v12763_v62  ;;  %v12862_v42 = vld [vmem:[#allocation11 + $0x120] sm:$0xff] }
 0x502   : > { %7069 = vmatprep.subr.mxu0 %v12769_v22  ;;  %7667 = vmatprep.subr.mxu1 %v12772_v26  ;;  %14388 = vst [vmem:[#allocation43_spill] sm:$0xff] %v12862_v42 }
 0x503   : > { %v12788_v24 = vpop.f32.mrf.mxu0  ;;  %7070 = vmatpush3.msra.mxu0 %v12775_v4  ;;  %7668 = vmatpush3.msra.mxu1 %v12772_v26 }
 0x504   : > { %5349 = vmatmul.mubr.f32.gmra.mxu0 %v12676_v31  ;;  %7071 = vmatprep.subr.mxu0 %v12782_v13  ;;  %v14392_v31 = vld [vmem:[#allocation101_spill] sm:$0xff] }
 0x505   : > { %5353 = vmatprep.mubr.f32.mxu0 %v12686_v38  ;;  %7072 = vmatpush3.msra.mxu0 %v12785_v6  ;;  %v12810_v40 = vpop.f32.mrf.mxu0  ;;  %v12897_v19 = vrot.slane %v12881_v32, %v14392_v31  ;;  %v14393_v38 = vld [vmem:[#allocation102_spill] sm:$0xff] }
 0x506   : > { %7073 = vmatprep.subr.mxu0 %v12791_v57  ;;  %7669 = vmatprep.subr.mxu1 %v12794_v20  ;;  %v12903_v7 = vrot.slane %v12881_v32, %v14393_v38 }
 0x507   : > { %7074 = vmatpush3.msra.mxu0 %v12798_v18  ;;  %7670 = vmatpush3.msra.mxu1 %v12794_v20  ;;  %v12832_v61 = vpop.f32.mrf.mxu0 }
 0x508   : > { %5354 = vmatmul.mubr.f32.gmra.mxu0 %v12698_v27  ;;  %7075 = vmatprep.subr.mxu0 %v12802_v15  ;;  %v4635_v27 = vadd.f32 %v12766_v39, %v12897_v19  ;;  %v4637_v31 = vadd.f32 %v12779_v56, %v12903_v7 }
 0x509   : > { %7076 = vmatpush3.msra.mxu0 %v12805_v46  ;;  %7671 = vmatprep.subr.mxu1 %v12808_v45  ;;  %v4648_v59 = vpop.f32.mrf.mxu0 }
 0x50a   : > { %7077 = vmatprep.subr.mxu0 %v12813_v10  ;;  %7672 = vmatpush3.msra.mxu1 %v12808_v45 }
 0x50b   : > { %7078 = vmatpush3.msra.mxu0 %v12818_v29  ;;  %7673 = vmatprep.subr.mxu1 %v12820_v30  ;;  %v4652_v16 = vpop.f32.mrf.mxu0 }
 0x50c   : > { %7079 = vmatprep.subr.mxu0 %v12823_v21  ;;  %7674 = vmatpush3.msra.mxu1 %v12820_v30 }
 0x50d   : > { %7080 = vmatpush3.msra.mxu0 %v12827_v41  ;;  %7675 = vmatprep.subr.mxu1 %v12830_v34  ;;  %v4654_v11 = vpop.f32.mrf.mxu0 }
 0x50e   : > { %7081 = vmatprep.subr.mxu0 %v12835_v36  ;;  %7676 = vmatpush3.msra.mxu1 %v12830_v34 }
 0x50f   : > { %7082 = vmatpush3.msra.mxu0 %v12839_v2  ;;  %7677 = vmatprep.subr.mxu1 %v12842_v52  ;;  %v4658_v25 = vpop.f32.mrf.mxu0 }
 0x510   : > { %7083 = vmatprep.subr.mxu0 %v12845_v28  ;;  %7678 = vmatpush3.msra.mxu1 %v12842_v52 }
 0x511   : > { %7084 = vmatpush3.msra.mxu0 %v12849_v48  ;;  %7679 = vmatprep.subr.mxu1 %v12852_v12 }
 0x512   : > { %7085 = vmatprep.subr.mxu0 %v12855_v58  ;;  %7680 = vmatpush3.msra.mxu1 %v12852_v12 }
 0x513   : > { %7086 = vmatpush3.msra.mxu0 %v12859_v0  ;;  %7681 = vmatprep.subr.mxu1 %v12862_v42 }
 0x514   : > { %7087 = vmatprep.subr.mxu0 %v12865_v47  ;;  %7682 = vmatpush3.msra.mxu1 %v12862_v42  ;;  %v4643_v42 = vadd.f32 %v12810_v40, %v12903_v7  ;;  %v4655_v40 = vadd.f32 %v4654_v11, %v12903_v7 }
 0x515   : > { %7088 = vmatpush3.msra.mxu0 %v12869_v60  ;;  %7683 = vmatprep.subr.mxu1 %v12872_v33 }
 0x516   : > { %7089 = vmatprep.subr.mxu0 %v12875_v8  ;;  %7684 = vmatpush3.msra.mxu1 %v12872_v33  ;;  %v4660_v33 = vpop.f32.mrf.mxu0 }
 0x517   : > { %7090 = vmatpush3.msra.mxu0 %v12884_v1  ;;  %7685 = vmatprep.subr.mxu1 %v12887_v53 }
 0x518   : > { %7686 = vmatpush3.msra.mxu1 %v12887_v53  ;;  %7139 = vmatprep.subr.mxu0 %v12708_v9  ;;  %v4664_v12 = vpop.f32.mrf.mxu0 }
 0x519   : > { %7687 = vmatprep.subr.mxu1 %v12893_v17 }
 0x51a   : > { %7688 = vmatpush3.msra.mxu1 %v12893_v17  ;;  %v4641_v17 = vadd.f32 %v12788_v24, %v12897_v19 }
 0x51b   : > { %v4747_v43 = vpop.f32.mrf.mxu1  ;;  %7689 = vmatprep.subr.mxu1 %v12906_v49 }
 0x51c   : > { %7690 = vmatpush3.msra.mxu1 %v12906_v49  ;;  %v4748_v38 = vadd.f32 %v4747_v43, %v4635_v27  ;;  %v4647_v27 = vadd.f32 %v12832_v61, %v12897_v19  ;;  %v4653_v49 = vadd.f32 %v4652_v16, %v12897_v19 }
 0x51d   : > { %v4749_v53 = vpop.f32.mrf.mxu1  ;;  %7703 = vmatprep.subr.mxu1 %v12714_v55 }
 0x51e   : > { %v4750_v9 = vadd.f32 %v4749_v53, %v4637_v31  ;;  %v4649_v53 = vadd.f32 %v4648_v59, %v12903_v7  ;;  %v4666_v31 = vpop.f32.mrf.mxu0  ;;  %v4659_v59 = vadd.f32 %v4658_v25, %v12897_v19 }
 0x51f   : > { %v4667_v25 = vadd.f32 %v4666_v31, %v12903_v7 }
 0x520   : > { %8285 = vtanh.f32 %v4750_v9 }
 0x521   : > { %8287 = vtanh.f32 %v4748_v38  ;;  %v4753_v39 = vpop.f32.mrf.mxu1 }
 0x522   : > { %v4754_v52 = vadd.f32 %v4753_v39, %v4641_v17  ;;  %v4670_v17 = vpop.f32.mrf.mxu0 }
 0x523   : > { %v4755_v56 = vpop.f32.mrf.mxu1 }
 0x524   : > { %v4756_v34 = vadd.f32 %v4755_v56, %v4643_v42 }
 0x525   : > { %v4759_v43 = vpop.f32.mrf.mxu1 }
 0x526   : > { %8289 = vtanh.f32 %v4756_v34  ;;  %v4760_v9 = vadd.f32 %v4759_v43, %v4647_v27  ;;  %v4672_v27 = vpop.f32.mrf.mxu0 }
 0x527   : > { %8291 = vtanh.f32 %v4754_v52  ;;  %v4761_v24 = vpop.f32.mrf.mxu1  ;;  %v4661_v52 = vadd.f32 %v4660_v33, %v12903_v7 }
 0x528   : > { %v4762_v38 = vadd.f32 %v4761_v24, %v4649_v53  ;;  %v4676_v53 = vpop.f32.mrf.mxu0 }
 0x529   : > { %v4765_v30 = vpop.f32.mrf.mxu1 }
 0x52a   : > { %8293 = vtanh.f32 %v4762_v38  ;;  %v4766_v42 = vadd.f32 %v4765_v30, %v4653_v49  ;;  %v4665_v30 = vadd.f32 %v4664_v12, %v12897_v19  ;;  %v4678_v31 = vpop.f32.mrf.mxu0 }
 0x52b   : > { %8295 = vtanh.f32 %v4760_v9  ;;  %v4767_v39 = vpop.f32.mrf.mxu1 }
 0x52c   : > { %v4768_v61 = vadd.f32 %v4767_v39, %v4655_v40 }
 0x52d   : > { %v8286_v56 = vpop.eup %8285  ;;  %v4771_v34 = vpop.f32.mrf.mxu1 }
 0x52e   : > { %v8288_v45 = vpop.eup %8287  ;;  %8297 = vtanh.f32 %v4768_v61  ;;  %5607 = vmatprep.mubr.f32.mxu0 %v8286_v56  ;;  %v4772_v16 = vadd.f32 %v4771_v34, %v4659_v59 }
 0x52f   : > { %8299 = vtanh.f32 %v4766_v42  ;;  %v4773_v43 = vpop.f32.mrf.mxu1  ;;  %5608 = vmatmul.mubr.f32.vlgmr.msra.gmra.mxu0 %v8288_v45 }
 0x530   : > { %v4774_v11 = vadd.f32 %v4773_v43, %v4661_v52  ;;  %7140 = vmatpush3.msra.mxu0 %v12712_v5  ;;  %v4671_v5 = vadd.f32 %v4670_v17, %v12897_v19  ;;  %v4677_v17 = vadd.f32 %v4676_v53, %v12897_v19  ;;  %v7605_v52 = vpop.f32.mrf.mxu0 }
 0x531   : > { %v4777_v49 = vpop.f32.mrf.mxu1  ;;  %7141 = vmatprep.subr.mxu0 %v12718_v35 }
 0x532   : > { %8301 = vtanh.f32 %v4774_v11  ;;  %7142 = vmatpush3.msra.mxu0 %v12723_v37  ;;  %v4778_v9 = vadd.f32 %v4777_v49, %v4665_v30  ;;  %v4673_v37 = vadd.f32 %v4672_v27, %v12903_v7 }
 0x533   : > { %v8290_v33 = vpop.eup %8289  ;;  %8303 = vtanh.f32 %v4772_v16  ;;  %v4779_v24 = vpop.f32.mrf.mxu1  ;;  %7143 = vmatprep.subr.mxu0 %v12728_v63 }
 0x534   : > { %v8292_v45 = vpop.eup %8291  ;;  %v4780_v38 = vadd.f32 %v4779_v24, %v4667_v25  ;;  %5612 = vmatprep.mubr.f32.mxu0 %v8290_v33  ;;  %7144 = vmatpush3.msra.mxu0 %v12737_v51 }
 0x535   : > { %v4783_v35 = vpop.f32.mrf.mxu1  ;;  %5613 = vmatmul.mubr.f32.gmra.mxu0 %v8292_v45  ;;  %7145 = vmatprep.subr.mxu0 %v12741_v23 }
 0x536   : > { %8305 = vtanh.f32 %v4780_v38  ;;  %7146 = vmatpush3.msra.mxu0 %v12751_v50  ;;  %v4784_v63 = vadd.f32 %v4783_v35, %v4671_v5  ;;  %v4679_v50 = vadd.f32 %v4678_v31, %v12903_v7 }
 0x537   : > { %v8294_v12 = vpop.eup %8293  ;;  %8307 = vtanh.f32 %v4778_v9  ;;  %v4785_v40 = vpop.f32.mrf.mxu1  ;;  %7147 = vmatprep.subr.mxu0 %v12755_v44 }
 0x538   : > { %v8296_v42 = vpop.eup %8295  ;;  %v4786_v51 = vadd.f32 %v4785_v40, %v4673_v37  ;;  %5617 = vmatprep.mubr.f32.mxu0 %v8294_v12  ;;  %7148 = vmatpush3.msra.mxu0 %v12763_v62 }
 0x539   : > { %v4789_v23 = vpop.f32.mrf.mxu1  ;;  %5618 = vmatmul.mubr.f32.gmra.mxu0 %v8296_v42  ;;  %7149 = vmatprep.subr.mxu0 %v12769_v22  ;;  %v14395_v22 = vld [vmem:[#allocation104_spill] sm:$0xff] }
 0x53a   : > { %8309 = vtanh.f32 %v4786_v51  ;;  %7150 = vmatpush3.msra.mxu0 %v12775_v4  ;;  %v4790_v61 = vadd.f32 %v4789_v23, %v4677_v17  ;;  %v12951_v34 = vrot.slane %v12881_v32, %v14395_v22  ;;  %v4965_v32 = vpop.f32.mrf.mxu0 }
 0x53b   : > { %v8298_v39 = vpop.eup %8297  ;;  %8311 = vtanh.f32 %v4784_v63  ;;  %v4791_v44 = vpop.f32.mrf.mxu1  ;;  %7151 = vmatprep.subr.mxu0 %v12782_v13 }
 0x53c   : > { %v8300_v56 = vpop.eup %8299  ;;  %v4792_v59 = vadd.f32 %v4791_v44, %v4679_v50  ;;  %5622 = vmatprep.mubr.f32.mxu0 %v8298_v39  ;;  %7152 = vmatpush3.msra.mxu0 %v12785_v6  ;;  %v7608_v49 = vpop.f32.mrf.mxu0 }
 0x53d   : > { %v6931_v62 = vpop.f32.mrf.mxu1  ;;  %5623 = vmatmul.mubr.f32.gmra.mxu0 %v8300_v56  ;;  %7153 = vmatprep.subr.mxu0 %v12791_v57 }
 0x53e   : > { %8313 = vtanh.f32 %v4792_v59  ;;  %7154 = vmatpush3.msra.mxu0 %v12798_v18  ;;  %v4975_v9 = vpop.f32.mrf.mxu0 }
 0x53f   : > { %v8302_v4 = vpop.eup %8301  ;;  %8315 = vtanh.f32 %v4790_v61  ;;  %v6932_v13 = vpop.f32.mrf.mxu1  ;;  %7155 = vmatprep.subr.mxu0 %v12802_v15 }
 0x540   : > { %v8304_v27 = vpop.eup %8303  ;;  %v6933_v16 = vadd.f32 %v6932_v13, %v6931_v62  ;;  %5627 = vmatprep.mubr.f32.mxu0 %v8302_v4  ;;  %7156 = vmatpush3.msra.mxu0 %v12805_v46 }
 0x541   : > { %v6934_v6 = vpop.f32.mrf.mxu1  ;;  %5628 = vmatmul.mubr.f32.gmra.mxu0 %v8304_v27  ;;  %7157 = vmatprep.subr.mxu0 %v12813_v10  ;;  %v14397_v27 = vld [vmem:[#allocation67_spill] sm:$0xff] }
 0x542   : > { %v4861_v57 = vadd.f32 %v6933_v16, %v12951_v34  ;;  %7158 = vmatpush3.msra.mxu0 %v12818_v29  ;;  %v14398_v16 = vld [vmem:[#allocation69_spill] sm:$0xff] }
 0x543   : > { %v8306_v18 = vpop.eup %8305  ;;  %v6935_v43 = vpop.f32.mrf.mxu1  ;;  %7159 = vmatprep.subr.mxu0 %v12823_v21 }
 0x544   : > { %v8308_v11 = vpop.eup %8307  ;;  %v4966_v15 = vadd.f32 %v4965_v32, %v4861_v57  ;;  %v6936_v30 = vadd.f32 %v6935_v43, %v6934_v6  ;;  %5632 = vmatprep.mubr.f32.mxu0 %v8306_v18  ;;  %7160 = vmatpush3.msra.mxu0 %v12827_v41  ;;  %v14401_v57 = vld [vmem:[#allocation43_spill] sm:$0xff]  ;;  %v14403_v43 = vld [vmem:[#allocation54_spill] sm:$0xff] }
 0x545   : > { %v6937_v46 = vpop.f32.mrf.mxu1  ;;  %5633 = vmatmul.mubr.f32.gmra.mxu0 %v8308_v11  ;;  %7161 = vmatprep.subr.mxu0 %v12835_v36  ;;  %v14402_v32 = vld [vmem:[#allocation71_spill] sm:$0xff]  ;;  %v14404_v11 = vld [vmem:[#allocation57_spill] sm:$0xff] }
 0x546   : > { %8317 = vtanh.f32 %v4966_v15  ;;  %v4866_v10 = vadd.f32 %v6936_v30, %v12951_v34  ;;  %7162 = vmatpush3.msra.mxu0 %v12839_v2  ;;  %v14405_v15 = vld [vmem:[#allocation73_spill] sm:$0xff] }
 0x547   : > { %v8310_v29 = vpop.eup %8309  ;;  %v6938_v25 = vpop.f32.mrf.mxu1  ;;  %7163 = vmatprep.subr.mxu0 %v12845_v28 }
 0x548   : > { %v8312_v21 = vpop.eup %8311  ;;  %v4971_v33 = vadd.f32 %v7605_v52, %v4866_v10  ;;  %v6939_v53 = vadd.f32 %v6938_v25, %v6937_v46  ;;  %5637 = vmatprep.mubr.f32.mxu0 %v8310_v29  ;;  %7164 = vmatpush3.msra.mxu0 %v12849_v48 }
 0x549   : > { %v6940_v41 = vpop.f32.mrf.mxu1  ;;  %5638 = vmatmul.mubr.f32.gmra.mxu0 %v8312_v21  ;;  %7165 = vmatprep.subr.mxu0 %v12855_v58 }
 0x54a   : > { %8319 = vtanh.f32 %v4971_v33  ;;  %v4871_v36 = vadd.f32 %v6939_v53, %v12951_v34  ;;  %7166 = vmatpush3.msra.mxu0 %v12859_v0  ;;  %v7611_v0 = vpop.f32.mrf.mxu0 }
 0x54b   : > { %v8314_v2 = vpop.eup %8313  ;;  %v6941_v24 = vpop.f32.mrf.mxu1  ;;  %7167 = vmatprep.subr.mxu0 %v12865_v47 }
 0x54c   : > { %v8316_v28 = vpop.eup %8315  ;;  %v4976_v45 = vadd.f32 %v4975_v9, %v4871_v36  ;;  %v6942_v38 = vadd.f32 %v6941_v24, %v6940_v41  ;;  %5642 = vmatprep.mubr.f32.mxu0 %v8314_v2  ;;  %7168 = vmatpush3.msra.mxu0 %v12869_v60  ;;  %v4985_v63 = vpop.f32.mrf.mxu0 }
 0x54d   : > { %v6943_v48 = vpop.f32.mrf.mxu1  ;;  %5643 = vmatmul.mubr.f32.gmra.mxu0 %v8316_v28  ;;  %7169 = vmatprep.subr.mxu0 %v12875_v8 }
 0x54e   : > { %8321 = vtanh.f32 %v4976_v45  ;;  %v4876_v58 = vadd.f32 %v6942_v38, %v12951_v34  ;;  %7170 = vmatpush3.msra.mxu0 %v12884_v1  ;;  %v7614_v1 = vpop.f32.mrf.mxu0 }
 0x54f   : > { %v6944_v5 = vpop.f32.mrf.mxu1 }
 0x550   : > { %v4981_v35 = vadd.f32 %v7608_v49, %v4876_v58  ;;  %v6945_v37 = vadd.f32 %v6944_v5, %v6943_v48  ;;  %v4995_v59 = vpop.f32.mrf.mxu0 }
 0x551   : > { %v6946_v47 = vpop.f32.mrf.mxu1 }
 0x552   : > { %8323 = vtanh.f32 %v4981_v35  ;;  %v4881_v12 = vadd.f32 %v6945_v37, %v12951_v34 }
 0x553   : > { %v8318_v31 = vpop.eup %8317  ;;  %v6947_v60 = vpop.f32.mrf.mxu1 }
 0x554   : > { %v4986_v40 = vadd.f32 %v4985_v63, %v4881_v12  ;;  %v6948_v42 = vadd.f32 %v6947_v60, %v6946_v47  ;;  %7691 = vmatprep.mubr.f32.mxu1 %v8318_v31 }
 0x555   : > { %v6949_v8 = vpop.f32.mrf.mxu1 }
 0x556   : > { %8325 = vtanh.f32 %v4986_v40  ;;  %v4886_v51 = vadd.f32 %v6948_v42, %v12951_v34 }
 0x557   : > { %v8320_v17 = vpop.eup %8319  ;;  %v6950_v23 = vpop.f32.mrf.mxu1 }
 0x558   : > { %v4991_v50 = vadd.f32 %v7611_v0, %v4886_v51  ;;  %v6951_v39 = vadd.f32 %v6950_v23, %v6949_v8  ;;  %7692 = vmatmul.mubr.f32.vlgmr.msra.gmra.mxu1 %v8320_v17 }
 0x559   : > { %v6952_v61 = vpop.f32.mrf.mxu1  ;;  %7704 = vmatpush3.msra.mxu1 %v12714_v55 }
 0x55a   : > { %8327 = vtanh.f32 %v4991_v50  ;;  %v4891_v44 = vadd.f32 %v6951_v39, %v12951_v34  ;;  %7705 = vmatprep.subr.mxu1 %v12732_v14 }
 0x55b   : > { %v8322_v56 = vpop.eup %8321  ;;  %v6953_v62 = vpop.f32.mrf.mxu1  ;;  %7706 = vmatpush3.msra.mxu1 %v12732_v14 }
 0x55c   : > { %v4996_v22 = vadd.f32 %v4995_v59, %v4891_v44  ;;  %v6954_v4 = vadd.f32 %v6953_v62, %v6952_v61  ;;  %7694 = vmatprep.mubr.f32.mxu1 %v8322_v56  ;;  %7707 = vmatprep.subr.mxu1 %v12746_v54 }
 0x55d   : > { %7708 = vmatpush3.msra.mxu1 %v12746_v54  ;;  %v14396_v54 = vld [vmem:[#allocation51_spill] sm:$0xff] }
 0x55e   : > { %8329 = vtanh.f32 %v4996_v22  ;;  %v4896_v55 = vadd.f32 %v6954_v4, %v12951_v34  ;;  %7709 = vmatprep.subr.mxu1 %v12758_v3 }
 0x55f   : > { %v8324_v52 = vpop.eup %8323  ;;  %7710 = vmatpush3.msra.mxu1 %v12758_v3 }
 0x560   : > { %v5001_v13 = vadd.f32 %v7614_v1, %v4896_v55  ;;  %7695 = vmatmul.mubr.f32.gmra.mxu1 %v8324_v52  ;;  %7711 = vmatprep.subr.mxu1 %v12772_v26 }
 0x561   : > { %7712 = vmatpush3.msra.mxu1 %v12772_v26  ;;  %v14399_v26 = vld [vmem:[#allocation55_spill] sm:$0xff] }
 0x562   : > { %8331 = vtanh.f32 %v5001_v13  ;;  %7713 = vmatprep.subr.mxu1 %v12794_v20 }
 0x563   : > { %v8326_v14 = vpop.eup %8325  ;;  %7714 = vmatpush3.msra.mxu1 %v12794_v20  ;;  %v14400_v20 = vld [vmem:[#allocation52_spill] sm:$0xff] }
 0x564   : > { %7697 = vmatprep.mubr.f32.mxu1 %v8326_v14  ;;  %7715 = vmatprep.subr.mxu1 %v14396_v54 }
 0x565   : > { %7716 = vmatpush3.msra.mxu1 %v14396_v54 }
 0x566   : > { %7717 = vmatprep.subr.mxu1 %v14397_v27 }
 0x567   : > { %v8328_v3 = vpop.eup %8327  ;;  %7718 = vmatpush3.msra.mxu1 %v14397_v27 }
 0x568   : > { %7698 = vmatmul.mubr.f32.gmra.mxu1 %v8328_v3  ;;  %7719 = vmatprep.subr.mxu1 %v14398_v16 }
 0x569   : > { %7720 = vmatpush3.msra.mxu1 %v14398_v16 }
 0x56a   : > { %7721 = vmatprep.subr.mxu1 %v14399_v26 }
 0x56b   : > { %v8330_v6 = vpop.eup %8329  ;;  %7722 = vmatpush3.msra.mxu1 %v14399_v26 }
 0x56c   : > { %7700 = vmatprep.mubr.f32.mxu1 %v8330_v6  ;;  %7723 = vmatprep.subr.mxu1 %v14400_v20 }
 0x56d   : > { %7724 = vmatpush3.msra.mxu1 %v14400_v20 }
 0x56e   : > { %7725 = vmatprep.subr.mxu1 %v14401_v57 }
 0x56f   : > { %v8332_v18 = vpop.eup %8331  ;;  %7726 = vmatpush3.msra.mxu1 %v14401_v57 }
 0x570   : > { %7701 = vmatmul.mubr.f32.gmra.mxu1 %v8332_v18  ;;  %7727 = vmatprep.subr.mxu1 %v14402_v32 }
 0x571   : > { %7728 = vmatpush3.msra.mxu1 %v14402_v32 }
 0x572   : > { %7729 = vmatprep.subr.mxu1 %v14403_v43 }
 0x573   : > { %7730 = vmatpush3.msra.mxu1 %v14403_v43 }
 0x574   : > { %7731 = vmatprep.subr.mxu1 %v14404_v11 }
 0x575   : > { %7732 = vmatpush3.msra.mxu1 %v14404_v11 }
 0x576   : > { %7733 = vmatprep.subr.mxu1 %v14405_v15 }
 0x577   : > { %7734 = vmatpush3.msra.mxu1 %v14405_v15 }
 0x57d   : > { %v5094_v30 = vpop.f32.mrf.mxu1 }
 0x57e   : > { %v5095_v21 = vadd.f32 %v5094_v30, %v12897_v19 }
 0x57f   : > { %v5096_v46 = vpop.f32.mrf.mxu1 }
 0x580   : > { %v5097_v33 = vadd.f32 %v5096_v46, %v12903_v7 }
 0x581   : > { %v5100_v10 = vpop.f32.mrf.mxu1 }
 0x582   : > { %v5101_v9 = vadd.f32 %v5100_v10, %v12897_v19 }
 0x583   : > { %v5102_v29 = vpop.f32.mrf.mxu1 }
 0x584   : > { %v5103_v28 = vadd.f32 %v5102_v29, %v12903_v7 }
 0x585   : > { %v5106_v49 = vpop.f32.mrf.mxu1 }
 0x586   : > { %v5107_v0 = vadd.f32 %v5106_v49, %v12897_v19 }
 0x587   : > { %v5108_v25 = vpop.f32.mrf.mxu1 }
 0x588   : > { %v5109_v35 = vadd.f32 %v5108_v25, %v12903_v7 }
 0x589   : > { %v5112_v53 = vpop.f32.mrf.mxu1 }
 0x58a   : > { %v5113_v63 = vadd.f32 %v5112_v53, %v12897_v19 }
 0x58b   : > { %v5207_v41 = vpop.f32.mrf.mxu0  ;;  %v5114_v45 = vpop.f32.mrf.mxu1 }
 0x58c   : > { %v5208_v2 = vadd.f32 %v5207_v41, %v5095_v21  ;;  %v5115_v40 = vadd.f32 %v5114_v45, %v12903_v7 }
 0x58d   : > { %v5209_v36 = vpop.f32.mrf.mxu0 }
 0x58e   : > { %v5210_v24 = vadd.f32 %v5209_v36, %v5097_v33  ;;  %v5118_v37 = vpop.f32.mrf.mxu1 }
 0x58f   : > { %v5213_v38 = vpop.f32.mrf.mxu0  ;;  %v5119_v1 = vadd.f32 %v5118_v37, %v12897_v19 }
 0x590   : > { %8333 = vtanh.f32 %v5210_v24  ;;  %v5214_v58 = vadd.f32 %v5213_v38, %v5101_v9  ;;  %v5120_v42 = vpop.f32.mrf.mxu1 }
 0x591   : > { %8335 = vtanh.f32 %v5208_v2  ;;  %v5215_v48 = vpop.f32.mrf.mxu0  ;;  %v5121_v50 = vadd.f32 %v5120_v42, %v12903_v7 }
 0x592   : > { %v5216_v5 = vadd.f32 %v5215_v48, %v5103_v28 }
 0x593   : > { %v5219_v47 = vpop.f32.mrf.mxu0 }
 0x594   : > { %8337 = vtanh.f32 %v5216_v5  ;;  %v5220_v31 = vadd.f32 %v5219_v47, %v5107_v0 }
 0x595   : > { %8339 = vtanh.f32 %v5214_v58  ;;  %v5221_v12 = vpop.f32.mrf.mxu0 }
 0x596   : > { %v5222_v60 = vadd.f32 %v5221_v12, %v5109_v35 }
 0x597   : > { %v5225_v8 = vpop.f32.mrf.mxu0 }
 0x598   : > { %8341 = vtanh.f32 %v5222_v60  ;;  %v5226_v17 = vadd.f32 %v5225_v8, %v5113_v63 }
 0x599   : > { %8343 = vtanh.f32 %v5220_v31  ;;  %v5227_v51 = vpop.f32.mrf.mxu0 }
 0x59a   : > { %v5228_v23 = vadd.f32 %v5227_v51, %v5115_v40  ;;  %v5124_v39 = vpop.f32.mrf.mxu1 }
 0x59b   : > { %v5231_v61 = vpop.f32.mrf.mxu0  ;;  %v5125_v22 = vadd.f32 %v5124_v39, %v12897_v19 }
 0x59c   : > { %8345 = vtanh.f32 %v5228_v23  ;;  %v5126_v44 = vpop.f32.mrf.mxu1  ;;  %v5232_v62 = vadd.f32 %v5231_v61, %v5119_v1 }
 0x59d   : > { %v8334_v56 = vpop.eup %8333  ;;  %8347 = vtanh.f32 %v5226_v17  ;;  %v5233_v59 = vpop.f32.mrf.mxu0  ;;  %v5127_v52 = vadd.f32 %v5126_v44, %v12903_v7 }
 0x59e   : > { %v8336_v4 = vpop.eup %8335  ;;  %v5234_v55 = vadd.f32 %v5233_v59, %v5121_v50  ;;  %5817 = vmatprep.mubr.f32.mxu0 %v8334_v56 }
 0x59f   : > { %v5237_v13 = vpop.f32.mrf.mxu0  ;;  %5818 = vmatmul.mubr.f32.vlgmr.msra.gmra.mxu0 %v8336_v4 }
 0x5a0   : > { %8349 = vtanh.f32 %v5234_v55  ;;  %v5238_v27 = vadd.f32 %v5237_v13, %v5125_v22 }
 0x5a1   : > { %v8338_v14 = vpop.eup %8337  ;;  %8351 = vtanh.f32 %v5232_v62  ;;  %v5239_v54 = vpop.f32.mrf.mxu0 }
 0x5a2   : > { %v8340_v3 = vpop.eup %8339  ;;  %v5240_v16 = vadd.f32 %v5239_v54, %v5127_v52  ;;  %5822 = vmatprep.mubr.f32.mxu0 %v8338_v14 }
 0x5a3   : > { %v5243_v26 = vpop.f32.mrf.mxu0  ;;  %5823 = vmatmul.mubr.f32.gmra.mxu0 %v8340_v3 }
 0x5a4   : > { %8353 = vtanh.f32 %v5240_v16 }
 0x5a5   : > { %v8342_v6 = vpop.eup %8341  ;;  %8355 = vtanh.f32 %v5238_v27  ;;  %v5245_v20 = vpop.f32.mrf.mxu0 }
 0x5a6   : > { %v8344_v57 = vpop.eup %8343  ;;  %v5130_v18 = vpop.f32.mrf.mxu1  ;;  %5827 = vmatprep.mubr.f32.mxu0 %v8342_v6 }
 0x5a7   : > { %v5131_v32 = vadd.f32 %v5130_v18, %v12897_v19  ;;  %v5249_v43 = vpop.f32.mrf.mxu0  ;;  %5828 = vmatmul.mubr.f32.gmra.mxu0 %v8344_v57 }
 0x5a8   : > { %v5132_v11 = vpop.f32.mrf.mxu1 }
 0x5a9   : > { %v8346_v15 = vpop.eup %8345  ;;  %v5133_v30 = vadd.f32 %v5132_v11, %v12903_v7  ;;  %v5251_v46 = vpop.f32.mrf.mxu0  ;;  %v5244_v29 = vadd.f32 %v5243_v26, %v5131_v32 }
 0x5aa   : > { %v8348_v10 = vpop.eup %8347  ;;  %5832 = vmatprep.mubr.f32.mxu0 %v8346_v15 }
 0x5ab   : > { %v5246_v49 = vadd.f32 %v5245_v20, %v5133_v30  ;;  %5833 = vmatmul.mubr.f32.gmra.mxu0 %v8348_v10 }
 0x5ac   : > { %v7011_v25 = vpop.f32.mrf.mxu0 }
 0x5ad   : > { %v8350_v21 = vpop.eup %8349  ;;  %8357 = vtanh.f32 %v5246_v49  ;;  %v5136_v33 = vpop.f32.mrf.mxu1 }
 0x5ae   : > { %v8352_v53 = vpop.eup %8351  ;;  %8359 = vtanh.f32 %v5244_v29  ;;  %v5137_v41 = vadd.f32 %v5136_v33, %v12897_v19  ;;  %v7012_v36 = vpop.f32.mrf.mxu0  ;;  %5837 = vmatprep.mubr.f32.mxu0 %v8350_v21 }
 0x5af   : > { %v5138_v2 = vpop.f32.mrf.mxu1  ;;  %v7013_v9 = vadd.f32 %v7012_v36, %v7011_v25  ;;  %5838 = vmatmul.mubr.f32.gmra.mxu0 %v8352_v53 }
 0x5b0   : > { %v5139_v24 = vadd.f32 %v5138_v2, %v12903_v7  ;;  %v7014_v28 = vpop.f32.mrf.mxu0  ;;  %v5250_v38 = vadd.f32 %v5249_v43, %v5137_v41 }
 0x5b1   : > { %v8354_v45 = vpop.eup %8353  ;;  %v7649_v48 = vpop.f32.mrf.mxu1  ;;  %v5321_v58 = vadd.f32 %v7013_v9, %v12951_v34 }
 0x5b2   : > { %v8356_v0 = vpop.eup %8355  ;;  %v5252_v5 = vadd.f32 %v5251_v46, %v5139_v24  ;;  %v7015_v35 = vpop.f32.mrf.mxu0  ;;  %5842 = vmatprep.mubr.f32.mxu0 %v8354_v45 }
 0x5b3   : > { %v7016_v37 = vadd.f32 %v7015_v35, %v7014_v28  ;;  %v5425_v47 = vpop.f32.mrf.mxu1  ;;  %5843 = vmatmul.mubr.f32.gmra.mxu0 %v8356_v0 }
 0x5b4   : > { %8361 = vtanh.f32 %v5252_v5  ;;  %v5426_v19 = vadd.f32 %v5425_v47, %v5321_v58  ;;  %v7017_v12 = vpop.f32.mrf.mxu0 }
 0x5b5   : > { %8363 = vtanh.f32 %v5250_v38  ;;  %v5326_v31 = vadd.f32 %v7016_v37, %v12951_v34  ;;  %v7652_v7 = vpop.f32.mrf.mxu1 }
 0x5b6   : > { %8365 = vtanh.f32 %v5426_v19  ;;  %v7018_v63 = vpop.f32.mrf.mxu0  ;;  %v13037_v19 = vld [vmem:[%s13217_s12] ss:$0 sm:$0xff] }
 0x5b7   : > { %v5431_v60 = vadd.f32 %v7649_v48, %v5326_v31  ;;  %v7019_v40 = vadd.f32 %v7018_v63, %v7017_v12  ;;  %v5435_v17 = vpop.f32.mrf.mxu1 }
 0x5b8   : > { %v7020_v42 = vpop.f32.mrf.mxu0 }
 0x5b9   : > { %8367 = vtanh.f32 %v5431_v60  ;;  %v5331_v8 = vadd.f32 %v7019_v40, %v12951_v34  ;;  %v7655_v56 = vpop.f32.mrf.mxu1 }
 0x5ba   : > { %v8358_v51 = vpop.eup %8357  ;;  %v7021_v1 = vpop.f32.mrf.mxu0 }
 0x5bb   : > { %v8360_v23 = vpop.eup %8359  ;;  %v5436_v50 = vadd.f32 %v5435_v17, %v5331_v8  ;;  %v7022_v39 = vadd.f32 %v7021_v1, %v7020_v42  ;;  %5847 = vmatprep.mubr.f32.mxu0 %v8358_v51  ;;  %v5445_v14 = vpop.f32.mrf.mxu1  ;;  %v14406_v8 = vld [vmem:[#allocation21_spill] sm:$0xff] }
 0x5bc   : > { %v7023_v61 = vpop.f32.mrf.mxu0  ;;  %5848 = vmatmul.mubr.f32.gmra.mxu0 %v8360_v23 }
 0x5bd   : > { %8369 = vtanh.f32 %v5436_v50  ;;  %v5336_v44 = vadd.f32 %v7022_v39, %v12951_v34  ;;  %v7658_v57 = vpop.f32.mrf.mxu1  ;;  %v14407_v50 = vld [vmem:[#allocation20_spill] sm:$0xff] }
 0x5be   : > { %v7024_v59 = vpop.f32.mrf.mxu0 }
 0x5bf   : > { %v5441_v62 = vadd.f32 %v7652_v7, %v5336_v44  ;;  %v7025_v22 = vadd.f32 %v7024_v59, %v7023_v61  ;;  %v5455_v46 = vpop.f32.mrf.mxu1 }
 0x5c0   : > { %v7026_v4 = vpop.f32.mrf.mxu0 }
 0x5c1   : > { %v8362_v55 = vpop.eup %8361  ;;  %8371 = vtanh.f32 %v5441_v62  ;;  %v5341_v52 = vadd.f32 %v7025_v22, %v12951_v34 }
 0x5c2   : > { %v8364_v13 = vpop.eup %8363  ;;  %5852 = vmatprep.mubr.f32.mxu0 %v8362_v55  ;;  %v7027_v54 = vpop.f32.mrf.mxu0  ;;  %v14408_v55 = vld [vmem:[#allocation23_spill] sm:$0xff] }
 0x5c3   : > { %v8366_v27 = vpop.eup %8365  ;;  %v5446_v3 = vadd.f32 %v5445_v14, %v5341_v52  ;;  %v7028_v16 = vadd.f32 %v7027_v54, %v7026_v4  ;;  %5853 = vmatmul.mubr.f32.gmra.mxu0 %v8364_v13 }
 0x5c4   : > { %7735 = vmatprep.mubr.f32.mxu1 %v8366_v27  ;;  %v7029_v26 = vpop.f32.mrf.mxu0  ;;  %v14409_v27 = vld [vmem:[#allocation22_spill] sm:$0xff] }
 0x5c5   : > { %8373 = vtanh.f32 %v5446_v3  ;;  %v5346_v6 = vadd.f32 %v7028_v16, %v12951_v34 }
 0x5c6   : > { %v8368_v20 = vpop.eup %8367  ;;  %v7030_v18 = vpop.f32.mrf.mxu0 }
 0x5c7   : > { %v5451_v32 = vadd.f32 %v7655_v56, %v5346_v6  ;;  %v7031_v43 = vadd.f32 %v7030_v18, %v7029_v26  ;;  %7736 = vmatmul.mubr.f32.vlgmr.msra.gmra.mxu1 %v8368_v20 }
 0x5c8   : > { %v7032_v11 = vpop.f32.mrf.mxu0 }
 0x5c9   : > { %8375 = vtanh.f32 %v5451_v32  ;;  %v5351_v15 = vadd.f32 %v7031_v43, %v12951_v34  ;;  %v14410_v43 = vld [vmem:[#allocation25_spill] sm:$0xff] }
 0x5ca   : > { %v8370_v30 = vpop.eup %8369  ;;  %v7033_v10 = vpop.f32.mrf.mxu0 }
 0x5cb   : > { %v5456_v29 = vadd.f32 %v5455_v46, %v5351_v15  ;;  %v7034_v49 = vadd.f32 %v7033_v10, %v7032_v11  ;;  %7738 = vmatprep.mubr.f32.mxu1 %v8370_v30  ;;  %v14411_v46 = vld [vmem:[#allocation24_spill] sm:$0xff] }
 0x5cd   : > { %8377 = vtanh.f32 %v5456_v29  ;;  %v5356_v25 = vadd.f32 %v7034_v49, %v12951_v34 }
 0x5ce   : > { %v8372_v21 = vpop.eup %8371 }
 0x5cf   : > { %v5461_v33 = vadd.f32 %v7658_v57, %v5356_v25  ;;  %7739 = vmatmul.mubr.f32.gmra.mxu1 %v8372_v21 }
 0x5d1   : > { %8379 = vtanh.f32 %v5461_v33 }
 0x5d2   : > { %v8374_v53 = vpop.eup %8373 }
 0x5d3   : > { %7741 = vmatprep.mubr.f32.mxu1 %v8374_v53  ;;  %v14412_v53 = vld [vmem:[#allocation27_spill] sm:$0xff] }
 0x5d6   : > { %v8376_v41 = vpop.eup %8375 }
 0x5d7   : > { %7742 = vmatmul.mubr.f32.gmra.mxu1 %v8376_v41 }
 0x5da   : > { %v8378_v36 = vpop.eup %8377 }
 0x5db   : > { %7744 = vmatprep.mubr.f32.mxu1 %v8378_v36 }
 0x5de   : > { %v8380_v2 = vpop.eup %8379 }
 0x5df   : > { %7745 = vmatmul.mubr.f32.gmra.mxu1 %v8380_v2  ;;  %v14413_v2 = vld [vmem:[#allocation26_spill] sm:$0xff] }
 0x5ef   : > { %v7091_v9 = vpop.f32.mrf.mxu0 }
 0x5f1   : > { %v7092_v24 = vpop.f32.mrf.mxu0 }
 0x5f2   : > { %v7093_v47 = vadd.f32 %v7092_v24, %v7091_v9 }
 0x5f4   : > { %v5610_v60 = vadd.f32 %v7093_v47, %v13037_v19 }
 0x5f5   : > { %v7094_v28 = vpop.f32.mrf.mxu0 }
 0x5f7   : > { %v7095_v45 = vpop.f32.mrf.mxu0 }
 0x5f8   : > { %v7096_v35 = vadd.f32 %v7095_v45, %v7094_v28 }
 0x5f9   : > { %v7097_v38 = vpop.f32.mrf.mxu0 }
 0x5fa   : > { %v5615_v12 = vadd.f32 %v7096_v35, %v13037_v19 }
 0x5fb   : > { %v7098_v48 = vpop.f32.mrf.mxu0 }
 0x5fc   : > { %v7099_v23 = vadd.f32 %v7098_v48, %v7097_v38 }
 0x5fd   : > { %v7100_v34 = vpop.f32.mrf.mxu0 }
 0x5fe   : > { %v5620_v62 = vadd.f32 %v7099_v23, %v13037_v19 }
 0x5ff   : > { %v7101_v58 = vpop.f32.mrf.mxu0 }
 0x600   : > { %v7102_v42 = vadd.f32 %v7101_v58, %v7100_v34 }
 0x601   : > { %v7103_v0 = vpop.f32.mrf.mxu0 }
 0x602   : > { %v5625_v61 = vadd.f32 %v7102_v42, %v13037_v19 }
 0x603   : > { %v7104_v5 = vpop.f32.mrf.mxu0 }
 0x604   : > { %v7105_v54 = vadd.f32 %v7104_v5, %v7103_v0 }
 0x605   : > { %v7106_v37 = vpop.f32.mrf.mxu0 }
 0x606   : > { %v5630_v57 = vadd.f32 %v7105_v54, %v13037_v19 }
 0x607   : > { %v7107_v31 = vpop.f32.mrf.mxu0 }
 0x608   : > { %v7108_v4 = vadd.f32 %v7107_v31, %v7106_v37 }
 0x609   : > { %v7109_v1 = vpop.f32.mrf.mxu0 }
 0x60a   : > { %v5635_v16 = vadd.f32 %v7108_v4, %v13037_v19 }
 0x60b   : > { %v7110_v44 = vpop.f32.mrf.mxu0 }
 0x60c   : > { %v7111_v30 = vadd.f32 %v7110_v44, %v7109_v1 }
 0x60d   : > { %v7112_v14 = vpop.f32.mrf.mxu0 }
 0x60e   : > { %v5640_v21 = vadd.f32 %v7111_v30, %v13037_v19 }
 0x60f   : > { %v7113_v26 = vpop.f32.mrf.mxu0 }
 0x610   : > { %v7114_v32 = vadd.f32 %v7113_v26, %v7112_v14 }
 0x612   : > { %v5645_v29 = vadd.f32 %v7114_v32, %v13037_v19 }
 0x618   : > { %v7693_v7 = vpop.f32.mrf.mxu1 }
 0x619   : > { %v5720_v63 = vadd.f32 %v7693_v7, %v5615_v12 }
 0x61a   : > { %v5714_v40 = vpop.f32.mrf.mxu1 }
 0x61b   : > { %v5964_v51 = vadd.f32 %v5720_v63, %v14406_v8  ;;  %v5715_v17 = vadd.f32 %v5714_v40, %v5610_v60 }
 0x61d   : > { %5972 = vst.msk [vmem:[%s13042_s25 + $0x8] sm:$0xff] %vm582_vm0, %v5964_v51  ;;  %v5963_v39 = vadd.f32 %v5715_v17, %v14407_v50  ;;  %v14414_v51 = vld [vmem:[#allocation29_spill] sm:$0xff] }
 0x61f   : > { %5971 = vst.msk [vmem:[%s13042_s25] sm:$0xff] %vm582_vm0, %v5963_v39  ;;  %v14415_v39 = vld [vmem:[#allocation28_spill] sm:$0xff] }
 0x620   : > { %v7696_v56 = vpop.f32.mrf.mxu1 }
 0x621   : > { %v5730_v59 = vadd.f32 %v7696_v56, %v5625_v61 }
 0x622   : > { %v5724_v22 = vpop.f32.mrf.mxu1 }
 0x623   : > { %v5966_v52 = vadd.f32 %v5730_v59, %v14408_v55  ;;  %v5725_v13 = vadd.f32 %v5724_v22, %v5620_v62 }
 0x625   : > { %5974 = vst.msk [vmem:[%s13042_s25 + $0x18] sm:$0xff] %vm582_vm0, %v5966_v52  ;;  %v5965_v3 = vadd.f32 %v5725_v13, %v14409_v27  ;;  %v14416_v52 = vld [vmem:[#allocation31_spill] sm:$0xff] }
 0x627   : > { %5973 = vst.msk [vmem:[%s13042_s25 + $0x10] sm:$0xff] %vm582_vm0, %v5965_v3  ;;  %v14417_v3 = vld [vmem:[#allocation30_spill] sm:$0xff] }
 0x628   : > { %v7699_v6 = vpop.f32.mrf.mxu1 }
 0x629   : > { %v5740_v20 = vadd.f32 %v7699_v6, %v5635_v16 }
 0x62a   : > { %v5734_v18 = vpop.f32.mrf.mxu1 }
 0x62b   : > { %v5968_v11 = vadd.f32 %v5740_v20, %v14410_v43  ;;  %v5735_v15 = vadd.f32 %v5734_v18, %v5630_v57 }
 0x62d   : > { %5976 = vst.msk [vmem:[%s13042_s25 + $0x28] sm:$0xff] %vm582_vm0, %v5968_v11  ;;  %v5967_v10 = vadd.f32 %v5735_v15, %v14411_v46  ;;  %v14418_v11 = vld [vmem:[#allocation33_spill] sm:$0xff] }
 0x62f   : > { %5975 = vst.msk [vmem:[%s13042_s25 + $0x20] sm:$0xff] %vm582_vm0, %v5967_v10  ;;  %v14419_v10 = vld [vmem:[#allocation32_spill] sm:$0xff] }
 0x630   : > { %v7702_v49 = vpop.f32.mrf.mxu1 }
 0x631   : > { %v5750_v25 = vadd.f32 %v7702_v49, %v5645_v29 }
 0x632   : > { %v5744_v33 = vpop.f32.mrf.mxu1 }
 0x633   : > { %v5970_v41 = vadd.f32 %v5750_v25, %v14412_v53  ;;  %v5745_v36 = vadd.f32 %v5744_v33, %v5640_v21 }
 0x635   : > { %5978 = vst.msk [vmem:[%s13042_s25 + $0x38] sm:$0xff] %vm582_vm0, %v5970_v41  ;;  %v5969_v9 = vadd.f32 %v5745_v36, %v14413_v2  ;;  %v14420_v41 = vld [vmem:[#allocation35_spill] sm:$0xff] }
 0x637   : > { %5977 = vst.msk [vmem:[%s13042_s25 + $0x30] sm:$0xff] %vm582_vm0, %v5969_v9  ;;  %v14421_v9 = vld [vmem:[#allocation34_spill] sm:$0xff] }
 0x65f   : > { %v7171_v24 = vpop.f32.mrf.mxu0 }
 0x661   : > { %v7172_v28 = vpop.f32.mrf.mxu0 }
 0x662   : > { %v7173_v12 = vadd.f32 %v7172_v28, %v7171_v24 }
 0x663   : > { %v7174_v45 = vpop.f32.mrf.mxu0 }
 0x664   : > { %v5820_v40 = vadd.f32 %v7173_v12, %v13037_v19 }
 0x665   : > { %v7175_v38 = vpop.f32.mrf.mxu0 }
 0x666   : > { %v7176_v37 = vadd.f32 %v7175_v38, %v7174_v45 }
 0x667   : > { %v7177_v48 = vpop.f32.mrf.mxu0 }
 0x668   : > { %v5825_v31 = vadd.f32 %v7176_v37, %v13037_v19 }
 0x669   : > { %v7178_v34 = vpop.f32.mrf.mxu0 }
 0x66a   : > { %v7179_v50 = vadd.f32 %v7178_v34, %v7177_v48 }
 0x66b   : > { %v7180_v58 = vpop.f32.mrf.mxu0 }
 0x66c   : > { %v5830_v22 = vadd.f32 %v7179_v50, %v13037_v19 }
 0x66d   : > { %v7181_v0 = vpop.f32.mrf.mxu0 }
 0x66e   : > { %v7182_v8 = vadd.f32 %v7181_v0, %v7180_v58 }
 0x66f   : > { %v7183_v5 = vpop.f32.mrf.mxu0 }
 0x670   : > { %v5835_v44 = vadd.f32 %v7182_v8, %v13037_v19 }
 0x671   : > { %v7184_v35 = vpop.f32.mrf.mxu0 }
 0x672   : > { %v7185_v27 = vadd.f32 %v7184_v35, %v7183_v5 }
 0x673   : > { %v7186_v47 = vpop.f32.mrf.mxu0 }
 0x674   : > { %v5840_v18 = vadd.f32 %v7185_v27, %v13037_v19 }
 0x675   : > { %v7187_v7 = vpop.f32.mrf.mxu0 }
 0x676   : > { %v7188_v55 = vadd.f32 %v7187_v7, %v7186_v47 }
 0x678   : > { %v5845_v26 = vadd.f32 %v7188_v55, %v13037_v19 }
 0x67c   : > { %v7189_v23 = vpop.f32.mrf.mxu0 }
 0x67e   : > { %v7190_v56 = vpop.f32.mrf.mxu0 }
 0x67f   : > { %v7191_v46 = vadd.f32 %v7190_v56, %v7189_v23 }
 0x681   : > { %v5850_v33 = vadd.f32 %v7191_v46, %v13037_v19 }
 0x683   : > { %v7192_v54 = vpop.f32.mrf.mxu0 }
 0x685   : > { %v7193_v6 = vpop.f32.mrf.mxu0 }
 0x686   : > { %v7194_v43 = vadd.f32 %v7193_v6, %v7192_v54 }
 0x687   : > { %v7737_v63 = vpop.f32.mrf.mxu1 }
 0x688   : > { %v5930_v60 = vadd.f32 %v7737_v63, %v5825_v31  ;;  %v5855_v49 = vadd.f32 %v7194_v43, %v13037_v19 }
 0x689   : > { %v5924_v42 = vpop.f32.mrf.mxu1 }
 0x68a   : > { %v5980_v17 = vadd.f32 %v5930_v60, %v14414_v51  ;;  %v5925_v1 = vadd.f32 %v5924_v42, %v5820_v40 }
 0x68c   : > { %5988 = vst.msk [vmem:[%s13042_s25 + $0x48] sm:$0xff] %vm582_vm0, %v5980_v17  ;;  %v5979_v61 = vadd.f32 %v5925_v1, %v14415_v39 }
 0x68e   : > { %5987 = vst.msk [vmem:[%s13042_s25 + $0x40] sm:$0xff] %vm582_vm0, %v5979_v61 }
 0x68f   : > { %v7740_v59 = vpop.f32.mrf.mxu1 }
 0x690   : > { %v5940_v62 = vadd.f32 %v7740_v59, %v5835_v44 }
 0x691   : > { %v5934_v4 = vpop.f32.mrf.mxu1 }
 0x692   : > { %v5982_v13 = vadd.f32 %v5940_v62, %v14416_v52  ;;  %v5935_v14 = vadd.f32 %v5934_v4, %v5830_v22 }
 0x694   : > { %5990 = vst.msk [vmem:[%s13042_s25 + $0x58] sm:$0xff] %vm582_vm0, %v5982_v13  ;;  %v5981_v16 = vadd.f32 %v5935_v14, %v14417_v3 }
 0x696   : > { %5989 = vst.msk [vmem:[%s13042_s25 + $0x50] sm:$0xff] %vm582_vm0, %v5981_v16 }
 0x697   : > { %v7743_v20 = vpop.f32.mrf.mxu1 }
 0x698   : > { %v5950_v57 = vadd.f32 %v7743_v20, %v5845_v26 }
 0x699   : > { %v5944_v32 = vpop.f32.mrf.mxu1 }
 0x69a   : > { %v5984_v15 = vadd.f32 %v5950_v57, %v14418_v11  ;;  %v5945_v30 = vadd.f32 %v5944_v32, %v5840_v18 }
 0x69c   : > { %5992 = vst.msk [vmem:[%s13042_s25 + $0x68] sm:$0xff] %vm582_vm0, %v5984_v15  ;;  %v5983_v29 = vadd.f32 %v5945_v30, %v14419_v10 }
 0x69e   : > { %5991 = vst.msk [vmem:[%s13042_s25 + $0x60] sm:$0xff] %vm582_vm0, %v5983_v29 }
 0x69f   : > { %v7746_v25 = vpop.f32.mrf.mxu1 }
 0x6a0   : > { %v5960_v21 = vadd.f32 %v7746_v25, %v5855_v49 }
 0x6a1   : > { %v5954_v53 = vpop.f32.mrf.mxu1 }
 0x6a2   : > { %v5986_v36 = vadd.f32 %v5960_v21, %v14420_v41  ;;  %v5955_v2 = vadd.f32 %v5954_v53, %v5850_v33  ;;  %6001 = sbr.rel (!%p8810_p4) target bundleno = 1744 (0x6d0), region = 100 }
 0x6a4   : > { %5994 = vst.msk [vmem:[%s13042_s25 + $0x78] sm:$0xff] %vm582_vm0, %v5986_v36  ;;  %v5985_v24 = vadd.f32 %v5955_v2, %v14421_v9 }
 0x6a6   : > { %5993 = vst.msk [vmem:[%s13042_s25 + $0x70] sm:$0xff] %vm582_vm0, %v5985_v24 }
 0x6a7   : > { %s14429_s22 = smov (!%p6004_p7, %s6003_s22), 16 }
 0x6a8   : > { %s6353_s15 = sshll.u32 %s14429_s22, 7 }
 0x6a9   : > { %p6356_p9 = scmp.eq.s32.totalorder %s6353_s15, 0 }
 0x6aa   : > { %s13118_s3 = sshrl.u32 (!%p6356_p9), %s14429_s22, 4 }
 0x6ab   : > { %6012 = sbr.rel (%p6356_p9) target bundleno = 1744 (0x6d0), region = 104  ;;  %p6357_p4 = scmp.le.s32.totalorder (!%p6356_p9), %s13118_s3, 0 }
 0x6b0   : > { %6233 = sbr.rel (%p6357_p4) target bundleno = 1727 (0x6bf), region = 181  ;;  %s14422_s28 = smov (!%p6357_p4), %s13112_s19 }
 0x6b1   : > { %s14423_s16 = smov (!%p6357_p4), %s13042_s25  ;;  %s13127_s17 = smov (!%p6357_p4), 0  }
 0x6b2   : > { %s13129_s20 = smov (!%p6357_p4), 0  }
 0x6b5 LB: >> { %v6105_v19 = vld [vmem:[%s8678_s16] sm:$0xff]  ;;  %v6107_v28 = vld [vmem:[%s8678_s16 + $0x8] sm:$0xff]  ;;  %v6109_v45 = vld [vmem:[%s8678_s16 + $0x10] sm:$0xff]  ;;  %s6137_s27 = sadd.s32 1, %s8682_s17  ;;  %s6099_s20 = sadd.s32 1, %s8686_s20   ;;  %s8686_s20 = sphi %s13129_s20, %s6099_s20   ;;  %s8682_s17 = sphi %s13127_s17, %s14424_s17   ;;  %s8678_s16 = sphi %s14423_s16, %s6142_s16   ;;  %s8674_s28 = sphi %s14422_s28, %s6143_s28  }
 0x6b6   : >> { %6106 = vst [vmem:[%s8674_s28] sm:$0xff] %v6105_v19  ;;  %6108 = vst [vmem:[%s8674_s28 + $0x8] sm:$0xff] %v6107_v28  ;;  %v6111_v38 = vld [vmem:[%s8678_s16 + $0x18] sm:$0xff]  ;;  %v6113_v48 = vld [vmem:[%s8678_s16 + $0x20] sm:$0xff]  ;;  %p6138_p10 = scmp.ge.s32.totalorder %s6137_s27, %s13118_s3  ;;  %p6098_p2 = scmp.ge.s32.totalorder %s6099_s20, %s13118_s3 }
 0x6b7   : >> { %6110 = vst [vmem:[%s8674_s28 + $0x10] sm:$0xff] %v6109_v45  ;;  %v6115_v34 = vld [vmem:[%s8678_s16 + $0x28] sm:$0xff]  ;;  %6112 = vst [vmem:[%s8674_s28 + $0x18] sm:$0xff] %v6111_v38  ;;  %v6117_v58 = vld [vmem:[%s8678_s16 + $0x30] sm:$0xff] }
 0x6b8   : >> { %6114 = vst [vmem:[%s8674_s28 + $0x20] sm:$0xff] %v6113_v48  ;;  %6116 = vst [vmem:[%s8674_s28 + $0x28] sm:$0xff] %v6115_v34  ;;  %v6119_v0 = vld [vmem:[%s8678_s16 + $0x38] sm:$0xff]  ;;  %v6121_v5 = vld [vmem:[%s8678_s16 + $0x40] sm:$0xff]  ;;  %s14431_s27 = smov (%p6138_p10, %s6137_s27), 0 }
 0x6b9   : >> { %6118 = vst [vmem:[%s8674_s28 + $0x30] sm:$0xff] %v6117_v58  ;;  %6120 = vst [vmem:[%s8674_s28 + $0x38] sm:$0xff] %v6119_v0  ;;  %v6123_v35 = vld [vmem:[%s8678_s16 + $0x48] sm:$0xff]  ;;  %v6125_v37 = vld [vmem:[%s8678_s16 + $0x50] sm:$0xff]  ;;  %s6358_s14 = sshll.u32 %s14431_s27, 7  ;;  %s14424_s17 = smov %s14431_s27 }
 0x6ba   : >> { %6122 = vst [vmem:[%s8674_s28 + $0x40] sm:$0xff] %v6121_v5  ;;  %v6127_v47 = vld [vmem:[%s8678_s16 + $0x58] sm:$0xff]  ;;  %6124 = vst [vmem:[%s8674_s28 + $0x48] sm:$0xff] %v6123_v35  ;;  %v6129_v12 = vld [vmem:[%s8678_s16 + $0x60] sm:$0xff]  ;;  %6101 = sbr.rel (!%p6098_p2) target bundleno = 1717 (0x6b5), region = 187 }
 0x6bb   : >> { %6126 = vst [vmem:[%s8674_s28 + $0x50] sm:$0xff] %v6125_v37  ;;  %6128 = vst [vmem:[%s8674_s28 + $0x58] sm:$0xff] %v6127_v47  ;;  %v6131_v31 = vld [vmem:[%s8678_s16 + $0x68] sm:$0xff]  ;;  %v6133_v7 = vld [vmem:[%s8678_s16 + $0x70] sm:$0xff] }
 0x6bc   : >> { %6130 = vst [vmem:[%s8674_s28 + $0x60] sm:$0xff] %v6129_v12  ;;  %6132 = vst [vmem:[%s8674_s28 + $0x68] sm:$0xff] %v6131_v31  ;;  %v6135_v63 = vld [vmem:[%s8678_s16 + $0x78] sm:$0xff]  ;;  %s6142_s16 = scalar_lea.vmem %s13042_s25, %s6358_s14 [#allocation13]  }
 0x6bd   : >> { %6134 = vst [vmem:[%s8674_s28 + $0x70] sm:$0xff] %v6133_v7  ;;  %6136 = vst [vmem:[%s8674_s28 + $0x78] sm:$0xff] %v6135_v63  ;;  %s6143_s28 = scalar_lea.vmem %s13112_s19, %s6358_s14  }
 0x6bf PF: > { %s13187_s18 = sand.u32 15, %s14429_s22   ;;  %s6369_s30 = sshll.u32 %s13118_s3, 7 }
 0x6c0   : > { %s6148_s26 = scalar_lea.vmem %s13042_s25, %s6369_s30 [#allocation13]   ;;  %s6150_s21 = scalar_lea.vmem %s13112_s19, %s6369_s30  }
 0x6c1   : > { %p6363_p5 = scmp.le.s32.totalorder %s13187_s18, 0 }
 0x6c2   : > { %s8688_s23 = smov (!%p6363_p5), %s6150_s21   ;;  %s8692_s24 = smov (!%p6363_p5), %s6148_s26  }
 0x6c3   : > { %6247 = sbr.rel (%p6363_p5) target bundleno = 1744 (0x6d0), region = 192  ;;  %s8696_s15 = smov (!%p6363_p5), 0  }
 0x6c4   : > { %s8700_s27 = smov (!%p6363_p5), 0  }
 0x6c8 LB: >> { %v6160_v60 = vld [vmem:[%s8694_s24] sm:$0xff]  ;;  %s6162_s22 = sadd.s32 1, %s8698_s15  ;;  %s6154_s27 = sadd.s32 1, %s8702_s27   ;;  %s8702_s27 = sphi %s8700_s27, %s6154_s27   ;;  %s8698_s15 = sphi %s8696_s15, %s8697_s15   ;;  %s8694_s24 = sphi %s8692_s24, %s6167_s24   ;;  %s8690_s23 = sphi %s8688_s23, %s6168_s23  }
 0x6c9   : >> { %6161 = vst [vmem:[%s8690_s23] sm:$0xff] %v6160_v60  ;;  %p6163_p8 = scmp.ge.s32.totalorder %s6162_s22, %s13187_s18  ;;  %p6153_p12 = scmp.ge.s32.totalorder %s6154_s27, %s13187_s18 }
 0x6cb   : >> { %s14433_s22 = smov (%p6163_p8, %s6162_s22), 0  ;;  %6156 = sbr.rel (!%p6153_p12) target bundleno = 1736 (0x6c8), region = 198 }
 0x6cc   : >> { %s6364_s25 = sshll.u32 %s14433_s22, 3  ;;  %s8697_s15 = smov %s14433_s22  }
 0x6cd   : >> { %s6167_s24 = scalar_lea.vmem %s6148_s26, %s6364_s25 [#allocation13]   ;;  %s6168_s23 = scalar_lea.vmem %s6150_s21, %s6364_s25  }
 0x6d0 PF: > { %s14425_s25 = sld [smem:[#allocation18_spill]]  ;;  %p24_p11 = scmp.ge.s32.totalorder %s8800_s29, 4  }
 0x6d1   : > { %s14426_s26 = sld [smem:[#allocation19_spill]]  ;;  %s14427_s27 = smov %s8800_s29 }
 0x6d2   :  { %26 = sbr.rel (!%p24_p11) target bundleno = 7 (0x7), region = 209 }
 0x6d7   :  { %6184 = vsyncpa [#allocation4], 1 }
 0x6d8   :  { %6186 = vsyncpa [#allocation4 + $0x1], 1 }
 0x6d9   :  { %6187 = vsyncpa [#allocation6], 1 }
 0x6da   :  { %6188 = vsyncpa [#allocation9], 1 }
 0x6db   :  { %6189 = vsyncpa [#allocation12], 1 }

</bundles_post_ra>
